<compile_context>
chip_gen: v6e
topology: v6e:2x2x1
jax: 0.10.0
libtpu: 0.0.40
codegen_flags: <defaults>
</compile_context>

<pallas_src>
import math
import functools

import jax
import jax.numpy as jnp
from jax import lax
from jax.experimental import pallas as pl
from jax.experimental.pallas import tpu as pltpu

_HI = lax.Precision.HIGHEST


def mab_kernel(q_ref, k_ref, wq_ref, wkv_ref, wo_ref, b_ref, o_ref,
               *, num_heads, dim_V):
    TB, Nq, dQ = q_ref.shape
    _, Nk, dK = k_ref.shape
    ds = dim_V // num_heads

    # Flatten batch*seq so each projection is one wide 2-D MXU matmul.
    q2 = q_ref[...].reshape(TB * Nq, dQ)
    k2 = k_ref[...].reshape(TB * Nk, dK)

    biases = b_ref[...]                                # (1, 4*dim_V): [bq | bk*scale | bv | bo]
    bq = biases[:, 0:dim_V]
    bkv = biases[:, dim_V:3 * dim_V]
    bo = biases[:, 3 * dim_V:4 * dim_V]

    Qp = jnp.dot(q2, wq_ref[...], preferred_element_type=jnp.float32, precision=_HI) + bq
    KVp = jnp.dot(k2, wkv_ref[...], preferred_element_type=jnp.float32, precision=_HI) + bkv

    Qp3 = Qp.reshape(TB, Nq, dim_V)
    Kp3 = KVp[:, :dim_V].reshape(TB, Nk, dim_V)        # 1/sqrt(dim_V) already folded into wk/bk
    Vp3 = KVp[:, dim_V:].reshape(TB, Nk, dim_V)

    # One transpose per tile; per-head K slices below are sublane slices (ds == 8 -> free).
    KpT = jnp.swapaxes(Kp3, 1, 2)                      # (TB, dim_V, Nk)

    head_outs = []
    for h in range(num_heads):                         # static unroll; every op is TB-batched
        sl = slice(h * ds, (h + 1) * ds)
        qh = Qp3[:, :, sl]                             # (TB, Nq, ds)
        khT = KpT[:, sl, :]                            # (TB, ds, Nk)
        vh = Vp3[:, :, sl]                             # (TB, Nk, ds)

        # Natural batched-matmul form: contraction dims already MXU-aligned, no transposes.
        s = jnp.einsum('bqd,bdk->bqk', qh, khT,
                       preferred_element_type=jnp.float32, precision=_HI)   # (TB, Nq, Nk)
        s = s - jnp.max(s, axis=-1, keepdims=True)
        e = jnp.exp(s)
        a = e / jnp.sum(e, axis=-1, keepdims=True)     # exact divide: matches jax.nn.softmax

        head_outs.append(qh + jnp.einsum('bqk,bkd->bqd', a, vh,
                                         preferred_element_type=jnp.float32, precision=_HI))

    O2 = jnp.concatenate(head_outs, axis=-1).reshape(TB * Nq, dim_V)

    proj = jnp.dot(O2, wo_ref[...], preferred_element_type=jnp.float32, precision=_HI) + bo
    out = O2 + jnp.maximum(proj, 0.0)

    o_ref[...] = out.reshape(TB, Nq, dim_V).astype(o_ref.dtype)


def _grid_steps(B):
    """1 grid step on single-TC chips (v5e/v6e: per-step overhead paid once);
    2 steps on two-TC chips (v7x) so 'parallel' semantics can feed both cores."""
    try:
        kind = jax.devices()[0].device_kind.lower()
    except Exception:
        return 1
    two_tc = "7" in kind        # e.g. "tpu7x" / "tpu v7x"
    if two_tc and B >= 2 and B % 2 == 0:
        return 2
    return 1


def mab_forward(Q, K, params, num_heads):
    """Q: (B, Nq, dim_Q), K: (B, Nk, dim_K). Returns (B, Nq, dim_V)."""
    B, Nq, dim_Q = Q.shape
    _, Nk, dim_K = K.shape
    dim_V = params["wq"].shape[0]

    steps = _grid_steps(B)
    TB = B // steps
    grid = (steps,)

    # Host-side glue (free): transpose PyTorch (out,in) weights to (in,out), fuse K|V
    # projections, fold the 1/sqrt(dim_V) attention scale into wk/bk, stack biases.
    scale = 1.0 / math.sqrt(dim_V)     # PyTorch MAB scales by sqrt(dim_V), not sqrt(head_dim)
    wq = params["wq"].T                                                    # (dim_Q, dim_V)
    wkv = jnp.concatenate([params["wk"].T * scale, params["wv"].T], axis=1)  # (dim_K, 2*dim_V)
    wo = params["wo"].T                                                    # (dim_V, dim_V)
    biases = jnp.concatenate([params["bq"], params["bk"] * scale,
                              params["bv"], params["bo"]]).reshape(1, 4 * dim_V)

    def full(shape):
        return pl.BlockSpec(shape, lambda b, _n=len(shape): (0,) * _n)

    kernel = functools.partial(mab_kernel, num_heads=num_heads, dim_V=dim_V)

    return pl.pallas_call(
        kernel,
        out_shape=jax.ShapeDtypeStruct((B, Nq, dim_V), Q.dtype),
        grid_spec=pltpu.PrefetchScalarGridSpec(
            num_scalar_prefetch=0,
            grid=grid,
            in_specs=[
                pl.BlockSpec((TB, Nq, dim_Q), lambda b: (b, 0, 0)),   # Q batch tile
                pl.BlockSpec((TB, Nk, dim_K), lambda b: (b, 0, 0)),   # K batch tile
                full(wq.shape),
                full(wkv.shape),
                full(wo.shape),
                full(biases.shape),
            ],
            out_specs=pl.BlockSpec((TB, Nq, dim_V), lambda b: (b, 0, 0)),
        ),
        compiler_params=pltpu.CompilerParams(
            dimension_semantics=("parallel",)),
    )(Q, K, wq, wkv, wo, biases)


def mab_reference(Q, K, params, num_heads):
    """Pure-JAX reference mirroring the PyTorch forward exactly (HIGHEST-precision matmuls)."""
    dim_V = params["wq"].shape[0]
    Qp = jnp.einsum('bnd,vd->bnv', Q, params["wq"], precision=_HI) + params["bq"]
    Kp = jnp.einsum('bnd,vd->bnv', K, params["wk"], precision=_HI) + params["bk"]
    Vp = jnp.einsum('bnd,vd->bnv', K, params["wv"], precision=_HI) + params["bv"]
    ds = dim_V // num_heads
    B = Q.shape[0]
    # split along feature dim, concat along batch dim -> (B*H, N, ds)
    split_cat = lambda X: jnp.concatenate(
        [X[:, :, h * ds:(h + 1) * ds] for h in range(num_heads)], axis=0)
    Q_, K_, V_ = split_cat(Qp), split_cat(Kp), split_cat(Vp)
    A = jax.nn.softmax(
        jnp.einsum("bqd,bkd->bqk", Q_, K_, precision=_HI) / math.sqrt(dim_V), axis=2)
    O_ = Q_ + jnp.einsum("bqk,bkd->bqd", A, V_, precision=_HI)
    O = jnp.concatenate([O_[h * B:(h + 1) * B] for h in range(num_heads)], axis=2)
    return O + jax.nn.relu(
        jnp.einsum('bnv,wv->bnw', O, params["wo"], precision=_HI) + params["bo"])


def init_params(key, dim_Q, dim_K, dim_V):
    """Deterministic PyTorch-Linear-style init (uniform +/- 1/sqrt(fan_in))."""
    ks = jax.random.split(key, 8)

    def lin(kw, kb, fan_in, fan_out):
        bound = 1.0 / math.sqrt(fan_in)
        w = jax.random.uniform(kw, (fan_out, fan_in), jnp.float32, -bound, bound)
        b = jax.random.uniform(kb, (fan_out,), jnp.float32, -bound, bound)
        return w, b

    wq, bq = lin(ks[0], ks[1], dim_Q, dim_V)
    wk, bk = lin(ks[2], ks[3], dim_K, dim_V)
    wv, bv = lin(ks[4], ks[5], dim_K, dim_V)
    wo, bo = lin(ks[6], ks[7], dim_V, dim_V)
    return dict(wq=wq, bq=bq, wk=wk, bk=bk, wv=wv, bv=bv, wo=wo, bo=bo)


if __name__ == "__main__":
    B, Nq, Nk = 8, 8, 16
    dim_Q, dim_K, dim_V, num_heads = 24, 40, 32, 4

    root = jax.random.PRNGKey(0)
    kq, kk, kp = jax.random.split(root, 3)
    Q = jax.random.normal(kq, (B, Nq, dim_Q), jnp.float32)
    K = jax.random.normal(kk, (B, Nk, dim_K), jnp.float32)
    params = init_params(kp, dim_Q, dim_K, dim_V)

    out = mab_forward(Q, K, params, num_heads)
    out = jax.block_until_ready(out)

    ref = mab_reference(Q, K, params, num_heads)
    assert out.shape == (B, Nq, dim_V)
    # Kernel and reference both use exact softmax division and HIGHEST-precision f32 matmuls,
    # so the only differences are rounding-order effects (~1e-6); 2e-3 leaves ample margin.
    assert jnp.allclose(out, ref, atol=2e-3, rtol=2e-3), "mismatch vs JAX reference"

    print("KERNEL_OK")
</pallas_src>

<mosaic_0001>
module attributes {stable_mosaic.version = 11 : i64} {
  func.func @mab_kernel(%arg0: i32, %arg1: memref<8x8x24xf32, #tpu.memory_space<vmem>>, %arg2: memref<8x16x40xf32, #tpu.memory_space<vmem>>, %arg3: memref<24x32xf32, #tpu.memory_space<vmem>>, %arg4: memref<40x64xf32, #tpu.memory_space<vmem>>, %arg5: memref<32x32xf32, #tpu.memory_space<vmem>>, %arg6: memref<1x128xf32, #tpu.memory_space<vmem>>, %arg7: memref<8x8x32xf32, #tpu.memory_space<vmem>>) attributes {dimension_semantics = [#tpu.dimension_semantics<parallel>], iteration_bounds = array<i64: 1>, scalar_prefetch = 0 : i64, scratch_operands = 0 : i64, tpu.core_type = #tpu.core_type<tc>, window_params = [{transform_indices = @transform_0, window_bounds = array<i64: 8, 8, 24>}, {transform_indices = @transform_1, window_bounds = array<i64: 8, 16, 40>}, {pipeline_mode = #tpu.pipeline_mode<synchronous>, transform_indices = @transform_2, window_bounds = array<i64: 24, 32>}, {pipeline_mode = #tpu.pipeline_mode<synchronous>, transform_indices = @transform_3, window_bounds = array<i64: 40, 64>}, {pipeline_mode = #tpu.pipeline_mode<synchronous>, transform_indices = @transform_4, window_bounds = array<i64: 32, 32>}, {pipeline_mode = #tpu.pipeline_mode<synchronous>, transform_indices = @transform_5, window_bounds = array<i64: 1, 128>}, {transform_indices = @transform_6, window_bounds = array<i64: 8, 8, 32>}]} {
    %c0 = arith.constant 0 : index
    %c0_0 = arith.constant 0 : index
    %c0_1 = arith.constant 0 : index
    %0 = vector.load %arg1[%c0, %c0_0, %c0_1] : memref<8x8x24xf32, #tpu.memory_space<vmem>>, vector<8x8x24xf32>
    %1 = vector.shape_cast %0 : vector<8x8x24xf32> to vector<64x24xf32>
    %c0_2 = arith.constant 0 : index
    %c0_3 = arith.constant 0 : index
    %c0_4 = arith.constant 0 : index
    %2 = vector.load %arg2[%c0_2, %c0_3, %c0_4] : memref<8x16x40xf32, #tpu.memory_space<vmem>>, vector<8x16x40xf32>
    %3 = vector.shape_cast %2 : vector<8x16x40xf32> to vector<128x40xf32>
    %c0_5 = arith.constant 0 : index
    %c0_6 = arith.constant 0 : index
    %4 = vector.load %arg6[%c0_5, %c0_6] : memref<1x128xf32, #tpu.memory_space<vmem>>, vector<1x128xf32>
    %5 = vector.extract_strided_slice %4 {offsets = [0, 0], sizes = [1, 32], strides = [1, 1]} : vector<1x128xf32> to vector<1x32xf32>
    %6 = vector.extract_strided_slice %4 {offsets = [0, 32], sizes = [1, 64], strides = [1, 1]} : vector<1x128xf32> to vector<1x64xf32>
    %7 = vector.extract_strided_slice %4 {offsets = [0, 96], sizes = [1, 32], strides = [1, 1]} : vector<1x128xf32> to vector<1x32xf32>
    %c0_7 = arith.constant 0 : index
    %c0_8 = arith.constant 0 : index
    %8 = vector.load %arg3[%c0_7, %c0_8] : memref<24x32xf32, #tpu.memory_space<vmem>>, vector<24x32xf32>
    %cst = arith.constant dense<0.000000e+00> : vector<64x32xf32>
    %9 = tpu.matmul %1, %8, %cst {dimension_numbers = #tpu.dot_dimension_numbers<[1], [0], [0], [1], [0, 0, 1, 1], [], []>, precision = #tpu.contract_precision<fp32>} : vector<64x24xf32>, vector<24x32xf32>, vector<64x32xf32> -> vector<64x32xf32>
    %10 = vector.broadcast %5 : vector<1x32xf32> to vector<64x32xf32>
    %11 = arith.addf %9, %10 : vector<64x32xf32>
    %c0_9 = arith.constant 0 : index
    %c0_10 = arith.constant 0 : index
    %12 = vector.load %arg4[%c0_9, %c0_10] : memref<40x64xf32, #tpu.memory_space<vmem>>, vector<40x64xf32>
    %cst_11 = arith.constant dense<0.000000e+00> : vector<128x64xf32>
    %13 = tpu.matmul %3, %12, %cst_11 {dimension_numbers = #tpu.dot_dimension_numbers<[1], [0], [0], [1], [0, 0, 1, 1], [], []>, precision = #tpu.contract_precision<fp32>} : vector<128x40xf32>, vector<40x64xf32>, vector<128x64xf32> -> vector<128x64xf32>
    %14 = vector.broadcast %6 : vector<1x64xf32> to vector<128x64xf32>
    %15 = arith.addf %13, %14 : vector<128x64xf32>
    %16 = vector.shape_cast %11 : vector<64x32xf32> to vector<8x8x32xf32>
    %17 = vector.extract_strided_slice %15 {offsets = [0, 0], sizes = [128, 32], strides = [1, 1]} : vector<128x64xf32> to vector<128x32xf32>
    %18 = vector.shape_cast %17 : vector<128x32xf32> to vector<8x16x32xf32>
    %19 = vector.extract_strided_slice %15 {offsets = [0, 32], sizes = [128, 32], strides = [1, 1]} : vector<128x64xf32> to vector<128x32xf32>
    %20 = vector.shape_cast %19 : vector<128x32xf32> to vector<8x16x32xf32>
    %21 = tpu.transpose %18, [0, 2, 1] : vector<8x16x32xf32> -> vector<8x32x16xf32>
    %22 = vector.extract_strided_slice %16 {offsets = [0, 0, 0], sizes = [8, 8, 8], strides = [1, 1, 1]} : vector<8x8x32xf32> to vector<8x8x8xf32>
    %23 = vector.extract_strided_slice %21 {offsets = [0, 0, 0], sizes = [8, 8, 16], strides = [1, 1, 1]} : vector<8x32x16xf32> to vector<8x8x16xf32>
    %24 = vector.extract_strided_slice %20 {offsets = [0, 0, 0], sizes = [8, 16, 8], strides = [1, 1, 1]} : vector<8x16x32xf32> to vector<8x16x8xf32>
    "tpu.trace_start"() <{level = 10 : i32, message = "bqd,bdk->bqk"}> : () -> ()
    %cst_12 = arith.constant dense<0.000000e+00> : vector<8x8x16xf32>
    %25 = tpu.matmul %22, %23, %cst_12 {dimension_numbers = #tpu.dot_dimension_numbers<[2], [1], [1], [2], [0, 0, 0, 1, 1, 2], [0], [0]>, precision = #tpu.contract_precision<fp32>} : vector<8x8x8xf32>, vector<8x8x16xf32>, vector<8x8x16xf32> -> vector<8x8x16xf32>
    "tpu.trace_stop"() : () -> ()
    %cst_13 = arith.constant dense<0xFF800000> : vector<8x8xf32>
    %26 = vector.multi_reduction <maximumf>, %25, %cst_13 [2] : vector<8x8x16xf32> to vector<8x8xf32>
    %27 = vector.shape_cast %26 : vector<8x8xf32> to vector<8x8x1xf32>
    %28 = vector.broadcast %27 : vector<8x8x1xf32> to vector<8x8x16xf32>
    %29 = arith.subf %25, %28 : vector<8x8x16xf32>
    %30 = math.exp %29 : vector<8x8x16xf32>
    %cst_14 = arith.constant dense<0.000000e+00> : vector<8x8xf32>
    %31 = vector.multi_reduction <add>, %30, %cst_14 [2] : vector<8x8x16xf32> to vector<8x8xf32>
    %32 = vector.shape_cast %31 : vector<8x8xf32> to vector<8x8x1xf32>
    %33 = vector.broadcast %32 : vector<8x8x1xf32> to vector<8x8x16xf32>
    %34 = arith.divf %30, %33 : vector<8x8x16xf32>
    "tpu.trace_start"() <{level = 10 : i32, message = "bqk,bkd->bqd"}> : () -> ()
    %cst_15 = arith.constant dense<0.000000e+00> : vector<8x8x8xf32>
    %35 = tpu.matmul %34, %24, %cst_15 {dimension_numbers = #tpu.dot_dimension_numbers<[2], [1], [1], [2], [0, 0, 0, 1, 1, 2], [0], [0]>, precision = #tpu.contract_precision<fp32>} : vector<8x8x16xf32>, vector<8x16x8xf32>, vector<8x8x8xf32> -> vector<8x8x8xf32>
    "tpu.trace_stop"() : () -> ()
    %36 = arith.addf %22, %35 : vector<8x8x8xf32>
    %37 = vector.extract_strided_slice %16 {offsets = [0, 0, 8], sizes = [8, 8, 8], strides = [1, 1, 1]} : vector<8x8x32xf32> to vector<8x8x8xf32>
    %38 = vector.extract_strided_slice %21 {offsets = [0, 8, 0], sizes = [8, 8, 16], strides = [1, 1, 1]} : vector<8x32x16xf32> to vector<8x8x16xf32>
    %39 = vector.extract_strided_slice %20 {offsets = [0, 0, 8], sizes = [8, 16, 8], strides = [1, 1, 1]} : vector<8x16x32xf32> to vector<8x16x8xf32>
    "tpu.trace_start"() <{level = 10 : i32, message = "bqd,bdk->bqk"}> : () -> ()
    %cst_16 = arith.constant dense<0.000000e+00> : vector<8x8x16xf32>
    %40 = tpu.matmul %37, %38, %cst_16 {dimension_numbers = #tpu.dot_dimension_numbers<[2], [1], [1], [2], [0, 0, 0, 1, 1, 2], [0], [0]>, precision = #tpu.contract_precision<fp32>} : vector<8x8x8xf32>, vector<8x8x16xf32>, vector<8x8x16xf32> -> vector<8x8x16xf32>
    "tpu.trace_stop"() : () -> ()
    %cst_17 = arith.constant dense<0xFF800000> : vector<8x8xf32>
    %41 = vector.multi_reduction <maximumf>, %40, %cst_17 [2] : vector<8x8x16xf32> to vector<8x8xf32>
    %42 = vector.shape_cast %41 : vector<8x8xf32> to vector<8x8x1xf32>
    %43 = vector.broadcast %42 : vector<8x8x1xf32> to vector<8x8x16xf32>
    %44 = arith.subf %40, %43 : vector<8x8x16xf32>
    %45 = math.exp %44 : vector<8x8x16xf32>
    %cst_18 = arith.constant dense<0.000000e+00> : vector<8x8xf32>
    %46 = vector.multi_reduction <add>, %45, %cst_18 [2] : vector<8x8x16xf32> to vector<8x8xf32>
    %47 = vector.shape_cast %46 : vector<8x8xf32> to vector<8x8x1xf32>
    %48 = vector.broadcast %47 : vector<8x8x1xf32> to vector<8x8x16xf32>
    %49 = arith.divf %45, %48 : vector<8x8x16xf32>
    "tpu.trace_start"() <{level = 10 : i32, message = "bqk,bkd->bqd"}> : () -> ()
    %cst_19 = arith.constant dense<0.000000e+00> : vector<8x8x8xf32>
    %50 = tpu.matmul %49, %39, %cst_19 {dimension_numbers = #tpu.dot_dimension_numbers<[2], [1], [1], [2], [0, 0, 0, 1, 1, 2], [0], [0]>, precision = #tpu.contract_precision<fp32>} : vector<8x8x16xf32>, vector<8x16x8xf32>, vector<8x8x8xf32> -> vector<8x8x8xf32>
    "tpu.trace_stop"() : () -> ()
    %51 = arith.addf %37, %50 : vector<8x8x8xf32>
    %52 = vector.extract_strided_slice %16 {offsets = [0, 0, 16], sizes = [8, 8, 8], strides = [1, 1, 1]} : vector<8x8x32xf32> to vector<8x8x8xf32>
    %53 = vector.extract_strided_slice %21 {offsets = [0, 16, 0], sizes = [8, 8, 16], strides = [1, 1, 1]} : vector<8x32x16xf32> to vector<8x8x16xf32>
    %54 = vector.extract_strided_slice %20 {offsets = [0, 0, 16], sizes = [8, 16, 8], strides = [1, 1, 1]} : vector<8x16x32xf32> to vector<8x16x8xf32>
    "tpu.trace_start"() <{level = 10 : i32, message = "bqd,bdk->bqk"}> : () -> ()
    %cst_20 = arith.constant dense<0.000000e+00> : vector<8x8x16xf32>
    %55 = tpu.matmul %52, %53, %cst_20 {dimension_numbers = #tpu.dot_dimension_numbers<[2], [1], [1], [2], [0, 0, 0, 1, 1, 2], [0], [0]>, precision = #tpu.contract_precision<fp32>} : vector<8x8x8xf32>, vector<8x8x16xf32>, vector<8x8x16xf32> -> vector<8x8x16xf32>
    "tpu.trace_stop"() : () -> ()
    %cst_21 = arith.constant dense<0xFF800000> : vector<8x8xf32>
    %56 = vector.multi_reduction <maximumf>, %55, %cst_21 [2] : vector<8x8x16xf32> to vector<8x8xf32>
    %57 = vector.shape_cast %56 : vector<8x8xf32> to vector<8x8x1xf32>
    %58 = vector.broadcast %57 : vector<8x8x1xf32> to vector<8x8x16xf32>
    %59 = arith.subf %55, %58 : vector<8x8x16xf32>
    %60 = math.exp %59 : vector<8x8x16xf32>
    %cst_22 = arith.constant dense<0.000000e+00> : vector<8x8xf32>
    %61 = vector.multi_reduction <add>, %60, %cst_22 [2] : vector<8x8x16xf32> to vector<8x8xf32>
    %62 = vector.shape_cast %61 : vector<8x8xf32> to vector<8x8x1xf32>
    %63 = vector.broadcast %62 : vector<8x8x1xf32> to vector<8x8x16xf32>
    %64 = arith.divf %60, %63 : vector<8x8x16xf32>
    "tpu.trace_start"() <{level = 10 : i32, message = "bqk,bkd->bqd"}> : () -> ()
    %cst_23 = arith.constant dense<0.000000e+00> : vector<8x8x8xf32>
    %65 = tpu.matmul %64, %54, %cst_23 {dimension_numbers = #tpu.dot_dimension_numbers<[2], [1], [1], [2], [0, 0, 0, 1, 1, 2], [0], [0]>, precision = #tpu.contract_precision<fp32>} : vector<8x8x16xf32>, vector<8x16x8xf32>, vector<8x8x8xf32> -> vector<8x8x8xf32>
    "tpu.trace_stop"() : () -> ()
    %66 = arith.addf %52, %65 : vector<8x8x8xf32>
    %67 = vector.extract_strided_slice %16 {offsets = [0, 0, 24], sizes = [8, 8, 8], strides = [1, 1, 1]} : vector<8x8x32xf32> to vector<8x8x8xf32>
    %68 = vector.extract_strided_slice %21 {offsets = [0, 24, 0], sizes = [8, 8, 16], strides = [1, 1, 1]} : vector<8x32x16xf32> to vector<8x8x16xf32>
    %69 = vector.extract_strided_slice %20 {offsets = [0, 0, 24], sizes = [8, 16, 8], strides = [1, 1, 1]} : vector<8x16x32xf32> to vector<8x16x8xf32>
    "tpu.trace_start"() <{level = 10 : i32, message = "bqd,bdk->bqk"}> : () -> ()
    %cst_24 = arith.constant dense<0.000000e+00> : vector<8x8x16xf32>
    %70 = tpu.matmul %67, %68, %cst_24 {dimension_numbers = #tpu.dot_dimension_numbers<[2], [1], [1], [2], [0, 0, 0, 1, 1, 2], [0], [0]>, precision = #tpu.contract_precision<fp32>} : vector<8x8x8xf32>, vector<8x8x16xf32>, vector<8x8x16xf32> -> vector<8x8x16xf32>
    "tpu.trace_stop"() : () -> ()
    %cst_25 = arith.constant dense<0xFF800000> : vector<8x8xf32>
    %71 = vector.multi_reduction <maximumf>, %70, %cst_25 [2] : vector<8x8x16xf32> to vector<8x8xf32>
    %72 = vector.shape_cast %71 : vector<8x8xf32> to vector<8x8x1xf32>
    %73 = vector.broadcast %72 : vector<8x8x1xf32> to vector<8x8x16xf32>
    %74 = arith.subf %70, %73 : vector<8x8x16xf32>
    %75 = math.exp %74 : vector<8x8x16xf32>
    %cst_26 = arith.constant dense<0.000000e+00> : vector<8x8xf32>
    %76 = vector.multi_reduction <add>, %75, %cst_26 [2] : vector<8x8x16xf32> to vector<8x8xf32>
    %77 = vector.shape_cast %76 : vector<8x8xf32> to vector<8x8x1xf32>
    %78 = vector.broadcast %77 : vector<8x8x1xf32> to vector<8x8x16xf32>
    %79 = arith.divf %75, %78 : vector<8x8x16xf32>
    "tpu.trace_start"() <{level = 10 : i32, message = "bqk,bkd->bqd"}> : () -> ()
    %cst_27 = arith.constant dense<0.000000e+00> : vector<8x8x8xf32>
    %80 = tpu.matmul %79, %69, %cst_27 {dimension_numbers = #tpu.dot_dimension_numbers<[2], [1], [1], [2], [0, 0, 0, 1, 1, 2], [0], [0]>, precision = #tpu.contract_precision<fp32>} : vector<8x8x16xf32>, vector<8x16x8xf32>, vector<8x8x8xf32> -> vector<8x8x8xf32>
    "tpu.trace_stop"() : () -> ()
    %81 = arith.addf %67, %80 : vector<8x8x8xf32>
    %82 = tpu.concatenate %36, %51, %66, %81 in 2 : vector<8x8x8xf32>, vector<8x8x8xf32>, vector<8x8x8xf32>, vector<8x8x8xf32> -> vector<8x8x32xf32>
    %83 = vector.shape_cast %82 : vector<8x8x32xf32> to vector<64x32xf32>
    %c0_28 = arith.constant 0 : index
    %c0_29 = arith.constant 0 : index
    %84 = vector.load %arg5[%c0_28, %c0_29] : memref<32x32xf32, #tpu.memory_space<vmem>>, vector<32x32xf32>
    %cst_30 = arith.constant dense<0.000000e+00> : vector<64x32xf32>
    %85 = tpu.matmul %83, %84, %cst_30 {dimension_numbers = #tpu.dot_dimension_numbers<[1], [0], [0], [1], [0, 0, 1, 1], [], []>, precision = #tpu.contract_precision<fp32>} : vector<64x32xf32>, vector<32x32xf32>, vector<64x32xf32> -> vector<64x32xf32>
    %86 = vector.broadcast %7 : vector<1x32xf32> to vector<64x32xf32>
    %87 = arith.addf %85, %86 : vector<64x32xf32>
    %cst_31 = arith.constant 0.000000e+00 : f32
    %88 = vector.broadcast %cst_31 : f32 to vector<64x32xf32>
    %89 = arith.maximumf %87, %88 : vector<64x32xf32>
    %90 = arith.addf %83, %89 : vector<64x32xf32>
    %91 = vector.shape_cast %90 : vector<64x32xf32> to vector<8x8x32xf32>
    %c0_32 = arith.constant 0 : index
    %c0_33 = arith.constant 0 : index
    %c0_34 = arith.constant 0 : index
    %92 = vector.load %arg7[%c0_32, %c0_33, %c0_34] : memref<8x8x32xf32, #tpu.memory_space<vmem>>, vector<8x8x32xf32>
    tpu.vector_store %arg7[%c0_32, %c0_33, %c0_34], %91 {strides = array<i32>} : memref<8x8x32xf32, #tpu.memory_space<vmem>>, vector<8x8x32xf32>,
    return
  }
  func.func @transform_0(%arg0: i32) -> (i32, i32, i32) {
    %c0_i32 = arith.constant 0 : i32
    %c0_i32_0 = arith.constant 0 : i32
    %c0_i32_1 = arith.constant 0 : i32
    return %arg0, %c0_i32, %c0_i32_0 : i32, i32, i32
  }
  func.func @transform_1(%arg0: i32) -> (i32, i32, i32) {
    %c0_i32 = arith.constant 0 : i32
    %c0_i32_0 = arith.constant 0 : i32
    %c0_i32_1 = arith.constant 0 : i32
    return %arg0, %c0_i32, %c0_i32_0 : i32, i32, i32
  }
  func.func @transform_2(%arg0: i32) -> (i32, i32) {
    %c0_i32 = arith.constant 0 : i32
    %c0_i32_0 = arith.constant 0 : i32
    %c0_i32_1 = arith.constant 0 : i32
    return %c0_i32, %c0_i32_0 : i32, i32
  }
  func.func @transform_3(%arg0: i32) -> (i32, i32) {
    %c0_i32 = arith.constant 0 : i32
    %c0_i32_0 = arith.constant 0 : i32
    %c0_i32_1 = arith.constant 0 : i32
    return %c0_i32, %c0_i32_0 : i32, i32
  }
  func.func @transform_4(%arg0: i32) -> (i32, i32) {
    %c0_i32 = arith.constant 0 : i32
    %c0_i32_0 = arith.constant 0 : i32
    %c0_i32_1 = arith.constant 0 : i32
    return %c0_i32, %c0_i32_0 : i32, i32
  }
  func.func @transform_5(%arg0: i32) -> (i32, i32) {
    %c0_i32 = arith.constant 0 : i32
    %c0_i32_0 = arith.constant 0 : i32
    %c0_i32_1 = arith.constant 0 : i32
    return %c0_i32, %c0_i32_0 : i32, i32
  }
  func.func @transform_6(%arg0: i32) -> (i32, i32, i32) {
    %c0_i32 = arith.constant 0 : i32
    %c0_i32_0 = arith.constant 0 : i32
    %c0_i32_1 = arith.constant 0 : i32
    return %arg0, %c0_i32, %c0_i32_0 : i32, i32, i32
  }
}

</mosaic_0001>

<bundles_post_ra>
// kernel: tpu_custom_call.1
= control target key start
LH: loop header
LB: loop body
LE: loop exit
PB: predicated region body
PF: predicated region fallthrough
CT: control target
= control target key end

     0   :  { %11 = vsyncpa [#allocation3], 0  ;;  %s44110_s0 = inlined_call_operand.hbm [shape: f32[8,8,24], index: 0, kind: input, shape index: {}]   ;;  %s44111_s1 = inlined_call_operand.hbm [shape: f32[8,16,40], index: 1, kind: input, shape index: {}]   ;;  %s44112_s2 = inlined_call_operand.hbm [shape: f32[24,32], index: 2, kind: input, shape index: {}]   ;;  %s44113_s3 = inlined_call_operand.hbm [shape: f32[40,64], index: 3, kind: input, shape index: {}]   ;;  %s44114_s4 = inlined_call_operand.hbm [shape: f32[32,32], index: 4, kind: input, shape index: {}]   ;;  %s44115_s5 = inlined_call_operand.vmem [shape: f32[1,128], index: 5, kind: input, shape index: {}]   ;;  %s44116_s6 = inlined_call_operand.hbm [shape: f32[8,8,32], index: 6, kind: output, shape index: {}]  }
   0x1   :  { %12 = vsyncpa [#allocation6], 0 }
   0x2   :  { %13 = vsyncpa [#allocation9], 0 }
   0x3   :  { %14 = vsyncpa [#allocation4], 0  ;;  %s38330_s21 = smov [#allocation5]   ;;  %s38331_s23 = smov [#allocation8]  }
   0x4   :  { %s32_s22 = sshll.u32 %s38330_s21, 4  ;;  %s56_s24 = sshll.u32 %s38331_s23, 4  ;;  %s33_s22 = int_to_ptr.vmem [resolvable:$true] %s32_s22  ;;  %s57_s24 = int_to_ptr.vmem [resolvable:$true] %s56_s24 }
   0x5   :  { %s38210_s25 = scalar_lea.vmem %s33_s22, 2048  ;;  %p38215_p1 = scmp.lt.s32.totalorder %s33_s22, %s33_s22 }
   0x6   :  { %p38211_p0 = scmp.ne.s32.totalorder %s33_s22, %s38210_s25  ;;  %p38216_p2 = scmp.lt.s32.totalorder %s38210_s25, %s38210_s25 }
   0x8   :  { %p38217_p3 = por %p38216_p2, %p38215_p1 }
   0xa   :  { %p38218_p4 = pnand %p38217_p3, %p38211_p0 }
   0xc   :  { %38221 = shalt.err (!%p38218_p4)
}
   0xd   :  { %s38332_s26 = smov 128   ;;  %s38333_s27 = smov 8  }
   0xe   :  { %38 = dma.hbm_to_vmem [thread:$0]  %s44111_s1, 2048, %s33_s22, [#allocation6], %s38332_s26, %s38332_s26, %s38333_s27  }
   0xf   :  { %s38230_s30 = scalar_lea.vmem %s57_s24, 640  ;;  %p38235_p6 = scmp.lt.s32.totalorder %s57_s24, %s57_s24 }
  0x10   :  { %p38231_p5 = scmp.ne.s32.totalorder %s57_s24, %s38230_s30  ;;  %p38236_p7 = scmp.lt.s32.totalorder %s38230_s30, %s38230_s30 }
  0x12   :  { %p38237_p8 = por %p38236_p7, %p38235_p6 }
  0x14   :  { %p38238_p9 = pnand %p38237_p8, %p38231_p5 }
  0x16   :  { %38241 = shalt.err (!%p38238_p9)
}
  0x17   :  { %62 = dma.hbm_to_vmem [thread:$0]  %s44113_s3, 640, %s57_s24, [#allocation9], %s38332_s26, %s38332_s26, %s38333_s27  }
  0x18   :  { %s38334_s9 = smov [#allocation2]   ;;  %s38335_s11 = smov [#allocation7]  }
  0x19   :  { %s20_s10 = sshll.u32 %s38334_s9, 4  ;;  %s44_s12 = sshll.u32 %s38335_s11, 4  ;;  %s21_s10 = int_to_ptr.vmem [resolvable:$true] %s20_s10  ;;  %s45_s12 = int_to_ptr.vmem [resolvable:$true] %s44_s12 }
  0x1a   :  { %s38250_s1 = scalar_lea.vmem %s21_s10, 1024  ;;  %p38255_p11 = scmp.lt.s32.totalorder %s21_s10, %s21_s10 }
  0x1b   :  { %p38251_p10 = scmp.ne.s32.totalorder %s21_s10, %s38250_s1  ;;  %p38256_p12 = scmp.lt.s32.totalorder %s38250_s1, %s38250_s1 }
  0x1d   :  { %p38257_p13 = por %p38256_p12, %p38255_p11 }
  0x1f   :  { %p38258_p0 = pnand %p38257_p13, %p38251_p10 }
  0x21   :  { %38261 = shalt.err (!%p38258_p0)
}
  0x22   :  { %26 = dma.hbm_to_vmem [thread:$0]  %s44110_s0, 1024, %s21_s10, [#allocation3], %s38332_s26, %s38332_s26, %s38333_s27  }
  0x23   :  { %s38270_s3 = scalar_lea.vmem %s45_s12, 384  ;;  %p38275_p2 = scmp.lt.s32.totalorder %s45_s12, %s45_s12 }
  0x24   :  { %p38271_p1 = scmp.ne.s32.totalorder %s45_s12, %s38270_s3  ;;  %p38276_p3 = scmp.lt.s32.totalorder %s38270_s3, %s38270_s3 }
  0x26   :  { %p38277_p4 = por %p38276_p3, %p38275_p2 }
  0x28   :  { %p38278_p5 = pnand %p38277_p4, %p38271_p1 }
  0x2a   :  { %38281 = shalt.err (!%p38278_p5)
}
  0x2b   :  { %50 = dma.hbm_to_vmem [thread:$0]  %s44112_s2, 384, %s45_s12, [#allocation6], %s38332_s26, %s38332_s26, %s38333_s27  }
  0x2c   :  { %s38336_s17 = smov [#allocation10]  }
  0x2d   :  { %s68_s18 = sshll.u32 %s38336_s17, 4  ;;  %s69_s18 = int_to_ptr.vmem [resolvable:$true] %s68_s18 }
  0x2e   :  { %s38290_s19 = scalar_lea.vmem %s69_s18, 512  ;;  %p38295_p7 = scmp.lt.s32.totalorder %s69_s18, %s69_s18 }
  0x2f   :  { %p38291_p6 = scmp.ne.s32.totalorder %s69_s18, %s38290_s19  ;;  %p38296_p8 = scmp.lt.s32.totalorder %s38290_s19, %s38290_s19 }
  0x31   :  { %p38297_p9 = por %p38296_p8, %p38295_p7 }
  0x33   :  { %p38298_p10 = pnand %p38297_p9, %p38291_p6 }
  0x35   :  { %38301 = shalt.err (!%p38298_p10)
}
  0x36   :  { %74 = dma.hbm_to_vmem [thread:$0]  %s44114_s4, 512, %s69_s18, [#allocation9], %s38332_s26, %s38332_s26, %s38333_s27  }
  0x37   :  { %38322 = dma.done.wait [#allocation3], 1024  }
  0x38   :  { %38323 = vsyncadd [#allocation3], 4294966272 }
  0x39   :  { %38324 = dma.done.wait [#allocation6], 2432  }
  0x3a   :  { %38325 = vsyncadd [#allocation6], 4294964864 }
  0x3b   :  { %38326 = dma.done.wait [#allocation9], 1152  }
  0x3c   :  { %38327 = vsyncadd [#allocation9], 4294966144  ;;  %vm126_vm0 = vcmask 195584   ;;  %v119_v0 = vld [vmem:[#allocation7 + $0x10] sm:$0xff]  ;;  %v118_v1 = vld [vmem:[#allocation7 + $0x8] sm:$0xff]  ;;  %s38337_s21 = smov 96  }
  0x3d   :  { %v117_v2 = vld [vmem:[#allocation7] sm:$0xff]  ;;  %v38415_v3 = vand.u32 4294901760, %v119_v0  ;;  %v38417_v4 = vand.u32 4294901760, %v118_v1  ;;  %v93_v7 = vld [vmem:[#allocation2 + $0x8] sm:$0xff]  ;;  %v94_v8 = vld [vmem:[#allocation2 + $0x10] sm:$0xff]  ;;  %vm932_vm1 = vcmask 326656  }
  0x3e   :  { %v38419_v5 = vand.u32 4294901760, %v117_v2  ;;  %v92_v6 = vld [vmem:[#allocation2] sm:$0xff]  ;;  %v131_v10 = vsel %vm126_vm0, %v93_v7, 0  ;;  %v134_v11 = vsel %vm126_vm0, %v94_v8, 0  ;;  %v95_v12 = vld [vmem:[#allocation2 + $0x18] sm:$0xff]  ;;  %v97_v38 = vld [vmem:[#allocation2 + $0x28] sm:$0xff] }
  0x3f   :  { %v128_v9 = vsel %vm126_vm0, %v92_v6, 0  ;;  %v96_v13 = vld [vmem:[#allocation2 + $0x20] sm:$0xff]  ;;  %34932 = vmatprep.subr.mxu0 %v38415_v3  ;;  %v38426_v14 = vsub.f32 %v119_v0, %v38415_v3  ;;  %v38430_v16 = vand.u32 4294901760, %v131_v10  ;;  %v38433_v17 = vsub.f32 %v118_v1, %v38417_v4  ;;  %v98_v39 = vld [vmem:[#allocation2 + $0x30] sm:$0xff]  ;;  %v99_v48 = vld [vmem:[#allocation2 + $0x38] sm:$0xff]  ;;  %s38340_s24 = smov 120  }
  0x40   :  { %v38428_v15 = vand.u32 4294901760, %v128_v9  ;;  %34933 = vmatpush3.msra.mxu0 %v38415_v3  ;;  %v38437_v18 = vsub.f32 %v117_v2, %v38419_v5  ;;  %v38439_v19 = vand.u32 4294901760, %v134_v11  ;;  %v137_v20 = vsel %vm126_vm0, %v95_v12, 0  ;;  %v928_v12 = vld [vmem:[#allocation8 + $0x20] sm:$0xff]  ;;  %s38341_s25 = smov 88   ;;  %s38342_s28 = smov 112  }
  0x41   :  { %v140_v21 = vsel %vm126_vm0, %v96_v13, 0  ;;  %34934 = vmatprep.subr.mxu0 %v38417_v4  ;;  %v38445_v22 = vand.u32 4294901760, %v38426_v14  ;;  %v38451_v24 = vsub.f32 %v131_v10, %v38430_v16  ;;  %v38454_v25 = vand.u32 4294901760, %v38433_v17  ;;  %s38343_s29 = smov 80   ;;  %s38344_s30 = smov 104  }
  0x42   :  { %v38448_v23 = vsub.f32 %v128_v9, %v38428_v15  ;;  %34956 = vmatprep.mubr.f32.mxu1 %v38428_v15  ;;  %34935 = vmatpush3.msra.mxu0 %v38417_v4  ;;  %v38459_v26 = vand.u32 4294901760, %v38437_v18  ;;  %v38462_v27 = vsub.f32 %v134_v11, %v38439_v19  ;;  %v38464_v28 = vand.u32 4294901760, %v137_v20  ;;  %s38345_s7 = smov 72   ;;  %s38346_s8 = smov 16  }
  0x43   :  { %v38466_v29 = vand.u32 4294901760, %v140_v21  ;;  %34936 = vmatprep.subr.mxu0 %v38419_v5  ;;  %v329_v30 = vsub.f32 %v38426_v14, %v38445_v22  ;;  %v231_v32 = vand.u32 4294901760, %v38451_v24  ;;  %v336_v33 = vsub.f32 %v38433_v17, %v38454_v25  ;;  %s38347_s9 = smov 24   ;;  %s38348_s12 = smov 32  }
  0x44   :  { %v221_v31 = vand.u32 4294901760, %v38448_v23  ;;  %34937 = vmatpush3.msra.mxu0 %v38419_v5  ;;  %v343_v34 = vsub.f32 %v38437_v18, %v38459_v26  ;;  %v241_v35 = vand.u32 4294901760, %v38462_v27  ;;  %v38480_v36 = vsub.f32 %v137_v20, %v38464_v28  ;;  %v927_v20 = vld [vmem:[#allocation8 + $0x18] sm:$0xff] }
  0x45   :  { %v38483_v37 = vsub.f32 %v140_v21, %v38466_v29  ;;  %v330_v40 = vand.u32 4294901760, %v329_v30  ;;  %v232_v42 = vsub.f32 %v38451_v24, %v231_v32  ;;  %v337_v43 = vand.u32 4294901760, %v336_v33  ;;  %34968 = vmatprep.subr.mxu0 %v38426_v14  ;;  %v926_v30 = vld [vmem:[#allocation8 + $0x10] sm:$0xff] }
  0x46   :  { %v222_v41 = vsub.f32 %v38448_v23, %v221_v31  ;;  %v344_v44 = vand.u32 4294901760, %v343_v34  ;;  %v242_v45 = vsub.f32 %v38462_v27, %v241_v35  ;;  %v251_v46 = vand.u32 4294901760, %v38480_v36 }
  0x47   :  { %v261_v47 = vand.u32 4294901760, %v38483_v37  ;;  %34950 = vmatprep.subr.mxu1 %v330_v40  ;;  %v233_v50 = vand.u32 4294901760, %v232_v42  ;;  %v143_v51 = vsel %vm126_vm0, %v97_v38, 0  ;;  %v146_v52 = vsel %vm126_vm0, %v98_v39, 0 }
  0x48   :  { %v223_v49 = vand.u32 4294901760, %v222_v41  ;;  %34951 = vmatpush3.msra.mxu1 %v330_v40  ;;  %v243_v53 = vand.u32 4294901760, %v242_v45  ;;  %v252_v54 = vsub.f32 %v38480_v36, %v251_v46  ;;  %v38505_v56 = vand.u32 4294901760, %v143_v51  ;;  %v103_v40 = vld [vmem:[#allocation5 + $0x18] sm:$0xff] }
  0x49   :  { %v262_v55 = vsub.f32 %v38483_v37, %v261_v47  ;;  %34952 = vmatprep.subr.mxu1 %v337_v43  ;;  %v38507_v57 = vand.u32 4294901760, %v146_v52  ;;  %v149_v58 = vsel %vm126_vm0, %v99_v48, 0  ;;  %v943_v45 = vsel %vm932_vm1, %v103_v40, 0 }
  0x4a   :  { %34938 = vmatprep.mubr.f32.mxu0 %v223_v49  ;;  %34953 = vmatpush3.msra.mxu1 %v337_v43  ;;  %v253_v59 = vand.u32 4294901760, %v252_v54  ;;  %v38511_v60 = vsub.f32 %v143_v51, %v38505_v56  ;;  %v38513_v61 = vand.u32 4294901760, %v149_v58  ;;  %v38653_v54 = vand.u32 4294901760, %v943_v45 }
  0x4b   :  { %34939 = vmatmul.mubr.f32.vlgmr.msra.gmra.mxu0 %v233_v50  ;;  %34954 = vmatprep.subr.mxu1 %v344_v44  ;;  %v263_v62 = vand.u32 4294901760, %v262_v55  ;;  %v38516_v63 = vsub.f32 %v146_v52, %v38507_v57  ;;  %vm38339_vm2 = vmmov 0   ;;  %vm2124_vm3 = vcmask 64512  }
  0x4c   :  { %34941 = vmatprep.mubr.f32.mxu0 %v243_v53  ;;  %34955 = vmatpush3.msra.mxu1 %v344_v44  ;;  %v271_v0 = vand.u32 4294901760, %v38511_v60  ;;  %v38521_v1 = vsub.f32 %v149_v58, %v38513_v61  ;;  %vm5869_vm4 = vcmask 130048   ;;  %vm32661_vm5 = vcmask 261120  }
  0x4d   :  { %34969 = vmatpush3.msra.mxu0 %v38426_v14  ;;  %34957 = vmatmul.mubr.f32.vlgmr.msra.gmra.mxu1 %v38430_v16  ;;  %v281_v2 = vand.u32 4294901760, %v38516_v63  ;;  %v38546_v14 = vld [vmem:[%s44115_s5] ss:$0 sm:$0xff] }
  0x4e   :  { %34970 = vmatprep.subr.mxu0 %v38433_v17  ;;  %34959 = vmatprep.mubr.f32.mxu1 %v38439_v19  ;;  %v272_v6 = vsub.f32 %v38511_v60, %v271_v0  ;;  %v291_v7 = vand.u32 4294901760, %v38521_v1 }
  0x4f   :  { %34942 = vmatmul.mubr.f32.gmra.mxu0 %v253_v59  ;;  %v282_v8 = vsub.f32 %v38516_v63, %v281_v2  ;;  %34986 = vmatprep.subr.mxu1 %v38415_v3 }
  0x50   :  { %34944 = vmatprep.mubr.f32.mxu0 %v263_v62  ;;  %34971 = vmatpush3.msra.mxu0 %v38433_v17  ;;  %v273_v9 = vand.u32 4294901760, %v272_v6  ;;  %v292_v10 = vsub.f32 %v38521_v1, %v291_v7  ;;  %v38551_v17 = vand.u32 4294901760, %v928_v12 }
  0x51   :  { %34972 = vmatprep.subr.mxu0 %v38437_v18  ;;  %34960 = vmatmul.mubr.f32.gmra.mxu1 %v38464_v28  ;;  %v283_v11 = vand.u32 4294901760, %v282_v8 }
  0x52   :  { %34973 = vmatpush3.msra.mxu0 %v38437_v18  ;;  %34962 = vmatprep.mubr.f32.mxu1 %v38466_v29  ;;  %v293_v13 = vand.u32 4294901760, %v292_v10  ;;  %v38561_v18 = vsub.f32 %v928_v12, %v38551_v17  ;;  %v38684_v10 = vsub.f32 %v943_v45, %v38653_v54 }
  0x53   :  { %34945 = vmatmul.mubr.f32.gmra.mxu0 %v273_v9  ;;  %34987 = vmatpush3.msra.mxu1 %v38415_v3 }
  0x54   :  { %34947 = vmatprep.mubr.f32.mxu0 %v283_v11  ;;  %34988 = vmatprep.subr.mxu1 %v38417_v4  ;;  %v38572_v21 = vand.u32 4294901760, %v38561_v18 }
  0x55   :  { %35004 = vmatprep.subr.mxu0 %v38445_v22  ;;  %34963 = vmatmul.mubr.f32.gmra.mxu1 %v38505_v56 }
  0x56   :  { %929 = vrot.lane.b32.xlu0 %v38546_v14, %s38337_s21  ;;  %34965 = vmatprep.mubr.f32.mxu1 %v38507_v57 }
  0x57   :  { %34948 = vmatmul.mubr.f32.gmra.mxu0 %v293_v13  ;;  %34989 = vmatpush3.msra.mxu1 %v38417_v4 }
  0x58   :  { %34974 = vmatprep.mubr.f32.mxu0 %v38448_v23  ;;  %34990 = vmatprep.subr.mxu1 %v38419_v5  ;;  %v38580_v23 = vand.u32 4294901760, %v927_v20 }
  0x59   :  { %34966 = vmatmul.mubr.f32.gmra.mxu1 %v38513_v61 }
  0x5a   :  { %34991 = vmatpush3.msra.mxu1 %v38419_v5  ;;  %34992 = vmatprep.mubr.f32.mxu1 %v221_v31  ;;  %v100_v31 = vld [vmem:[#allocation5] sm:$0xff] }
  0x5b   :  { %34975 = vmatmul.mubr.f32.vlgmr.msra.gmra.mxu0 %v38451_v24  ;;  %35022 = vmatprep.subr.mxu1 %v38415_v3  ;;  %v1237_v24 = vsub.f32 %v38561_v18, %v38572_v21  ;;  %v934_v33 = vsel %vm932_vm1, %v100_v31, 0 }
  0x5c   :  { %34977 = vmatprep.mubr.f32.mxu0 %v38462_v27  ;;  %35005 = vmatpush3.msra.mxu0 %v38445_v22  ;;  %v101_v22 = vld [vmem:[#allocation5 + $0x8] sm:$0xff]  ;;  %v38591_v27 = vand.u32 4294901760, %v926_v30  ;;  %v38607_v38 = vand.u32 4294901760, %v934_v33 }
  0x5d   :  { %34993 = vmatmul.mubr.f32.vlgmr.msra.gmra.mxu1 %v231_v32  ;;  %35006 = vmatprep.subr.mxu0 %v38454_v25  ;;  %v925_v32 = vld [vmem:[#allocation8 + $0x8] sm:$0xff]  ;;  %v937_v34 = vsel %vm932_vm1, %v101_v22, 0 }
  0x5e   :  { %34995 = vmatprep.mubr.f32.mxu1 %v241_v35  ;;  %35007 = vmatpush3.msra.mxu0 %v38454_v25  ;;  %v102_v25 = vld [vmem:[#allocation5 + $0x10] sm:$0xff]  ;;  %v924_v35 = vld [vmem:[#allocation8] sm:$0xff]  ;;  %v38609_v39 = vand.u32 4294901760, %v937_v34  ;;  %v38618_v42 = vsub.f32 %v926_v30, %v38591_v27  ;;  %v38632_v48 = vsub.f32 %v934_v33, %v38607_v38 }
  0x5f   :  { %34978 = vmatmul.mubr.f32.gmra.mxu0 %v38480_v36  ;;  %35008 = vmatprep.subr.mxu0 %v38459_v26  ;;  %v1238_v36 = vand.u32 4294901760, %v1237_v24  ;;  %v38615_v41 = vand.u32 4294901760, %v924_v35 }
  0x60   :  { %34980 = vmatprep.mubr.f32.mxu0 %v38483_v37  ;;  %35023 = vmatpush3.msra.mxu1 %v38415_v3  ;;  %v38599_v3 = vsub.f32 %v927_v20, %v38580_v23  ;;  %v940_v37 = vsel %vm932_vm1, %v102_v25, 0  ;;  %v38635_v49 = vsub.f32 %v937_v34, %v38609_v39  ;;  %v109_v20 = vld [vmem:[#allocation5 + $0x48] sm:$0xff]  ;;  %v110_v34 = vld [vmem:[#allocation5 + $0x50] sm:$0xff]  ;;  %v1083_v25 = vand.u32 4294901760, %v38684_v10 }
  0x61   :  { %34996 = vmatmul.mubr.f32.gmra.mxu1 %v251_v46  ;;  %35009 = vmatpush3.msra.mxu0 %v38459_v26  ;;  %v38603_v26 = vand.u32 4294901760, %v925_v32  ;;  %v38628_v44 = vand.u32 4294901760, %v940_v37  ;;  %v105_v46 = vld [vmem:[#allocation5 + $0x28] sm:$0xff]  ;;  %v38647_v52 = vsub.f32 %v924_v35, %v38615_v41  ;;  %v964_v45 = vsel %vm932_vm1, %v110_v34, 0  ;;  %v114_v34 = vld [vmem:[#allocation5 + $0x70] sm:$0xff] }
  0x62   :  { %34998 = vmatprep.mubr.f32.mxu1 %v261_v47  ;;  %35024 = vmatprep.subr.mxu1 %v38417_v4  ;;  %v38624_v43 = vand.u32 4294901760, %v38599_v3  ;;  %v106_v47 = vld [vmem:[#allocation5 + $0x30] sm:$0xff]  ;;  %v949_v55 = vsel %vm932_vm1, %v105_v46, 0  ;;  %v1063_v62 = vand.u32 4294901760, %v38635_v49  ;;  %v111_v46 = vld [vmem:[#allocation5 + $0x58] sm:$0xff] }
  0x63   :  { %34981 = vmatmul.mubr.f32.gmra.mxu0 %v38511_v60  ;;  %35025 = vmatpush3.msra.mxu1 %v38417_v4  ;;  %v104_v4 = vld [vmem:[#allocation5 + $0x20] sm:$0xff]  ;;  %v38638_v50 = vsub.f32 %v925_v32, %v38603_v26  ;;  %v952_v58 = vsel %vm932_vm1, %v106_v47, 0  ;;  %v38660_v59 = vsub.f32 %v940_v37, %v38628_v44  ;;  %v38675_v6 = vand.u32 4294901760, %v38647_v52 }
  0x64   :  { %34983 = vmatprep.mubr.f32.mxu0 %v38516_v63  ;;  %35040 = vmatprep.subr.mxu0 %v38551_v17  ;;  %v946_v51 = vsel %vm932_vm1, %v104_v4, 0  ;;  %v1244_v53 = vsub.f32 %v38599_v3, %v38624_v43  ;;  %v38679_v8 = vand.u32 4294901760, %v952_v58  ;;  %v1064_v30 = vsub.f32 %v38635_v49, %v1063_v62 }
  0x65   :  { %34999 = vmatmul.mubr.f32.gmra.mxu1 %v271_v0  ;;  %35026 = vmatprep.subr.mxu1 %v38419_v5  ;;  %v38662_v60 = vand.u32 4294901760, %v946_v51  ;;  %v38668_v63 = vand.u32 4294901760, %v38638_v50  ;;  %v107_v0 = vld [vmem:[#allocation5 + $0x38] sm:$0xff]  ;;  %v1265_v24 = vsub.f32 %v38647_v52, %v38675_v6 }
  0x66   :  { %35001 = vmatprep.mubr.f32.mxu1 %v281_v2  ;;  %35027 = vmatpush3.msra.mxu1 %v38419_v5  ;;  %v38644_v5 = vand.u32 4294901760, %v38618_v42  ;;  %v1245_v9 = vand.u32 4294901760, %v1244_v53  ;;  %v955_v12 = vsel %vm932_vm1, %v107_v0, 0  ;;  %v38711_v33 = vsub.f32 %v952_v58, %v38679_v8  ;;  %v112_v58 = vld [vmem:[#allocation5 + $0x60] sm:$0xff] }
  0x67   :  { %34984 = vmatmul.mubr.f32.gmra.mxu0 %v38521_v1  ;;  %35074 = vmatprep.subr.mxu1 %v1238_v36  ;;  %v108_v1 = vld [vmem:[#allocation5 + $0x40] sm:$0xff]  ;;  %v38690_v11 = vsub.f32 %v946_v51, %v38662_v60  ;;  %v1258_v31 = vsub.f32 %v38638_v50, %v38668_v63  ;;  %v1065_v47 = vand.u32 4294901760, %v1064_v30  ;;  %v1266_v0 = vand.u32 4294901760, %v1265_v24 }
  0x68   :  { %35010 = vmatprep.mubr.f32.mxu0 %v38428_v15  ;;  %v1251_v2 = vsub.f32 %v38618_v42, %v38644_v5  ;;  %v958_v13 = vsel %vm932_vm1, %v108_v1, 0  ;;  %v44117_v53 = vand.u32 4294901760, %v38711_v33  ;;  %v1084_v1 = vsub.f32 %v38684_v10, %v1083_v25 }
  0x69   :  { %35002 = vmatmul.mubr.f32.gmra.mxu1 %v291_v7  ;;  %v38677_v7 = vand.u32 4294901760, %v949_v55  ;;  %v38718_v35 = vand.u32 4294901760, %v958_v13  ;;  %v1093_v40 = vand.u32 4294901760, %v38690_v11  ;;  %v1259_v4 = vand.u32 4294901760, %v1258_v31  ;;  %v113_v31 = vld [vmem:[#allocation5 + $0x68] sm:$0xff] }
  0x6a   :  { %35028 = vmatprep.mubr.f32.mxu1 %v38428_v15  ;;  %v1053_v15 = vand.u32 4294901760, %v38632_v48  ;;  %v1252_v22 = vand.u32 4294901760, %v1251_v2  ;;  %v967_v30 = vsel %vm932_vm1, %v111_v46, 0 }
  0x6b   :  { %35011 = vmatmul.mubr.f32.vlgmr.msra.gmra.mxu0 %v38430_v16  ;;  %v38708_v32 = vsub.f32 %v949_v55, %v38677_v7  ;;  %v38742_v2 = vsub.f32 %v958_v13, %v38718_v35  ;;  %v1114_v13 = vsub.f32 %v38711_v33, %v44117_v53 }
  0x6c   :  { %35013 = vmatprep.mubr.f32.mxu0 %v38439_v19  ;;  %35041 = vmatpush3.msra.mxu0 %v38551_v17 }
  0x6d   :  { %35042 = vmatprep.subr.mxu0 %v38580_v23  ;;  %35029 = vmatmul.mubr.f32.vlgmr.msra.gmra.mxu1 %v38430_v16  ;;  %v1073_v16 = vand.u32 4294901760, %v38660_v59  ;;  %v44118_v51 = vand.u32 4294901760, %v38708_v32 }
  0x6e   :  { %35043 = vmatpush3.msra.mxu0 %v38580_v23  ;;  %35031 = vmatprep.mubr.f32.mxu1 %v38439_v19  ;;  %v1054_v19 = vsub.f32 %v38632_v48, %v1053_v15 }
  0x6f   :  { %35014 = vmatmul.mubr.f32.gmra.mxu0 %v38464_v28  ;;  %35044 = vmatprep.subr.mxu0 %v38591_v27  ;;  %v1074_v37 = vsub.f32 %v38660_v59, %v1073_v16 }
  0x70   :  { %35016 = vmatprep.mubr.f32.mxu0 %v38466_v29  ;;  %35045 = vmatpush3.msra.mxu0 %v38591_v27 }
  0x71   :  { %35075 = vmatpush3.msra.mxu1 %v1238_v36  ;;  %35046 = vmatprep.subr.mxu0 %v38603_v26  ;;  %v961_v36 = vsel %vm932_vm1, %v109_v20, 0  ;;  %v1094_v20 = vsub.f32 %v38690_v11, %v1093_v40 }
  0x72   :  { %35032 = vmatmul.mubr.f32.gmra.mxu1 %v38464_v28  ;;  %v38716_v28 = vand.u32 4294901760, %v955_v12  ;;  %35076 = vmatprep.subr.mxu1 %v1245_v9  ;;  %v38732_v55 = vand.u32 4294901760, %v961_v36 }
  0x73   :  { %35017 = vmatmul.mubr.f32.gmra.mxu0 %v38505_v56  ;;  %35034 = vmatprep.mubr.f32.mxu1 %v38466_v29  ;;  %v1055_v29 = vand.u32 4294901760, %v1054_v19  ;;  %v38749_v19 = vand.u32 4294901760, %v964_v45  ;;  %v1095_v46 = vand.u32 4294901760, %v1094_v20 }
  0x74   :  { %35019 = vmatprep.mubr.f32.mxu0 %v38507_v57  ;;  %35047 = vmatpush3.msra.mxu0 %v38603_v26  ;;  %v38761_v24 = vsub.f32 %v961_v36, %v38732_v55  ;;  %v973_v36 = vsel %vm932_vm1, %v113_v31, 0 }
  0x75   :  { %35077 = vmatpush3.msra.mxu1 %v1245_v9  ;;  %35048 = vmatprep.subr.mxu0 %v38615_v41  ;;  %v1075_v9 = vand.u32 4294901760, %v1074_v37  ;;  %v38788_v31 = vand.u32 4294901760, %v973_v36 }
  0x76   :  { %35035 = vmatmul.mubr.f32.gmra.mxu1 %v38505_v56  ;;  %35078 = vmatprep.subr.mxu1 %v1252_v22  ;;  %v38739_v56 = vsub.f32 %v955_v12, %v38716_v28  ;;  %v970_v12 = vsel %vm932_vm1, %v112_v58, 0  ;;  %v38768_v58 = vsub.f32 %v964_v45, %v38749_v19 }
  0x77   :  { %35020 = vmatmul.mubr.f32.gmra.mxu0 %v38513_v61  ;;  %35037 = vmatprep.mubr.f32.mxu1 %v38507_v57  ;;  %v1104_v57 = vsub.f32 %v38708_v32, %v44118_v51  ;;  %v38770_v53 = vand.u32 4294901760, %v970_v12  ;;  %v1115_v51 = vand.u32 4294901760, %v1114_v13 }
  0x78   :  { %35049 = vmatpush3.msra.mxu0 %v38615_v41  ;;  %35050 = vmatprep.mubr.f32.mxu0 %v1055_v29  ;;  %v44120_v37 = vand.u32 4294901760, %v38739_v56  ;;  %v38765_v29 = vand.u32 4294901760, %v967_v30 }
  0x79   :  { %35079 = vmatpush3.msra.mxu1 %v1252_v22  ;;  %v1085_v22 = vand.u32 4294901760, %v1084_v1  ;;  %v1105_v1 = vand.u32 4294901760, %v1104_v57  ;;  %35108 = vmatprep.subr.mxu0 %v38561_v18  ;;  %v1153_v57 = vand.u32 4294901760, %v38768_v58  ;;  %v38792_v13 = vsub.f32 %v970_v12, %v38770_v53 }
  0x7a   :  { %35038 = vmatmul.mubr.f32.gmra.mxu1 %v38513_v61  ;;  %35080 = vmatprep.subr.mxu1 %v1259_v4  ;;  %v44119_v61 = vand.u32 4294901760, %v38742_v2  ;;  %v1124_v45 = vsub.f32 %v38739_v56, %v44120_v37  ;;  %v38786_v20 = vsub.f32 %v967_v30, %v38765_v29 }
  0x7b   :  { %35051 = vmatmul.mubr.f32.vlgmr.msra.gmra.mxu0 %v1065_v47  ;;  %35081 = vmatpush3.msra.mxu1 %v1259_v4  ;;  %v976_v4 = vsel %vm932_vm1, %v114_v34, 0  ;;  %v115_v47 = vld [vmem:[#allocation5 + $0x78] sm:$0xff]  ;;  %v1154_v37 = vsub.f32 %v38768_v58, %v1153_v57 }
  0x7c   :  { %35082 = vmatprep.subr.mxu1 %v1266_v0  ;;  %35053 = vmatprep.mubr.f32.mxu0 %v1075_v9  ;;  %v44121_v9 = vand.u32 4294901760, %v38761_v24  ;;  %v38795_v34 = vand.u32 4294901760, %v976_v4  ;;  %v1163_v12 = vand.u32 4294901760, %v38786_v20 }
  0x7d   :  { %35083 = vmatpush3.msra.mxu1 %v1266_v0  ;;  %35084 = vmatprep.mubr.f32.mxu1 %v38607_v38  ;;  %v1134_v0 = vsub.f32 %v38742_v2, %v44119_v61 }
  0x7e   :  { %35085 = vmatmul.mubr.f32.vlgmr.msra.gmra.mxu1 %v38609_v39  ;;  %35109 = vmatpush3.msra.mxu0 %v38561_v18  ;;  %v1144_v30 = vsub.f32 %v38761_v24, %v44121_v9  ;;  %v1125_v18 = vand.u32 4294901760, %v1124_v45  ;;  %v1173_v9 = vand.u32 4294901760, %v38792_v13 }
  0x7f   :  { %35054 = vmatmul.mubr.f32.gmra.mxu0 %v1085_v22  ;;  %35087 = vmatprep.mubr.f32.mxu1 %v38628_v44  ;;  %v979_v22 = vsel %vm932_vm1, %v115_v47, 0  ;;  %v1135_v61 = vand.u32 4294901760, %v1134_v0 }
  0x80   :  { %35056 = vmatprep.mubr.f32.mxu0 %v1095_v46  ;;  %35110 = vmatprep.subr.mxu0 %v38599_v3  ;;  %v38808_v46 = vsub.f32 %v973_v36, %v38788_v31  ;;  %v38810_v47 = vand.u32 4294901760, %v979_v22  ;;  %v1164_v36 = vsub.f32 %v38786_v20, %v1163_v12  ;;  %v1174_v45 = vsub.f32 %v38792_v13, %v1173_v9 }
  0x81   :  { %35142 = vmatprep.subr.mxu1 %v38551_v17  ;;  %35111 = vmatpush3.msra.mxu0 %v38599_v3  ;;  %v38818_v3 = vsub.f32 %v976_v4, %v38795_v34 }
  0x82   :  { %35088 = vmatmul.mubr.f32.gmra.mxu1 %v38653_v54  ;;  %35112 = vmatprep.subr.mxu0 %v38618_v42  ;;  %v38830_v4 = vsub.f32 %v979_v22, %v38810_v47 }
  0x83   :  { %35057 = vmatmul.mubr.f32.gmra.mxu0 %v1105_v1  ;;  %35090 = vmatprep.mubr.f32.mxu1 %v38662_v60  ;;  %v1183_v1 = vand.u32 4294901760, %v38808_v46  ;;  %v1193_v0 = vand.u32 4294901760, %v38818_v3 }
  0x84   :  { %35059 = vmatprep.mubr.f32.mxu0 %v1115_v51  ;;  %35113 = vmatpush3.msra.mxu0 %v38618_v42  ;;  %v1145_v51 = vand.u32 4294901760, %v1144_v30  ;;  %v1155_v42 = vand.u32 4294901760, %v1154_v37  ;;  %v1165_v37 = vand.u32 4294901760, %v1164_v36  ;;  %v1203_v22 = vand.u32 4294901760, %v38830_v4 }
  0x85   :  { %35143 = vmatpush3.msra.mxu1 %v38551_v17  ;;  %35114 = vmatprep.subr.mxu0 %v38638_v50  ;;  %v1175_v30 = vand.u32 4294901760, %v1174_v45 }
  0x86   :  { %35091 = vmatmul.mubr.f32.gmra.mxu1 %v38677_v7  ;;  %35144 = vmatprep.subr.mxu1 %v38580_v23 }
  0x87   :  { %35060 = vmatmul.mubr.f32.gmra.mxu0 %v1125_v18  ;;  %35093 = vmatprep.mubr.f32.mxu1 %v38679_v8 }
  0x88   :  { %35062 = vmatprep.mubr.f32.mxu0 %v1135_v61  ;;  %35115 = vmatpush3.msra.mxu0 %v38638_v50  ;;  %v1184_v61 = vsub.f32 %v38808_v46, %v1183_v1  ;;  %v1194_v50 = vsub.f32 %v38818_v3, %v1193_v0 }
  0x89   :  { %35145 = vmatpush3.msra.mxu1 %v38580_v23  ;;  %35116 = vmatprep.subr.mxu0 %v38647_v52 }
  0x8a   :  { %35094 = vmatmul.mubr.f32.gmra.mxu1 %v38716_v28  ;;  %35146 = vmatprep.subr.mxu1 %v38591_v27  ;;  %v1185_v18 = vand.u32 4294901760, %v1184_v61  ;;  %v1195_v36 = vand.u32 4294901760, %v1194_v50 }
  0x8b   :  { %35063 = vmatmul.mubr.f32.gmra.mxu0 %v1145_v51  ;;  %35096 = vmatprep.mubr.f32.mxu1 %v38718_v35  ;;  %v1204_v51 = vsub.f32 %v38830_v4, %v1203_v22 }
  0x8c   :  { %35065 = vmatprep.mubr.f32.mxu0 %v1155_v42  ;;  %35117 = vmatpush3.msra.mxu0 %v38647_v52 }
  0x8d   :  { %35147 = vmatpush3.msra.mxu1 %v38591_v27  ;;  %35176 = vmatprep.subr.mxu0 %v38572_v21  ;;  %v1205_v52 = vand.u32 4294901760, %v1204_v51 }
  0x8e   :  { %35097 = vmatmul.mubr.f32.gmra.mxu1 %v38732_v55  ;;  %35148 = vmatprep.subr.mxu1 %v38603_v26 }
  0x8f   :  { %35066 = vmatmul.mubr.f32.gmra.mxu0 %v1165_v37  ;;  %35099 = vmatprep.mubr.f32.mxu1 %v38749_v19 }
  0x90   :  { %35068 = vmatprep.mubr.f32.mxu0 %v1175_v30  ;;  %35149 = vmatpush3.msra.mxu1 %v38603_v26 }
  0x91   :  { %35150 = vmatprep.subr.mxu1 %v38615_v41 }
  0x92   :  { %35100 = vmatmul.mubr.f32.gmra.mxu1 %v38765_v29 }
  0x93   :  { %35069 = vmatmul.mubr.f32.gmra.mxu0 %v1185_v18  ;;  %35102 = vmatprep.mubr.f32.mxu1 %v38770_v53 }
  0x94   :  { %35071 = vmatprep.mubr.f32.mxu0 %v1195_v36  ;;  %35151 = vmatpush3.msra.mxu1 %v38615_v41 }
  0x95   :  { %35210 = vmatprep.subr.mxu1 %v38551_v17 }
  0x96   :  { %35103 = vmatmul.mubr.f32.gmra.mxu1 %v38788_v31 }
  0x97   :  { %35072 = vmatmul.mubr.f32.gmra.mxu0 %v1205_v52  ;;  %35105 = vmatprep.mubr.f32.mxu1 %v38795_v34 }
  0x98   :  { %35118 = vmatprep.mubr.f32.mxu0 %v38632_v48  ;;  %v44147_v48 = vand.u32 4294901760, %v38761_v24 }
  0x9a   :  { %35106 = vmatmul.mubr.f32.gmra.mxu1 %v38810_v47 }
  0x9b   :  { %35119 = vmatmul.mubr.f32.vlgmr.msra.gmra.mxu0 %v38635_v49  ;;  %35152 = vmatprep.mubr.f32.mxu1 %v1053_v15 }
  0x9c   :  { %35121 = vmatprep.mubr.f32.mxu0 %v38660_v59  ;;  %35177 = vmatpush3.msra.mxu0 %v38572_v21  ;;  %v44144_v21 = vand.u32 4294901760, %v38711_v33 }
  0x9d   :  { %35178 = vmatprep.subr.mxu0 %v38624_v43 }
  0x9e   :  { %35153 = vmatmul.mubr.f32.vlgmr.msra.gmra.mxu1 %v1063_v62  ;;  %35179 = vmatpush3.msra.mxu0 %v38624_v43  ;;  %v44146_v43 = vand.u32 4294901760, %v38742_v2 }
  0x9f   :  { %35122 = vmatmul.mubr.f32.gmra.mxu0 %v38684_v10  ;;  %35155 = vmatprep.mubr.f32.mxu1 %v1073_v16 }
  0xa0   :  { %35124 = vmatprep.mubr.f32.mxu0 %v38690_v11  ;;  %35180 = vmatprep.subr.mxu0 %v38644_v5 }
  0xa1   :  { %35181 = vmatpush3.msra.mxu0 %v38644_v5  ;;  %35211 = vmatpush3.msra.mxu1 %v38551_v17  ;;  %v44143_v17 = vand.u32 4294901760, %v38708_v32 }
  0xa2   :  { %35156 = vmatmul.mubr.f32.gmra.mxu1 %v1083_v25  ;;  %35182 = vmatprep.subr.mxu0 %v38668_v63 }
  0xa3   :  { %35125 = vmatmul.mubr.f32.gmra.mxu0 %v38708_v32  ;;  %35158 = vmatprep.mubr.f32.mxu1 %v1093_v40 }
  0xa4   :  { %35127 = vmatprep.mubr.f32.mxu0 %v38711_v33  ;;  %35212 = vmatprep.subr.mxu1 %v38580_v23 }
  0xa5   :  { %35183 = vmatpush3.msra.mxu0 %v38668_v63  ;;  %35213 = vmatpush3.msra.mxu1 %v38580_v23  ;;  %v44145_v23 = vand.u32 4294901760, %v38739_v56 }
  0xa6   :  { %35159 = vmatmul.mubr.f32.gmra.mxu1 %v44143_v17  ;;  %35184 = vmatprep.subr.mxu0 %v38675_v6 }
  0xa7   :  { %35128 = vmatmul.mubr.f32.gmra.mxu0 %v38739_v56  ;;  %35161 = vmatprep.mubr.f32.mxu1 %v44144_v21 }
  0xa8   :  { %35130 = vmatprep.mubr.f32.mxu0 %v38742_v2  ;;  %35214 = vmatprep.subr.mxu1 %v38591_v27 }
  0xa9   :  { %35185 = vmatpush3.msra.mxu0 %v38675_v6  ;;  %35215 = vmatpush3.msra.mxu1 %v38591_v27  ;;  %v44122_v27 = vmov 0.0  }
  0xaa   :  { %35162 = vmatmul.mubr.f32.gmra.mxu1 %v44145_v23  ;;  %35216 = vmatprep.subr.mxu1 %v38603_v26 }
  0xab   :  { %35131 = vmatmul.mubr.f32.gmra.mxu0 %v38761_v24  ;;  %35164 = vmatprep.mubr.f32.mxu1 %v44146_v43 }
  0xac   :  { %35133 = vmatprep.mubr.f32.mxu0 %v38768_v58  ;;  %35217 = vmatpush3.msra.mxu1 %v38603_v26 }
  0xad   :  { %35218 = vmatprep.subr.mxu1 %v38615_v41  ;;  %35244 = vmatprep.subr.mxu0 %v44122_v27 }
  0xae   :  { %35165 = vmatmul.mubr.f32.gmra.mxu1 %v44147_v48 }
  0xaf   :  { %35134 = vmatmul.mubr.f32.gmra.mxu0 %v38786_v20  ;;  %35167 = vmatprep.mubr.f32.mxu1 %v1153_v57 }
  0xb0   :  { %35136 = vmatprep.mubr.f32.mxu0 %v38792_v13  ;;  %35219 = vmatpush3.msra.mxu1 %v38615_v41 }
  0xb1   :  { %35251 = vmatprep.subr.mxu1 %v44122_v27 }
  0xb2   :  { %35168 = vmatmul.mubr.f32.gmra.mxu1 %v1163_v12 }
  0xb3   :  { %35137 = vmatmul.mubr.f32.gmra.mxu0 %v38808_v46  ;;  %35170 = vmatprep.mubr.f32.mxu1 %v1173_v9 }
  0xb4   :  { %35139 = vmatprep.mubr.f32.mxu0 %v38818_v3 }
  0xb6   :  { %35171 = vmatmul.mubr.f32.gmra.mxu1 %v1183_v1 }
  0xb7   :  { %35140 = vmatmul.mubr.f32.gmra.mxu0 %v38830_v4  ;;  %35173 = vmatprep.mubr.f32.mxu1 %v1193_v0 }
  0xb8   :  { %35186 = vmatprep.mubr.f32.mxu0 %v38607_v38 }
  0xba   :  { %35174 = vmatmul.mubr.f32.gmra.mxu1 %v1203_v22 }
  0xbb   :  { %35187 = vmatmul.mubr.f32.vlgmr.msra.gmra.mxu0 %v38609_v39  ;;  %35220 = vmatprep.mubr.f32.mxu1 %v38607_v38 }
  0xbc   :  { %35189 = vmatprep.mubr.f32.mxu0 %v38628_v44 }
  0xbe   :  { %35221 = vmatmul.mubr.f32.vlgmr.msra.gmra.mxu1 %v38609_v39 }
  0xbf   :  { %35190 = vmatmul.mubr.f32.gmra.mxu0 %v38653_v54  ;;  %35223 = vmatprep.mubr.f32.mxu1 %v38628_v44 }
  0xc0   :  { %35192 = vmatprep.mubr.f32.mxu0 %v38662_v60 }
  0xc2   :  { %35224 = vmatmul.mubr.f32.gmra.mxu1 %v38653_v54 }
  0xc3   :  { %35193 = vmatmul.mubr.f32.gmra.mxu0 %v38677_v7  ;;  %35226 = vmatprep.mubr.f32.mxu1 %v38662_v60 }
  0xc4   :  { %35195 = vmatprep.mubr.f32.mxu0 %v38679_v8 }
  0xc6   :  { %35227 = vmatmul.mubr.f32.gmra.mxu1 %v38677_v7 }
  0xc7   :  { %35196 = vmatmul.mubr.f32.gmra.mxu0 %v38716_v28  ;;  %35229 = vmatprep.mubr.f32.mxu1 %v38679_v8 }
  0xc8   :  { %35198 = vmatprep.mubr.f32.mxu0 %v38718_v35 }
  0xca   :  { %35230 = vmatmul.mubr.f32.gmra.mxu1 %v38716_v28 }
  0xcb   :  { %35199 = vmatmul.mubr.f32.gmra.mxu0 %v38732_v55  ;;  %35232 = vmatprep.mubr.f32.mxu1 %v38718_v35 }
  0xcc   :  { %35201 = vmatprep.mubr.f32.mxu0 %v38749_v19 }
  0xce   :  { %35233 = vmatmul.mubr.f32.gmra.mxu1 %v38732_v55 }
  0xcf   :  { %35202 = vmatmul.mubr.f32.gmra.mxu0 %v38765_v29  ;;  %35235 = vmatprep.mubr.f32.mxu1 %v38749_v19 }
  0xd0   :  { %35204 = vmatprep.mubr.f32.mxu0 %v38770_v53 }
  0xd2   :  { %35236 = vmatmul.mubr.f32.gmra.mxu1 %v38765_v29 }
  0xd3   :  { %35205 = vmatmul.mubr.f32.gmra.mxu0 %v38788_v31  ;;  %35238 = vmatprep.mubr.f32.mxu1 %v38770_v53 }
  0xd4   :  { %35207 = vmatprep.mubr.f32.mxu0 %v38795_v34 }
  0xd6   :  { %35239 = vmatmul.mubr.f32.gmra.mxu1 %v38788_v31 }
  0xd7   :  { %35208 = vmatmul.mubr.f32.gmra.mxu0 %v38810_v47  ;;  %35241 = vmatprep.mubr.f32.mxu1 %v38795_v34 }
  0xd8   :  { %35248 = vmatprep.mubr.msk.f32.mxu0 %vm38339_vm2, %v44122_v27 }
  0xda   :  { %35242 = vmatmul.mubr.f32.gmra.mxu1 %v38810_v47 }
  0xdb   :  { %35255 = vmatprep.mubr.msk.f32.mxu1 %vm38339_vm2, %v44122_v27 }
 0x10b   :  { %v34940_v26 = vpop.f32.mrf.mxu0 }
 0x10c   :  { %v236_v38 = vadd.f32 %v34940_v26, %v38546_v14 }
 0x10d   :  { %v38973_v39 = vpop.f32.mrf.mxu0  ;;  %v34958_v41 = vpop.f32.mrf.mxu1 }
 0x10e   :  { %v388_v49 = vadd.f32 %v34958_v41, %v236_v38 }
 0x10f   :  { %v34943_v44 = vpop.f32.mrf.mxu0  ;;  %v38976_v54 = vpop.f32.mrf.mxu1 }
 0x110   :  { %v256_v5 = vadd.f32 %v34943_v44, %v38546_v14 }
 0x111   :  { %v38978_v59 = vpop.f32.mrf.mxu0  ;;  %v34961_v60 = vpop.f32.mrf.mxu1 }
 0x112   :  { %v400_v62 = vadd.f32 %v34961_v60, %v256_v5 }
 0x113   :  { %v34946_v15 = vpop.f32.mrf.mxu0  ;;  %v38981_v6 = vpop.f32.mrf.mxu1 }
 0x114   :  { %v276_v63 = vadd.f32 %v34946_v15, %v38546_v14 }
 0x115   :  { %v38983_v7 = vpop.f32.mrf.mxu0  ;;  %v34964_v8 = vpop.f32.mrf.mxu1 }
 0x116   :  { %v412_v16 = vadd.f32 %v34964_v8, %v276_v63 }
 0x117   :  { %v34949_v10 = vpop.f32.mrf.mxu0  ;;  %v38986_v32 = vpop.f32.mrf.mxu1 }
 0x118   :  { %v296_v11 = vadd.f32 %v34949_v10, %v38546_v14 }
 0x119   :  { %v38988_v33 = vpop.f32.mrf.mxu0  ;;  %v34967_v25 = vpop.f32.mrf.mxu1 }
 0x11a   :  { %44148 = vst [vmem:[#allocation16_spill] sm:$0xff] %v38988_v33  ;;  %v424_v28 = vadd.f32 %v34967_v25, %v296_v11  ;;  %v39038_v11 = vpop.permute.xlu0 %929 }
 0x11b   :  { %v34976_v35 = vpop.f32.mrf.mxu0  ;;  %v38990_v53 = vpop.f32.mrf.mxu1 }
 0x11c   :  { %v509_v40 = vadd.f32 %v34976_v35, %v388_v49  ;;  %44149 = vst [vmem:[#allocation17_spill] sm:$0xff] %v38990_v53 }
 0x11d   :  { %v38992_v55 = vpop.f32.mrf.mxu0  ;;  %v34994_v56 = vpop.f32.mrf.mxu1 }
 0x11e   :  { %v635_v19 = vadd.f32 %v34994_v56, %v509_v40 }
 0x11f   :  { %v34979_v2 = vpop.f32.mrf.mxu0  ;;  %v38994_v29 = vpop.f32.mrf.mxu1 }
 0x120   :  { %v523_v24 = vadd.f32 %v34979_v2, %v400_v62 }
 0x121   :  { %v38996_v58 = vpop.f32.mrf.mxu0  ;;  %v34997_v9 = vpop.f32.mrf.mxu1 }
 0x122   :  { %v651_v31 = vadd.f32 %v34997_v9, %v523_v24 }
 0x123   :  { %v34982_v20 = vpop.f32.mrf.mxu0  ;;  %v38998_v13 = vpop.f32.mrf.mxu1 }
 0x124   :  { %v537_v57 = vadd.f32 %v34982_v20, %v412_v16 }
 0x125   :  { %v39000_v34 = vpop.f32.mrf.mxu0  ;;  %v35000_v12 = vpop.f32.mrf.mxu1 }
 0x126   :  { %v667_v47 = vadd.f32 %v35000_v12, %v537_v57 }
 0x127   :  { %v34985_v46 = vpop.f32.mrf.mxu0  ;;  %v39002_v1 = vpop.f32.mrf.mxu1 }
 0x128   :  { %v551_v3 = vadd.f32 %v34985_v46, %v424_v28 }
 0x129   :  { %v39004_v4 = vpop.f32.mrf.mxu0  ;;  %v35003_v42 = vpop.f32.mrf.mxu1 }
 0x12a   :  { %44150 = vst [vmem:[#allocation18_spill] sm:$0xff] %v39004_v4  ;;  %v683_v45 = vadd.f32 %v35003_v42, %v551_v3 }
 0x12b   :  { %v35012_v0 = vpop.f32.mrf.mxu0  ;;  %v39006_v61 = vpop.f32.mrf.mxu1 }
 0x12c   :  { %v769_v37 = vadd.f32 %v35012_v0, %v635_v19  ;;  %44151 = vst [vmem:[#allocation19_spill] sm:$0xff] %v39006_v61 }
 0x12d   :  { %v39008_v22 = vpop.f32.mrf.mxu0  ;;  %v35030_v30 = vpop.f32.mrf.mxu1 }
 0x12e   :  { %v39010_v18 = vadd.f32 %v35030_v30, %v769_v37 }
 0x12f   :  { %v35015_v50 = vpop.f32.mrf.mxu0  ;;  %v39012_v36 = vpop.f32.mrf.mxu1 }
 0x130   :  { %v781_v51 = vadd.f32 %v35015_v50, %v651_v31 }
 0x131   :  { %v39014_v52 = vpop.f32.mrf.mxu0 }
 0x132   :  { %v35033_v17 = vpop.f32.mrf.mxu1 }
 0x133   :  { %v35018_v21 = vpop.f32.mrf.mxu0  ;;  %v39016_v23 = vadd.f32 %v35033_v17, %v781_v51 }
 0x134   :  { %v793_v43 = vadd.f32 %v35018_v21, %v667_v47  ;;  %v39018_v48 = vpop.f32.mrf.mxu1 }
 0x135   :  { %44152 = vst [vmem:[#allocation20_spill] sm:$0xff] %v39016_v23  ;;  %v39020_v26 = vpop.f32.mrf.mxu0 }
 0x136   :  { %v35036_v38 = vpop.f32.mrf.mxu1 }
 0x137   :  { %v35021_v41 = vpop.f32.mrf.mxu0  ;;  %v39022_v44 = vadd.f32 %v35036_v38, %v793_v43 }
 0x138   :  { %v805_v49 = vadd.f32 %v35021_v41, %v683_v45  ;;  %v39024_v5 = vpop.f32.mrf.mxu1 }
 0x139   :  { %44153 = vst [vmem:[#allocation21_spill] sm:$0xff] %v39022_v44  ;;  %v39026_v60 = vpop.f32.mrf.mxu0 }
 0x13a   :  { %44154 = vst [vmem:[#allocation22_spill] sm:$0xff] %v39026_v60  ;;  %v35039_v15 = vpop.f32.mrf.mxu1 }
 0x13b   :  { %v39028_v62 = vadd.f32 %v35039_v15, %v805_v49  ;;  %v39030_v63 = vpop.f32.mrf.mxu0 }
 0x13c   :  { %v39032_v8 = vpop.f32.mrf.mxu1 }
 0x13d   :  { %44155 = vst [vmem:[#allocation23_spill] sm:$0xff] %v39028_v62  ;;  %44156 = vst [vmem:[#allocation24_spill] sm:$0xff] %v39032_v8  ;;  %v39034_v10 = vpop.f32.mrf.mxu0 }
 0x13e   :  { %v39036_v16 = vpop.f32.mrf.mxu1 }
 0x13f   :  { %v35055_v25 = vpop.f32.mrf.mxu0 }
 0x140   :  { %v1088_v28 = vadd.f32 %v35055_v25, %v39038_v11  ;;  %v39041_v35 = vpop.f32.mrf.mxu1 }
 0x141   :  { %v39043_v40 = vpop.f32.mrf.mxu0 }
 0x142   :  { %v35089_v56 = vpop.f32.mrf.mxu1 }
 0x143   :  { %v35058_v2 = vpop.f32.mrf.mxu0  ;;  %v39045_v19 = vadd.f32 %v35089_v56, %v1088_v28 }
 0x144   :  { %v1108_v24 = vadd.f32 %v35058_v2, %v39038_v11  ;;  %v39048_v9 = vpop.f32.mrf.mxu1 }
 0x145   :  { %v39050_v20 = vpop.f32.mrf.mxu0 }
 0x146   :  { %v35092_v31 = vpop.f32.mrf.mxu1 }
 0x147   :  { %v35061_v57 = vpop.f32.mrf.mxu0  ;;  %v1334_v12 = vadd.f32 %v35092_v31, %v1108_v24 }
 0x148   :  { %v1128_v46 = vadd.f32 %v35061_v57, %v39038_v11  ;;  %v39053_v47 = vpop.f32.mrf.mxu1 }
 0x149   :  { %v39055_v3 = vpop.f32.mrf.mxu0 }
 0x14a   :  { %v35095_v42 = vpop.f32.mrf.mxu1 }
 0x14b   :  { %v35064_v45 = vpop.f32.mrf.mxu0  ;;  %v1346_v0 = vadd.f32 %v35095_v42, %v1128_v46 }
 0x14c   :  { %v1148_v37 = vadd.f32 %v35064_v45, %v39038_v11  ;;  %v39058_v30 = vpop.f32.mrf.mxu1 }
 0x14d   :  { %v39060_v50 = vpop.f32.mrf.mxu0 }
 0x14e   :  { %v35098_v51 = vpop.f32.mrf.mxu1 }
 0x14f   :  { %v35067_v17 = vpop.f32.mrf.mxu0  ;;  %v1358_v21 = vadd.f32 %v35098_v51, %v1148_v37 }
 0x150   :  { %v1168_v43 = vadd.f32 %v35067_v17, %v39038_v11  ;;  %v39063_v38 = vpop.f32.mrf.mxu1 }
 0x151   :  { %v39065_v41 = vpop.f32.mrf.mxu0 }
 0x152   :  { %44157 = vst [vmem:[#allocation25_spill] sm:$0xff] %v39065_v41  ;;  %v35101_v49 = vpop.f32.mrf.mxu1 }
 0x153   :  { %v35070_v15 = vpop.f32.mrf.mxu0  ;;  %v1370_v25 = vadd.f32 %v35101_v49, %v1168_v43 }
 0x154   :  { %v1188_v28 = vadd.f32 %v35070_v15, %v39038_v11  ;;  %v39068_v56 = vpop.f32.mrf.mxu1 }
 0x155   :  { %44158 = vst [vmem:[#allocation26_spill] sm:$0xff] %v39068_v56  ;;  %v39070_v2 = vpop.f32.mrf.mxu0 }
 0x156   :  { %44159 = vst [vmem:[#allocation27_spill] sm:$0xff] %v39070_v2  ;;  %v35104_v24 = vpop.f32.mrf.mxu1 }
 0x157   :  { %v35073_v31 = vpop.f32.mrf.mxu0  ;;  %v1382_v57 = vadd.f32 %v35104_v24, %v1188_v28 }
 0x158   :  { %v1208_v46 = vadd.f32 %v35073_v31, %v39038_v11  ;;  %v39073_v42 = vpop.f32.mrf.mxu1 }
 0x159   :  { %44160 = vst [vmem:[#allocation28_spill] sm:$0xff] %v39073_v42  ;;  %v39075_v45 = vpop.f32.mrf.mxu0 }
 0x15a   :  { %44161 = vst [vmem:[#allocation29_spill] sm:$0xff] %v39075_v45  ;;  %v35107_v37 = vpop.f32.mrf.mxu1 }
 0x15b   :  { %v1394_v51 = vadd.f32 %v35107_v37, %v1208_v46  ;;  %v35120_v17 = vpop.f32.mrf.mxu0 }
 0x15c   :  { %v39077_v27 = vpop.f32.mrf.mxu1 }
 0x15d   :  { %44162 = vst [vmem:[#allocation30_spill] sm:$0xff] %v39077_v27  ;;  %v1475_v43 = vpop.f32.mrf.mxu0  ;;  %v226_v27 = vadd.f32 %v38546_v14, %v38973_v39 }
 0x15e   :  { %v35154_v49 = vpop.f32.mrf.mxu1 }
 0x15f   :  { %v39079_v15 = vpop.f32.mrf.mxu0  ;;  %v382_v53 = vadd.f32 %v38976_v54, %v226_v27 }
 0x160   :  { %v1658_v62 = vpop.f32.mrf.mxu1 }
 0x161   :  { %v39081_v8 = vpop.f32.mrf.mxu0  ;;  %v502_v44 = vadd.f32 %v38992_v55, %v382_v53 }
 0x162   :  { %v39083_v60 = vpop.f32.mrf.mxu1 }
 0x163   :  { %v35126_v28 = vpop.f32.mrf.mxu0  ;;  %v627_v14 = vadd.f32 %v38994_v29, %v502_v44 }
 0x164   :  { %v1511_v24 = vadd.f32 %v35126_v28, %v1334_v12  ;;  %v39085_v31 = vpop.f32.mrf.mxu1 }
 0x165   :  { %v39087_v42 = vpop.f32.mrf.mxu0 }
 0x166   :  { %v35160_v45 = vpop.f32.mrf.mxu1 }
 0x167   :  { %v35129_v46 = vpop.f32.mrf.mxu0  ;;  %v39089_v37 = vadd.f32 %v35160_v45, %v1511_v24 }
 0x168   :  { %v1525_v61 = vadd.f32 %v35129_v46, %v1346_v0  ;;  %v39093_v2 = vpop.f32.mrf.mxu1  ;;  %v763_v46 = vadd.f32 %v39008_v22, %v627_v14 }
 0x169   :  { %v39095_v4 = vpop.f32.mrf.mxu0 }
 0x16a   :  { %v35163_v33 = vpop.f32.mrf.mxu1  ;;  %v39114_v53 = vadd.f32 %v39012_v36, %v763_v46  ;;  %v1058_v36 = vadd.f32 %v39034_v10, %v39038_v11 }
 0x16b   :  { %v35132_v12 = vpop.f32.mrf.mxu0  ;;  %v39098_v28 = vadd.f32 %v35163_v33, %v1525_v61  ;;  %v1068_v61 = vadd.f32 %v39030_v63, %v39038_v11 }
 0x16c   :  { %v1539_v56 = vadd.f32 %v35132_v12, %v1358_v21  ;;  %v39101_v41 = vpop.f32.mrf.mxu1  ;;  %44163 = vst [vmem:[#allocation31_spill] sm:$0xff] %v39114_v53 }
 0x16d   :  { %v39103_v45 = vpop.f32.mrf.mxu0  ;;  %v1310_v14 = vadd.f32 %v39036_v16, %v1068_v61 }
 0x16e   :  { %v35166_v39 = vpop.f32.mrf.mxu1 }
 0x16f   :  { %v35135_v0 = vpop.f32.mrf.mxu0  ;;  %v39106_v24 = vadd.f32 %v35166_v39, %v1539_v56 }
 0x170   :  { %v1553_v27 = vadd.f32 %v35135_v0, %v1370_v25  ;;  %v39109_v54 = vpop.f32.mrf.mxu1  ;;  %v2126_v25 = vsel %vm2124_vm3, %v39114_v53, 0 }
 0x171   :  { %v39111_v33 = vpop.f32.mrf.mxu0 }
 0x172   :  { %v35169_v55 = vpop.f32.mrf.mxu1 }
 0x173   :  { %v35138_v21 = vpop.f32.mrf.mxu0  ;;  %v39118_v29 = vadd.f32 %v35169_v55, %v1553_v27  ;;  %v1483_v27 = vadd.f32 %v35120_v17, %v1310_v14 }
 0x174   :  { %v1567_v44 = vadd.f32 %v35138_v21, %v1382_v57  ;;  %v39120_v56 = vpop.f32.mrf.mxu1  ;;  %v1304_v57 = vadd.f32 %v39041_v35, %v1058_v36  ;;  %v39136_v21 = vand.u32 4294901760, %v2126_v25 }
 0x175   :  { %44164 = vst [vmem:[#allocation32_spill] sm:$0xff] %v39118_v29  ;;  %44165 = vst [vmem:[#allocation33_spill] sm:$0xff] %v39120_v56  ;;  %v39122_v12 = vpop.f32.mrf.mxu0  ;;  %v1667_v56 = vadd.f32 %v35154_v49, %v1483_v27 }
 0x176   :  { %44166 = vst [vmem:[#allocation34_spill] sm:$0xff] %v39122_v12  ;;  %v35172_v22 = vpop.f32.mrf.mxu1  ;;  %v1476_v53 = vadd.f32 %v1475_v43, %v1304_v57  ;;  %v44170_v57 = vmov 0.0  }
 0x177   :  { %v35141_v39 = vpop.f32.mrf.mxu0  ;;  %v39129_v63 = vadd.f32 %v35172_v22, %v1567_v44  ;;  %v39143_v22 = vsub.f32 %v2126_v25, %v39136_v21  ;;  %v1078_v25 = vadd.f32 %v39043_v40, %v39038_v11 }
 0x178   :  { %v1581_v0 = vadd.f32 %v35141_v39, %v1394_v51  ;;  %v39131_v46 = vpop.f32.mrf.mxu1  ;;  %v1659_v61 = vadd.f32 %v1658_v62, %v1476_v53 }
 0x179   :  { %v39134_v55 = vpop.f32.mrf.mxu0  ;;  %v44128_v62 = vand.u32 4294901760, %v39143_v22 }
 0x17a   :  { %v35175_v12 = vpop.f32.mrf.mxu1 }
 0x17b   :  { %v39138_v29 = vadd.f32 %v35175_v12, %v1581_v0  ;;  %v35188_v10 = vpop.f32.mrf.mxu0  ;;  %v1497_v0 = vadd.f32 %v39079_v15, %v39045_v19  ;;  %v2204_v27 = vsub.f32 %v39143_v22, %v44128_v62 }
 0x17c   :  { %v39140_v16 = vpop.f32.mrf.mxu1  ;;  %v1871_v44 = vadd.f32 %v35188_v10, %v1667_v56 }
 0x17d   :  { %44167 = vst [vmem:[#allocation35_spill] sm:$0xff] %v39140_v16  ;;  %v1864_v51 = vpop.f32.mrf.mxu0 }
 0x17e   :  { %v35222_v35 = vpop.f32.mrf.mxu1  ;;  %v1865_v17 = vadd.f32 %v1864_v51, %v1659_v61  ;;  %v1316_v51 = vadd.f32 %v39048_v9, %v1078_v25  ;;  %v2594_v25 = vsel %vm2124_vm3, %v39010_v18, 0 }
 0x17f   :  { %v39145_v36 = vadd.f32 %v35222_v35, %v1871_v44  ;;  %v35191_v10 = vpop.f32.mrf.mxu0  ;;  %v1683_v35 = vadd.f32 %v39083_v60, %v1497_v0 }
 0x180   :  { %v2030_v14 = vpop.f32.mrf.mxu1  ;;  %v1490_v19 = vadd.f32 %v39081_v8, %v1316_v51 }
 0x181   :  { %44168 = vst [vmem:[#allocation36_spill] sm:$0xff] %v39145_v36  ;;  %v39147_v39 = vadd.f32 %v2030_v14, %v1865_v17  ;;  %5960 = vrot.lane.b32.xlu1 %v39145_v36, %s38337_s21  ;;  %v2132_v43 = vsel %vm2124_vm3, %v39145_v36, 0  ;;  %v1883_v15 = vadd.f32 %v35191_v10, %v1683_v35  ;;  %v1876_v62 = vpop.f32.mrf.mxu0 }
 0x182   :  { %v39154_v49 = vand.u32 4294901760, %v2132_v43  ;;  %v35225_v17 = vpop.f32.mrf.mxu1 }
 0x183   :  { %44169 = vst [vmem:[#allocation37_spill] sm:$0xff] %v39147_v39  ;;  %v2129_v53 = vsel %vm2124_vm3, %v39147_v39, 0  ;;  %v39177_v16 = vadd.f32 %v35225_v17, %v1883_v15  ;;  %v35194_v15 = vpop.f32.mrf.mxu0 }
 0x184   :  { %35245 = vmatpush3.xpose.msra.mxu0 %v39154_v49  ;;  %v2241_v56 = vsub.f32 %v2132_v43, %v39154_v49  ;;  %v39160_v12 = vand.u32 4294901760, %v2129_v53  ;;  %v2205_v43 = vand.u32 4294901760, %v2204_v27  ;;  %v2042_v60 = vpop.f32.mrf.mxu1 }
 0x185   :  { %35246 = vmatprep.subr.mxu0 %v44170_v57 }
 0x186   :  { %v2248_v61 = vsub.f32 %v2129_v53, %v39160_v12  ;;  %v2242_v44 = vand.u32 4294901760, %v2241_v56  ;;  %v1675_v53 = vadd.f32 %v39085_v31, %v1490_v19  ;;  %v2600_v31 = vsel %vm2124_vm3, %v39177_v16, 0 }
 0x187   :  { %v44171_v19 = vand.u32 4294901760, %v39143_v22 }
 0x188   :  { %35247 = vmatpush3.xpose.msra.mxu0 %v39160_v12  ;;  %v2243_v40 = vsub.f32 %v2241_v56, %v2242_v44  ;;  %v2249_v14 = vand.u32 4294901760, %v2248_v61  ;;  %v1877_v9 = vadd.f32 %v1876_v62, %v1675_v53  ;;  %v35228_v53 = vpop.f32.mrf.mxu1 }
 0x189   :  { %35258 = vmatprep.subr.mxu0 %v44170_v57 }
 0x18a   :  { %v2244_v36 = vand.u32 4294901760, %v2243_v40  ;;  %v2250_v39 = vsub.f32 %v2248_v61, %v2249_v14  ;;  %v39185_v0 = vadd.f32 %v2042_v60, %v1877_v9  ;;  %v1895_v60 = vadd.f32 %v35194_v15, %v39089_v37 }
 0x18b   :  { %35249 = vmatmul.mubr.f32.vlgmr.msra.gmra.mxu0 %v2205_v43 }
 0x18c   :  { %35252 = vmatpush3.xpose.msra.mxu1 %v2244_v36  ;;  %35259 = vmatpush3.xpose.msra.mxu0 %v2241_v56  ;;  %v2251_v8 = vand.u32 4294901760, %v2250_v39  ;;  %v39191_v36 = vand.u32 4294901760, %v2594_v25  ;;  %v39193_v39 = vand.u32 4294901760, %v2600_v31  ;;  %v2597_v62 = vsel %vm2124_vm3, %v39185_v0, 0 }
 0x18d   :  { %35253 = vmatprep.subr.mxu1 %v44170_v57  ;;  %35260 = vmatprep.subr.mxu0 %v44170_v57  ;;  %v39212_v10 = vand.u32 4294901760, %v2597_v62 }
 0x18e   :  { %35262 = vmatprep.mubr.msk.f32.mxu0 %vm38339_vm2, %v44170_v57  ;;  %v39203_v56 = vsub.f32 %v2594_v25, %v39191_v36  ;;  %v39210_v27 = vsub.f32 %v2600_v31, %v39193_v39  ;;  %v39263_v31 = vadd.f32 %v35228_v53, %v1895_v60 }
 0x18f   :  { %v39227_v17 = vsub.f32 %v2597_v62, %v39212_v10 }
 0x190   :  { %35254 = vmatpush3.xpose.msra.mxu1 %v2251_v8  ;;  %35261 = vmatpush3.xpose.msra.mxu0 %v2248_v61  ;;  %v39217_v61 = vld [vmem:[%s44115_s5] ss:$0 sm:$0xff]  ;;  %v2671_v51 = vand.u32 4294901760, %v39203_v56  ;;  %v2710_v40 = vand.u32 4294901760, %v39210_v27  ;;  %v3068_v62 = vsel %vm2124_vm3, %v39263_v31, 0 }
 0x191   :  { %35265 = vmatprep.subr.mxu1 %v44170_v57  ;;  %35272 = vmatprep.subr.mxu0 %v44170_v57 }
 0x193   :  { %35256 = vmatmul.mubr.f32.vlgmr.msra.gmra.mxu1 %v39136_v21  ;;  %35263 = vmatmul.mubr.f32.vlgmr.msra.gmra.mxu0 %v39143_v22 }
 0x194   :  { %35266 = vmatpush3.xpose.msra.mxu1 %v39154_v49  ;;  %35273 = vmatpush3.xpose.msra.mxu0 %v2242_v44  ;;  %v246_v44 = vadd.f32 %v39217_v61, %v38978_v59 }
 0x195   :  { %35267 = vmatprep.subr.mxu1 %v44170_v57  ;;  %35274 = vmatprep.subr.mxu0 %v44170_v57 }
 0x196   :  { %35269 = vmatprep.mubr.msk.f32.mxu1 %vm38339_vm2, %v44170_v57  ;;  %35276 = vmatprep.mubr.msk.f32.mxu0 %vm38339_vm2, %v44170_v57  ;;  %v394_v35 = vadd.f32 %v38981_v6, %v246_v44  ;;  %v2672_v6 = vsub.f32 %v39203_v56, %v2671_v51  ;;  %v39284_v44 = vand.u32 4294901760, %v3068_v62 }
 0x198   :  { %35268 = vmatpush3.xpose.msra.mxu1 %v39160_v12  ;;  %35275 = vmatpush3.xpose.msra.mxu0 %v2249_v14  ;;  %v516_v59 = vadd.f32 %v38996_v58, %v394_v35  ;;  %v1098_v14 = vadd.f32 %v39050_v20, %v39038_v11  ;;  %v2711_v58 = vsub.f32 %v39210_v27, %v2710_v40  ;;  %v2717_v20 = vand.u32 4294901760, %v39227_v17 }
 0x199   :  { %35279 = vmatprep.subr.mxu1 %v44170_v57  ;;  %35286 = vmatprep.subr.mxu0 %v44170_v57  ;;  %v2673_v9 = vand.u32 4294901760, %v2672_v6 }
 0x19a   :  { %v643_v22 = vadd.f32 %v38998_v13, %v516_v59  ;;  %v2712_v25 = vand.u32 4294901760, %v2711_v58 }
 0x19b   :  { %35270 = vmatmul.mubr.f32.vlgmr.msra.gmra.mxu1 %v44171_v19  ;;  %35277 = vmatmul.mubr.f32.vlgmr.msra.gmra.mxu0 %v39136_v21  ;;  %v3177_v19 = vsub.f32 %v3068_v62, %v39284_v44 }
 0x19c   :  { %35280 = vmatpush3.xpose.msra.mxu1 %v39154_v49  ;;  %35287 = vmatpush3.xpose.msra.mxu0 %v39193_v39  ;;  %v1328_v49 = vadd.f32 %v39053_v47, %v1098_v14  ;;  %v775_v43 = vadd.f32 %v39014_v52, %v643_v22  ;;  %v1888_v47 = vpop.f32.mrf.mxu0  ;;  %v2718_v52 = vsub.f32 %v39227_v17, %v2717_v20 }
 0x19d   :  { %35281 = vmatprep.subr.mxu1 %v44170_v57  ;;  %35288 = vmatprep.subr.mxu0 %v44170_v57  ;;  %v3178_v6 = vand.u32 4294901760, %v3177_v19  ;;  %v1118_v22 = vadd.f32 %v39055_v3, %v39038_v11 }
 0x19e   :  { %35283 = vmatprep.mubr.msk.f32.mxu1 %vm38339_vm2, %v44170_v57  ;;  %35290 = vmatprep.mubr.msk.f32.mxu0 %vm38339_vm2, %v44170_v57  ;;  %v1504_v13 = vadd.f32 %v39087_v42, %v1328_v49  ;;  %v39259_v8 = vadd.f32 %v39018_v48, %v775_v43  ;;  %v2054_v42 = vpop.f32.mrf.mxu1  ;;  %v2719_v48 = vand.u32 4294901760, %v2718_v52  ;;  %v35197_v58 = vpop.f32.mrf.mxu0 }
 0x19f   :  { %v1340_v3 = vadd.f32 %v39058_v30, %v1118_v22  ;;  %v1907_v49 = vadd.f32 %v35197_v58, %v39098_v28 }
 0x1a0   :  { %35282 = vmatpush3.xpose.msra.mxu1 %v39160_v12  ;;  %35289 = vmatpush3.xpose.msra.mxu0 %v39212_v10  ;;  %44172 = vst [vmem:[#allocation38_spill] sm:$0xff] %v39259_v8  ;;  %v1691_v12 = vadd.f32 %v39093_v2, %v1504_v13  ;;  %v3062_v2 = vsel %vm2124_vm3, %v39259_v8, 0  ;;  %v1900_v53 = vpop.f32.mrf.mxu0 }
 0x1a1   :  { %35293 = vmatprep.subr.mxu1 %v44170_v57  ;;  %35300 = vmatprep.subr.mxu0 %v44170_v57 }
 0x1a2   :  { %v1889_v37 = vadd.f32 %v1888_v47, %v1691_v12 }
 0x1a3   :  { %35284 = vmatmul.mubr.f32.vlgmr.msra.gmra.mxu1 %v39136_v21  ;;  %35291 = vmatmul.mubr.f32.vlgmr.msra.gmra.mxu0 %v2673_v9 }
 0x1a4   :  { %35294 = vmatpush3.xpose.msra.mxu1 %v2712_v25  ;;  %35301 = vmatpush3.xpose.msra.mxu0 %v39210_v27  ;;  %v39275_v21 = vadd.f32 %v2054_v42, %v1889_v37  ;;  %v39282_v27 = vand.u32 4294901760, %v3062_v2 }
 0x1a5   :  { %35295 = vmatprep.subr.mxu1 %v44170_v57  ;;  %35302 = vmatprep.subr.mxu0 %v44170_v57 }
 0x1a6   :  { %35297 = vmatprep.mubr.msk.f32.mxu1 %vm38339_vm2, %v44170_v57  ;;  %35304 = vmatprep.mubr.msk.f32.mxu0 %vm38339_vm2, %v44170_v57  ;;  %v3065_v35 = vsel %vm2124_vm3, %v39275_v21, 0 }
 0x1a7   :  { %v39301_v59 = vand.u32 4294901760, %v3065_v35 }
 0x1a8   :  { %35296 = vmatpush3.xpose.msra.mxu1 %v2719_v48  ;;  %35303 = vmatpush3.xpose.msra.mxu0 %v39227_v17  ;;  %v39294_v17 = vsub.f32 %v3062_v2, %v39282_v27  ;;  %v266_v2 = vadd.f32 %v39217_v61, %v38983_v7 }
 0x1a9   :  { %35307 = vmatprep.subr.mxu1 %v44170_v57  ;;  %35314 = vmatprep.subr.mxu0 %v44170_v57  ;;  %v39308_v14 = vsub.f32 %v3065_v35, %v39301_v59 }
 0x1aa   :  { %v406_v35 = vadd.f32 %v38986_v32, %v266_v2  ;;  %v44174_v2 = vld [vmem:[#allocation26_spill] sm:$0xff] }
 0x1ab   :  { %35298 = vmatmul.mubr.f32.vlgmr.msra.gmra.mxu1 %v39191_v36  ;;  %35305 = vmatmul.mubr.f32.vlgmr.msra.gmra.mxu0 %v39203_v56  ;;  %v3185_v56 = vand.u32 4294901760, %v39308_v14 }
 0x1ac   :  { %35308 = vmatpush3.xpose.msra.mxu1 %v39193_v39  ;;  %35315 = vmatpush3.xpose.msra.mxu0 %v2710_v40  ;;  %v3139_v40 = vand.u32 4294901760, %v39294_v17  ;;  %v530_v7 = vadd.f32 %v39000_v34, %v406_v35 }
 0x1ad   :  { %35309 = vmatprep.subr.mxu1 %v44170_v57  ;;  %35316 = vmatprep.subr.mxu0 %v44170_v57  ;;  %v3186_v60 = vsub.f32 %v39308_v14, %v3185_v56 }
 0x1ae   :  { %35311 = vmatprep.mubr.msk.f32.mxu1 %vm38339_vm2, %v44170_v57  ;;  %35318 = vmatprep.mubr.msk.f32.mxu0 %vm38339_vm2, %v44170_v57  ;;  %v3140_v15 = vsub.f32 %v39294_v17, %v3139_v40 }
 0x1af   :  { %v3187_v28 = vand.u32 4294901760, %v3186_v60 }
 0x1b0   :  { %35310 = vmatpush3.xpose.msra.mxu1 %v39212_v10  ;;  %35317 = vmatpush3.xpose.msra.mxu0 %v2717_v20  ;;  %v1518_v20 = vadd.f32 %v39095_v4, %v1340_v3  ;;  %v3141_v43 = vand.u32 4294901760, %v3140_v15 }
 0x1b1   :  { %35321 = vmatprep.subr.mxu1 %v44170_v57  ;;  %35328 = vmatprep.subr.mxu0 %v44170_v57 }
 0x1b2   :  { %v1707_v30 = vadd.f32 %v39101_v41, %v1518_v20  ;;  %v3530_v41 = vsel %vm2124_vm3, %v39016_v23, 0 }
 0x1b3   :  { %35312 = vmatmul.mubr.f32.vlgmr.msra.gmra.mxu1 %v2671_v51  ;;  %35319 = vmatmul.mubr.f32.vlgmr.msra.gmra.mxu0 %v39191_v36  ;;  %v35231_v51 = vpop.f32.mrf.mxu1  ;;  %v39354_v25 = vand.u32 4294901760, %v3530_v41 }
 0x1b4   :  { %35322 = vmatpush3.xpose.msra.mxu1 %v39193_v39  ;;  %35329 = vmatpush3.xpose.msra.mxu0 %v39284_v44  ;;  %v3179_v39 = vsub.f32 %v3177_v19, %v3178_v6  ;;  %v39336_v9 = vadd.f32 %v35231_v51, %v1907_v49  ;;  %v1901_v4 = vadd.f32 %v1900_v53, %v1707_v30 }
 0x1b5   :  { %35323 = vmatprep.subr.mxu1 %v44170_v57  ;;  %35330 = vmatprep.subr.mxu0 %v44170_v57  ;;  %v39366_v42 = vsub.f32 %v3530_v41, %v39354_v25  ;;  %v44173_v41 = vld [vmem:[#allocation25_spill] sm:$0xff] }
 0x1b6   :  { %35325 = vmatprep.mubr.msk.f32.mxu1 %vm38339_vm2, %v44170_v57  ;;  %35332 = vmatprep.mubr.msk.f32.mxu0 %vm38339_vm2, %v44170_v57  ;;  %v3180_v13 = vand.u32 4294901760, %v3179_v39  ;;  %v3536_v47 = vsel %vm2124_vm3, %v39336_v9, 0 }
 0x1b7   :  { %v39356_v52 = vand.u32 4294901760, %v3536_v47  ;;  %v3607_v62 = vand.u32 4294901760, %v39366_v42 }
 0x1b8   :  { %35324 = vmatpush3.xpose.msra.mxu1 %v39212_v10  ;;  %35331 = vmatpush3.xpose.msra.mxu0 %v39301_v59  ;;  %v2066_v10 = vpop.f32.mrf.mxu1 }
 0x1b9   :  { %35335 = vmatprep.subr.mxu1 %v44170_v57  ;;  %35342 = vmatprep.subr.mxu0 %v44170_v57  ;;  %v39373_v37 = vsub.f32 %v3536_v47, %v39356_v52  ;;  %v3608_v32 = vsub.f32 %v39366_v42, %v3607_v62  ;;  %v1158_v47 = vadd.f32 %v44173_v41, %v39038_v11  ;;  %v44181_v41 = vld [vmem:[#allocation27_spill] sm:$0xff] }
 0x1ba   :  { %v35234_v15 = vpop.f32.mrf.mxu1 }
 0x1bb   :  { %35326 = vmatmul.mubr.f32.vlgmr.msra.gmra.mxu1 %v39191_v36  ;;  %35333 = vmatmul.mubr.f32.vlgmr.msra.gmra.mxu0 %v3141_v43  ;;  %v39347_v36 = vadd.f32 %v2066_v10, %v1901_v4  ;;  %v3609_v39 = vand.u32 4294901760, %v3608_v32 }
 0x1bc   :  { %35336 = vmatpush3.xpose.msra.mxu1 %v3180_v13  ;;  %35343 = vmatpush3.xpose.msra.mxu0 %v3177_v19 }
 0x1bd   :  { %35337 = vmatprep.subr.mxu1 %v44170_v57  ;;  %35344 = vmatprep.subr.mxu0 %v44170_v57  ;;  %v3533_v12 = vsel %vm2124_vm3, %v39347_v36, 0 }
 0x1be   :  { %35339 = vmatprep.mubr.msk.f32.mxu1 %vm38339_vm2, %v44170_v57  ;;  %35346 = vmatprep.mubr.msk.f32.mxu0 %vm38339_vm2, %v44170_v57  ;;  %v39375_v48 = vand.u32 4294901760, %v3533_v12 }
 0x1c0   :  { %35338 = vmatpush3.xpose.msra.mxu1 %v3187_v28  ;;  %35345 = vmatpush3.xpose.msra.mxu0 %v39308_v14  ;;  %v39385_v19 = vsub.f32 %v3533_v12, %v39375_v48  ;;  %v3646_v14 = vand.u32 4294901760, %v39373_v37 }
 0x1c1   :  { %35349 = vmatprep.subr.mxu1 %v44170_v57  ;;  %35356 = vmatprep.subr.mxu0 %v44170_v57 }
 0x1c2   :  { %v3647_v34 = vsub.f32 %v39373_v37, %v3646_v14 }
 0x1c3   :  { %35340 = vmatmul.mubr.f32.vlgmr.msra.gmra.mxu1 %v39282_v27  ;;  %35347 = vmatmul.mubr.f32.vlgmr.msra.gmra.mxu0 %v39294_v17  ;;  %v659_v17 = vadd.f32 %v39002_v1, %v530_v7 }
 0x1c4   :  { %35350 = vmatpush3.xpose.msra.mxu1 %v39284_v44  ;;  %35357 = vmatpush3.xpose.msra.mxu0 %v3178_v6  ;;  %v1138_v6 = vadd.f32 %v39060_v50, %v39038_v11  ;;  %v3653_v50 = vand.u32 4294901760, %v39385_v19  ;;  %v3648_v3 = vand.u32 4294901760, %v3647_v34  ;;  %v44176_v34 = vld [vmem:[#allocation33_spill] sm:$0xff] }
 0x1c5   :  { %35351 = vmatprep.subr.mxu1 %v44170_v57  ;;  %35358 = vmatprep.subr.mxu0 %v44170_v57  ;;  %v787_v22 = vadd.f32 %v39020_v26, %v659_v17 }
 0x1c6   :  { %35353 = vmatprep.mubr.msk.f32.mxu1 %vm38339_vm2, %v44170_v57  ;;  %35360 = vmatprep.mubr.msk.f32.mxu0 %vm38339_vm2, %v44170_v57  ;;  %v3654_v26 = vsub.f32 %v39385_v19, %v3653_v50 }
 0x1c8   :  { %35352 = vmatpush3.xpose.msra.mxu1 %v39301_v59  ;;  %35359 = vmatpush3.xpose.msra.mxu0 %v3185_v56  ;;  %v39417_v56 = vadd.f32 %v39024_v5, %v787_v22  ;;  %v3655_v5 = vand.u32 4294901760, %v3654_v26 }
 0x1c9   :  { %35363 = vmatprep.subr.mxu1 %v44170_v57  ;;  %35370 = vmatprep.subr.mxu0 %v44170_v57 }
 0x1cb   :  { %35354 = vmatmul.mubr.f32.vlgmr.msra.gmra.mxu1 %v3139_v40  ;;  %35361 = vmatmul.mubr.f32.vlgmr.msra.gmra.mxu0 %v39282_v27  ;;  %v35200_v40 = vpop.f32.mrf.mxu0 }
 0x1cc   :  { %35364 = vmatpush3.xpose.msra.mxu1 %v39284_v44  ;;  %35371 = vmatpush3.xpose.msra.mxu0 %v39356_v52  ;;  %v1352_v44 = vadd.f32 %v39063_v38, %v1138_v6  ;;  %v1919_v58 = vadd.f32 %v35200_v40, %v39106_v24 }
 0x1cd   :  { %35365 = vmatprep.subr.mxu1 %v44170_v57  ;;  %35372 = vmatprep.subr.mxu0 %v44170_v57  ;;  %v1912_v38 = vpop.f32.mrf.mxu0 }
 0x1ce   :  { %35367 = vmatprep.mubr.msk.f32.mxu1 %vm38339_vm2, %v44170_v57  ;;  %35374 = vmatprep.mubr.msk.f32.mxu0 %vm38339_vm2, %v44170_v57  ;;  %v1532_v1 = vadd.f32 %v39103_v45, %v1352_v44  ;;  %v39421_v51 = vadd.f32 %v35234_v15, %v1919_v58  ;;  %v2078_v45 = vpop.f32.mrf.mxu1  ;;  %v44177_v15 = vld [vmem:[#allocation21_spill] sm:$0xff] }
 0x1d0   :  { %35366 = vmatpush3.xpose.msra.mxu1 %v39301_v59  ;;  %35373 = vmatpush3.xpose.msra.mxu0 %v39375_v48  ;;  %v1723_v59 = vadd.f32 %v39109_v54, %v1532_v1  ;;  %v3998_v54 = vsel %vm2124_vm3, %v39417_v56, 0  ;;  %v4004_v20 = vsel %vm2124_vm3, %v39421_v51, 0  ;;  %v35237_v35 = vpop.f32.mrf.mxu1  ;;  %v4466_v1 = vsel %vm2124_vm3, %v44177_v15, 0 }
 0x1d1   :  { %35377 = vmatprep.subr.mxu1 %v44170_v57  ;;  %35384 = vmatprep.subr.mxu0 %v44170_v57  ;;  %v39440_v49 = vand.u32 4294901760, %v3998_v54  ;;  %v39442_v43 = vand.u32 4294901760, %v4004_v20 }
 0x1d2   :  { %v1913_v24 = vadd.f32 %v1912_v38, %v1723_v59 }
 0x1d3   :  { %35368 = vmatmul.mubr.f32.vlgmr.msra.gmra.mxu1 %v39282_v27  ;;  %35375 = vmatmul.mubr.f32.vlgmr.msra.gmra.mxu0 %v3609_v39  ;;  %v39452_v13 = vsub.f32 %v3998_v54, %v39440_v49  ;;  %v4113_v60 = vsub.f32 %v4004_v20, %v39442_v43  ;;  %v39512_v39 = vand.u32 4294901760, %v4466_v1  ;;  %v44179_v20 = vld [vmem:[#allocation17_spill] sm:$0xff] }
 0x1d4   :  { %35378 = vmatpush3.xpose.msra.mxu1 %v3648_v3  ;;  %35385 = vmatpush3.xpose.msra.mxu0 %v39373_v37  ;;  %v39433_v27 = vadd.f32 %v2078_v45, %v1913_v24  ;;  %v35203_v37 = vpop.f32.mrf.mxu0  ;;  %v44178_v24 = vld [vmem:[#allocation16_spill] sm:$0xff] }
 0x1d5   :  { %35379 = vmatprep.subr.mxu1 %v44170_v57  ;;  %35386 = vmatprep.subr.mxu0 %v44170_v57  ;;  %v4075_v10 = vand.u32 4294901760, %v39452_v13  ;;  %v4114_v28 = vand.u32 4294901760, %v4113_v60  ;;  %v39524_v26 = vsub.f32 %v4466_v1, %v39512_v39 }
 0x1d6   :  { %35381 = vmatprep.mubr.msk.f32.mxu1 %vm38339_vm2, %v44170_v57  ;;  %35388 = vmatprep.mubr.msk.f32.mxu0 %vm38339_vm2, %v44170_v57  ;;  %v4001_v53 = vsel %vm2124_vm3, %v39433_v27, 0  ;;  %v1924_v32 = vpop.f32.mrf.mxu0 }
 0x1d7   :  { %v39459_v30 = vand.u32 4294901760, %v4001_v53  ;;  %v4076_v12 = vsub.f32 %v39452_v13, %v4075_v10  ;;  %v4543_v54 = vand.u32 4294901760, %v39524_v26 }
 0x1d8   :  { %35380 = vmatpush3.xpose.msra.mxu1 %v3655_v5  ;;  %35387 = vmatpush3.xpose.msra.mxu0 %v39385_v19  ;;  %v286_v5 = vadd.f32 %v39217_v61, %v44178_v24  ;;  %v44180_v61 = vld [vmem:[#allocation18_spill] sm:$0xff] }
 0x1d9   :  { %35391 = vmatprep.subr.mxu1 %v44170_v57  ;;  %35398 = vmatprep.subr.mxu0 %v44170_v57  ;;  %v39466_v4 = vsub.f32 %v4001_v53, %v39459_v30  ;;  %v4077_v6 = vand.u32 4294901760, %v4076_v12 }
 0x1da   :  { %v418_v53 = vadd.f32 %v44179_v20, %v286_v5 }
 0x1db   :  { %35382 = vmatmul.mubr.f32.vlgmr.msra.gmra.mxu1 %v39354_v25  ;;  %35389 = vmatmul.mubr.f32.vlgmr.msra.gmra.mxu0 %v39366_v42  ;;  %v4121_v42 = vand.u32 4294901760, %v39466_v4 }
 0x1dc   :  { %35392 = vmatpush3.xpose.msra.mxu1 %v39356_v52  ;;  %35399 = vmatpush3.xpose.msra.mxu0 %v3646_v14  ;;  %v44175_v14 = vld [vmem:[#allocation32_spill] sm:$0xff] }
 0x1dd   :  { %35393 = vmatprep.subr.mxu1 %v44170_v57  ;;  %35400 = vmatprep.subr.mxu0 %v44170_v57  ;;  %v1931_v7 = vadd.f32 %v35203_v37, %v44175_v14  ;;  %v4122_v40 = vsub.f32 %v39466_v4, %v4121_v42  ;;  %v35206_v37 = vpop.f32.mrf.mxu0  ;;  %v44185_v14 = vld [vmem:[#allocation34_spill] sm:$0xff] }
 0x1de   :  { %35395 = vmatprep.mubr.msk.f32.mxu1 %vm38339_vm2, %v44170_v57  ;;  %35402 = vmatprep.mubr.msk.f32.mxu0 %vm38339_vm2, %v44170_v57 }
 0x1df   :  { %v39494_v44 = vadd.f32 %v35237_v35, %v1931_v7  ;;  %v4123_v22 = vand.u32 4294901760, %v4122_v40 }
 0x1e0   :  { %35394 = vmatpush3.xpose.msra.mxu1 %v39375_v48  ;;  %35401 = vmatpush3.xpose.msra.mxu0 %v3653_v50 }
 0x1e1   :  { %35405 = vmatprep.subr.mxu1 %v44170_v57  ;;  %35412 = vmatprep.subr.mxu0 %v44170_v57  ;;  %v4472_v58 = vsel %vm2124_vm3, %v39494_v44, 0 }
 0x1e2   :  { %v39514_v38 = vand.u32 4294901760, %v4472_v58 }
 0x1e3   :  { %35396 = vmatmul.mubr.f32.vlgmr.msra.gmra.mxu1 %v3607_v62  ;;  %35403 = vmatmul.mubr.f32.vlgmr.msra.gmra.mxu0 %v39354_v25  ;;  %v1364_v62 = vadd.f32 %v44174_v2, %v1158_v47  ;;  %v1178_v47 = vadd.f32 %v44181_v41, %v39038_v11 }
 0x1e4   :  { %35406 = vmatpush3.xpose.msra.mxu1 %v39356_v52  ;;  %35413 = vmatpush3.xpose.msra.mxu0 %v39442_v43  ;;  %v4115_v52 = vsub.f32 %v4113_v60, %v4114_v28  ;;  %v39531_v59 = vsub.f32 %v4472_v58, %v39514_v38 }
 0x1e5   :  { %35407 = vmatprep.subr.mxu1 %v44170_v57  ;;  %35414 = vmatprep.subr.mxu0 %v44170_v57  ;;  %v1546_v19 = vadd.f32 %v39111_v33, %v1364_v62  ;;  %v44184_v62 = vld [vmem:[#allocation22_spill] sm:$0xff] }
 0x1e6   :  { %35409 = vmatprep.mubr.msk.f32.mxu1 %vm38339_vm2, %v44170_v57  ;;  %35416 = vmatprep.mubr.msk.f32.mxu0 %vm38339_vm2, %v44170_v57  ;;  %v4116_v17 = vand.u32 4294901760, %v4115_v52 }
 0x1e7   :  { %v1739_v50 = vadd.f32 %v44176_v34, %v1546_v19  ;;  %v1936_v34 = vpop.f32.mrf.mxu0 }
 0x1e8   :  { %35408 = vmatpush3.xpose.msra.mxu1 %v39375_v48  ;;  %35415 = vmatpush3.xpose.msra.mxu0 %v39459_v30  ;;  %v2090_v48 = vpop.f32.mrf.mxu1 }
 0x1e9   :  { %35419 = vmatprep.subr.mxu1 %v44170_v57  ;;  %35426 = vmatprep.subr.mxu0 %v44170_v57  ;;  %v1925_v33 = vadd.f32 %v1924_v32, %v1739_v50 }
 0x1ea   :  { %v35240_v19 = vpop.f32.mrf.mxu1 }
 0x1eb   :  { %35410 = vmatmul.mubr.f32.vlgmr.msra.gmra.mxu1 %v39354_v25  ;;  %35417 = vmatmul.mubr.f32.vlgmr.msra.gmra.mxu0 %v4077_v6  ;;  %v39505_v25 = vadd.f32 %v2090_v48, %v1925_v33  ;;  %v1943_v6 = vadd.f32 %v35206_v37, %v39129_v63 }
 0x1ec   :  { %35420 = vmatpush3.xpose.msra.mxu1 %v4116_v17  ;;  %35427 = vmatpush3.xpose.msra.mxu0 %v4113_v60  ;;  %v44186_v17 = vld [vmem:[#allocation24_spill] sm:$0xff]  ;;  %v2102_v63 = vpop.f32.mrf.mxu1 }
 0x1ed   :  { %35421 = vmatprep.subr.mxu1 %v44170_v57  ;;  %35428 = vmatprep.subr.mxu0 %v44170_v57  ;;  %v4469_v3 = vsel %vm2124_vm3, %v39505_v25, 0  ;;  %v39579_v33 = vadd.f32 %v35240_v19, %v1943_v6 }
 0x1ee   :  { %35423 = vmatprep.mubr.msk.f32.mxu1 %vm38339_vm2, %v44170_v57  ;;  %35430 = vmatprep.mubr.msk.f32.mxu0 %vm38339_vm2, %v44170_v57  ;;  %v39533_v45 = vand.u32 4294901760, %v4469_v3 }
 0x1ef   :  { %v4940_v58 = vsel %vm2124_vm3, %v39579_v33, 0 }
 0x1f0   :  { %35422 = vmatpush3.xpose.msra.mxu1 %v4123_v22  ;;  %35429 = vmatpush3.xpose.msra.mxu0 %v39466_v4  ;;  %v39543_v60 = vsub.f32 %v4469_v3, %v39533_v45  ;;  %v4582_v4 = vand.u32 4294901760, %v39531_v59 }
 0x1f1   :  { %35433 = vmatprep.subr.mxu1 %v44170_v57  ;;  %35440 = vmatprep.subr.mxu0 %v44170_v57 }
 0x1f2   :  { %v4589_v52 = vand.u32 4294901760, %v39543_v60 }
 0x1f3   :  { %35424 = vmatmul.mubr.f32.vlgmr.msra.gmra.mxu1 %v39440_v49  ;;  %35431 = vmatmul.mubr.f32.vlgmr.msra.gmra.mxu0 %v39452_v13  ;;  %v4544_v13 = vsub.f32 %v39524_v26, %v4543_v54 }
 0x1f4   :  { %35434 = vmatpush3.xpose.msra.mxu1 %v39442_v43  ;;  %35441 = vmatpush3.xpose.msra.mxu0 %v4114_v28  ;;  %v544_v28 = vadd.f32 %v44180_v61, %v418_v53  ;;  %v4590_v48 = vsub.f32 %v39543_v60, %v4589_v52 }
 0x1f5   :  { %35435 = vmatprep.subr.mxu1 %v44170_v57  ;;  %35442 = vmatprep.subr.mxu0 %v44170_v57  ;;  %v4545_v32 = vand.u32 4294901760, %v4544_v13  ;;  %v35209_v13 = vpop.f32.mrf.mxu0 }
 0x1f6   :  { %35437 = vmatprep.mubr.msk.f32.mxu1 %vm38339_vm2, %v44170_v57  ;;  %35444 = vmatprep.mubr.msk.f32.mxu0 %vm38339_vm2, %v44170_v57  ;;  %v4591_v1 = vand.u32 4294901760, %v4590_v48  ;;  %v1955_v37 = vadd.f32 %v35209_v13, %v39138_v29 }
 0x1f8   :  { %35436 = vmatpush3.xpose.msra.mxu1 %v39459_v30  ;;  %35443 = vmatpush3.xpose.msra.mxu0 %v4121_v42  ;;  %v44183_v42 = vld [vmem:[#allocation28_spill] sm:$0xff] }
 0x1f9   :  { %35447 = vmatprep.subr.mxu1 %v44170_v57  ;;  %35454 = vmatprep.subr.mxu0 %v44170_v57  ;;  %v1376_v2 = vadd.f32 %v44183_v42, %v1178_v47 }
 0x1fb   :  { %35438 = vmatmul.mubr.f32.vlgmr.msra.gmra.mxu1 %v4075_v10  ;;  %35445 = vmatmul.mubr.f32.vlgmr.msra.gmra.mxu0 %v39440_v49  ;;  %v44182_v10 = vld [vmem:[#allocation19_spill] sm:$0xff]  ;;  %v1560_v7 = vadd.f32 %v44185_v14, %v1376_v2 }
 0x1fc   :  { %35448 = vmatpush3.xpose.msra.mxu1 %v39442_v43  ;;  %35455 = vmatpush3.xpose.msra.mxu0 %v39514_v38  ;;  %v675_v12 = vadd.f32 %v44182_v10, %v544_v28  ;;  %v4583_v43 = vsub.f32 %v39531_v59, %v4582_v4  ;;  %v44187_v28 = vld [vmem:[#allocation29_spill] sm:$0xff]  ;;  %v44190_v14 = vld [vmem:[#allocation23_spill] sm:$0xff] }
 0x1fd   :  { %35449 = vmatprep.subr.mxu1 %v44170_v57  ;;  %35456 = vmatprep.subr.mxu0 %v44170_v57  ;;  %v1198_v41 = vadd.f32 %v44187_v28, %v39038_v11  ;;  %v35243_v11 = vpop.f32.mrf.mxu1 }
 0x1fe   :  { %35451 = vmatprep.mubr.msk.f32.mxu1 %vm38339_vm2, %v44170_v57  ;;  %35458 = vmatprep.mubr.msk.f32.mxu0 %vm38339_vm2, %v44170_v57  ;;  %v799_v35 = vadd.f32 %v44184_v62, %v675_v12  ;;  %v4584_v50 = vand.u32 4294901760, %v4583_v43  ;;  %v44189_v62 = vld [vmem:[#allocation35_spill] sm:$0xff]  ;;  %v39648_v19 = vadd.f32 %v35243_v11, %v1955_v37 }
 0x200   :  { %35450 = vmatpush3.xpose.msra.mxu1 %v39459_v30  ;;  %35457 = vmatpush3.xpose.msra.mxu0 %v39533_v45  ;;  %v39575_v40 = vadd.f32 %v44186_v17, %v799_v35  ;;  %v1755_v30 = vadd.f32 %v39131_v46, %v1560_v7  ;;  %v5402_v7 = vsel %vm2124_vm3, %v44190_v14, 0  ;;  %v5408_v6 = vsel %vm2124_vm3, %v39648_v19, 0 }
 0x201   :  { %35461 = vmatprep.subr.mxu1 %v44170_v57  ;;  %35468 = vmatprep.subr.mxu0 %v44170_v57  ;;  %v39667_v17 = vand.u32 4294901760, %v5408_v6 }
 0x202   :  { %v1937_v22 = vadd.f32 %v1936_v34, %v1755_v30  ;;  %v4934_v46 = vsel %vm2124_vm3, %v39575_v40, 0 }
 0x203   :  { %35452 = vmatmul.mubr.f32.vlgmr.msra.gmra.mxu1 %v39440_v49  ;;  %35459 = vmatmul.mubr.f32.vlgmr.msra.gmra.mxu0 %v4545_v32  ;;  %v39598_v3 = vand.u32 4294901760, %v4934_v46  ;;  %v39665_v32 = vand.u32 4294901760, %v5402_v7  ;;  %v5517_v48 = vsub.f32 %v5408_v6, %v39667_v17 }
 0x204   :  { %35462 = vmatpush3.xpose.msra.mxu1 %v4584_v50  ;;  %35469 = vmatpush3.xpose.msra.mxu0 %v39531_v59  ;;  %v39591_v49 = vadd.f32 %v2102_v63, %v1937_v22  ;;  %v39600_v59 = vand.u32 4294901760, %v4940_v58 }
 0x205   :  { %35463 = vmatprep.subr.mxu1 %v44170_v57  ;;  %35470 = vmatprep.subr.mxu0 %v44170_v57  ;;  %v39610_v5 = vsub.f32 %v4934_v46, %v39598_v3  ;;  %v5478_v50 = vsub.f32 %v5402_v7, %v39665_v32 }
 0x206   :  { %35465 = vmatprep.mubr.msk.f32.mxu1 %vm38339_vm2, %v44170_v57  ;;  %35472 = vmatprep.mubr.msk.f32.mxu0 %vm38339_vm2, %v44170_v57  ;;  %v4937_v24 = vsel %vm2124_vm3, %v39591_v49, 0  ;;  %v5049_v20 = vsub.f32 %v4940_v58, %v39600_v59 }
 0x207   :  { %v39617_v53 = vand.u32 4294901760, %v4937_v24  ;;  %v5479_v63 = vand.u32 4294901760, %v5478_v50 }
 0x208   :  { %35464 = vmatpush3.xpose.msra.mxu1 %v4591_v1  ;;  %35471 = vmatpush3.xpose.msra.mxu0 %v39543_v60  ;;  %v5011_v60 = vand.u32 4294901760, %v39610_v5  ;;  %v5050_v61 = vand.u32 4294901760, %v5049_v20  ;;  %v5518_v1 = vand.u32 4294901760, %v5517_v48 }
 0x209   :  { %35475 = vmatprep.subr.mxu1 %v44170_v57  ;;  %35482 = vmatprep.subr.mxu0 %v44170_v57  ;;  %v5480_v46 = vsub.f32 %v5478_v50, %v5479_v63 }
 0x20a   :  { %v5012_v47 = vsub.f32 %v39610_v5, %v5011_v60  ;;  %v5519_v58 = vsub.f32 %v5517_v48, %v5518_v1 }
 0x20b   :  { %35466 = vmatmul.mubr.f32.vlgmr.msra.gmra.mxu1 %v39512_v39  ;;  %35473 = vmatmul.mubr.f32.vlgmr.msra.gmra.mxu0 %v39524_v26 }
 0x20c   :  { %35476 = vmatpush3.xpose.msra.mxu1 %v39514_v38  ;;  %35483 = vmatpush3.xpose.msra.mxu0 %v4582_v4  ;;  %v5056_v4 = vsub.f32 %v4937_v24, %v39617_v53  ;;  %v5013_v43 = vand.u32 4294901760, %v5012_v47 }
 0x20d   :  { %35477 = vmatprep.subr.mxu1 %v44170_v57  ;;  %35484 = vmatprep.subr.mxu0 %v44170_v57 }
 0x20e   :  { %35479 = vmatprep.mubr.msk.f32.mxu1 %vm38339_vm2, %v44170_v57  ;;  %35486 = vmatprep.mubr.msk.f32.mxu0 %vm38339_vm2, %v44170_v57  ;;  %v5057_v26 = vand.u32 4294901760, %v5056_v4 }
 0x210   :  { %35478 = vmatpush3.xpose.msra.mxu1 %v39533_v45  ;;  %35485 = vmatpush3.xpose.msra.mxu0 %v4589_v52  ;;  %v1948_v52 = vpop.f32.mrf.mxu0  ;;  %v5058_v2 = vsub.f32 %v5056_v4, %v5057_v26 }
 0x211   :  { %35489 = vmatprep.subr.mxu1 %v44170_v57  ;;  %35496 = vmatprep.subr.mxu0 %v44170_v57 }
 0x212   :  { %v5059_v29 = vand.u32 4294901760, %v5058_v2 }
 0x213   :  { %35480 = vmatmul.mubr.f32.vlgmr.msra.gmra.mxu1 %v4543_v54  ;;  %35487 = vmatmul.mubr.f32.vlgmr.msra.gmra.mxu0 %v39512_v39  ;;  %v44188_v54 = vld [vmem:[#allocation30_spill] sm:$0xff] }
 0x214   :  { %35490 = vmatpush3.xpose.msra.mxu1 %v39514_v38  ;;  %35497 = vmatpush3.xpose.msra.mxu0 %v39600_v59  ;;  %v5051_v38 = vsub.f32 %v5049_v20, %v5050_v61  ;;  %v1388_v10 = vadd.f32 %v44188_v54, %v1198_v41 }
 0x215   :  { %35491 = vmatprep.subr.mxu1 %v44170_v57  ;;  %35498 = vmatprep.subr.mxu0 %v44170_v57 }
 0x216   :  { %35493 = vmatprep.mubr.msk.f32.mxu1 %vm38339_vm2, %v44170_v57  ;;  %35500 = vmatprep.mubr.msk.f32.mxu0 %vm38339_vm2, %v44170_v57  ;;  %v1574_v12 = vadd.f32 %v39134_v55, %v1388_v10  ;;  %v5052_v42 = vand.u32 4294901760, %v5051_v38 }
 0x218   :  { %35492 = vmatpush3.xpose.msra.mxu1 %v39533_v45  ;;  %35499 = vmatpush3.xpose.msra.mxu0 %v39617_v53  ;;  %v1771_v35 = vadd.f32 %v44189_v62, %v1574_v12  ;;  %v2114_v45 = vpop.f32.mrf.mxu1 }
 0x219   :  { %35503 = vmatprep.subr.mxu1 %v44170_v57  ;;  %35510 = vmatprep.subr.mxu0 %v44170_v57 }
 0x21a   :  { %v1949_v55 = vadd.f32 %v1948_v52, %v1771_v35 }
 0x21b   :  { %35494 = vmatmul.mubr.f32.vlgmr.msra.gmra.mxu1 %v39512_v39  ;;  %35501 = vmatmul.mubr.f32.vlgmr.msra.gmra.mxu0 %v5013_v43 }
 0x21c   :  { %35504 = vmatpush3.xpose.msra.mxu1 %v5052_v42  ;;  %35511 = vmatpush3.xpose.msra.mxu0 %v5049_v20  ;;  %v39659_v39 = vadd.f32 %v2114_v45, %v1949_v55 }
 0x21d   :  { %35505 = vmatprep.subr.mxu1 %v44170_v57  ;;  %35512 = vmatprep.subr.mxu0 %v44170_v57 }
 0x21e   :  { %35507 = vmatprep.mubr.msk.f32.mxu1 %vm38339_vm2, %v44170_v57  ;;  %35514 = vmatprep.mubr.msk.f32.mxu0 %vm38339_vm2, %v44170_v57  ;;  %v5405_v34 = vsel %vm2124_vm3, %v39659_v39, 0 }
 0x21f   :  { %v39682_v30 = vand.u32 4294901760, %v5405_v34 }
 0x220   :  { %35506 = vmatpush3.xpose.msra.mxu1 %v5059_v29  ;;  %35513 = vmatpush3.xpose.msra.mxu0 %v5056_v4 }
 0x221   :  { %35517 = vmatprep.subr.mxu1 %v44170_v57  ;;  %35524 = vmatprep.subr.mxu0 %v44170_v57  ;;  %v5524_v22 = vsub.f32 %v5405_v34, %v39682_v30 }
 0x223   :  { %35508 = vmatmul.mubr.f32.vlgmr.msra.gmra.mxu1 %v39598_v3  ;;  %35515 = vmatmul.mubr.f32.vlgmr.msra.gmra.mxu0 %v39610_v5  ;;  %v5525_v24 = vand.u32 4294901760, %v5524_v22  ;;  %v5520_v5 = vand.u32 4294901760, %v5519_v58 }
 0x224   :  { %35518 = vmatpush3.xpose.msra.mxu1 %v39600_v59  ;;  %35525 = vmatpush3.xpose.msra.mxu0 %v5050_v61 }
 0x225   :  { %35519 = vmatprep.subr.mxu1 %v44170_v57  ;;  %35526 = vmatprep.subr.mxu0 %v44170_v57  ;;  %v5526_v20 = vsub.f32 %v5524_v22, %v5525_v24 }
 0x226   :  { %35521 = vmatprep.mubr.msk.f32.mxu1 %vm38339_vm2, %v44170_v57  ;;  %35528 = vmatprep.mubr.msk.f32.mxu0 %vm38339_vm2, %v44170_v57 }
 0x228   :  { %35520 = vmatpush3.xpose.msra.mxu1 %v39617_v53  ;;  %35527 = vmatpush3.xpose.msra.mxu0 %v5057_v26 }
 0x229   :  { %35531 = vmatprep.subr.mxu1 %v44170_v57  ;;  %35538 = vmatprep.subr.mxu0 %v44170_v57 }
 0x22b   :  { %35522 = vmatmul.mubr.f32.vlgmr.msra.gmra.mxu1 %v5011_v60  ;;  %35529 = vmatmul.mubr.f32.vlgmr.msra.gmra.mxu0 %v39598_v3  ;;  %v5527_v60 = vand.u32 4294901760, %v5526_v20 }
 0x22c   :  { %35532 = vmatpush3.xpose.msra.mxu1 %v39600_v59  ;;  %35539 = vmatpush3.xpose.msra.mxu0 %v39667_v17  ;;  %v5481_v59 = vand.u32 4294901760, %v5480_v46 }
 0x22d   :  { %35533 = vmatprep.subr.mxu1 %v44170_v57  ;;  %35540 = vmatprep.subr.mxu0 %v44170_v57 }
 0x22e   :  { %35535 = vmatprep.mubr.msk.f32.mxu1 %vm38339_vm2, %v44170_v57  ;;  %35542 = vmatprep.mubr.msk.f32.mxu0 %vm38339_vm2, %v44170_v57 }
 0x230   :  { %35534 = vmatpush3.xpose.msra.mxu1 %v39617_v53  ;;  %35541 = vmatpush3.xpose.msra.mxu0 %v39682_v30  ;;  %v5961_v53 = vpop.permute.xlu1 %5960 }
 0x231   :  { %35545 = vmatprep.subr.mxu1 %v44170_v57  ;;  %35552 = vmatprep.subr.mxu0 %v44170_v57 }
 0x233   :  { %35536 = vmatmul.mubr.f32.vlgmr.msra.gmra.mxu1 %v39598_v3  ;;  %35543 = vmatmul.mubr.f32.vlgmr.msra.gmra.mxu0 %v5481_v59  ;;  %v39712_v3 = vand.u32 4294901760, %v5961_v53 }
 0x234   :  { %35546 = vmatpush3.xpose.msra.mxu1 %v5520_v5  ;;  %35553 = vmatpush3.xpose.msra.mxu0 %v5517_v48 }
 0x235   :  { %35547 = vmatprep.subr.mxu1 %v44170_v57  ;;  %35554 = vmatprep.subr.mxu0 %v44170_v57  ;;  %v39719_v4 = vsub.f32 %v5961_v53, %v39712_v3  ;;  %v44191_v53 = vld [vmem:[#allocation37_spill] sm:$0xff] }
 0x236   :  { %35549 = vmatprep.mubr.msk.f32.mxu1 %vm38339_vm2, %v44170_v57  ;;  %35556 = vmatprep.mubr.msk.f32.mxu0 %vm38339_vm2, %v44170_v57 }
 0x237   :  { %v6075_v61 = vand.u32 4294901760, %v39719_v4 }
 0x238   :  { %35548 = vmatpush3.xpose.msra.mxu1 %v5527_v60  ;;  %35555 = vmatpush3.xpose.msra.mxu0 %v5524_v22 }
 0x239   :  { %35559 = vmatprep.subr.mxu1 %v44170_v57  ;;  %35566 = vmatprep.subr.mxu0 %v44170_v57  ;;  %v6076_v28 = vsub.f32 %v39719_v4, %v6075_v61 }
 0x23b   :  { %35550 = vmatmul.mubr.f32.vlgmr.msra.gmra.mxu1 %v39665_v32  ;;  %35557 = vmatmul.mubr.f32.vlgmr.msra.gmra.mxu0 %v5478_v50  ;;  %v6077_v41 = vand.u32 4294901760, %v6076_v28 }
 0x23c   :  { %35560 = vmatpush3.xpose.msra.mxu1 %v39667_v17  ;;  %35567 = vmatpush3.xpose.msra.mxu0 %v5518_v1 }
 0x23d   :  { %35561 = vmatprep.subr.mxu1 %v44170_v57  ;;  %35568 = vmatprep.subr.mxu0 %v44170_v57 }
 0x23e   :  { %35563 = vmatprep.mubr.msk.f32.mxu1 %vm38339_vm2, %v44170_v57  ;;  %35570 = vmatprep.mubr.msk.f32.mxu0 %vm38339_vm2, %v44170_v57 }
 0x240   :  { %35562 = vmatpush3.xpose.msra.mxu1 %v39682_v30  ;;  %35569 = vmatpush3.xpose.msra.mxu0 %v5525_v24 }
 0x241   :  { %35573 = vmatprep.subr.mxu1 %v44170_v57  ;;  %35580 = vmatprep.subr.mxu0 %v44170_v57 }
 0x243   :  { %35564 = vmatmul.mubr.f32.vlgmr.msra.gmra.mxu1 %v5479_v63  ;;  %35571 = vmatmul.mubr.f32.vlgmr.msra.gmra.mxu0 %v39665_v32 }
 0x244   :  { %35574 = vmatpush3.xpose.msra.mxu1 %v39667_v17  ;;  %35581 = vmatpush3.msra.mxu0 %v39712_v3 }
 0x245   :  { %35575 = vmatprep.subr.mxu1 %v44170_v57  ;;  %35577 = vmatprep.mubr.msk.f32.mxu1 %vm38339_vm2, %v44170_v57 }
 0x246   :  { %35582 = vmatprep.subr.mxu0 %v44170_v57  ;;  %35584 = vmatprep.mubr.msk.f32.mxu0 %vm38339_vm2, %v44170_v57 }
 0x248   :  { %35576 = vmatpush3.xpose.msra.mxu1 %v39682_v30 }
 0x249   :  { %35587 = vmatprep.subr.mxu1 %v44170_v57 }
 0x24b   :  { %v2207_v47 = vpop.f32.mrf.mxu0  ;;  %35578 = vmatmul.mubr.f32.vlgmr.msra.gmra.mxu1 %v39665_v32 }
 0x24c   :  { %35588 = vmatpush3.msra.mxu1 %v6077_v41  ;;  %35591 = vmatprep.mubr.msk.f32.mxu1 %vm38339_vm2, %v44170_v57 }
 0x24d   :  { %v35250_v13 = vpop.f32.mrf.mxu0  ;;  %35589 = vmatprep.subr.mxu1 %v44170_v57 }
 0x253   :  { %v2288_v38 = vpop.f32.mrf.mxu1  ;;  %v2364_v26 = vpop.f32.mrf.mxu0 }
 0x254   :  { %v2289_v11 = vadd.f32 %v2288_v38, %v2207_v47 }
 0x255   :  { %v35257_v54 = vpop.f32.mrf.mxu1  ;;  %v35264_v10 = vpop.f32.mrf.mxu0 }
 0x256   :  { %v2365_v43 = vadd.f32 %v2364_v26, %v2289_v11 }
 0x25b   :  { %v2439_v12 = vpop.f32.mrf.mxu1  ;;  %v2516_v37 = vpop.f32.mrf.mxu0 }
 0x25c   :  { %v2440_v2 = vadd.f32 %v2439_v12, %v2365_v43 }
 0x25d   :  { %v35271_v52 = vpop.f32.mrf.mxu1  ;;  %v35278_v42 = vpop.f32.mrf.mxu0 }
 0x25e   :  { %v2517_v62 = vadd.f32 %v2516_v37, %v2440_v2 }
 0x263   :  { %v2589_v35 = vpop.f32.mrf.mxu1  ;;  %v2675_v45 = vpop.f32.mrf.mxu0 }
 0x264   :  { %v39747_v55 = vadd.f32 %v2589_v35, %v2517_v62 }
 0x265   :  { %v35285_v29 = vpop.f32.mrf.mxu1  ;;  %v35292_v7 = vpop.f32.mrf.mxu0 }
 0x266   :  { %v5870_v6 = vsel %vm5869_vm4, %v39747_v55, -inf }
 0x267   :  { %5871 = vmax.xlane.f32.xlu0 %v5870_v6 }
 0x26b   :  { %v2756_v32 = vpop.f32.mrf.mxu1  ;;  %v2832_v17 = vpop.f32.mrf.mxu0 }
 0x26c   :  { %v2757_v48 = vadd.f32 %v2756_v32, %v2675_v45 }
 0x26d   :  { %v35299_v34 = vpop.f32.mrf.mxu1  ;;  %v35306_v50 = vpop.f32.mrf.mxu0 }
 0x26e   :  { %v2833_v22 = vadd.f32 %v2832_v17, %v2757_v48 }
 0x273   :  { %v2907_v30 = vpop.f32.mrf.mxu1  ;;  %v2984_v63 = vpop.f32.mrf.mxu0 }
 0x274   :  { %v2908_v58 = vadd.f32 %v2907_v30, %v2833_v22 }
 0x275   :  { %v35313_v1 = vpop.f32.mrf.mxu1  ;;  %v35320_v46 = vpop.f32.mrf.mxu0 }
 0x276   :  { %v2985_v24 = vadd.f32 %v2984_v63, %v2908_v58 }
 0x27b   :  { %v3057_v59 = vpop.f32.mrf.mxu1  ;;  %v3143_v5 = vpop.f32.mrf.mxu0 }
 0x27c   :  { %v39751_v20 = vadd.f32 %v3057_v59, %v2985_v24 }
 0x27d   :  { %v35327_v60 = vpop.f32.mrf.mxu1  ;;  %5958 = vrot.lane.b32.xlu0 %v44191_v53, %s38337_s21  ;;  %v35334_v28 = vpop.f32.mrf.mxu0 }
 0x27e   :  { %v5873_v41 = vsel %vm5869_vm4, %v39751_v20, -inf }
 0x27f   :  { %5874 = vmax.xlane.f32.xlu1 %v5873_v41 }
 0x281   :  { %6428 = vrot.lane.b32.xlu0 %v39177_v16, %s38337_s21 }
 0x283   :  { %v3224_v47 = vpop.f32.mrf.mxu1  ;;  %v3300_v13 = vpop.f32.mrf.mxu0 }
 0x284   :  { %v3225_v54 = vadd.f32 %v3224_v47, %v3143_v5 }
 0x285   :  { %v35341_v38 = vpop.f32.mrf.mxu1  ;;  %6426 = vrot.lane.b32.xlu0 %v39185_v0, %s38337_s21  ;;  %v35348_v26 = vpop.f32.mrf.mxu0 }
 0x286   :  { %v3301_v12 = vadd.f32 %v3300_v13, %v3225_v54 }
 0x289   :  { %6894 = vrot.lane.b32.xlu0 %v39275_v21, %s38337_s21 }
 0x28b   :  { %v3375_v10 = vpop.f32.mrf.mxu1  ;;  %v3452_v11 = vpop.f32.mrf.mxu0 }
 0x28c   :  { %v3376_v52 = vadd.f32 %v3375_v10, %v3301_v12 }
 0x28d   :  { %v35355_v37 = vpop.f32.mrf.mxu1  ;;  %7364 = vrot.lane.b32.xlu0 %v39336_v9, %s38337_s21  ;;  %v35362_v43 = vpop.f32.mrf.mxu0 }
 0x28e   :  { %v3453_v42 = vadd.f32 %v3452_v11, %v3376_v52 }
 0x293   :  { %v3525_v2 = vpop.f32.mrf.mxu1  ;;  %v3611_v62 = vpop.f32.mrf.mxu0 }
 0x294   :  { %v39765_v35 = vadd.f32 %v3525_v2, %v3453_v42 }
 0x295   :  { %v35369_v45 = vpop.f32.mrf.mxu1  ;;  %v35376_v29 = vpop.f32.mrf.mxu0 }
 0x296   :  { %v5876_v7 = vsel %vm5869_vm4, %v39765_v35, -inf }
 0x297   :  { %5877 = vmax.xlane.f32.xlu1 %v5876_v7 }
 0x29b   :  { %v3692_v6 = vpop.f32.mrf.mxu1  ;;  %v3768_v32 = vpop.f32.mrf.mxu0 }
 0x29c   :  { %v3693_v50 = vadd.f32 %v3692_v6, %v3611_v62 }
 0x29d   :  { %v35383_v17 = vpop.f32.mrf.mxu1  ;;  %v35390_v34 = vpop.f32.mrf.mxu0 }
 0x29e   :  { %v3769_v63 = vadd.f32 %v3768_v32, %v3693_v50 }
 0x2a3   :  { %v3843_v48 = vpop.f32.mrf.mxu1  ;;  %v3920_v30 = vpop.f32.mrf.mxu0 }
 0x2a4   :  { %v3844_v46 = vadd.f32 %v3843_v48, %v3769_v63 }
 0x2a5   :  { %v35397_v22 = vpop.f32.mrf.mxu1  ;;  %v35404_v1 = vpop.f32.mrf.mxu0 }
 0x2a6   :  { %v3921_v58 = vadd.f32 %v3920_v30, %v3844_v46 }
 0x2ab   :  { %v3993_v24 = vpop.f32.mrf.mxu1  ;;  %v4079_v59 = vpop.f32.mrf.mxu0 }
 0x2ac   :  { %v39769_v5 = vadd.f32 %v3993_v24, %v3921_v58 }
 0x2ad   :  { %v35411_v60 = vpop.f32.mrf.mxu1  ;;  %v35418_v28 = vpop.f32.mrf.mxu0 }
 0x2ae   :  { %v5879_v41 = vsel %vm5869_vm4, %v39769_v5, -inf }
 0x2af   :  { %5880 = vmax.xlane.f32.xlu1 %v5879_v41 }
 0x2b3   :  { %v4160_v47 = vpop.f32.mrf.mxu1  ;;  %v4236_v13 = vpop.f32.mrf.mxu0 }
 0x2b4   :  { %v4161_v54 = vadd.f32 %v4160_v47, %v4079_v59 }
 0x2b5   :  { %v35425_v38 = vpop.f32.mrf.mxu1  ;;  %v35432_v26 = vpop.f32.mrf.mxu0 }
 0x2b6   :  { %v4237_v12 = vadd.f32 %v4236_v13, %v4161_v54 }
 0x2bb   :  { %v4311_v10 = vpop.f32.mrf.mxu1  ;;  %v4388_v11 = vpop.f32.mrf.mxu0 }
 0x2bc   :  { %v4312_v52 = vadd.f32 %v4311_v10, %v4237_v12 }
 0x2bd   :  { %v35439_v37 = vpop.f32.mrf.mxu1  ;;  %v35446_v43 = vpop.f32.mrf.mxu0 }
 0x2be   :  { %v4389_v42 = vadd.f32 %v4388_v11, %v4312_v52 }
 0x2c3   :  { %v4461_v2 = vpop.f32.mrf.mxu1  ;;  %v4547_v62 = vpop.f32.mrf.mxu0 }
 0x2c4   :  { %v39773_v45 = vadd.f32 %v4461_v2, %v4389_v42 }
 0x2c5   :  { %v35453_v29 = vpop.f32.mrf.mxu1  ;;  %v35460_v7 = vpop.f32.mrf.mxu0 }
 0x2c6   :  { %v5882_v6 = vsel %vm5869_vm4, %v39773_v45, -inf }
 0x2c7   :  { %5883 = vmax.xlane.f32.xlu1 %v5882_v6 }
 0x2cb   :  { %v4628_v32 = vpop.f32.mrf.mxu1  ;;  %v4704_v17 = vpop.f32.mrf.mxu0 }
 0x2cc   :  { %v4629_v48 = vadd.f32 %v4628_v32, %v4547_v62 }
 0x2cd   :  { %v35467_v34 = vpop.f32.mrf.mxu1  ;;  %v35474_v50 = vpop.f32.mrf.mxu0 }
 0x2ce   :  { %v4705_v22 = vadd.f32 %v4704_v17, %v4629_v48 }
 0x2d3   :  { %v4779_v30 = vpop.f32.mrf.mxu1  ;;  %v4856_v63 = vpop.f32.mrf.mxu0 }
 0x2d4   :  { %v4780_v58 = vadd.f32 %v4779_v30, %v4705_v22 }
 0x2d5   :  { %v35481_v1 = vpop.f32.mrf.mxu1  ;;  %v35488_v46 = vpop.f32.mrf.mxu0 }
 0x2d6   :  { %v4857_v24 = vadd.f32 %v4856_v63, %v4780_v58 }
 0x2db   :  { %v4929_v59 = vpop.f32.mrf.mxu1  ;;  %v5015_v60 = vpop.f32.mrf.mxu0 }
 0x2dc   :  { %v39777_v28 = vadd.f32 %v4929_v59, %v4857_v24 }
 0x2dd   :  { %v35495_v41 = vpop.f32.mrf.mxu1  ;;  %v35502_v47 = vpop.f32.mrf.mxu0 }
 0x2de   :  { %v5885_v13 = vsel %vm5869_vm4, %v39777_v28, -inf }
 0x2df   :  { %5886 = vmax.xlane.f32.xlu1 %v5885_v13 }
 0x2e3   :  { %v5096_v38 = vpop.f32.mrf.mxu1  ;;  %v5172_v26 = vpop.f32.mrf.mxu0 }
 0x2e4   :  { %v5097_v46 = vadd.f32 %v5096_v38, %v5015_v60 }
 0x2e5   :  { %v35509_v54 = vpop.f32.mrf.mxu1  ;;  %v35516_v10 = vpop.f32.mrf.mxu0 }
 0x2e6   :  { %v5173_v13 = vadd.f32 %v5172_v26, %v5097_v46 }
 0x2eb   :  { %v5247_v11 = vpop.f32.mrf.mxu1  ;;  %v5324_v12 = vpop.f32.mrf.mxu0 }
 0x2ec   :  { %v5248_v10 = vadd.f32 %v5247_v11, %v5173_v13 }
 0x2ed   :  { %v35523_v37 = vpop.f32.mrf.mxu1  ;;  %v35530_v43 = vpop.f32.mrf.mxu0 }
 0x2f0   :  { %v5872_v52 = vpop.xlane.xlu0 %5871  ;;  %6896 = vrot.lane.b32.xlu1 %v39263_v31, %s38337_s21 }
 0x2f1   :  { %v5894_v1 = vsub.f32 %v39747_v55, %v5872_v52 }
 0x2f3   :  { %v5397_v42 = vpop.f32.mrf.mxu1  ;;  %v5483_v2 = vpop.f32.mrf.mxu0  ;;  %v5902_v58 = vmul.f32 1.442695, %v5894_v1 }
 0x2f4   :  { %v5959_v62 = vpop.permute.xlu0 %5958 }
 0x2f5   :  { %v39783_v29 = vand.u32 4294901760, %v5959_v62  ;;  %v35537_v7 = vpop.f32.mrf.mxu1  ;;  %v35544_v6 = vpop.f32.mrf.mxu0  ;;  %38072 = vpow2.f32 %v5902_v58 }
 0x2f6   :  { %v5325_v6 = vadd.f32 %v5324_v12, %v5248_v10 }
 0x2f7   :  { %v39786_v32 = vsub.f32 %v5959_v62, %v39783_v29  ;;  %35583 = vmatpush3.msra.mxu0 %v39783_v29 }
 0x2f8   :  { %35594 = vmatprep.subr.mxu0 %v44170_v57  ;;  %v5398_v52 = vadd.f32 %v5397_v42, %v5325_v6 }
 0x2f9   :  { %v6082_v17 = vand.u32 4294901760, %v39786_v32 }
 0x2fa   :  { %v5888_v38 = vsel %vm5869_vm4, %v5398_v52, -inf }
 0x2fb   :  { %v5564_v34 = vpop.f32.mrf.mxu1  ;;  %v5640_v50 = vpop.f32.mrf.mxu0  ;;  %v6083_v48 = vsub.f32 %v39786_v32, %v6082_v17 }
 0x2fc   :  { %v5565_v43 = vadd.f32 %v5564_v34, %v5483_v2 }
 0x2fd   :  { %v35551_v30 = vpop.f32.mrf.mxu1  ;;  %v35558_v63 = vpop.f32.mrf.mxu0  ;;  %v6084_v22 = vand.u32 4294901760, %v6083_v48 }
 0x2fe   :  { %v5641_v48 = vadd.f32 %v5640_v50, %v5565_v43 }
 0x2ff   :  { %35590 = vmatpush3.msra.mxu1 %v6084_v22 }
 0x300   :  { %35601 = vmatprep.subr.mxu1 %v44170_v57 }
 0x302   :  { %v39798_v30 = vpop.eup %38072 }
 0x303   :  { %v5715_v24 = vpop.f32.mrf.mxu1  ;;  %v5792_v59 = vpop.f32.mrf.mxu0  ;;  %v5918_v11 = vsel %vm5869_vm4, %v39798_v30, 0.0 }
 0x304   :  { %v5716_v60 = vadd.f32 %v5715_v24, %v5641_v48 }
 0x305   :  { %v35565_v41 = vpop.f32.mrf.mxu1  ;;  %v35572_v47 = vpop.f32.mrf.mxu0 }
 0x306   :  { %v5793_v26 = vadd.f32 %v5792_v59, %v5716_v60 }
 0x308   :  { %v5875_v54 = vpop.xlane.xlu1 %5874 }
 0x309   :  { %v5895_v37 = vsub.f32 %v39751_v20, %v5875_v54 }
 0x30b   :  { %v5904_v62 = vmul.f32 1.442695, %v5895_v37  ;;  %v5865_v7 = vpop.f32.mrf.mxu1 }
 0x30c   :  { %v5866_v63 = vadd.f32 %v5865_v7, %v5793_v26  ;;  %v6429_v26 = vpop.permute.xlu0 %6428 }
 0x30d   :  { %v35579_v55 = vpop.f32.mrf.mxu1  ;;  %38074 = vpow2.f32 %v5904_v62 }
 0x30e   :  { %v5891_v20 = vsel %vm5869_vm4, %v5866_v63, -inf }
 0x314   :  { %5889 = vmax.xlane.f32.xlu1 %v5888_v38 }
 0x318   :  { %5919 = vadd.xlane.f32.xlu1 %v5918_v11 }
 0x31a   :  { %v39803_v2 = vpop.eup %38074 }
 0x31b   :  { %v5921_v12 = vsel %vm5869_vm4, %v39803_v2, 0.0 }
 0x31c   :  { %5892 = vmax.xlane.f32.xlu1 %v5891_v20 }
 0x320   :  { %v5878_v42 = vpop.xlane.xlu1 %5877  ;;  %5922 = vadd.xlane.f32.xlu1 %v5921_v12  ;;  %v6427_v12 = vpop.permute.xlu0 %6426 }
 0x321   :  { %v5896_v34 = vsub.f32 %v39765_v35, %v5878_v42  ;;  %v39847_v42 = vand.u32 4294901760, %v6429_v26 }
 0x323   :  { %v5906_v50 = vmul.f32 1.442695, %v5896_v34  ;;  %v44193_v34 = vld [vmem:[#allocation31_spill] sm:$0xff] }
 0x325   :  { %38076 = vpow2.f32 %v5906_v50 }
 0x332   :  { %v39808_v22 = vpop.eup %38076 }
 0x333   :  { %v5924_v1 = vsel %vm5869_vm4, %v39808_v22, 0.0 }
 0x334   :  { %5925 = vadd.xlane.f32.xlu0 %v5924_v1  ;;  %v39853_v1 = vand.u32 4294901760, %v6427_v12 }
 0x338   :  { %v5881_v46 = vpop.xlane.xlu1 %5880 }
 0x339   :  { %v5897_v58 = vsub.f32 %v39769_v5, %v5881_v46 }
 0x33b   :  { %v5908_v24 = vmul.f32 1.442695, %v5897_v58 }
 0x33d   :  { %38078 = vpow2.f32 %v5908_v24  ;;  %v39859_v24 = vsub.f32 %v6429_v26, %v39847_v42 }
 0x34a   :  { %v39813_v59 = vpop.eup %38078 }
 0x34b   :  { %v5927_v41 = vsel %vm5869_vm4, %v39813_v59, 0.0 }
 0x34c   :  { %5928 = vadd.xlane.f32.xlu1 %v5927_v41  ;;  %v6895_v41 = vpop.permute.xlu0 %6894 }
 0x350   :  { %v5884_v35 = vpop.xlane.xlu1 %5883 }
 0x351   :  { %v5898_v47 = vsub.f32 %v39773_v45, %v5884_v35 }
 0x353   :  { %v5910_v13 = vmul.f32 1.442695, %v5898_v47  ;;  %v39865_v47 = vsub.f32 %v6427_v12, %v39853_v1 }
 0x355   :  { %38080 = vpow2.f32 %v5910_v13 }
 0x35d   :  { %7832 = vrot.lane.b32.xlu1 %v39421_v51, %s38337_s21 }
 0x361   :  { %7830 = vrot.lane.b32.xlu1 %v39433_v27, %s38337_s21 }
 0x362   :  { %v39822_v5 = vpop.eup %38080 }
 0x363   :  { %v5930_v54 = vsel %vm5869_vm4, %v39822_v5, 0.0 }
 0x364   :  { %5931 = vadd.xlane.f32.xlu0 %v5930_v54  ;;  %v6543_v54 = vand.u32 4294901760, %v39859_v24 }
 0x368   :  { %v5887_v10 = vpop.xlane.xlu1 %5886 }
 0x369   :  { %v5899_v37 = vsub.f32 %v39777_v28, %v5887_v10 }
 0x36b   :  { %v5912_v43 = vmul.f32 1.442695, %v5899_v37 }
 0x36c   :  { %v39835_v7 = vpop.permute.xlu1 %6896 }
 0x36d   :  { %38082 = vpow2.f32 %v5912_v43  ;;  %v6550_v43 = vand.u32 4294901760, %v39865_v47 }
 0x37a   :  { %7362 = vrot.lane.b32.xlu0 %v39347_v36, %s38337_s21  ;;  %v39829_v45 = vpop.eup %38082 }
 0x37b   :  { %v5933_v62 = vsel %vm5869_vm4, %v39829_v45, 0.0 }
 0x385   :  { %5934 = vadd.xlane.f32.xlu1 %v5933_v62 }
 0x396   :  { %8300 = vrot.lane.b32.xlu1 %v39494_v44, %s38337_s21 }
 0x39a   :  { %8768 = vrot.lane.b32.xlu1 %v39579_v33, %s38337_s21 }
 0x39d   :  { %v5890_v28 = vpop.xlane.xlu1 %5889 }
 0x39e   :  { %v5900_v6 = vsub.f32 %v5398_v52, %v5890_v28  ;;  %8766 = vrot.lane.b32.xlu1 %v39591_v49, %s38337_s21  ;;  %v44192_v52 = vld [vmem:[#allocation36_spill] sm:$0xff] }
 0x3a0   :  { %v5914_v55 = vmul.f32 1.442695, %v5900_v6  ;;  %v39883_v6 = vpop.permute.xlu0 %7364 }
 0x3a1   :  { %v5920_v48 = vpop.xlane.xlu1 %5919 }
 0x3a2   :  { %38084 = vpow2.f32 %v5914_v55  ;;  %9236 = vrot.lane.b32.xlu1 %v39648_v19, %s38337_s21 }
 0x3a3   :  { %38086 = vrcp.f32 %v5920_v48 }
 0x3a5   :  { %v5893_v60 = vpop.xlane.xlu1 %5892 }
 0x3a6   :  { %v5901_v38 = vsub.f32 %v5866_v63, %v5893_v60  ;;  %9234 = vrot.lane.b32.xlu1 %v39659_v39, %s38337_s21  ;;  %v6544_v60 = vsub.f32 %v39859_v24, %v6543_v54 }
 0x3a8   :  { %v5916_v11 = vmul.f32 1.442695, %v5901_v38 }
 0x3a9   :  { %v5923_v20 = vpop.xlane.xlu1 %5922 }
 0x3aa   :  { %38088 = vpow2.f32 %v5916_v11  ;;  %9714 = vrot.lane.b32.xlu1 %v44192_v52, %s38340_s24 }
 0x3ab   :  { %38090 = vrcp.f32 %v5923_v20 }
 0x3ae   :  { %9710 = vrot.lane.b32.xlu1 %v44193_v34, %s38340_s24 }
 0x3af   :  { %v39851_v50 = vpop.eup %38084 }
 0x3b0   :  { %v38087_v63 = vpop.eup %38086  ;;  %v5936_v46 = vsel %vm5869_vm4, %v39851_v50, 0.0 }
 0x3b1   :  { %5937 = vadd.xlane.f32.xlu0 %v5936_v46  ;;  %v5943_v58 = vmul.f32 %v38087_v63, %v39798_v30  ;;  %v39918_v63 = vand.u32 4294901760, %v6895_v41 }
 0x3b2   :  { %10183 = vrot.lane.b32.xlu1 %v39185_v0, %s38340_s24 }
 0x3b3   :  { %v5965_v35 = vsel %vm5869_vm4, %v5943_v58, 0 }
 0x3b4   :  { %v39867_v13 = vand.u32 4294901760, %v5965_v35 }
 0x3b6   :  { %v6035_v10 = vsub.f32 %v5965_v35, %v39867_v13  ;;  %35592 = vmatmul.mubr.f32.vlgmr.msra.gmra.mxu1 %v39867_v13  ;;  %10656 = vrot.lane.b32.xlu1 %v39263_v31, %s38340_s24  ;;  %v39936_v35 = vsub.f32 %v6895_v41, %v39918_v63 }
 0x3b7   :  { %v39874_v30 = vpop.eup %38088  ;;  %35602 = vmatpush3.msra.mxu1 %v39712_v3  ;;  %35605 = vmatprep.mubr.msk.f32.mxu1 %vm38339_vm2, %v44170_v57 }
 0x3b8   :  { %v38091_v37 = vpop.eup %38090  ;;  %35603 = vmatprep.subr.mxu1 %v44170_v57  ;;  %v6036_v62 = vand.u32 4294901760, %v6035_v10  ;;  %v5939_v28 = vsel %vm5869_vm4, %v39874_v30, 0.0 }
 0x3b9   :  { %35604 = vmatpush3.msra.mxu1 %v39783_v29  ;;  %5940 = vadd.xlane.f32.xlu0 %v5939_v28  ;;  %v5945_v55 = vmul.f32 %v38091_v37, %v39803_v2  ;;  %v6551_v2 = vsub.f32 %v39865_v47, %v6550_v43 }
 0x3ba   :  { %35615 = vmatprep.subr.mxu1 %v44170_v57  ;;  %35606 = vmatmul.mubr.f32.vlgmr.msra.gmra.mxu1 %v6036_v62  ;;  %v6037_v48 = vsub.f32 %v6035_v10, %v6036_v62 }
 0x3bb   :  { %35616 = vmatpush3.msra.mxu1 %v39712_v3  ;;  %10652 = vrot.lane.b32.xlu1 %v39259_v8, %s38340_s24  ;;  %v6433_v11 = vsel %vm5869_vm4, %v5945_v55, 0  ;;  %v6545_v3 = vand.u32 4294901760, %v6544_v60  ;;  %v6552_v20 = vand.u32 4294901760, %v6551_v2  ;;  %v39985_v55 = vand.u32 4294901760, %v39883_v6 }
 0x3bc   :  { %35617 = vmatprep.subr.mxu1 %v44170_v57  ;;  %35619 = vmatprep.mubr.msk.f32.mxu1 %vm38339_vm2, %v44170_v57  ;;  %v6038_v38 = vand.u32 4294901760, %v6037_v48  ;;  %v39906_v12 = vand.u32 4294901760, %v6433_v11 }
 0x3bd   :  { %35618 = vmatpush3.msra.mxu1 %v39783_v29  ;;  %v5926_v26 = vpop.xlane.xlu0 %5925  ;;  %v39909_v29 = vand.u32 4294901760, %v39835_v7  ;;  %v40002_v60 = vsub.f32 %v39883_v6, %v39985_v55 }
 0x3be   :  { %35629 = vmatprep.subr.mxu1 %v44170_v57  ;;  %38092 = vrcp.f32 %v5926_v26  ;;  %35585 = vmatmul.mubr.f32.vlgmr.msra.gmra.mxu0 %v6038_v38  ;;  %v6503_v46 = vsub.f32 %v6433_v11, %v39906_v12 }
 0x3bf   :  { %35595 = vmatpush3.msra.mxu0 %v39719_v4  ;;  %35620 = vmatmul.mubr.f32.vlgmr.msra.gmra.mxu1 %v39867_v13  ;;  %v39926_v58 = vsub.f32 %v39835_v7, %v39909_v29 }
 0x3c0   :  { %35630 = vmatpush3.msra.mxu1 %v6545_v3  ;;  %35596 = vmatprep.subr.mxu0 %v44170_v57  ;;  %v6504_v7 = vand.u32 4294901760, %v6503_v46 }
 0x3c1   :  { %35631 = vmatprep.subr.mxu1 %v44170_v57  ;;  %11125 = vrot.lane.b32.xlu1 %v39347_v36, %s38340_s24 }
 0x3c2   :  { %35597 = vmatpush3.msra.mxu0 %v39786_v32  ;;  %35632 = vmatpush3.msra.mxu1 %v6552_v20  ;;  %v6505_v32 = vsub.f32 %v6503_v46, %v6504_v7 }
 0x3c3   :  { %35598 = vmatprep.mubr.msk.f32.mxu0 %vm38339_vm2, %v44170_v57  ;;  %35608 = vmatprep.subr.mxu0 %v44170_v57 }
 0x3c4   :  { %35633 = vmatprep.mubr.msk.f32.mxu1 %vm38339_vm2, %v44170_v57  ;;  %35643 = vmatprep.subr.mxu1 %v44170_v57 }
 0x3c5   :  { %35599 = vmatmul.mubr.f32.vlgmr.msra.gmra.mxu0 %v6035_v10  ;;  %35634 = vmatmul.mubr.f32.vlgmr.msra.gmra.mxu1 %v39906_v12  ;;  %v7011_v10 = vand.u32 4294901760, %v39926_v58 }
 0x3c6   :  { %35609 = vmatpush3.msra.mxu0 %v6075_v61  ;;  %35644 = vmatpush3.msra.mxu1 %v39847_v42  ;;  %v7018_v61 = vand.u32 4294901760, %v39936_v35 }
 0x3c7   :  { %35610 = vmatprep.subr.mxu0 %v44170_v57  ;;  %11598 = vrot.lane.b32.xlu1 %v39421_v51, %s38340_s24  ;;  %v7012_v41 = vsub.f32 %v39926_v58, %v7011_v10 }
 0x3c8   :  { %35645 = vmatprep.subr.mxu1 %v44170_v57  ;;  %35611 = vmatpush3.msra.mxu0 %v6082_v17 }
 0x3c9   :  { %35646 = vmatpush3.msra.mxu1 %v39853_v1  ;;  %35612 = vmatprep.mubr.msk.f32.mxu0 %vm38339_vm2, %v44170_v57  ;;  %v7013_v37 = vand.u32 4294901760, %v7012_v41 }
 0x3ca   :  { %35622 = vmatprep.subr.mxu0 %v44170_v57  ;;  %35647 = vmatprep.mubr.msk.f32.mxu1 %vm38339_vm2, %v44170_v57 }
 0x3cb   :  { %v38093_v4 = vpop.eup %38092  ;;  %35657 = vmatprep.subr.mxu1 %v44170_v57  ;;  %35613 = vmatmul.mubr.f32.vlgmr.msra.gmra.mxu0 %v39867_v13 }
 0x3cc   :  { %35623 = vmatpush3.msra.mxu0 %v39847_v42  ;;  %35648 = vmatmul.mubr.f32.vlgmr.msra.gmra.mxu1 %v6504_v7  ;;  %v5947_v17 = vmul.f32 %v38093_v4, %v39808_v22  ;;  %v6506_v22 = vand.u32 4294901760, %v6505_v32 }
 0x3cd   :  { %35658 = vmatpush3.msra.mxu1 %v39847_v42  ;;  %35624 = vmatprep.subr.mxu0 %v44170_v57  ;;  %v7019_v42 = vsub.f32 %v39936_v35, %v7018_v61 }
 0x3ce   :  { %11594 = vrot.lane.b32.xlu1 %v39417_v56, %s38340_s24  ;;  %35659 = vmatprep.subr.mxu1 %v44170_v57  ;;  %v6901_v13 = vsel %vm5869_vm4, %v5947_v17, 0 }
 0x3cf   :  { %35625 = vmatpush3.msra.mxu0 %v39853_v1  ;;  %35660 = vmatpush3.msra.mxu1 %v39853_v1  ;;  %v39975_v1 = vand.u32 4294901760, %v6901_v13  ;;  %v7020_v62 = vand.u32 4294901760, %v7019_v42 }
 0x3d0   :  { %35626 = vmatprep.mubr.msk.f32.mxu0 %vm38339_vm2, %v44170_v57  ;;  %35636 = vmatprep.subr.mxu0 %v44170_v57 }
 0x3d1   :  { %35661 = vmatprep.mubr.msk.f32.mxu1 %vm38339_vm2, %v44170_v57  ;;  %35671 = vmatprep.subr.mxu1 %v44170_v57  ;;  %v6971_v48 = vsub.f32 %v6901_v13, %v39975_v1 }
 0x3d2   :  { %35627 = vmatmul.mubr.f32.vlgmr.msra.gmra.mxu0 %v6506_v22  ;;  %35662 = vmatmul.mubr.f32.vlgmr.msra.gmra.mxu1 %v39906_v12 }
 0x3d3   :  { %35637 = vmatpush3.msra.mxu0 %v39859_v24  ;;  %35672 = vmatpush3.msra.mxu1 %v7013_v37  ;;  %v6972_v24 = vand.u32 4294901760, %v6971_v48 }
 0x3d4   :  { %12067 = vrot.lane.b32.xlu1 %v39505_v25, %s38340_s24  ;;  %35638 = vmatprep.subr.mxu0 %v44170_v57 }
 0x3d5   :  { %35673 = vmatprep.subr.mxu1 %v44170_v57  ;;  %35639 = vmatpush3.msra.mxu0 %v39865_v47  ;;  %v5929_v28 = vpop.xlane.xlu1 %5928  ;;  %v7479_v47 = vand.u32 4294901760, %v40002_v60 }
 0x3d6   :  { %35674 = vmatpush3.msra.mxu1 %v7020_v62  ;;  %35640 = vmatprep.mubr.msk.f32.mxu0 %vm38339_vm2, %v44170_v57  ;;  %38094 = vrcp.f32 %v5929_v28 }
 0x3d7   :  { %35650 = vmatprep.subr.mxu0 %v44170_v57  ;;  %35641 = vmatmul.mubr.f32.vlgmr.msra.gmra.mxu0 %v6503_v46  ;;  %v7480_v38 = vsub.f32 %v40002_v60, %v7479_v47 }
 0x3d8   :  { %35651 = vmatpush3.msra.mxu0 %v6543_v54  ;;  %12540 = vrot.lane.b32.xlu1 %v39579_v33, %s38340_s24  ;;  %v6973_v54 = vsub.f32 %v6971_v48, %v6972_v24 }
 0x3d9   :  { %35652 = vmatprep.subr.mxu0 %v44170_v57  ;;  %8298 = vrot.lane.b32.xlu0 %v39505_v25, %s38337_s21 }
 0x3da   :  { %35653 = vmatpush3.msra.mxu0 %v6550_v43  ;;  %35654 = vmatprep.mubr.msk.f32.mxu0 %vm38339_vm2, %v44170_v57  ;;  %v6974_v6 = vand.u32 4294901760, %v6973_v54 }
 0x3db   :  { %35664 = vmatprep.subr.mxu0 %v44170_v57  ;;  %35675 = vmatprep.mubr.msk.f32.mxu1 %vm38339_vm2, %v44170_v57 }
 0x3dc   :  { %35685 = vmatprep.subr.mxu1 %v44170_v57  ;;  %35655 = vmatmul.mubr.f32.vlgmr.msra.gmra.mxu0 %v39906_v12 }
 0x3dd   :  { %35665 = vmatpush3.msra.mxu0 %v39909_v29  ;;  %35676 = vmatmul.mubr.f32.vlgmr.msra.gmra.mxu1 %v39975_v1 }
 0x3de   :  { %35686 = vmatpush3.msra.mxu1 %v39909_v29  ;;  %12536 = vrot.lane.b32.xlu1 %v39575_v40, %s38340_s24 }
 0x3df   :  { %35666 = vmatprep.subr.mxu0 %v44170_v57  ;;  %35687 = vmatprep.subr.mxu1 %v44170_v57 }
 0x3e0   :  { %9712 = vrot.lane.b32.xlu0 %v44191_v53, %s38340_s24  ;;  %35667 = vmatpush3.msra.mxu0 %v39918_v63 }
 0x3e1   :  { %35688 = vmatpush3.msra.mxu1 %v39918_v63  ;;  %35689 = vmatprep.mubr.msk.f32.mxu1 %vm38339_vm2, %v44170_v57 }
 0x3e2   :  { %35699 = vmatprep.subr.mxu1 %v44170_v57  ;;  %35690 = vmatmul.mubr.f32.vlgmr.msra.gmra.mxu1 %v6972_v24 }
 0x3e3   :  { %v38095_v43 = vpop.eup %38094  ;;  %35700 = vmatpush3.msra.mxu1 %v39909_v29  ;;  %13009 = vrot.lane.b32.xlu1 %v39659_v39, %s38340_s24 }
 0x3e4   :  { %v5949_v2 = vmul.f32 %v38095_v43, %v39813_v59  ;;  %35701 = vmatprep.subr.mxu1 %v44170_v57  ;;  %10185 = vrot.lane.b32.xlu0 %v39177_v16, %s38340_s24  ;;  %v7481_v59 = vand.u32 4294901760, %v7480_v38 }
 0x3e5   :  { %35702 = vmatpush3.msra.mxu1 %v39918_v63  ;;  %35668 = vmatprep.mubr.msk.f32.mxu0 %vm38339_vm2, %v44170_v57  ;;  %v7833_v63 = vpop.permute.xlu1 %7832 }
 0x3e6   :  { %v7369_v26 = vsel %vm5869_vm4, %v5949_v2, 0  ;;  %35678 = vmatprep.subr.mxu0 %v44170_v57  ;;  %35703 = vmatprep.mubr.msk.f32.mxu1 %vm38339_vm2, %v44170_v57 }
 0x3e7   :  { %v40041_v11 = vand.u32 4294901760, %v7369_v26  ;;  %35713 = vmatprep.subr.mxu1 %v44170_v57  ;;  %35669 = vmatmul.mubr.f32.vlgmr.msra.gmra.mxu0 %v6974_v6 }
 0x3e8   :  { %35679 = vmatpush3.msra.mxu0 %v39926_v58  ;;  %35704 = vmatmul.mubr.f32.vlgmr.msra.gmra.mxu1 %v39975_v1 }
 0x3e9   :  { %35714 = vmatpush3.msra.mxu1 %v7481_v59  ;;  %35680 = vmatprep.subr.mxu0 %v44170_v57  ;;  %v40048_v3 = vsub.f32 %v7369_v26, %v40041_v11 }
 0x3ea   :  { %10181 = vrot.lane.b32.xlu0 %v39010_v18, %s38340_s24  ;;  %35681 = vmatpush3.msra.mxu0 %v39936_v35 }
 0x3eb   :  { %35682 = vmatprep.mubr.msk.f32.mxu0 %vm38339_vm2, %v44170_v57  ;;  %35692 = vmatprep.subr.mxu0 %v44170_v57  ;;  %v7440_v20 = vand.u32 4294901760, %v40048_v3 }
 0x3ec   :  { %35683 = vmatmul.mubr.f32.vlgmr.msra.gmra.mxu0 %v6971_v48  ;;  %35715 = vmatprep.subr.mxu1 %v44170_v57 }
 0x3ed   :  { %35693 = vmatpush3.msra.mxu0 %v7011_v10  ;;  %35696 = vmatprep.mubr.msk.f32.mxu0 %vm38339_vm2, %v44170_v57  ;;  %v5932_v12 = vpop.xlane.xlu0 %5931  ;;  %v7441_v29 = vsub.f32 %v40048_v3, %v7440_v20  ;;  %v7831_v10 = vpop.permute.xlu1 %7830 }
 0x3ee   :  { %35694 = vmatprep.subr.mxu0 %v44170_v57  ;;  %10654 = vrot.lane.b32.xlu0 %v39275_v21, %s38340_s24  ;;  %38096 = vrcp.f32 %v5932_v12  ;;  %v40089_v17 = vand.u32 4294901760, %v7831_v10 }
 0x3ef   :  { %35695 = vmatpush3.msra.mxu0 %v7018_v61  ;;  %35717 = vmatprep.mubr.msk.f32.mxu1 %vm38339_vm2, %v44170_v57  ;;  %v7442_v35 = vand.u32 4294901760, %v7441_v29  ;;  %v40084_v61 = vand.u32 4294901760, %v7833_v63 }
 0x3f0   :  { %35706 = vmatprep.subr.mxu0 %v44170_v57  ;;  %35697 = vmatmul.mubr.f32.vlgmr.msra.gmra.mxu0 %v39975_v1  ;;  %v40105_v37 = vsub.f32 %v7831_v10, %v40089_v17 }
 0x3f1   :  { %35707 = vmatpush3.msra.mxu0 %v39985_v55  ;;  %v7363_v46 = vpop.permute.xlu0 %7362  ;;  %35710 = vmatprep.mubr.msk.f32.mxu0 %vm38339_vm2, %v44170_v57  ;;  %v40098_v42 = vsub.f32 %v7833_v63, %v40084_v61 }
 0x3f2   :  { %11127 = vrot.lane.b32.xlu0 %v39336_v9, %s38340_s24  ;;  %v7403_v58 = vand.u32 4294901760, %v7363_v46  ;;  %35708 = vmatprep.subr.mxu0 %v44170_v57 }
 0x3f3   :  { %v7947_v62 = vand.u32 4294901760, %v40098_v42 }
 0x3f4   :  { %v7485_v7 = vsub.f32 %v7363_v46, %v7403_v58  ;;  %35709 = vmatpush3.msra.mxu0 %v7403_v58 }
 0x3f5   :  { %35711 = vmatmul.mubr.f32.vlgmr.msra.gmra.mxu0 %v7442_v35  ;;  %35720 = vmatprep.subr.mxu0 %v44170_v57 }
 0x3f6   :  { %11123 = vrot.lane.b32.xlu0 %v39016_v23, %s38340_s24  ;;  %v7486_v4 = vand.u32 4294901760, %v7485_v7  ;;  %35721 = vmatpush3.msra.mxu0 %v40002_v60  ;;  %v7948_v60 = vsub.f32 %v40098_v42, %v7947_v62 }
 0x3f7   :  { %35722 = vmatprep.subr.mxu0 %v44170_v57  ;;  %35724 = vmatprep.mubr.msk.f32.mxu0 %vm38339_vm2, %v44170_v57 }
 0x3f8   :  { %35723 = vmatpush3.msra.mxu0 %v7485_v7  ;;  %v7487_v32 = vsub.f32 %v7485_v7, %v7486_v4  ;;  %v7949_v43 = vand.u32 4294901760, %v7948_v60 }
 0x3f9   :  { %35725 = vmatmul.mubr.f32.vlgmr.msra.gmra.mxu0 %v40048_v3  ;;  %35734 = vmatprep.subr.mxu0 %v44170_v57 }
 0x3fa   :  { %11596 = vrot.lane.b32.xlu0 %v39433_v27, %s38340_s24  ;;  %35735 = vmatpush3.msra.mxu0 %v7479_v47  ;;  %v7488_v41 = vand.u32 4294901760, %v7487_v32 }
 0x3fb   :  { %v38097_v22 = vpop.eup %38096  ;;  %35736 = vmatprep.subr.mxu0 %v44170_v57  ;;  %35738 = vmatprep.mubr.msk.f32.mxu0 %vm38339_vm2, %v44170_v57 }
 0x3fc   :  { %v5951_v13 = vmul.f32 %v38097_v22, %v39822_v5  ;;  %35716 = vmatpush3.msra.mxu1 %v7488_v41  ;;  %35737 = vmatpush3.msra.mxu0 %v7486_v4  ;;  %v7954_v5 = vand.u32 4294901760, %v40105_v37 }
 0x3fd   :  { %35718 = vmatmul.mubr.f32.vlgmr.msra.gmra.mxu1 %v40041_v11  ;;  %35727 = vmatprep.subr.mxu1 %v44170_v57 }
 0x3fe   :  { %v7837_v1 = vsel %vm5869_vm4, %v5951_v13, 0  ;;  %12069 = vrot.lane.b32.xlu0 %v39494_v44, %s38340_s24  ;;  %35739 = vmatmul.mubr.f32.vlgmr.msra.gmra.mxu0 %v40041_v11  ;;  %v7955_v47 = vsub.f32 %v40105_v37, %v7954_v5 }
 0x3ff   :  { %v40114_v28 = vand.u32 4294901760, %v7837_v1  ;;  %35748 = vmatprep.subr.mxu0 %v44170_v57  ;;  %35728 = vmatpush3.msra.mxu1 %v39985_v55 }
 0x400   :  { %35749 = vmatpush3.msra.mxu0 %v40084_v61  ;;  %35729 = vmatprep.subr.mxu1 %v44170_v57 }
 0x401   :  { %35750 = vmatprep.subr.mxu0 %v44170_v57  ;;  %35730 = vmatpush3.msra.mxu1 %v7403_v58  ;;  %v7907_v48 = vsub.f32 %v7837_v1, %v40114_v28 }
 0x402   :  { %12065 = vrot.lane.b32.xlu0 %v44177_v15, %s38340_s24  ;;  %35731 = vmatprep.mubr.msk.f32.mxu1 %vm38339_vm2, %v44170_v57 }
 0x403   :  { %35751 = vmatpush3.msra.mxu0 %v40089_v17  ;;  %35732 = vmatmul.mubr.f32.vlgmr.msra.gmra.mxu1 %v7440_v20  ;;  %v7908_v24 = vand.u32 4294901760, %v7907_v48 }
 0x404   :  { %35741 = vmatprep.subr.mxu1 %v44170_v57  ;;  %35745 = vmatprep.mubr.msk.f32.mxu1 %vm38339_vm2, %v44170_v57 }
 0x405   :  { %35742 = vmatpush3.msra.mxu1 %v39985_v55  ;;  %35752 = vmatprep.mubr.msk.f32.mxu0 %vm38339_vm2, %v44170_v57  ;;  %v7909_v54 = vsub.f32 %v7907_v48, %v7908_v24  ;;  %v7956_v55 = vand.u32 4294901760, %v7955_v47 }
 0x406   :  { %12538 = vrot.lane.b32.xlu0 %v39591_v49, %s38340_s24  ;;  %35743 = vmatprep.subr.mxu1 %v44170_v57 }
 0x407   :  { %35744 = vmatpush3.msra.mxu1 %v7403_v58  ;;  %35762 = vmatprep.subr.mxu0 %v44170_v57  ;;  %v7910_v6 = vand.u32 4294901760, %v7909_v54 }
 0x408   :  { %35746 = vmatmul.mubr.f32.vlgmr.msra.gmra.mxu1 %v40041_v11  ;;  %35755 = vmatprep.subr.mxu1 %v44170_v57 }
 0x409   :  { %35756 = vmatpush3.msra.mxu1 %v7949_v43  ;;  %35759 = vmatprep.mubr.msk.f32.mxu1 %vm38339_vm2, %v44170_v57 }
 0x40a   :  { %13011 = vrot.lane.b32.xlu0 %v39648_v19, %s38340_s24  ;;  %35757 = vmatprep.subr.mxu1 %v44170_v57 }
 0x40b   :  { %35758 = vmatpush3.msra.mxu1 %v7956_v55  ;;  %35753 = vmatmul.mubr.f32.vlgmr.msra.gmra.mxu0 %v7910_v6 }
 0x40c   :  { %35760 = vmatmul.mubr.f32.vlgmr.msra.gmra.mxu1 %v40114_v28  ;;  %35763 = vmatpush3.msra.mxu0 %v40098_v42 }
 0x40d   :  { %35769 = vmatprep.subr.mxu1 %v44170_v57  ;;  %35764 = vmatprep.subr.mxu0 %v44170_v57 }
 0x40e   :  { %13007 = vrot.lane.b32.xlu0 %v44190_v14, %s38340_s24  ;;  %35770 = vmatpush3.msra.mxu1 %v40084_v61  ;;  %v5935_v38 = vpop.xlane.xlu1 %5934 }
 0x40f   :  { %35765 = vmatpush3.msra.mxu0 %v40105_v37  ;;  %35771 = vmatprep.subr.mxu1 %v44170_v57  ;;  %38098 = vrcp.f32 %v5935_v38 }
 0x410   :  { %35766 = vmatprep.mubr.msk.f32.mxu0 %vm38339_vm2, %v44170_v57  ;;  %35772 = vmatpush3.msra.mxu1 %v40089_v17 }
 0x411   :  { %35773 = vmatprep.mubr.msk.f32.mxu1 %vm38339_vm2, %v44170_v57  ;;  %35776 = vmatprep.subr.mxu0 %v44170_v57 }
 0x412   :  { %13566 = vrot.lane.b32.xlu0 %v44191_v53, %s38341_s25  ;;  %35767 = vmatmul.mubr.f32.vlgmr.msra.gmra.mxu0 %v7907_v48  ;;  %v8301_v2 = vpop.permute.xlu1 %8300 }
 0x413   :  { %35774 = vmatmul.mubr.f32.vlgmr.msra.gmra.mxu1 %v7908_v24  ;;  %35777 = vmatpush3.msra.mxu0 %v7947_v62  ;;  %v40166_v26 = vand.u32 4294901760, %v8301_v2 }
 0x414   :  { %35783 = vmatprep.subr.mxu1 %v44170_v57  ;;  %35778 = vmatprep.subr.mxu0 %v44170_v57 }
 0x415   :  { %35784 = vmatpush3.msra.mxu1 %v40084_v61  ;;  %35779 = vmatpush3.msra.mxu0 %v7954_v5  ;;  %v8414_v11 = vsub.f32 %v8301_v2, %v40166_v26 }
 0x416   :  { %14036 = vrot.lane.b32.xlu0 %v39177_v16, %s38341_s25  ;;  %35785 = vmatprep.subr.mxu1 %v44170_v57  ;;  %v8769_v22 = vpop.permute.xlu1 %8768 }
 0x417   :  { %35780 = vmatprep.mubr.msk.f32.mxu0 %vm38339_vm2, %v44170_v57  ;;  %35786 = vmatpush3.msra.mxu1 %v40089_v17  ;;  %v8415_v59 = vand.u32 4294901760, %v8414_v11  ;;  %v40210_v48 = vand.u32 4294901760, %v8769_v22 }
 0x418   :  { %35787 = vmatprep.mubr.msk.f32.mxu1 %vm38339_vm2, %v44170_v57  ;;  %35781 = vmatmul.mubr.f32.vlgmr.msra.gmra.mxu0 %v40114_v28 }
 0x419   :  { %35788 = vmatmul.mubr.f32.vlgmr.msra.gmra.mxu1 %v40114_v28  ;;  %35790 = vmatprep.subr.mxu0 %v44170_v57  ;;  %v8416_v3 = vsub.f32 %v8414_v11, %v8415_v59  ;;  %v8882_v43 = vsub.f32 %v8769_v22, %v40210_v48 }
 0x41a   :  { %14034 = vrot.lane.b32.xlu0 %v39185_v0, %s38341_s25  ;;  %35791 = vmatpush3.msra.mxu0 %v40166_v26 }
 0x41b   :  { %35797 = vmatprep.subr.mxu1 %v44170_v57  ;;  %v8417_v20 = vand.u32 4294901760, %v8416_v3  ;;  %35792 = vmatprep.subr.mxu0 %v44170_v57  ;;  %v8883_v2 = vand.u32 4294901760, %v8882_v43 }
 0x41c   :  { %35794 = vmatprep.mubr.msk.f32.mxu0 %vm38339_vm2, %v44170_v57  ;;  %35801 = vmatprep.mubr.msk.f32.mxu1 %vm38339_vm2, %v44170_v57  ;;  %v38099_v12 = vpop.eup %38098 }
 0x41d   :  { %35798 = vmatpush3.msra.mxu1 %v8417_v20  ;;  %v5953_v29 = vmul.f32 %v38099_v12, %v39829_v45  ;;  %v8884_v20 = vsub.f32 %v8882_v43, %v8883_v2 }
 0x41e   :  { %35799 = vmatprep.subr.mxu1 %v44170_v57 }
 0x41f   :  { %v8305_v63 = vsel %vm5869_vm4, %v5953_v29, 0 }
 0x420   :  { %v40195_v58 = vand.u32 4294901760, %v8305_v63 }
 0x422   :  { %v8375_v35 = vsub.f32 %v8305_v63, %v40195_v58 }
 0x424   :  { %v8376_v10 = vand.u32 4294901760, %v8375_v35 }
 0x426   :  { %v8377_v32 = vsub.f32 %v8375_v35, %v8376_v10 }
 0x428   :  { %v8378_v13 = vand.u32 4294901760, %v8377_v32 }
 0x43a   :  { %v5938_v46 = vpop.xlane.xlu0 %5937 }
 0x43b   :  { %38100 = vrcp.f32 %v5938_v46 }
 0x442   :  { %v5941_v7 = vpop.xlane.xlu0 %5940 }
 0x443   :  { %38102 = vrcp.f32 %v5941_v7 }
 0x448   :  { %v38101_v4 = vpop.eup %38100 }
 0x449   :  { %v5955_v61 = vmul.f32 %v38101_v4, %v39851_v50  ;;  %v8767_v50 = vpop.permute.xlu1 %8766 }
 0x44a   :  { %v40215_v47 = vand.u32 4294901760, %v8767_v50 }
 0x44b   :  { %v8773_v17 = vsel %vm5869_vm4, %v5955_v61, 0  ;;  %v8299_v41 = vpop.permute.xlu0 %8298 }
 0x44c   :  { %v40200_v45 = vand.u32 4294901760, %v8773_v17  ;;  %v8339_v42 = vand.u32 4294901760, %v8299_v41  ;;  %v8889_v55 = vsub.f32 %v8767_v50, %v40215_v47 }
 0x44d   :  { %v9237_v38 = vpop.permute.xlu1 %9236 }
 0x44e   :  { %v8421_v37 = vsub.f32 %v8299_v41, %v8339_v42  ;;  %35793 = vmatpush3.msra.mxu0 %v8339_v42  ;;  %v40203_v1 = vsub.f32 %v8773_v17, %v40200_v45  ;;  %v40256_v46 = vand.u32 4294901760, %v9237_v38 }
 0x44f   :  { %35795 = vmatmul.mubr.f32.vlgmr.msra.gmra.mxu0 %v8378_v13  ;;  %35804 = vmatprep.subr.mxu0 %v44170_v57 }
 0x450   :  { %v8422_v62 = vand.u32 4294901760, %v8421_v37  ;;  %35805 = vmatpush3.msra.mxu0 %v8414_v11  ;;  %35808 = vmatprep.mubr.msk.f32.mxu0 %vm38339_vm2, %v44170_v57  ;;  %v8844_v5 = vand.u32 4294901760, %v40203_v1  ;;  %v38103_v60 = vpop.eup %38102  ;;  %v9350_v4 = vsub.f32 %v9237_v38, %v40256_v46 }
 0x451   :  { %35806 = vmatprep.subr.mxu0 %v44170_v57  ;;  %v5957_v6 = vmul.f32 %v38103_v60, %v39874_v30  ;;  %v9235_v12 = vpop.permute.xlu1 %9234 }
 0x452   :  { %35807 = vmatpush3.msra.mxu0 %v8421_v37  ;;  %v8423_v28 = vsub.f32 %v8421_v37, %v8422_v62  ;;  %v8845_v54 = vsub.f32 %v40203_v1, %v8844_v5  ;;  %v9351_v41 = vand.u32 4294901760, %v9350_v4 }
 0x453   :  { %35809 = vmatmul.mubr.f32.vlgmr.msra.gmra.mxu0 %v8375_v35  ;;  %35818 = vmatprep.subr.mxu0 %v44170_v57  ;;  %v9241_v11 = vsel %vm5869_vm4, %v5957_v6, 0 }
 0x454   :  { %35819 = vmatpush3.msra.mxu0 %v8415_v59  ;;  %v8424_v24 = vand.u32 4294901760, %v8423_v28  ;;  %35822 = vmatprep.mubr.msk.f32.mxu0 %vm38339_vm2, %v44170_v57  ;;  %v8846_v30 = vand.u32 4294901760, %v8845_v54  ;;  %v8890_v59 = vand.u32 4294901760, %v8889_v55  ;;  %v40239_v3 = vand.u32 4294901760, %v9241_v11  ;;  %v9713_v28 = vpop.permute.xlu0 %9712 }
 0x455   :  { %35820 = vmatprep.subr.mxu0 %v44170_v57  ;;  %v9715_v7 = vpop.permute.xlu1 %9714 }
 0x456   :  { %35800 = vmatpush3.msra.mxu1 %v8424_v24  ;;  %35821 = vmatpush3.msra.mxu0 %v8422_v62  ;;  %v8891_v29 = vsub.f32 %v8889_v55, %v8890_v59  ;;  %v40250_v63 = vsub.f32 %v9241_v11, %v40239_v3  ;;  %v9720_v37 = vsel %vm2124_vm3, %v9715_v7, 0  ;;  %v9352_v62 = vsub.f32 %v9350_v4, %v9351_v41 }
 0x457   :  { %35802 = vmatmul.mubr.f32.vlgmr.msra.gmra.mxu1 %v40195_v58  ;;  %35811 = vmatprep.subr.mxu1 %v44170_v57 }
 0x458   :  { %35823 = vmatmul.mubr.f32.vlgmr.msra.gmra.mxu0 %v40195_v58  ;;  %35832 = vmatprep.subr.mxu0 %v44170_v57  ;;  %v8892_v35 = vand.u32 4294901760, %v8891_v29  ;;  %v9353_v60 = vand.u32 4294901760, %v9352_v62 }
 0x459   :  { %35812 = vmatpush3.msra.mxu1 %v40166_v26  ;;  %35833 = vmatpush3.msra.mxu0 %v40210_v48  ;;  %v9711_v17 = vpop.permute.xlu1 %9710 }
 0x45a   :  { %35813 = vmatprep.subr.mxu1 %v44170_v57  ;;  %35834 = vmatprep.subr.mxu0 %v44170_v57  ;;  %v9716_v13 = vsel %vm2124_vm3, %v9711_v17, 0 }
 0x45b   :  { %35814 = vmatpush3.msra.mxu1 %v8339_v42  ;;  %35815 = vmatprep.mubr.msk.f32.mxu1 %vm38339_vm2, %v44170_v57  ;;  %v40293_v50 = vand.u32 4294901760, %v9716_v13 }
 0x45c   :  { %35835 = vmatpush3.msra.mxu0 %v40215_v47  ;;  %35836 = vmatprep.mubr.msk.f32.mxu0 %vm38339_vm2, %v44170_v57 }
 0x45d   :  { %35816 = vmatmul.mubr.f32.vlgmr.msra.gmra.mxu1 %v8376_v10  ;;  %35825 = vmatprep.subr.mxu1 %v44170_v57  ;;  %v9312_v10 = vand.u32 4294901760, %v40250_v63  ;;  %v40308_v24 = vsub.f32 %v9716_v13, %v40293_v50 }
 0x45e   :  { %35837 = vmatmul.mubr.f32.vlgmr.msra.gmra.mxu0 %v8846_v30  ;;  %35846 = vmatprep.subr.mxu0 %v44170_v57 }
 0x45f   :  { %35826 = vmatpush3.msra.mxu1 %v40166_v26  ;;  %35847 = vmatpush3.msra.mxu0 %v8882_v43  ;;  %v8885_v26 = vand.u32 4294901760, %v8884_v20  ;;  %v9313_v61 = vsub.f32 %v40250_v63, %v9312_v10  ;;  %v10186_v20 = vpop.permute.xlu0 %10185 }
 0x460   :  { %35827 = vmatprep.subr.mxu1 %v44170_v57  ;;  %35848 = vmatprep.subr.mxu0 %v44170_v57  ;;  %v10191_v62 = vsel %vm2124_vm3, %v10186_v20, 0 }
 0x461   :  { %35828 = vmatpush3.msra.mxu1 %v8339_v42  ;;  %35829 = vmatprep.mubr.msk.f32.mxu1 %vm38339_vm2, %v44170_v57  ;;  %v9314_v22 = vand.u32 4294901760, %v9313_v61 }
 0x462   :  { %35849 = vmatpush3.msra.mxu0 %v8889_v55  ;;  %35850 = vmatprep.mubr.msk.f32.mxu0 %vm38339_vm2, %v44170_v57  ;;  %v9791_v55 = vand.u32 4294901760, %v40308_v24 }
 0x463   :  { %35830 = vmatmul.mubr.f32.vlgmr.msra.gmra.mxu1 %v40195_v58  ;;  %35839 = vmatprep.subr.mxu1 %v44170_v57  ;;  %v40261_v58 = vand.u32 4294901760, %v9235_v12 }
 0x464   :  { %35851 = vmatmul.mubr.f32.vlgmr.msra.gmra.mxu0 %v40203_v1  ;;  %35860 = vmatprep.subr.mxu0 %v44170_v57 }
 0x465   :  { %35840 = vmatpush3.msra.mxu1 %v8885_v26  ;;  %35861 = vmatpush3.msra.mxu0 %v8883_v2  ;;  %v9357_v32 = vsub.f32 %v9235_v12, %v40261_v58 }
 0x466   :  { %35841 = vmatprep.subr.mxu1 %v44170_v57  ;;  %35862 = vmatprep.subr.mxu0 %v44170_v57 }
 0x467   :  { %35842 = vmatpush3.msra.mxu1 %v8892_v35  ;;  %35843 = vmatprep.mubr.msk.f32.mxu1 %vm38339_vm2, %v44170_v57  ;;  %v9358_v42 = vand.u32 4294901760, %v9357_v32 }
 0x468   :  { %35863 = vmatpush3.msra.mxu0 %v8890_v59  ;;  %35864 = vmatprep.mubr.msk.f32.mxu0 %vm38339_vm2, %v44170_v57  ;;  %v9792_v59 = vsub.f32 %v40308_v24, %v9791_v55 }
 0x469   :  { %35844 = vmatmul.mubr.f32.vlgmr.msra.gmra.mxu1 %v40200_v45  ;;  %35853 = vmatprep.subr.mxu1 %v44170_v57  ;;  %v9359_v1 = vsub.f32 %v9357_v32, %v9358_v42 }
 0x46a   :  { %35865 = vmatmul.mubr.f32.vlgmr.msra.gmra.mxu0 %v40200_v45  ;;  %35874 = vmatprep.subr.mxu0 %v44170_v57 }
 0x46b   :  { %35854 = vmatpush3.msra.mxu1 %v40210_v48  ;;  %35875 = vmatpush3.msra.mxu0 %v40256_v46  ;;  %v9360_v54 = vand.u32 4294901760, %v9359_v1 }
 0x46c   :  { %35855 = vmatprep.subr.mxu1 %v44170_v57  ;;  %35876 = vmatprep.subr.mxu0 %v44170_v57 }
 0x46d   :  { %35856 = vmatpush3.msra.mxu1 %v40215_v47  ;;  %35857 = vmatprep.mubr.msk.f32.mxu1 %vm38339_vm2, %v44170_v57 }
 0x46e   :  { %35877 = vmatpush3.msra.mxu0 %v40261_v58  ;;  %35878 = vmatprep.mubr.msk.f32.mxu0 %vm38339_vm2, %v44170_v57 }
 0x46f   :  { %35858 = vmatmul.mubr.f32.vlgmr.msra.gmra.mxu1 %v8844_v5  ;;  %35867 = vmatprep.subr.mxu1 %v44170_v57  ;;  %v40300_v5 = vand.u32 4294901760, %v9720_v37 }
 0x470   :  { %35879 = vmatmul.mubr.f32.vlgmr.msra.gmra.mxu0 %v9314_v22  ;;  %35888 = vmatprep.subr.mxu0 %v44170_v57 }
 0x471   :  { %35868 = vmatpush3.msra.mxu1 %v40210_v48  ;;  %35889 = vmatpush3.msra.mxu0 %v9350_v4  ;;  %v9718_v48 = vsel %vm2124_vm3, %v9713_v28, 0  ;;  %v40313_v43 = vsub.f32 %v9720_v37, %v40300_v5  ;;  %v10184_v28 = vpop.permute.xlu1 %10183 }
 0x472   :  { %35869 = vmatprep.subr.mxu1 %v44170_v57  ;;  %35890 = vmatprep.subr.mxu0 %v44170_v57  ;;  %v40315_v6 = vand.u32 4294901760, %v9718_v48 }
 0x473   :  { %35870 = vmatpush3.msra.mxu1 %v40215_v47  ;;  %35871 = vmatprep.mubr.msk.f32.mxu1 %vm38339_vm2, %v44170_v57  ;;  %v9830_v30 = vand.u32 4294901760, %v40313_v43 }
 0x474   :  { %35891 = vmatpush3.msra.mxu0 %v9357_v32  ;;  %35892 = vmatprep.mubr.msk.f32.mxu0 %vm38339_vm2, %v44170_v57  ;;  %v40328_v2 = vsub.f32 %v9718_v48, %v40315_v6  ;;  %v9793_v32 = vand.u32 4294901760, %v9792_v59 }
 0x475   :  { %35872 = vmatmul.mubr.f32.vlgmr.msra.gmra.mxu1 %v40200_v45  ;;  %35881 = vmatprep.subr.mxu1 %v44170_v57  ;;  %v9831_v35 = vsub.f32 %v40313_v43, %v9830_v30 }
 0x476   :  { %35893 = vmatmul.mubr.f32.vlgmr.msra.gmra.mxu0 %v40250_v63  ;;  %35902 = vmatprep.subr.mxu0 %v44170_v57  ;;  %v6121_v47 = vpop.f32.mrf.mxu1  ;;  %v9837_v7 = vand.u32 4294901760, %v40328_v2 }
 0x477   :  { %35882 = vmatpush3.msra.mxu1 %v9353_v60  ;;  %35903 = vmatpush3.msra.mxu0 %v9351_v41  ;;  %v40375_v60 = vand.u32 4294901760, %v10191_v62 }
 0x478   :  { %35883 = vmatprep.subr.mxu1 %v44170_v57  ;;  %35904 = vmatprep.subr.mxu0 %v44170_v57  ;;  %v35593_v45 = vpop.f32.mrf.mxu1  ;;  %v9838_v63 = vsub.f32 %v40328_v2, %v9837_v7 }
 0x479   :  { %35884 = vmatpush3.msra.mxu1 %v9360_v54  ;;  %35885 = vmatprep.mubr.msk.f32.mxu1 %vm38339_vm2, %v44170_v57  ;;  %v10189_v45 = vsel %vm2124_vm3, %v10184_v28, 0 }
 0x47a   :  { %35905 = vmatpush3.msra.mxu0 %v9358_v42  ;;  %35906 = vmatprep.mubr.msk.f32.mxu0 %vm38339_vm2, %v44170_v57  ;;  %v6272_v38 = vpop.f32.mrf.mxu1  ;;  %v9839_v13 = vand.u32 4294901760, %v9838_v63  ;;  %v40390_v20 = vand.u32 4294901760, %v10189_v45 }
 0x47b   :  { %35886 = vmatmul.mubr.f32.vlgmr.msra.gmra.mxu1 %v40239_v3  ;;  %35895 = vmatprep.subr.mxu1 %v44170_v57 }
 0x47c   :  { %35907 = vmatmul.mubr.f32.vlgmr.msra.gmra.mxu0 %v40239_v3  ;;  %35916 = vmatprep.subr.mxu0 %v44170_v57  ;;  %v35607_v11 = vpop.f32.mrf.mxu1 }
 0x47d   :  { %35896 = vmatpush3.msra.mxu1 %v40256_v46  ;;  %35917 = vmatpush3.xpose.msra.mxu0 %v40300_v5 }
 0x47e   :  { %35897 = vmatprep.subr.mxu1 %v44170_v57  ;;  %35899 = vmatprep.mubr.msk.f32.mxu1 %vm38339_vm2, %v44170_v57  ;;  %v6040_v12 = vpop.f32.mrf.mxu0 }
 0x47f   :  { %35898 = vmatpush3.msra.mxu1 %v40261_v58  ;;  %35918 = vmatprep.subr.mxu0 %v44170_v57  ;;  %v6122_v29 = vadd.f32 %v6121_v47, %v6040_v12  ;;  %v6422_v26 = vpop.f32.mrf.mxu1  ;;  %v40393_v12 = vsub.f32 %v10191_v62, %v40375_v60 }
 0x480   :  { %35900 = vmatmul.mubr.f32.vlgmr.msra.gmra.mxu1 %v9312_v10  ;;  %35909 = vmatprep.subr.mxu1 %v44170_v57  ;;  %v35586_v4 = vpop.f32.mrf.mxu0  ;;  %v10182_v10 = vpop.permute.xlu0 %10181 }
 0x481   :  { %35910 = vmatpush3.msra.mxu1 %v40256_v46  ;;  %35919 = vmatpush3.xpose.msra.mxu0 %v40315_v6  ;;  %v35621_v61 = vpop.f32.mrf.mxu1  ;;  %v9832_v46 = vand.u32 4294901760, %v9831_v35  ;;  %v40404_v35 = vsub.f32 %v10189_v45, %v40390_v20  ;;  %v10301_v4 = vand.u32 4294901760, %v40393_v12 }
 0x482   :  { %35911 = vmatprep.subr.mxu1 %v44170_v57  ;;  %35913 = vmatprep.mubr.msk.f32.mxu1 %vm38339_vm2, %v44170_v57 }
 0x483   :  { %35912 = vmatpush3.msra.mxu1 %v40261_v58  ;;  %35920 = vmatprep.mubr.msk.f32.mxu0 %vm38339_vm2, %v44170_v57 }
 0x484   :  { %35914 = vmatmul.mubr.f32.vlgmr.msra.gmra.mxu1 %v40239_v3  ;;  %35921 = vmatmul.mubr.f32.vlgmr.msra.gmra.mxu0 %v9793_v32  ;;  %v10187_v3 = vsel %vm2124_vm3, %v10182_v10, 0 }
 0x485   :  { %35923 = vmatprep.subr.mxu1 %v44170_v57  ;;  %35930 = vmatprep.subr.mxu0 %v44170_v57  ;;  %v6197_v17 = vpop.f32.mrf.mxu0  ;;  %v6589_v41 = vpop.f32.mrf.mxu1  ;;  %v40371_v1 = vand.u32 4294901760, %v10187_v3 }
 0x486   :  { %35924 = vmatpush3.xpose.msra.mxu1 %v9832_v46  ;;  %35931 = vmatpush3.xpose.msra.mxu0 %v40313_v43  ;;  %v6198_v58 = vadd.f32 %v6197_v17, %v6122_v29  ;;  %v10308_v46 = vand.u32 4294901760, %v40404_v35 }
 0x487   :  { %35925 = vmatprep.subr.mxu1 %v44170_v57  ;;  %35932 = vmatprep.subr.mxu0 %v44170_v57  ;;  %v35600_v22 = vpop.f32.mrf.mxu0  ;;  %v35635_v42 = vpop.f32.mrf.mxu1  ;;  %v40386_v59 = vsub.f32 %v10187_v3, %v40371_v1 }
 0x488   :  { %35927 = vmatprep.mubr.msk.f32.mxu1 %vm38339_vm2, %v44170_v57  ;;  %35934 = vmatprep.mubr.msk.f32.mxu0 %vm38339_vm2, %v44170_v57  ;;  %v6273_v37 = vadd.f32 %v6272_v38, %v6198_v58  ;;  %v10309_v58 = vsub.f32 %v40404_v35, %v10308_v46 }
 0x489   :  { %v10262_v29 = vand.u32 4294901760, %v40386_v59 }
 0x48a   :  { %35926 = vmatpush3.xpose.msra.mxu1 %v9839_v13  ;;  %35933 = vmatpush3.xpose.msra.mxu0 %v40328_v2 }
 0x48b   :  { %35937 = vmatprep.subr.mxu1 %v44170_v57  ;;  %35944 = vmatprep.subr.mxu0 %v44170_v57  ;;  %v6349_v48 = vpop.f32.mrf.mxu0  ;;  %v10263_v63 = vsub.f32 %v40386_v59, %v10262_v29 }
 0x48c   :  { %v6350_v47 = vadd.f32 %v6349_v48, %v6273_v37  ;;  %v6740_v54 = vpop.f32.mrf.mxu1 }
 0x48d   :  { %35928 = vmatmul.mubr.f32.vlgmr.msra.gmra.mxu1 %v40293_v50  ;;  %35935 = vmatmul.mubr.f32.vlgmr.msra.gmra.mxu0 %v40308_v24  ;;  %v35614_v38 = vpop.f32.mrf.mxu0  ;;  %v10302_v24 = vsub.f32 %v40393_v12, %v10301_v4 }
 0x48e   :  { %35938 = vmatpush3.xpose.msra.mxu1 %v40300_v5  ;;  %35945 = vmatpush3.xpose.msra.mxu0 %v9830_v30  ;;  %v40383_v2 = vadd.f32 %v6422_v26, %v6350_v47  ;;  %v35649_v11 = vpop.f32.mrf.mxu1  ;;  %v10310_v47 = vand.u32 4294901760, %v10309_v58 }
 0x48f   :  { %35939 = vmatprep.subr.mxu1 %v44170_v57  ;;  %35946 = vmatprep.subr.mxu0 %v44170_v57  ;;  %v10303_v22 = vand.u32 4294901760, %v10302_v24 }
 0x490   :  { %44194 = vst [vmem:[#allocation25_spill] sm:$0xff] %v40383_v2  ;;  %35941 = vmatprep.mubr.msk.f32.mxu1 %vm38339_vm2, %v44170_v57  ;;  %35948 = vmatprep.mubr.msk.f32.mxu0 %vm38339_vm2, %v44170_v57 }
 0x492   :  { %35940 = vmatpush3.xpose.msra.mxu1 %v40315_v6  ;;  %35947 = vmatpush3.xpose.msra.mxu0 %v9837_v7  ;;  %v6508_v43 = vpop.f32.mrf.mxu0  ;;  %v6890_v30 = vpop.f32.mrf.mxu1 }
 0x493   :  { %35951 = vmatprep.subr.mxu1 %v44170_v57  ;;  %35958 = vmatprep.subr.mxu0 %v44170_v57  ;;  %v6590_v26 = vadd.f32 %v6589_v41, %v6508_v43  ;;  %v10657_v7 = vpop.permute.xlu1 %10656  ;;  %v10264_v41 = vand.u32 4294901760, %v10263_v63 }
 0x494   :  { %v35628_v61 = vpop.f32.mrf.mxu0  ;;  %v35663_v32 = vpop.f32.mrf.mxu1 }
 0x495   :  { %35942 = vmatmul.mubr.f32.vlgmr.msra.gmra.mxu1 %v9791_v55  ;;  %35949 = vmatmul.mubr.f32.vlgmr.msra.gmra.mxu0 %v40293_v50 }
 0x496   :  { %35952 = vmatpush3.xpose.msra.mxu1 %v40300_v5  ;;  %35959 = vmatpush3.xpose.msra.mxu0 %v40375_v60 }
 0x497   :  { %35953 = vmatprep.subr.mxu1 %v44170_v57  ;;  %35960 = vmatprep.subr.mxu0 %v44170_v57  ;;  %v6665_v10 = vpop.f32.mrf.mxu0  ;;  %v10653_v3 = vpop.permute.xlu1 %10652 }
 0x498   :  { %35955 = vmatprep.mubr.msk.f32.mxu1 %vm38339_vm2, %v44170_v57  ;;  %35962 = vmatprep.mubr.msk.f32.mxu0 %vm38339_vm2, %v44170_v57  ;;  %v6666_v5 = vadd.f32 %v6665_v10, %v6590_v26  ;;  %v10658_v48 = vsel %vm2124_vm3, %v10653_v3, 0 }
 0x499   :  { %v35642_v55 = vpop.f32.mrf.mxu0  ;;  %v40441_v38 = vand.u32 4294901760, %v10658_v48 }
 0x49a   :  { %35954 = vmatpush3.xpose.msra.mxu1 %v40315_v6  ;;  %35961 = vmatpush3.xpose.msra.mxu0 %v40390_v20  ;;  %v6741_v17 = vadd.f32 %v6740_v54, %v6666_v5  ;;  %v10655_v54 = vpop.permute.xlu0 %10654 }
 0x49b   :  { %35965 = vmatprep.subr.mxu1 %v44170_v57  ;;  %35972 = vmatprep.subr.mxu0 %v44170_v57  ;;  %v10660_v43 = vsel %vm2124_vm3, %v10655_v54, 0 }
 0x49c   :  { %v6817_v42 = vpop.f32.mrf.mxu0  ;;  %v40459_v61 = vand.u32 4294901760, %v10660_v43 }
 0x49d   :  { %35956 = vmatmul.mubr.f32.vlgmr.msra.gmra.mxu1 %v40293_v50  ;;  %35963 = vmatmul.mubr.f32.vlgmr.msra.gmra.mxu0 %v10264_v41  ;;  %v6818_v13 = vadd.f32 %v6817_v42, %v6741_v17  ;;  %v7057_v37 = vpop.f32.mrf.mxu1  ;;  %v10662_v50 = vsel %vm2124_vm3, %v10657_v7, 0 }
 0x49e   :  { %35966 = vmatpush3.xpose.msra.mxu1 %v10303_v22  ;;  %35973 = vmatpush3.xpose.msra.mxu0 %v40393_v12  ;;  %v35656_v6 = vpop.f32.mrf.mxu0  ;;  %v40445_v11 = vand.u32 4294901760, %v10662_v50  ;;  %v40471_v5 = vsub.f32 %v10660_v43, %v40459_v61  ;;  %v11128_v58 = vpop.permute.xlu0 %11127 }
 0x49f   :  { %35967 = vmatprep.subr.mxu1 %v44170_v57  ;;  %35974 = vmatprep.subr.mxu0 %v44170_v57  ;;  %v40432_v62 = vadd.f32 %v6890_v30, %v6818_v13  ;;  %v35677_v28 = vpop.f32.mrf.mxu1  ;;  %v40452_v30 = vsub.f32 %v10658_v48, %v40441_v38 }
 0x4a0   :  { %35969 = vmatprep.mubr.msk.f32.mxu1 %vm38339_vm2, %v44170_v57  ;;  %35976 = vmatprep.mubr.msk.f32.mxu0 %vm38339_vm2, %v44170_v57 }
 0x4a1   :  { %44195 = vst [vmem:[#allocation26_spill] sm:$0xff] %v40432_v62  ;;  %v10733_v10 = vand.u32 4294901760, %v40452_v30 }
 0x4a2   :  { %35968 = vmatpush3.xpose.msra.mxu1 %v10310_v47  ;;  %35975 = vmatpush3.xpose.msra.mxu0 %v40404_v35  ;;  %v7208_v45 = vpop.f32.mrf.mxu1  ;;  %v40457_v35 = vsub.f32 %v10662_v50, %v40445_v11  ;;  %v11124_v48 = vpop.permute.xlu0 %11123 }
 0x4a3   :  { %35979 = vmatprep.subr.mxu1 %v44170_v57  ;;  %35986 = vmatprep.subr.mxu0 %v44170_v57  ;;  %v10734_v41 = vsub.f32 %v40452_v30, %v10733_v10  ;;  %v11129_v50 = vsel %vm2124_vm3, %v11124_v48, 0 }
 0x4a4   :  { %v35691_v12 = vpop.f32.mrf.mxu1  ;;  %v10772_v24 = vand.u32 4294901760, %v40457_v35  ;;  %v40507_v43 = vand.u32 4294901760, %v11129_v50 }
 0x4a5   :  { %35970 = vmatmul.mubr.f32.vlgmr.msra.gmra.mxu1 %v40371_v1  ;;  %35977 = vmatmul.mubr.f32.vlgmr.msra.gmra.mxu0 %v40386_v59  ;;  %v10735_v13 = vand.u32 4294901760, %v10734_v41  ;;  %v11126_v12 = vpop.permute.xlu1 %11125 }
 0x4a6   :  { %35980 = vmatpush3.xpose.msra.mxu1 %v40375_v60  ;;  %35987 = vmatpush3.xpose.msra.mxu0 %v10301_v4  ;;  %v10773_v59 = vsub.f32 %v40457_v35, %v10772_v24 }
 0x4a7   :  { %35981 = vmatprep.subr.mxu1 %v44170_v57  ;;  %35988 = vmatprep.subr.mxu0 %v44170_v57  ;;  %v6976_v26 = vpop.f32.mrf.mxu0 }
 0x4a8   :  { %v7058_v32 = vadd.f32 %v7057_v37, %v6976_v26  ;;  %v7358_v7 = vpop.f32.mrf.mxu1  ;;  %35983 = vmatprep.mubr.msk.f32.mxu1 %vm38339_vm2, %v44170_v57  ;;  %35990 = vmatprep.mubr.msk.f32.mxu0 %vm38339_vm2, %v44170_v57  ;;  %v10774_v28 = vand.u32 4294901760, %v10773_v59 }
 0x4a9   :  { %v35670_v4 = vpop.f32.mrf.mxu0 }
 0x4aa   :  { %35982 = vmatpush3.xpose.msra.mxu1 %v40390_v20  ;;  %35989 = vmatpush3.xpose.msra.mxu0 %v10308_v46  ;;  %v35705_v63 = vpop.f32.mrf.mxu1 }
 0x4ab   :  { %35993 = vmatprep.subr.mxu1 %v44170_v57  ;;  %36000 = vmatprep.subr.mxu0 %v44170_v57 }
 0x4ac   :  { %v7133_v55 = vpop.f32.mrf.mxu0 }
 0x4ad   :  { %35984 = vmatmul.mubr.f32.vlgmr.msra.gmra.mxu1 %v10262_v29  ;;  %35991 = vmatmul.mubr.f32.vlgmr.msra.gmra.mxu0 %v40371_v1  ;;  %v7134_v17 = vadd.f32 %v7133_v55, %v7058_v32  ;;  %v10779_v29 = vand.u32 4294901760, %v40471_v5  ;;  %v11131_v32 = vsel %vm2124_vm3, %v11126_v12, 0 }
 0x4ae   :  { %35994 = vmatpush3.xpose.msra.mxu1 %v40375_v60  ;;  %36001 = vmatpush3.xpose.msra.mxu0 %v40445_v11  ;;  %v35684_v46 = vpop.f32.mrf.mxu0 }
 0x4af   :  { %35995 = vmatprep.subr.mxu1 %v44170_v57  ;;  %36002 = vmatprep.subr.mxu0 %v44170_v57  ;;  %v7209_v22 = vadd.f32 %v7208_v45, %v7134_v17  ;;  %v10780_v6 = vsub.f32 %v40471_v5, %v10779_v29  ;;  %v40522_v17 = vand.u32 4294901760, %v11131_v32 }
 0x4b0   :  { %v7285_v42 = vpop.f32.mrf.mxu0  ;;  %35997 = vmatprep.mubr.msk.f32.mxu1 %vm38339_vm2, %v44170_v57  ;;  %36004 = vmatprep.mubr.msk.f32.mxu0 %vm38339_vm2, %v44170_v57 }
 0x4b1   :  { %v7286_v60 = vadd.f32 %v7285_v42, %v7209_v22  ;;  %v10781_v54 = vand.u32 4294901760, %v10780_v6  ;;  %v40536_v59 = vsub.f32 %v11131_v32, %v40522_v17 }
 0x4b2   :  { %35996 = vmatpush3.xpose.msra.mxu1 %v40390_v20  ;;  %36003 = vmatpush3.xpose.msra.mxu0 %v40459_v61  ;;  %v35698_v3 = vpop.f32.mrf.mxu0 }
 0x4b3   :  { %v40491_v37 = vadd.f32 %v7358_v7, %v7286_v60  ;;  %36007 = vmatprep.subr.mxu1 %v44170_v57  ;;  %36014 = vmatprep.subr.mxu0 %v44170_v57 }
 0x4b5   :  { %44196 = vst [vmem:[#allocation32_spill] sm:$0xff] %v40491_v37  ;;  %35998 = vmatmul.mubr.f32.vlgmr.msra.gmra.mxu1 %v40371_v1  ;;  %36005 = vmatmul.mubr.f32.vlgmr.msra.gmra.mxu0 %v10735_v13  ;;  %v7444_v47 = vpop.f32.mrf.mxu0  ;;  %v11133_v1 = vsel %vm2124_vm3, %v11128_v58, 0  ;;  %v11599_v13 = vpop.permute.xlu1 %11598 }
 0x4b6   :  { %36008 = vmatpush3.xpose.msra.mxu1 %v10774_v28  ;;  %36015 = vmatpush3.xpose.msra.mxu0 %v40457_v35  ;;  %v40511_v35 = vand.u32 4294901760, %v11133_v1 }
 0x4b7   :  { %36009 = vmatprep.subr.mxu1 %v44170_v57  ;;  %36016 = vmatprep.subr.mxu0 %v44170_v57  ;;  %v35712_v20 = vpop.f32.mrf.mxu0 }
 0x4b8   :  { %36011 = vmatprep.mubr.msk.f32.mxu1 %vm38339_vm2, %v44170_v57  ;;  %36018 = vmatprep.mubr.msk.f32.mxu0 %vm38339_vm2, %v44170_v57  ;;  %v40525_v46 = vsub.f32 %v11133_v1, %v40511_v35 }
 0x4b9   :  { %v7601_v45 = vpop.f32.mrf.mxu0 }
 0x4ba   :  { %36010 = vmatpush3.xpose.msra.mxu1 %v10781_v54  ;;  %36017 = vmatpush3.xpose.msra.mxu0 %v40471_v5  ;;  %v40518_v5 = vsub.f32 %v11129_v50, %v40507_v43  ;;  %v11243_v42 = vand.u32 4294901760, %v40525_v46 }
 0x4bb   :  { %36021 = vmatprep.subr.mxu1 %v44170_v57  ;;  %36028 = vmatprep.subr.mxu0 %v44170_v57  ;;  %v35726_v26 = vpop.f32.mrf.mxu0 }
 0x4bc   :  { %v11204_v58 = vand.u32 4294901760, %v40518_v5 }
 0x4bd   :  { %36012 = vmatmul.mubr.f32.vlgmr.msra.gmra.mxu1 %v40441_v38  ;;  %36019 = vmatmul.mubr.f32.vlgmr.msra.gmra.mxu0 %v40452_v30  ;;  %v7525_v7 = vpop.f32.mrf.mxu1  ;;  %v11250_v30 = vand.u32 4294901760, %v40536_v59 }
 0x4be   :  { %36022 = vmatpush3.xpose.msra.mxu1 %v40445_v11  ;;  %36029 = vmatpush3.xpose.msra.mxu0 %v10772_v24  ;;  %v7526_v4 = vadd.f32 %v7525_v7, %v7444_v47  ;;  %v7753_v63 = vpop.f32.mrf.mxu0  ;;  %v11205_v6 = vsub.f32 %v40518_v5, %v11204_v58 }
 0x4bf   :  { %36023 = vmatprep.subr.mxu1 %v44170_v57  ;;  %36030 = vmatprep.subr.mxu0 %v44170_v57  ;;  %v35719_v55 = vpop.f32.mrf.mxu1  ;;  %v11251_v50 = vsub.f32 %v40536_v59, %v11250_v30 }
 0x4c0   :  { %36025 = vmatprep.mubr.msk.f32.mxu1 %vm38339_vm2, %v44170_v57  ;;  %36032 = vmatprep.mubr.msk.f32.mxu0 %vm38339_vm2, %v44170_v57  ;;  %v35740_v24 = vpop.f32.mrf.mxu0  ;;  %v7602_v41 = vadd.f32 %v7601_v45, %v7526_v4  ;;  %v11206_v47 = vand.u32 4294901760, %v11205_v6  ;;  %v11595_v45 = vpop.permute.xlu1 %11594 }
 0x4c1   :  { %v11600_v32 = vsel %vm2124_vm3, %v11595_v45, 0  ;;  %v11252_v7 = vand.u32 4294901760, %v11251_v50  ;;  %v11597_v4 = vpop.permute.xlu0 %11596 }
 0x4c2   :  { %36024 = vmatpush3.xpose.msra.mxu1 %v40459_v61  ;;  %36031 = vmatpush3.xpose.msra.mxu0 %v10779_v29  ;;  %v40573_v55 = vand.u32 4294901760, %v11600_v32 }
 0x4c3   :  { %36035 = vmatprep.subr.mxu1 %v44170_v57  ;;  %36042 = vmatprep.subr.mxu0 %v44170_v57  ;;  %v7676_v22 = vpop.f32.mrf.mxu1 }
 0x4c4   :  { %v7677_v60 = vadd.f32 %v7676_v22, %v7602_v41 }
 0x4c5   :  { %36026 = vmatmul.mubr.f32.vlgmr.msra.gmra.mxu1 %v10733_v10  ;;  %36033 = vmatmul.mubr.f32.vlgmr.msra.gmra.mxu0 %v40441_v38  ;;  %v35733_v3 = vpop.f32.mrf.mxu1  ;;  %v11244_v10 = vsub.f32 %v40525_v46, %v11243_v42  ;;  %v12070_v45 = vpop.permute.xlu0 %12069 }
 0x4c6   :  { %36036 = vmatpush3.xpose.msra.mxu1 %v40445_v11  ;;  %36043 = vmatpush3.xpose.msra.mxu0 %v40511_v35  ;;  %v7754_v29 = vadd.f32 %v7753_v63, %v7677_v60  ;;  %v11602_v60 = vsel %vm2124_vm3, %v11597_v4, 0 }
 0x4c7   :  { %36037 = vmatprep.subr.mxu1 %v44170_v57  ;;  %36044 = vmatprep.subr.mxu0 %v44170_v57  ;;  %v11245_v54 = vand.u32 4294901760, %v11244_v10  ;;  %v40589_v6 = vand.u32 4294901760, %v11602_v60 }
 0x4c8   :  { %36039 = vmatprep.mubr.msk.f32.mxu1 %vm38339_vm2, %v44170_v57  ;;  %36046 = vmatprep.mubr.msk.f32.mxu0 %vm38339_vm2, %v44170_v57  ;;  %v7826_v11 = vpop.f32.mrf.mxu1 }
 0x4c9   :  { %v40555_v28 = vadd.f32 %v7826_v11, %v7754_v29  ;;  %v40584_v29 = vsub.f32 %v11600_v32, %v40573_v55 }
 0x4ca   :  { %36038 = vmatpush3.xpose.msra.mxu1 %v40459_v61  ;;  %36045 = vmatpush3.xpose.msra.mxu0 %v40522_v17  ;;  %v35747_v48 = vpop.f32.mrf.mxu1 }
 0x4cb   :  { %44197 = vst [vmem:[#allocation33_spill] sm:$0xff] %v40555_v28  ;;  %36049 = vmatprep.subr.mxu1 %v44170_v57  ;;  %36056 = vmatprep.subr.mxu0 %v44170_v57  ;;  %v7912_v20 = vpop.f32.mrf.mxu0 }
 0x4cc   :  { %v7993_v1 = vpop.f32.mrf.mxu1 }
 0x4cd   :  { %36040 = vmatmul.mubr.f32.vlgmr.msra.gmra.mxu1 %v40441_v38  ;;  %36047 = vmatmul.mubr.f32.vlgmr.msra.gmra.mxu0 %v11206_v47  ;;  %v7994_v12 = vadd.f32 %v7993_v1, %v7912_v20  ;;  %v35754_v26 = vpop.f32.mrf.mxu0  ;;  %v11604_v38 = vsel %vm2124_vm3, %v11599_v13, 0  ;;  %v11675_v47 = vand.u32 4294901760, %v40584_v29  ;;  %v11720_v1 = vsub.f32 %v11602_v60, %v40589_v6 }
 0x4ce   :  { %36050 = vmatpush3.xpose.msra.mxu1 %v11245_v54  ;;  %36057 = vmatpush3.xpose.msra.mxu0 %v40525_v46  ;;  %v35761_v61 = vpop.f32.mrf.mxu1  ;;  %v40577_v41 = vand.u32 4294901760, %v11604_v38 }
 0x4cf   :  { %36051 = vmatprep.subr.mxu1 %v44170_v57  ;;  %36058 = vmatprep.subr.mxu0 %v44170_v57  ;;  %v11721_v26 = vand.u32 4294901760, %v11720_v1  ;;  %v12066_v61 = vpop.permute.xlu0 %12065 }
 0x4d0   :  { %36053 = vmatprep.mubr.msk.f32.mxu1 %vm38339_vm2, %v44170_v57  ;;  %36060 = vmatprep.mubr.msk.f32.mxu0 %vm38339_vm2, %v44170_v57  ;;  %v11713_v13 = vsub.f32 %v11604_v38, %v40577_v41  ;;  %v12068_v38 = vpop.permute.xlu1 %12067 }
 0x4d2   :  { %36052 = vmatpush3.xpose.msra.mxu1 %v11252_v7  ;;  %36059 = vmatpush3.xpose.msra.mxu0 %v40536_v59  ;;  %v8069_v63 = vpop.f32.mrf.mxu0  ;;  %v11714_v54 = vand.u32 4294901760, %v11713_v13  ;;  %v12075_v7 = vsel %vm2124_vm3, %v12070_v45, 0 }
 0x4d3   :  { %36063 = vmatprep.subr.mxu1 %v44170_v57  ;;  %36070 = vmatprep.subr.mxu0 %v44170_v57  ;;  %v8070_v46 = vadd.f32 %v8069_v63, %v7994_v12  ;;  %v8144_v24 = vpop.f32.mrf.mxu1  ;;  %v40633_v4 = vand.u32 4294901760, %v12075_v7  ;;  %v12073_v63 = vsel %vm2124_vm3, %v12068_v38, 0 }
 0x4d4   :  { %v35768_v22 = vpop.f32.mrf.mxu0  ;;  %v11715_v12 = vsub.f32 %v11713_v13, %v11714_v54 }
 0x4d5   :  { %36054 = vmatmul.mubr.f32.vlgmr.msra.gmra.mxu1 %v40507_v43  ;;  %36061 = vmatmul.mubr.f32.vlgmr.msra.gmra.mxu0 %v40518_v5  ;;  %v8145_v3 = vadd.f32 %v8144_v24, %v8070_v46  ;;  %v35775_v59 = vpop.f32.mrf.mxu1  ;;  %v11722_v5 = vsub.f32 %v11720_v1, %v11721_v26  ;;  %v40644_v24 = vand.u32 4294901760, %v12073_v63  ;;  %v12184_v22 = vsub.f32 %v12075_v7, %v40633_v4 }
 0x4d6   :  { %36064 = vmatpush3.xpose.msra.mxu1 %v40511_v35  ;;  %36071 = vmatpush3.xpose.msra.mxu0 %v11243_v42 }
 0x4d7   :  { %36065 = vmatprep.subr.mxu1 %v44170_v57  ;;  %36072 = vmatprep.subr.mxu0 %v44170_v57  ;;  %v11723_v32 = vand.u32 4294901760, %v11722_v5  ;;  %v12185_v59 = vand.u32 4294901760, %v12184_v22 }
 0x4d8   :  { %36067 = vmatprep.mubr.msk.f32.mxu1 %vm38339_vm2, %v44170_v57  ;;  %36074 = vmatprep.mubr.msk.f32.mxu0 %vm38339_vm2, %v44170_v57  ;;  %v8221_v10 = vpop.f32.mrf.mxu0 }
 0x4d9   :  { %v8222_v11 = vadd.f32 %v8221_v10, %v8145_v3  ;;  %v8294_v42 = vpop.f32.mrf.mxu1  ;;  %v12191_v3 = vsub.f32 %v12073_v63, %v40644_v24 }
 0x4da   :  { %36066 = vmatpush3.xpose.msra.mxu1 %v40522_v17  ;;  %36073 = vmatpush3.xpose.msra.mxu0 %v11250_v30  ;;  %v35782_v48 = vpop.f32.mrf.mxu0  ;;  %v11676_v30 = vsub.f32 %v40584_v29, %v11675_v47 }
 0x4db   :  { %36077 = vmatprep.subr.mxu1 %v44170_v57  ;;  %36084 = vmatprep.subr.mxu0 %v44170_v57  ;;  %v40599_v20 = vadd.f32 %v8294_v42, %v8222_v11  ;;  %v35789_v50 = vpop.f32.mrf.mxu1  ;;  %v12192_v11 = vand.u32 4294901760, %v12191_v3  ;;  %v12186_v42 = vsub.f32 %v12184_v22, %v12185_v59 }
 0x4dd   :  { %44198 = vst [vmem:[#allocation21_spill] sm:$0xff] %v40599_v20  ;;  %36068 = vmatmul.mubr.f32.vlgmr.msra.gmra.mxu1 %v11204_v58  ;;  %36075 = vmatmul.mubr.f32.vlgmr.msra.gmra.mxu0 %v40507_v43  ;;  %v11716_v58 = vand.u32 4294901760, %v11715_v12  ;;  %v12187_v48 = vand.u32 4294901760, %v12186_v42 }
 0x4de   :  { %36078 = vmatpush3.xpose.msra.mxu1 %v40511_v35  ;;  %36085 = vmatpush3.xpose.msra.mxu0 %v40577_v41  ;;  %v11677_v35 = vand.u32 4294901760, %v11676_v30 }
 0x4df   :  { %36079 = vmatprep.subr.mxu1 %v44170_v57  ;;  %36086 = vmatprep.subr.mxu0 %v44170_v57 }
 0x4e0   :  { %36081 = vmatprep.mubr.msk.f32.mxu1 %vm38339_vm2, %v44170_v57  ;;  %36088 = vmatprep.mubr.msk.f32.mxu0 %vm38339_vm2, %v44170_v57 }
 0x4e2   :  { %36080 = vmatpush3.xpose.msra.mxu1 %v40522_v17  ;;  %36087 = vmatpush3.xpose.msra.mxu0 %v40589_v6  ;;  %v12071_v17 = vsel %vm2124_vm3, %v12066_v61, 0 }
 0x4e3   :  { %36091 = vmatprep.subr.mxu1 %v44170_v57  ;;  %36098 = vmatprep.subr.mxu0 %v44170_v57 }
 0x4e5   :  { %36082 = vmatmul.mubr.f32.vlgmr.msra.gmra.mxu1 %v40507_v43  ;;  %36089 = vmatmul.mubr.f32.vlgmr.msra.gmra.mxu0 %v11677_v35  ;;  %v40629_v43 = vand.u32 4294901760, %v12071_v17 }
 0x4e6   :  { %36092 = vmatpush3.xpose.msra.mxu1 %v11716_v58  ;;  %36099 = vmatpush3.xpose.msra.mxu0 %v11713_v13  ;;  %v12541_v13 = vpop.permute.xlu1 %12540 }
 0x4e7   :  { %36093 = vmatprep.subr.mxu1 %v44170_v57  ;;  %36100 = vmatprep.subr.mxu0 %v44170_v57  ;;  %v40640_v46 = vsub.f32 %v12071_v17, %v40629_v43 }
 0x4e8   :  { %36095 = vmatprep.mubr.msk.f32.mxu1 %vm38339_vm2, %v44170_v57  ;;  %36102 = vmatprep.mubr.msk.f32.mxu0 %vm38339_vm2, %v44170_v57 }
 0x4e9   :  { %v12146_v60 = vand.u32 4294901760, %v40640_v46 }
 0x4ea   :  { %36094 = vmatpush3.xpose.msra.mxu1 %v11723_v32  ;;  %36101 = vmatpush3.xpose.msra.mxu0 %v11720_v1  ;;  %v12539_v1 = vpop.permute.xlu0 %12538 }
 0x4eb   :  { %36105 = vmatprep.subr.mxu1 %v44170_v57  ;;  %36112 = vmatprep.subr.mxu0 %v44170_v57  ;;  %v12147_v10 = vsub.f32 %v40640_v46, %v12146_v60  ;;  %v12544_v45 = vsel %vm2124_vm3, %v12539_v1, 0 }
 0x4ec   :  { %v40699_v35 = vand.u32 4294901760, %v12544_v45 }
 0x4ed   :  { %36096 = vmatmul.mubr.f32.vlgmr.msra.gmra.mxu1 %v40573_v55  ;;  %36103 = vmatmul.mubr.f32.vlgmr.msra.gmra.mxu0 %v40584_v29  ;;  %v12193_v29 = vsub.f32 %v12191_v3, %v12192_v11 }
 0x4ee   :  { %36106 = vmatpush3.xpose.msra.mxu1 %v40577_v41  ;;  %36113 = vmatpush3.xpose.msra.mxu0 %v11714_v54  ;;  %v12546_v54 = vsel %vm2124_vm3, %v12541_v13, 0  ;;  %v40711_v61 = vsub.f32 %v12544_v45, %v40699_v35  ;;  %v13012_v32 = vpop.permute.xlu0 %13011 }
 0x4ef   :  { %36107 = vmatprep.subr.mxu1 %v44170_v57  ;;  %36114 = vmatprep.subr.mxu0 %v44170_v57  ;;  %v12194_v50 = vand.u32 4294901760, %v12193_v29  ;;  %v40685_v30 = vand.u32 4294901760, %v12546_v54 }
 0x4f0   :  { %36109 = vmatprep.mubr.msk.f32.mxu1 %vm38339_vm2, %v44170_v57  ;;  %36116 = vmatprep.mubr.msk.f32.mxu0 %vm38339_vm2, %v44170_v57  ;;  %v12663_v63 = vand.u32 4294901760, %v40711_v61 }
 0x4f2   :  { %36108 = vmatpush3.xpose.msra.mxu1 %v40589_v6  ;;  %36115 = vmatpush3.xpose.msra.mxu0 %v11721_v26  ;;  %v40697_v26 = vsub.f32 %v12546_v54, %v40685_v30 }
 0x4f3   :  { %36119 = vmatprep.subr.mxu1 %v44170_v57  ;;  %36126 = vmatprep.subr.mxu0 %v44170_v57 }
 0x4f4   :  { %v12656_v58 = vand.u32 4294901760, %v40697_v26 }
 0x4f5   :  { %36110 = vmatmul.mubr.f32.vlgmr.msra.gmra.mxu1 %v11675_v47  ;;  %36117 = vmatmul.mubr.f32.vlgmr.msra.gmra.mxu0 %v40573_v55  ;;  %v12537_v47 = vpop.permute.xlu1 %12536 }
 0x4f6   :  { %36120 = vmatpush3.xpose.msra.mxu1 %v40577_v41  ;;  %36127 = vmatpush3.xpose.msra.mxu0 %v40633_v4  ;;  %v12148_v41 = vand.u32 4294901760, %v12147_v10  ;;  %v12657_v38 = vsub.f32 %v40697_v26, %v12656_v58 }
 0x4f7   :  { %36121 = vmatprep.subr.mxu1 %v44170_v57  ;;  %36128 = vmatprep.subr.mxu0 %v44170_v57 }
 0x4f8   :  { %36123 = vmatprep.mubr.msk.f32.mxu1 %vm38339_vm2, %v44170_v57  ;;  %36130 = vmatprep.mubr.msk.f32.mxu0 %vm38339_vm2, %v44170_v57 }
 0x4fa   :  { %36122 = vmatpush3.xpose.msra.mxu1 %v40589_v6  ;;  %36129 = vmatpush3.xpose.msra.mxu0 %v40644_v24  ;;  %v12542_v6 = vsel %vm2124_vm3, %v12537_v47, 0 }
 0x4fb   :  { %36133 = vmatprep.subr.mxu1 %v44170_v57  ;;  %36140 = vmatprep.subr.mxu0 %v44170_v57 }
 0x4fd   :  { %36124 = vmatmul.mubr.f32.vlgmr.msra.gmra.mxu1 %v40573_v55  ;;  %36131 = vmatmul.mubr.f32.vlgmr.msra.gmra.mxu0 %v12148_v41  ;;  %v40681_v55 = vand.u32 4294901760, %v12542_v6  ;;  %v13017_v41 = vsel %vm2124_vm3, %v13012_v32, 0 }
 0x4fe   :  { %36134 = vmatpush3.xpose.msra.mxu1 %v12187_v48  ;;  %36141 = vmatpush3.xpose.msra.mxu0 %v12184_v22  ;;  %v13010_v48 = vpop.permute.xlu1 %13009  ;;  %v40747_v54 = vand.u32 4294901760, %v13017_v41 }
 0x4ff   :  { %36135 = vmatprep.subr.mxu1 %v44170_v57  ;;  %36142 = vmatprep.subr.mxu0 %v44170_v57  ;;  %v40692_v12 = vsub.f32 %v12542_v6, %v40681_v55  ;;  %v13015_v1 = vsel %vm2124_vm3, %v13010_v48, 0 }
 0x500   :  { %36137 = vmatprep.mubr.msk.f32.mxu1 %vm38339_vm2, %v44170_v57  ;;  %36144 = vmatprep.mubr.msk.f32.mxu0 %vm38339_vm2, %v44170_v57 }
 0x501   :  { %v12617_v5 = vand.u32 4294901760, %v40692_v12 }
 0x502   :  { %36136 = vmatpush3.xpose.msra.mxu1 %v12194_v50  ;;  %36143 = vmatpush3.xpose.msra.mxu0 %v12191_v3  ;;  %v12658_v3 = vand.u32 4294901760, %v12657_v38  ;;  %v40761_v38 = vsub.f32 %v13017_v41, %v40747_v54 }
 0x503   :  { %36147 = vmatprep.subr.mxu1 %v44170_v57  ;;  %36154 = vmatprep.subr.mxu0 %v44170_v57  ;;  %v12618_v17 = vsub.f32 %v40692_v12, %v12617_v5 }
 0x505   :  { %36138 = vmatmul.mubr.f32.vlgmr.msra.gmra.mxu1 %v40629_v43  ;;  %36145 = vmatmul.mubr.f32.vlgmr.msra.gmra.mxu0 %v40640_v46  ;;  %v12619_v46 = vand.u32 4294901760, %v12618_v17 }
 0x506   :  { %36148 = vmatpush3.xpose.msra.mxu1 %v40633_v4  ;;  %36155 = vmatpush3.xpose.msra.mxu0 %v12185_v59  ;;  %v13008_v59 = vpop.permute.xlu0 %13007 }
 0x507   :  { %36149 = vmatprep.subr.mxu1 %v44170_v57  ;;  %36156 = vmatprep.subr.mxu0 %v44170_v57  ;;  %v13013_v10 = vsel %vm2124_vm3, %v13008_v59, 0 }
 0x508   :  { %36151 = vmatprep.mubr.msk.f32.mxu1 %vm38339_vm2, %v44170_v57  ;;  %36158 = vmatprep.mubr.msk.f32.mxu0 %vm38339_vm2, %v44170_v57  ;;  %v40743_v50 = vand.u32 4294901760, %v13013_v10 }
 0x50a   :  { %36150 = vmatpush3.xpose.msra.mxu1 %v40644_v24  ;;  %36157 = vmatpush3.xpose.msra.mxu0 %v12192_v11  ;;  %v40754_v17 = vsub.f32 %v13013_v10, %v40743_v50 }
 0x50b   :  { %36161 = vmatprep.subr.mxu1 %v44170_v57  ;;  %36168 = vmatprep.subr.mxu0 %v44170_v57 }
 0x50d   :  { %36152 = vmatmul.mubr.f32.vlgmr.msra.gmra.mxu1 %v12146_v60  ;;  %36159 = vmatmul.mubr.f32.vlgmr.msra.gmra.mxu0 %v40629_v43  ;;  %v12664_v60 = vsub.f32 %v40711_v61, %v12663_v63 }
 0x50e   :  { %36162 = vmatpush3.xpose.msra.mxu1 %v40633_v4  ;;  %36169 = vmatpush3.xpose.msra.mxu0 %v40685_v30 }
 0x50f   :  { %36163 = vmatprep.subr.mxu1 %v44170_v57  ;;  %36170 = vmatprep.subr.mxu0 %v44170_v57  ;;  %v8380_v7 = vpop.f32.mrf.mxu0  ;;  %v12665_v11 = vand.u32 4294901760, %v12664_v60 }
 0x510   :  { %36165 = vmatprep.mubr.msk.f32.mxu1 %vm38339_vm2, %v44170_v57  ;;  %36172 = vmatprep.mubr.msk.f32.mxu0 %vm38339_vm2, %v44170_v57 }
 0x511   :  { %v35796_v4 = vpop.f32.mrf.mxu0 }
 0x512   :  { %36164 = vmatpush3.xpose.msra.mxu1 %v40644_v24  ;;  %36171 = vmatpush3.xpose.msra.mxu0 %v40699_v35 }
 0x513   :  { %36175 = vmatprep.subr.mxu1 %v44170_v57  ;;  %36182 = vmatprep.subr.mxu0 %v44170_v57  ;;  %v8537_v22 = vpop.f32.mrf.mxu0 }
 0x515   :  { %36166 = vmatmul.mubr.f32.vlgmr.msra.gmra.mxu1 %v40629_v43  ;;  %36173 = vmatmul.mubr.f32.vlgmr.msra.gmra.mxu0 %v12619_v46  ;;  %v35810_v13 = vpop.f32.mrf.mxu0  ;;  %v13088_v46 = vand.u32 4294901760, %v40754_v17 }
 0x516   :  { %36176 = vmatpush3.xpose.msra.mxu1 %v12658_v3  ;;  %36183 = vmatpush3.xpose.msra.mxu0 %v40697_v26  ;;  %v13127_v3 = vand.u32 4294901760, %v40761_v38 }
 0x517   :  { %36177 = vmatprep.subr.mxu1 %v44170_v57  ;;  %36184 = vmatprep.subr.mxu0 %v44170_v57  ;;  %v8461_v24 = vpop.f32.mrf.mxu1  ;;  %v13089_v10 = vsub.f32 %v40754_v17, %v13088_v46 }
 0x518   :  { %36179 = vmatprep.mubr.msk.f32.mxu1 %vm38339_vm2, %v44170_v57  ;;  %36186 = vmatprep.mubr.msk.f32.mxu0 %vm38339_vm2, %v44170_v57  ;;  %v8462_v43 = vadd.f32 %v8461_v24, %v8380_v7  ;;  %v8689_v42 = vpop.f32.mrf.mxu0  ;;  %v40758_v7 = vand.u32 4294901760, %v13015_v1 }
 0x519   :  { %v35803_v29 = vpop.f32.mrf.mxu1 }
 0x51a   :  { %36178 = vmatpush3.xpose.msra.mxu1 %v12665_v11  ;;  %36185 = vmatpush3.xpose.msra.mxu0 %v40711_v61  ;;  %v35824_v47 = vpop.f32.mrf.mxu0  ;;  %v8538_v6 = vadd.f32 %v8537_v22, %v8462_v43  ;;  %v40772_v60 = vsub.f32 %v13015_v1, %v40758_v7 }
 0x51b   :  { %36189 = vmatprep.subr.mxu1 %v44170_v57  ;;  %36196 = vmatprep.subr.mxu0 %v44170_v57 }
 0x51c   :  { %v13134_v11 = vand.u32 4294901760, %v40772_v60 }
 0x51d   :  { %36180 = vmatmul.mubr.f32.vlgmr.msra.gmra.mxu1 %v40681_v55  ;;  %36187 = vmatmul.mubr.f32.vlgmr.msra.gmra.mxu0 %v40692_v12  ;;  %v8612_v45 = vpop.f32.mrf.mxu1  ;;  %v13128_v12 = vsub.f32 %v40761_v38, %v13127_v3 }
 0x51e   :  { %36190 = vmatpush3.xpose.msra.mxu1 %v40685_v30  ;;  %36197 = vmatpush3.xpose.msra.mxu0 %v12656_v58  ;;  %v8613_v26 = vadd.f32 %v8612_v45, %v8538_v6  ;;  %v8848_v61 = vpop.f32.mrf.mxu0  ;;  %v13135_v29 = vsub.f32 %v40772_v60, %v13134_v11 }
 0x51f   :  { %36191 = vmatprep.subr.mxu1 %v44170_v57  ;;  %36198 = vmatprep.subr.mxu0 %v44170_v57  ;;  %v35817_v32 = vpop.f32.mrf.mxu1  ;;  %v13129_v48 = vand.u32 4294901760, %v13128_v12 }
 0x520   :  { %36193 = vmatprep.mubr.msk.f32.mxu1 %vm38339_vm2, %v44170_v57  ;;  %36200 = vmatprep.mubr.msk.f32.mxu0 %vm38339_vm2, %v44170_v57  ;;  %v35838_v58 = vpop.f32.mrf.mxu0  ;;  %v8690_v4 = vadd.f32 %v8689_v42, %v8613_v26  ;;  %v13090_v42 = vand.u32 4294901760, %v13089_v10  ;;  %v13136_v1 = vand.u32 4294901760, %v13135_v29 }
 0x522   :  { %36192 = vmatpush3.xpose.msra.mxu1 %v40699_v35  ;;  %36199 = vmatpush3.xpose.msra.mxu0 %v12663_v63 }
 0x523   :  { %36203 = vmatprep.subr.mxu1 %v44170_v57  ;;  %36210 = vmatprep.subr.mxu0 %v44170_v57  ;;  %v8762_v22 = vpop.f32.mrf.mxu1 }
 0x524   :  { %v40775_v59 = vadd.f32 %v8762_v22, %v8690_v4  ;;  %v9005_v13 = vpop.f32.mrf.mxu0 }
 0x525   :  { %36194 = vmatmul.mubr.f32.vlgmr.msra.gmra.mxu1 %v12617_v5  ;;  %36201 = vmatmul.mubr.f32.vlgmr.msra.gmra.mxu0 %v40681_v55  ;;  %v35831_v63 = vpop.f32.mrf.mxu1 }
 0x526   :  { %44199 = vst [vmem:[#allocation16_spill] sm:$0xff] %v40775_v59  ;;  %36204 = vmatpush3.xpose.msra.mxu1 %v40685_v30  ;;  %36211 = vmatpush3.xpose.msra.mxu0 %v40747_v54  ;;  %v35852_v24 = vpop.f32.mrf.mxu0 }
 0x527   :  { %36205 = vmatprep.subr.mxu1 %v44170_v57  ;;  %36212 = vmatprep.subr.mxu0 %v44170_v57 }
 0x528   :  { %36207 = vmatprep.mubr.msk.f32.mxu1 %vm38339_vm2, %v44170_v57  ;;  %36214 = vmatprep.mubr.msk.f32.mxu0 %vm38339_vm2, %v44170_v57 }
 0x529   :  { %v8929_v30 = vpop.f32.mrf.mxu1 }
 0x52a   :  { %36206 = vmatpush3.xpose.msra.mxu1 %v40699_v35  ;;  %36213 = vmatpush3.xpose.msra.mxu0 %v40758_v7  ;;  %v8930_v5 = vadd.f32 %v8929_v30, %v8848_v61  ;;  %v9157_v43 = vpop.f32.mrf.mxu0 }
 0x52b   :  { %36217 = vmatprep.subr.mxu1 %v44170_v57  ;;  %36224 = vmatprep.subr.mxu0 %v44170_v57  ;;  %v35845_v41 = vpop.f32.mrf.mxu1 }
 0x52c   :  { %v35866_v47 = vpop.f32.mrf.mxu0  ;;  %v9006_v6 = vadd.f32 %v9005_v13, %v8930_v5 }
 0x52d   :  { %36208 = vmatmul.mubr.f32.vlgmr.msra.gmra.mxu1 %v40681_v55  ;;  %36215 = vmatmul.mubr.f32.vlgmr.msra.gmra.mxu0 %v13090_v42 }
 0x52e   :  { %36218 = vmatpush3.xpose.msra.mxu1 %v13129_v48  ;;  %36225 = vmatpush3.xpose.msra.mxu0 %v40761_v38 }
 0x52f   :  { %36219 = vmatprep.subr.mxu1 %v44170_v57  ;;  %36226 = vmatprep.subr.mxu0 %v44170_v57  ;;  %v9080_v35 = vpop.f32.mrf.mxu1 }
 0x530   :  { %36221 = vmatprep.mubr.msk.f32.mxu1 %vm38339_vm2, %v44170_v57  ;;  %36228 = vmatprep.mubr.msk.f32.mxu0 %vm38339_vm2, %v44170_v57  ;;  %v9081_v45 = vadd.f32 %v9080_v35, %v9006_v6  ;;  %v9316_v26 = vpop.f32.mrf.mxu0 }
 0x531   :  { %v35859_v61 = vpop.f32.mrf.mxu1 }
 0x532   :  { %36220 = vmatpush3.xpose.msra.mxu1 %v13136_v1  ;;  %36227 = vmatpush3.xpose.msra.mxu0 %v40772_v60  ;;  %v35880_v55 = vpop.f32.mrf.mxu0  ;;  %v9158_v32 = vadd.f32 %v9157_v43, %v9081_v45 }
 0x533   :  { %36231 = vmatprep.subr.mxu1 %v44170_v57  ;;  %36238 = vmatprep.subr.mxu0 %v44170_v57 }
 0x535   :  { %36222 = vmatmul.mubr.f32.vlgmr.msra.gmra.mxu1 %v40743_v50  ;;  %36229 = vmatmul.mubr.f32.vlgmr.msra.gmra.mxu0 %v40754_v17  ;;  %v9230_v38 = vpop.f32.mrf.mxu1 }
 0x536   :  { %36232 = vmatpush3.xpose.msra.mxu1 %v40747_v54  ;;  %36239 = vmatpush3.xpose.msra.mxu0 %v13127_v3  ;;  %v40812_v58 = vadd.f32 %v9230_v38, %v9158_v32  ;;  %v9473_v4 = vpop.f32.mrf.mxu0 }
 0x537   :  { %36233 = vmatprep.subr.mxu1 %v44170_v57  ;;  %36240 = vmatprep.subr.mxu0 %v44170_v57  ;;  %v35873_v22 = vpop.f32.mrf.mxu1 }
 0x538   :  { %44200 = vst [vmem:[#allocation17_spill] sm:$0xff] %v40812_v58  ;;  %v35894_v60 = vpop.f32.mrf.mxu0  ;;  %36235 = vmatprep.mubr.msk.f32.mxu1 %vm38339_vm2, %v44170_v57  ;;  %36242 = vmatprep.mubr.msk.f32.mxu0 %vm38339_vm2, %v44170_v57 }
 0x53a   :  { %36234 = vmatpush3.xpose.msra.mxu1 %v40758_v7  ;;  %36241 = vmatpush3.xpose.msra.mxu0 %v13134_v11 }
 0x53b   :  { %v9397_v13 = vpop.f32.mrf.mxu1  ;;  %36245 = vmatprep.subr.mxu1 %v44170_v57  ;;  %36252 = vmatprep.subr.mxu0 %v44170_v57 }
 0x53c   :  { %v9398_v3 = vadd.f32 %v9397_v13, %v9316_v26  ;;  %v9625_v63 = vpop.f32.mrf.mxu0 }
 0x53d   :  { %36236 = vmatmul.mubr.f32.vlgmr.msra.gmra.mxu1 %v13088_v46  ;;  %36243 = vmatmul.mubr.f32.vlgmr.msra.gmra.mxu0 %v40743_v50  ;;  %v35887_v24 = vpop.f32.mrf.mxu1 }
 0x53e   :  { %36246 = vmatpush3.xpose.msra.mxu1 %v40747_v54  ;;  %v35908_v10 = vpop.f32.mrf.mxu0  ;;  %v9474_v12 = vadd.f32 %v9473_v4, %v9398_v3  ;;  %36249 = vmatprep.mubr.msk.f32.mxu1 %vm38339_vm2, %v44170_v57 }
 0x53f   :  { %36247 = vmatprep.subr.mxu1 %v44170_v57  ;;  %36256 = vmatprep.mubr.msk.f32.mxu0 %vm38339_vm2, %v44170_v57 }
 0x540   :  { %v9548_v11 = vpop.f32.mrf.mxu1 }
 0x541   :  { %v9549_v30 = vadd.f32 %v9548_v11, %v9474_v12 }
 0x542   :  { %36248 = vmatpush3.xpose.msra.mxu1 %v40758_v7  ;;  %v35901_v17 = vpop.f32.mrf.mxu1 }
 0x543   :  { %v9626_v46 = vadd.f32 %v9625_v63, %v9549_v30  ;;  %36259 = vmatprep.subr.mxu1 %v44170_v57 }
 0x544   :  { %v9698_v5 = vpop.f32.mrf.mxu1  ;;  %v9795_v54 = vpop.f32.mrf.mxu0 }
 0x545   :  { %v40834_v43 = vadd.f32 %v9698_v5, %v9626_v46  ;;  %36250 = vmatmul.mubr.f32.vlgmr.msra.gmra.mxu1 %v40743_v50 }
 0x546   :  { %v35915_v42 = vpop.f32.mrf.mxu1  ;;  %v35922_v41 = vpop.f32.mrf.mxu0  ;;  %36263 = vmatprep.mubr.msk.f32.mxu1 %vm38339_vm2, %v44170_v57 }
 0x547   :  { %44201 = vst [vmem:[#allocation18_spill] sm:$0xff] %v40834_v43 }
 0x54d   :  { %v9876_v29 = vpop.f32.mrf.mxu1  ;;  %v9952_v48 = vpop.f32.mrf.mxu0 }
 0x54e   :  { %v9877_v7 = vadd.f32 %v9876_v29, %v9795_v54 }
 0x54f   :  { %v35929_v47 = vpop.f32.mrf.mxu1  ;;  %v35936_v6 = vpop.f32.mrf.mxu0 }
 0x550   :  { %v9953_v45 = vadd.f32 %v9952_v48, %v9877_v7 }
 0x555   :  { %v10027_v35 = vpop.f32.mrf.mxu1  ;;  %v10104_v1 = vpop.f32.mrf.mxu0 }
 0x556   :  { %v10028_v55 = vadd.f32 %v10027_v35, %v9953_v45 }
 0x557   :  { %v35943_v26 = vpop.f32.mrf.mxu1  ;;  %v35950_v61 = vpop.f32.mrf.mxu0 }
 0x558   :  { %v10105_v32 = vadd.f32 %v10104_v1, %v10028_v55 }
 0x55d   :  { %v10177_v38 = vpop.f32.mrf.mxu1  ;;  %v10266_v4 = vpop.f32.mrf.mxu0 }
 0x55e   :  { %v40839_v50 = vadd.f32 %v10177_v38, %v10105_v32 }
 0x55f   :  { %v35957_v22 = vpop.f32.mrf.mxu1  ;;  %v35964_v60 = vpop.f32.mrf.mxu0 }
 0x560   :  { %v13478_v13 = vsel %vm5869_vm4, %v40839_v50, -inf }
 0x561   :  { %13479 = vmax.xlane.f32.xlu1 %v13478_v13 }
 0x565   :  { %v10347_v3 = vpop.f32.mrf.mxu1  ;;  %v10423_v63 = vpop.f32.mrf.mxu0 }
 0x566   :  { %v10348_v12 = vadd.f32 %v10347_v3, %v10266_v4 }
 0x567   :  { %v35971_v24 = vpop.f32.mrf.mxu1  ;;  %v35978_v10 = vpop.f32.mrf.mxu0 }
 0x568   :  { %v10424_v17 = vadd.f32 %v10423_v63, %v10348_v12 }
 0x56d   :  { %v10498_v11 = vpop.f32.mrf.mxu1  ;;  %v10575_v30 = vpop.f32.mrf.mxu0 }
 0x56e   :  { %v10499_v54 = vadd.f32 %v10498_v11, %v10424_v17 }
 0x56f   :  { %v35985_v46 = vpop.f32.mrf.mxu1  ;;  %v35992_v5 = vpop.f32.mrf.mxu0 }
 0x570   :  { %v10576_v42 = vadd.f32 %v10575_v30, %v10499_v54 }
 0x572   :  { %13568 = vrot.lane.b32.xlu1 %v44192_v52, %s38341_s25 }
 0x575   :  { %v10648_v41 = vpop.f32.mrf.mxu1  ;;  %v10737_v29 = vpop.f32.mrf.mxu0 }
 0x576   :  { %v40845_v48 = vadd.f32 %v10648_v41, %v10576_v42 }
 0x577   :  { %v35999_v47 = vpop.f32.mrf.mxu1  ;;  %v36006_v6 = vpop.f32.mrf.mxu0 }
 0x578   :  { %v13481_v7 = vsel %vm5869_vm4, %v40845_v48, -inf }
 0x579   :  { %13482 = vmax.xlane.f32.xlu0 %v13481_v7 }
 0x57d   :  { %v10818_v35 = vpop.f32.mrf.mxu1  ;;  %v10894_v1 = vpop.f32.mrf.mxu0 }
 0x57e   :  { %v10819_v61 = vadd.f32 %v10818_v35, %v10737_v29 }
 0x57f   :  { %v36013_v45 = vpop.f32.mrf.mxu1  ;;  %v36020_v26 = vpop.f32.mrf.mxu0 }
 0x580   :  { %v10895_v38 = vadd.f32 %v10894_v1, %v10819_v61 }
 0x585   :  { %v10969_v55 = vpop.f32.mrf.mxu1  ;;  %v11046_v32 = vpop.f32.mrf.mxu0 }
 0x586   :  { %v10970_v60 = vadd.f32 %v10969_v55, %v10895_v38 }
 0x587   :  { %v36027_v4 = vpop.f32.mrf.mxu1  ;;  %v36034_v22 = vpop.f32.mrf.mxu0 }
 0x588   :  { %v11047_v13 = vadd.f32 %v11046_v32, %v10970_v60 }
 0x58d   :  { %v11119_v3 = vpop.f32.mrf.mxu1  ;;  %v11208_v63 = vpop.f32.mrf.mxu0 }
 0x58e   :  { %v40849_v24 = vadd.f32 %v11119_v3, %v11047_v13 }
 0x58f   :  { %v36041_v10 = vpop.f32.mrf.mxu1  ;;  %v36048_v12 = vpop.f32.mrf.mxu0 }
 0x590   :  { %v13484_v11 = vsel %vm5869_vm4, %v40849_v24, -inf }
 0x591   :  { %13485 = vmax.xlane.f32.xlu0 %v13484_v11 }
 0x595   :  { %v11289_v30 = vpop.f32.mrf.mxu1  ;;  %v11365_v17 = vpop.f32.mrf.mxu0 }
 0x596   :  { %v11290_v54 = vadd.f32 %v11289_v30, %v11208_v63 }
 0x597   :  { %v36055_v46 = vpop.f32.mrf.mxu1  ;;  %v36062_v5 = vpop.f32.mrf.mxu0 }
 0x598   :  { %v11366_v29 = vadd.f32 %v11365_v17, %v11290_v54 }
 0x59d   :  { %v11440_v42 = vpop.f32.mrf.mxu1  ;;  %v11517_v41 = vpop.f32.mrf.mxu0 }
 0x59e   :  { %v11441_v7 = vadd.f32 %v11440_v42, %v11366_v29 }
 0x59f   :  { %v36069_v47 = vpop.f32.mrf.mxu1  ;;  %v36076_v6 = vpop.f32.mrf.mxu0 }
 0x5a0   :  { %v11518_v35 = vadd.f32 %v11517_v41, %v11441_v7 }
 0x5a5   :  { %v11590_v1 = vpop.f32.mrf.mxu1  ;;  %v11679_v45 = vpop.f32.mrf.mxu0 }
 0x5a6   :  { %v40853_v26 = vadd.f32 %v11590_v1, %v11518_v35 }
 0x5a7   :  { %v36083_v61 = vpop.f32.mrf.mxu1  ;;  %v36090_v55 = vpop.f32.mrf.mxu0 }
 0x5a8   :  { %v13487_v32 = vsel %vm5869_vm4, %v40853_v26, -inf }
 0x5a9   :  { %13488 = vmax.xlane.f32.xlu1 %v13487_v32 }
 0x5ad   :  { %v11760_v38 = vpop.f32.mrf.mxu1  ;;  %v11836_v4 = vpop.f32.mrf.mxu0 }
 0x5ae   :  { %v11761_v13 = vadd.f32 %v11760_v38, %v11679_v45 }
 0x5af   :  { %v36097_v22 = vpop.f32.mrf.mxu1  ;;  %v36104_v60 = vpop.f32.mrf.mxu0 }
 0x5b0   :  { %v11837_v10 = vadd.f32 %v11836_v4, %v11761_v13 }
 0x5b5   :  { %v11911_v3 = vpop.f32.mrf.mxu1  ;;  %v11988_v63 = vpop.f32.mrf.mxu0 }
 0x5b6   :  { %v11912_v30 = vadd.f32 %v11911_v3, %v11837_v10 }
 0x5b7   :  { %v36111_v12 = vpop.f32.mrf.mxu1  ;;  %v36118_v11 = vpop.f32.mrf.mxu0 }
 0x5b8   :  { %v11989_v17 = vadd.f32 %v11988_v63, %v11912_v30 }
 0x5bd   :  { %v12061_v46 = vpop.f32.mrf.mxu1  ;;  %v12150_v5 = vpop.f32.mrf.mxu0 }
 0x5be   :  { %v40857_v54 = vadd.f32 %v12061_v46, %v11989_v17 }
 0x5bf   :  { %v36125_v42 = vpop.f32.mrf.mxu1  ;;  %v36132_v41 = vpop.f32.mrf.mxu0 }
 0x5c0   :  { %v13490_v29 = vsel %vm5869_vm4, %v40857_v54, -inf }
 0x5c1   :  { %13491 = vmax.xlane.f32.xlu0 %v13490_v29  ;;  %v13567_v29 = vpop.permute.xlu0 %13566 }
 0x5c5   :  { %v12231_v47 = vpop.f32.mrf.mxu1  ;;  %v12307_v6 = vpop.f32.mrf.mxu0 }
 0x5c6   :  { %v12232_v1 = vadd.f32 %v12231_v47, %v12150_v5 }
 0x5c7   :  { %v36139_v7 = vpop.f32.mrf.mxu1  ;;  %v36146_v35 = vpop.f32.mrf.mxu0 }
 0x5c8   :  { %v12308_v55 = vadd.f32 %v12307_v6, %v12232_v1  ;;  %v40867_v7 = vand.u32 4294901760, %v13567_v29 }
 0x5cd   :  { %v12382_v45 = vpop.f32.mrf.mxu1  ;;  %v12459_v61 = vpop.f32.mrf.mxu0 }
 0x5ce   :  { %v12383_v4 = vadd.f32 %v12382_v45, %v12308_v55 }
 0x5cf   :  { %v36153_v32 = vpop.f32.mrf.mxu1  ;;  %v36160_v38 = vpop.f32.mrf.mxu0 }
 0x5d0   :  { %v12460_v22 = vadd.f32 %v12459_v61, %v12383_v4  ;;  %v40872_v61 = vsub.f32 %v13567_v29, %v40867_v7 }
 0x5d5   :  { %v12532_v60 = vpop.f32.mrf.mxu1  ;;  %v12621_v13 = vpop.f32.mrf.mxu0 }
 0x5d6   :  { %v40861_v3 = vadd.f32 %v12532_v60, %v12460_v22 }
 0x5d7   :  { %v36167_v63 = vpop.f32.mrf.mxu1  ;;  %14502 = vrot.lane.b32.xlu0 %v39275_v21, %s38341_s25  ;;  %v36174_v10 = vpop.f32.mrf.mxu0 }
 0x5d8   :  { %v13493_v12 = vsel %vm5869_vm4, %v40861_v3, -inf  ;;  %v44133_v63 = vand.u32 4294901760, %v40872_v61 }
 0x5d9   :  { %13494 = vmax.xlane.f32.xlu1 %v13493_v12 }
 0x5dd   :  { %v12702_v11 = vpop.f32.mrf.mxu1  ;;  %v12778_v30 = vpop.f32.mrf.mxu0 }
 0x5de   :  { %v12703_v5 = vadd.f32 %v12702_v11, %v12621_v13 }
 0x5df   :  { %v36181_v17 = vpop.f32.mrf.mxu1  ;;  %v36188_v46 = vpop.f32.mrf.mxu0 }
 0x5e0   :  { %v12779_v35 = vadd.f32 %v12778_v30, %v12703_v5 }
 0x5e5   :  { %v12853_v42 = vpop.f32.mrf.mxu1  ;;  %v12930_v41 = vpop.f32.mrf.mxu0 }
 0x5e6   :  { %v12854_v45 = vadd.f32 %v12853_v42, %v12779_v35  ;;  %v13691_v42 = vsub.f32 %v40872_v61, %v44133_v63 }
 0x5e7   :  { %v36195_v47 = vpop.f32.mrf.mxu1  ;;  %v36202_v6 = vpop.f32.mrf.mxu0 }
 0x5e8   :  { %v12931_v4 = vadd.f32 %v12930_v41, %v12854_v45  ;;  %v40895_v6 = vpop.permute.xlu0 %14036  ;;  %v13692_v35 = vand.u32 4294901760, %v13691_v42 }
 0x5ea   :  { %v13480_v1 = vpop.xlane.xlu1 %13479  ;;  %14504 = vrot.lane.b32.xlu1 %v39263_v31, %s38341_s25 }
 0x5ed   :  { %v13003_v55 = vpop.f32.mrf.mxu1  ;;  %v13092_v32 = vpop.f32.mrf.mxu0 }
 0x5ee   :  { %v13569_v38 = vpop.permute.xlu1 %13568  ;;  %v40877_v10 = vadd.f32 %v13003_v55, %v12931_v4  ;;  %v40899_v4 = vpop.permute.xlu0 %14034 }
 0x5ef   :  { %v40874_v22 = vand.u32 4294901760, %v13569_v38  ;;  %v36209_v60 = vpop.f32.mrf.mxu1  ;;  %v36216_v13 = vpop.f32.mrf.mxu0 }
 0x5f0   :  { %v13496_v46 = vsel %vm5869_vm4, %v40877_v10, -inf }
 0x5f1   :  { %v40880_v12 = vsub.f32 %v13569_v38, %v40874_v22  ;;  %36253 = vmatpush3.msra.mxu0 %v40874_v22 }
 0x5f2   :  { %36254 = vmatprep.subr.mxu0 %v44170_v57 }
 0x5f3   :  { %v44134_v11 = vand.u32 4294901760, %v40880_v12  ;;  %36255 = vmatpush3.msra.mxu0 %v40867_v7 }
 0x5f4   :  { %36266 = vmatprep.subr.mxu0 %v44170_v57 }
 0x5f5   :  { %v13173_v30 = vpop.f32.mrf.mxu1  ;;  %v13249_v17 = vpop.f32.mrf.mxu0  ;;  %v13684_v5 = vsub.f32 %v40880_v12, %v44134_v11 }
 0x5f6   :  { %13497 = vmax.xlane.f32.xlu0 %v13496_v46  ;;  %v13174_v45 = vadd.f32 %v13173_v30, %v13092_v32  ;;  %v13502_v30 = vsub.f32 %v40839_v50, %v13480_v1 }
 0x5f7   :  { %v36223_v41 = vpop.f32.mrf.mxu1  ;;  %v36230_v29 = vpop.f32.mrf.mxu0  ;;  %v13685_v47 = vand.u32 4294901760, %v13684_v5 }
 0x5f8   :  { %v13250_v46 = vadd.f32 %v13249_v17, %v13174_v45 }
 0x5f9   :  { %36260 = vmatpush3.msra.mxu1 %v13685_v47 }
 0x5fa   :  { %36261 = vmatprep.subr.mxu1 %v44170_v57 }
 0x5fb   :  { %36262 = vmatpush3.msra.mxu1 %v13692_v35 }
 0x5fc   :  { %36273 = vmatprep.subr.mxu1 %v44170_v57 }
 0x5fd   :  { %v13324_v55 = vpop.f32.mrf.mxu1  ;;  %v13401_v38 = vpop.f32.mrf.mxu0 }
 0x5fe   :  { %v13325_v29 = vadd.f32 %v13324_v55, %v13250_v46 }
 0x5ff   :  { %v36237_v60 = vpop.f32.mrf.mxu1  ;;  %v36244_v13 = vpop.f32.mrf.mxu0 }
 0x600   :  { %v13402_v42 = vadd.f32 %v13401_v38, %v13325_v29 }
 0x602   :  { %v13483_v41 = vpop.xlane.xlu0 %13482 }
 0x603   :  { %v13503_v5 = vsub.f32 %v40845_v48, %v13483_v41  ;;  %v13510_v48 = vmul.f32 1.442695, %v13502_v30 }
 0x605   :  { %v13512_v63 = vmul.f32 1.442695, %v13503_v5  ;;  %v13474_v47 = vpop.f32.mrf.mxu1 }
 0x606   :  { %v13475_v35 = vadd.f32 %v13474_v47, %v13402_v42 }
 0x607   :  { %38104 = vpow2.f32 %v13512_v63  ;;  %v36251_v11 = vpop.f32.mrf.mxu1 }
 0x608   :  { %v13499_v32 = vsel %vm5869_vm4, %v13475_v35, -inf  ;;  %38106 = vpow2.f32 %v13510_v48 }
 0x60c   :  { %14972 = vrot.lane.b32.xlu0 %v39336_v9, %s38341_s25 }
 0x60e   :  { %13500 = vmax.xlane.f32.xlu1 %v13499_v32 }
 0x614   :  { %v40906_v60 = vpop.eup %38104 }
 0x615   :  { %v13529_v17 = vsel %vm5869_vm4, %v40906_v60, 0.0  ;;  %v40911_v55 = vpop.eup %38106 }
 0x616   :  { %13530 = vadd.xlane.f32.xlu1 %v13529_v17  ;;  %v13526_v38 = vsel %vm5869_vm4, %v40911_v55, 0.0 }
 0x61a   :  { %v13486_v45 = vpop.xlane.xlu0 %13485 }
 0x61b   :  { %v13504_v63 = vsub.f32 %v40849_v24, %v13486_v45 }
 0x61d   :  { %v13514_v11 = vmul.f32 1.442695, %v13504_v63 }
 0x61f   :  { %38108 = vpow2.f32 %v13514_v11 }
 0x62b   :  { %13527 = vadd.xlane.f32.xlu0 %v13526_v38 }
 0x62c   :  { %v40915_v50 = vpop.eup %38108 }
 0x62d   :  { %v13532_v1 = vsel %vm5869_vm4, %v40915_v50, 0.0 }
 0x62f   :  { %13533 = vadd.xlane.f32.xlu0 %v13532_v1 }
 0x632   :  { %v13489_v13 = vpop.xlane.xlu1 %13488 }
 0x633   :  { %v13505_v46 = vsub.f32 %v40853_v26, %v13489_v13 }
 0x635   :  { %v13516_v41 = vmul.f32 1.442695, %v13505_v46 }
 0x637   :  { %38110 = vpow2.f32 %v13516_v41 }
 0x644   :  { %v40920_v24 = vpop.eup %38110 }
 0x645   :  { %v13535_v29 = vsel %vm5869_vm4, %v40920_v24, 0.0 }
 0x646   :  { %13536 = vadd.xlane.f32.xlu1 %v13535_v29 }
 0x64a   :  { %v13492_v5 = vpop.xlane.xlu0 %13491 }
 0x64b   :  { %v13506_v47 = vsub.f32 %v40857_v54, %v13492_v5 }
 0x64d   :  { %v13518_v42 = vmul.f32 1.442695, %v13506_v47 }
 0x64e   :  { %v40938_v45 = vpop.permute.xlu0 %14502 }
 0x64f   :  { %38112 = vpow2.f32 %v13518_v42 }
 0x657   :  { %15440 = vrot.lane.b32.xlu1 %v39421_v51, %s38341_s25 }
 0x65b   :  { %15438 = vrot.lane.b32.xlu1 %v39433_v27, %s38341_s25 }
 0x65c   :  { %v40929_v26 = vpop.eup %38112 }
 0x65d   :  { %v13538_v32 = vsel %vm5869_vm4, %v40929_v26, 0.0 }
 0x65e   :  { %13539 = vadd.xlane.f32.xlu0 %v13538_v32 }
 0x662   :  { %v13495_v30 = vpop.xlane.xlu1 %13494 }
 0x663   :  { %v13507_v17 = vsub.f32 %v40861_v3, %v13495_v30  ;;  %v40980_v30 = vand.u32 4294901760, %v40895_v6 }
 0x665   :  { %v13520_v48 = vmul.f32 1.442695, %v13507_v17 }
 0x666   :  { %v40949_v46 = vpop.permute.xlu1 %14504 }
 0x667   :  { %38114 = vpow2.f32 %v13520_v48  ;;  %v40987_v48 = vand.u32 4294901760, %v40899_v4 }
 0x674   :  { %14970 = vrot.lane.b32.xlu0 %v39347_v36, %s38341_s25  ;;  %v40936_v54 = vpop.eup %38114 }
 0x675   :  { %v13541_v63 = vsel %vm5869_vm4, %v40936_v54, 0.0 }
 0x67f   :  { %v13498_v11 = vpop.xlane.xlu0 %13497  ;;  %13542 = vadd.xlane.f32.xlu1 %v13541_v63 }
 0x680   :  { %v13508_v38 = vsub.f32 %v40877_v10, %v13498_v11  ;;  %v40992_v11 = vsub.f32 %v40895_v6, %v40980_v30 }
 0x682   :  { %v13522_v1 = vmul.f32 1.442695, %v13508_v38 }
 0x683   :  { %v40969_v47 = vpop.permute.xlu0 %14972 }
 0x684   :  { %38116 = vpow2.f32 %v13522_v1 }
 0x690   :  { %15908 = vrot.lane.b32.xlu1 %v39494_v44, %s38341_s25 }
 0x691   :  { %v40945_v3 = vpop.eup %38116 }
 0x692   :  { %v13544_v13 = vsel %vm5869_vm4, %v40945_v3, 0.0 }
 0x693   :  { %13545 = vadd.xlane.f32.xlu0 %v13544_v13  ;;  %v41003_v13 = vsub.f32 %v40899_v4, %v40987_v48 }
 0x694   :  { %16376 = vrot.lane.b32.xlu1 %v39579_v33, %s38341_s25 }
 0x697   :  { %v13501_v41 = vpop.xlane.xlu1 %13500 }
 0x698   :  { %v13509_v29 = vsub.f32 %v13475_v35, %v13501_v41  ;;  %16374 = vrot.lane.b32.xlu1 %v39591_v49, %s38341_s25 }
 0x69a   :  { %v13524_v10 = vmul.f32 1.442695, %v13509_v29  ;;  %v14158_v29 = vand.u32 4294901760, %v41003_v13 }
 0x69c   :  { %38118 = vpow2.f32 %v13524_v10  ;;  %16844 = vrot.lane.b32.xlu1 %v39648_v19, %s38341_s25 }
 0x69f   :  { %v13531_v32 = vpop.xlane.xlu1 %13530 }
 0x6a0   :  { %16842 = vrot.lane.b32.xlu1 %v39659_v39, %s38341_s25 }
 0x6a4   :  { %17354 = vrot.lane.b32.xlu1 %v44192_v52, %s38342_s28 }
 0x6a8   :  { %17350 = vrot.lane.b32.xlu1 %v44193_v34, %s38342_s28 }
 0x6a9   :  { %v40963_v5 = vpop.eup %38118 }
 0x6aa   :  { %v13547_v35 = vsel %vm5869_vm4, %v40963_v5, 0.0 }
 0x6ab   :  { %13548 = vadd.xlane.f32.xlu0 %v13547_v35 }
 0x6ac   :  { %17823 = vrot.lane.b32.xlu1 %v39185_v0, %s38342_s28 }
 0x6b0   :  { %18296 = vrot.lane.b32.xlu1 %v39263_v31, %s38342_s28 }
 0x6b4   :  { %v13528_v42 = vpop.xlane.xlu0 %13527  ;;  %18292 = vrot.lane.b32.xlu1 %v39259_v8, %s38342_s28 }
 0x6b5   :  { %38120 = vrcp.f32 %v13528_v42 }
 0x6b6   :  { %38122 = vrcp.f32 %v13531_v32 }
 0x6b8   :  { %18765 = vrot.lane.b32.xlu1 %v39347_v36, %s38342_s28  ;;  %v13534_v35 = vpop.xlane.xlu0 %13533 }
 0x6b9   :  { %38124 = vrcp.f32 %v13534_v35 }
 0x6bc   :  { %19238 = vrot.lane.b32.xlu1 %v39421_v51, %s38342_s28 }
 0x6c0   :  { %19234 = vrot.lane.b32.xlu1 %v39417_v56, %s38342_s28 }
 0x6c1   :  { %15906 = vrot.lane.b32.xlu0 %v39505_v25, %s38341_s25 }
 0x6c2   :  { %v38121_v17 = vpop.eup %38120 }
 0x6c3   :  { %v13551_v63 = vmul.f32 %v38121_v17, %v40911_v55  ;;  %v38123_v41 = vpop.eup %38122  ;;  %v14151_v55 = vand.u32 4294901760, %v40992_v11  ;;  %v14159_v17 = vsub.f32 %v41003_v13, %v14158_v29 }
 0x6c4   :  { %19707 = vrot.lane.b32.xlu1 %v39505_v25, %s38342_s28  ;;  %v13553_v10 = vmul.f32 %v38123_v41, %v40906_v60  ;;  %v41046_v41 = vand.u32 4294901760, %v40949_v46 }
 0x6c5   :  { %17352 = vrot.lane.b32.xlu0 %v44191_v53, %s38342_s28  ;;  %v13573_v38 = vsel %vm5869_vm4, %v13551_v63, 0  ;;  %v14152_v32 = vsub.f32 %v40992_v11, %v14151_v55 }
 0x6c6   :  { %v40999_v1 = vand.u32 4294901760, %v13573_v38  ;;  %v41065_v35 = vsub.f32 %v40949_v46, %v41046_v41 }
 0x6c7   :  { %v14153_v63 = vand.u32 4294901760, %v14152_v32  ;;  %v44202_v32 = vand.u32 4294901760, %v40880_v12 }
 0x6c8   :  { %v13643_v6 = vsub.f32 %v13573_v38, %v40999_v1  ;;  %36264 = vmatmul.mubr.f32.vlgmr.msra.gmra.mxu1 %v40999_v1  ;;  %20180 = vrot.lane.b32.xlu1 %v39579_v33, %s38342_s28  ;;  %v14160_v38 = vand.u32 4294901760, %v14159_v17  ;;  %v14619_v17 = vand.u32 4294901760, %v41065_v35 }
 0x6c9   :  { %36274 = vmatpush3.msra.mxu1 %v40874_v22  ;;  %17825 = vrot.lane.b32.xlu0 %v39177_v16, %s38342_s28 }
 0x6ca   :  { %36275 = vmatprep.subr.mxu1 %v44170_v57  ;;  %36277 = vmatprep.mubr.msk.f32.mxu1 %vm38339_vm2, %v44170_v57  ;;  %v13644_v4 = vand.u32 4294901760, %v13643_v6 }
 0x6cb   :  { %36276 = vmatpush3.msra.mxu1 %v40867_v7 }
 0x6cc   :  { %36287 = vmatprep.subr.mxu1 %v44170_v57  ;;  %36278 = vmatmul.mubr.f32.vlgmr.msra.gmra.mxu1 %v13644_v4  ;;  %v13645_v42 = vsub.f32 %v13643_v6, %v13644_v4  ;;  %v41054_v4 = vand.u32 4294901760, %v40938_v45 }
 0x6cd   :  { %36288 = vmatpush3.msra.mxu1 %v40874_v22  ;;  %20176 = vrot.lane.b32.xlu1 %v39575_v40, %s38342_s28  ;;  %v14041_v22 = vsel %vm5869_vm4, %v13553_v10, 0 }
 0x6ce   :  { %36289 = vmatprep.subr.mxu1 %v44170_v57  ;;  %17821 = vrot.lane.b32.xlu0 %v39010_v18, %s38342_s28  ;;  %v13646_v60 = vand.u32 4294901760, %v13645_v42 }
 0x6cf   :  { %36290 = vmatpush3.msra.mxu1 %v40867_v7  ;;  %36291 = vmatprep.mubr.msk.f32.mxu1 %vm38339_vm2, %v44170_v57  ;;  %v41041_v7 = vand.u32 4294901760, %v14041_v22  ;;  %v13537_v42 = vpop.xlane.xlu1 %13536 }
 0x6d0   :  { %36301 = vmatprep.subr.mxu1 %v44170_v57  ;;  %36257 = vmatmul.mubr.f32.vlgmr.msra.gmra.mxu0 %v13646_v60  ;;  %v41074_v60 = vsub.f32 %v40938_v45, %v41054_v4  ;;  %38126 = vrcp.f32 %v13537_v42 }
 0x6d1   :  { %36267 = vmatpush3.msra.mxu0 %v40880_v12  ;;  %36292 = vmatmul.mubr.f32.vlgmr.msra.gmra.mxu1 %v40999_v1  ;;  %v41060_v10 = vsub.f32 %v14041_v22, %v41041_v7  ;;  %v44203_v12 = vand.u32 4294901760, %v40872_v61 }
 0x6d2   :  { %36302 = vmatpush3.msra.mxu1 %v14153_v63  ;;  %20649 = vrot.lane.b32.xlu1 %v39659_v39, %s38342_s28  ;;  %v14626_v45 = vand.u32 4294901760, %v41074_v60  ;;  %v14620_v63 = vsub.f32 %v41065_v35, %v14619_v17 }
 0x6d3   :  { %36268 = vmatprep.subr.mxu0 %v44170_v57  ;;  %36303 = vmatprep.subr.mxu1 %v44170_v57  ;;  %v14112_v46 = vand.u32 4294901760, %v41060_v10 }
 0x6d4   :  { %18294 = vrot.lane.b32.xlu0 %v39275_v21, %s38342_s28  ;;  %36269 = vmatpush3.msra.mxu0 %v40872_v61 }
 0x6d5   :  { %36304 = vmatpush3.msra.mxu1 %v14160_v38  ;;  %36270 = vmatprep.mubr.msk.f32.mxu0 %vm38339_vm2, %v44170_v57  ;;  %v14113_v61 = vsub.f32 %v41060_v10, %v14112_v46  ;;  %v14621_v38 = vand.u32 4294901760, %v14620_v63 }
 0x6d6   :  { %36280 = vmatprep.subr.mxu0 %v44170_v57  ;;  %36305 = vmatprep.mubr.msk.f32.mxu1 %vm38339_vm2, %v44170_v57 }
 0x6d7   :  { %36315 = vmatprep.subr.mxu1 %v44170_v57  ;;  %36271 = vmatmul.mubr.f32.vlgmr.msra.gmra.mxu0 %v13643_v6  ;;  %v38125_v6 = vpop.eup %38124 }
 0x6d8   :  { %36281 = vmatpush3.msra.mxu0 %v44202_v32  ;;  %36306 = vmatmul.mubr.f32.vlgmr.msra.gmra.mxu1 %v41041_v7  ;;  %v13555_v22 = vmul.f32 %v38125_v6, %v40915_v50  ;;  %v14627_v50 = vsub.f32 %v41074_v60, %v14626_v45  ;;  %v41122_v32 = vand.u32 4294901760, %v40969_v47 }
 0x6d9   :  { %36316 = vmatpush3.msra.mxu1 %v40980_v30  ;;  %36282 = vmatprep.subr.mxu0 %v44170_v57 }
 0x6da   :  { %18767 = vrot.lane.b32.xlu0 %v39336_v9, %s38342_s28  ;;  %36317 = vmatprep.subr.mxu1 %v44170_v57 }
 0x6db   :  { %36283 = vmatpush3.msra.mxu0 %v44203_v12  ;;  %36318 = vmatpush3.msra.mxu1 %v40987_v48 }
 0x6dc   :  { %36284 = vmatprep.mubr.msk.f32.mxu0 %vm38339_vm2, %v44170_v57  ;;  %36294 = vmatprep.subr.mxu0 %v44170_v57 }
 0x6dd   :  { %36319 = vmatprep.mubr.msk.f32.mxu1 %vm38339_vm2, %v44170_v57  ;;  %36329 = vmatprep.subr.mxu1 %v44170_v57  ;;  %v38127_v12 = vpop.eup %38126 }
 0x6de   :  { %36285 = vmatmul.mubr.f32.vlgmr.msra.gmra.mxu0 %v40999_v1  ;;  %36320 = vmatmul.mubr.f32.vlgmr.msra.gmra.mxu1 %v14112_v46  ;;  %v14509_v1 = vsel %vm5869_vm4, %v13555_v22, 0  ;;  %v13557_v22 = vmul.f32 %v38127_v12, %v40920_v24 }
 0x6df   :  { %36295 = vmatpush3.msra.mxu0 %v40980_v30  ;;  %36330 = vmatpush3.msra.mxu1 %v40980_v30  ;;  %v14114_v30 = vand.u32 4294901760, %v14113_v61  ;;  %v41119_v42 = vand.u32 4294901760, %v14509_v1  ;;  %v41136_v61 = vsub.f32 %v40969_v47, %v41122_v32 }
 0x6e0   :  { %36296 = vmatprep.subr.mxu0 %v44170_v57  ;;  %18763 = vrot.lane.b32.xlu0 %v39016_v23, %s38342_s28 }
 0x6e1   :  { %36331 = vmatprep.subr.mxu1 %v44170_v57  ;;  %36297 = vmatpush3.msra.mxu0 %v40987_v48  ;;  %v14579_v6 = vsub.f32 %v14509_v1, %v41119_v42  ;;  %v15087_v47 = vand.u32 4294901760, %v41136_v61 }
 0x6e2   :  { %36332 = vmatpush3.msra.mxu1 %v40987_v48  ;;  %36298 = vmatprep.mubr.msk.f32.mxu0 %vm38339_vm2, %v44170_v57  ;;  %v14628_v48 = vand.u32 4294901760, %v14627_v50 }
 0x6e3   :  { %36308 = vmatprep.subr.mxu0 %v44170_v57  ;;  %36333 = vmatprep.mubr.msk.f32.mxu1 %vm38339_vm2, %v44170_v57  ;;  %v14580_v24 = vand.u32 4294901760, %v14579_v6 }
 0x6e4   :  { %36343 = vmatprep.subr.mxu1 %v44170_v57  ;;  %36299 = vmatmul.mubr.f32.vlgmr.msra.gmra.mxu0 %v14114_v30 }
 0x6e5   :  { %36309 = vmatpush3.msra.mxu0 %v40992_v11  ;;  %36334 = vmatmul.mubr.f32.vlgmr.msra.gmra.mxu1 %v41041_v7  ;;  %v14977_v11 = vsel %vm5869_vm4, %v13557_v22, 0 }
 0x6e6   :  { %36344 = vmatpush3.msra.mxu1 %v14621_v38  ;;  %19236 = vrot.lane.b32.xlu0 %v39433_v27, %s38342_s28 }
 0x6e7   :  { %36310 = vmatprep.subr.mxu0 %v44170_v57  ;;  %36345 = vmatprep.subr.mxu1 %v44170_v57  ;;  %v13540_v46 = vpop.xlane.xlu0 %13539 }
 0x6e8   :  { %36311 = vmatpush3.msra.mxu0 %v41003_v13  ;;  %36346 = vmatpush3.msra.mxu1 %v14628_v48  ;;  %38128 = vrcp.f32 %v13540_v46  ;;  %v41162_v13 = vand.u32 4294901760, %v14977_v11  ;;  %v15441_v46 = vpop.permute.xlu1 %15440 }
 0x6e9   :  { %36312 = vmatprep.mubr.msk.f32.mxu0 %vm38339_vm2, %v44170_v57  ;;  %36322 = vmatprep.subr.mxu0 %v44170_v57 }
 0x6ea   :  { %36347 = vmatprep.mubr.msk.f32.mxu1 %vm38339_vm2, %v44170_v57  ;;  %36357 = vmatprep.subr.mxu1 %v44170_v57 }
 0x6eb   :  { %36313 = vmatmul.mubr.f32.vlgmr.msra.gmra.mxu0 %v41060_v10  ;;  %36348 = vmatmul.mubr.f32.vlgmr.msra.gmra.mxu1 %v41119_v42  ;;  %v14971_v63 = vpop.permute.xlu0 %14970  ;;  %v15088_v10 = vsub.f32 %v41136_v61, %v15087_v47 }
 0x6ec   :  { %36323 = vmatpush3.msra.mxu0 %v14151_v55  ;;  %36358 = vmatpush3.msra.mxu1 %v41046_v41  ;;  %v41155_v55 = vand.u32 4294901760, %v14971_v63 }
 0x6ed   :  { %19709 = vrot.lane.b32.xlu0 %v39494_v44, %s38342_s28  ;;  %36324 = vmatprep.subr.mxu0 %v44170_v57  ;;  %v15089_v50 = vand.u32 4294901760, %v15088_v10 }
 0x6ee   :  { %36359 = vmatprep.subr.mxu1 %v44170_v57  ;;  %36325 = vmatpush3.msra.mxu0 %v14158_v29  ;;  %v14581_v29 = vsub.f32 %v14579_v6, %v14580_v24  ;;  %v41172_v30 = vsub.f32 %v14971_v63, %v41155_v55 }
 0x6ef   :  { %36360 = vmatpush3.msra.mxu1 %v41054_v4  ;;  %36326 = vmatprep.mubr.msk.f32.mxu0 %vm38339_vm2, %v44170_v57 }
 0x6f0   :  { %36336 = vmatprep.subr.mxu0 %v44170_v57  ;;  %36361 = vmatprep.mubr.msk.f32.mxu1 %vm38339_vm2, %v44170_v57  ;;  %v15094_v1 = vand.u32 4294901760, %v41172_v30 }
 0x6f1   :  { %36371 = vmatprep.subr.mxu1 %v44170_v57  ;;  %36327 = vmatmul.mubr.f32.vlgmr.msra.gmra.mxu0 %v41041_v7  ;;  %v14582_v7 = vand.u32 4294901760, %v14581_v29 }
 0x6f2   :  { %36337 = vmatpush3.msra.mxu0 %v41046_v41  ;;  %36362 = vmatmul.mubr.f32.vlgmr.msra.gmra.mxu1 %v14580_v24  ;;  %v15095_v48 = vsub.f32 %v41172_v30, %v15094_v1 }
 0x6f3   :  { %36372 = vmatpush3.msra.mxu1 %v41046_v41  ;;  %19705 = vrot.lane.b32.xlu0 %v44177_v15, %s38342_s28  ;;  %v41182_v41 = vsub.f32 %v14977_v11, %v41162_v13 }
 0x6f4   :  { %36338 = vmatprep.subr.mxu0 %v44170_v57  ;;  %36373 = vmatprep.subr.mxu1 %v44170_v57 }
 0x6f5   :  { %36339 = vmatpush3.msra.mxu0 %v41054_v4  ;;  %36374 = vmatpush3.msra.mxu1 %v41054_v4  ;;  %v38129_v4 = vpop.eup %38128  ;;  %v15048_v38 = vand.u32 4294901760, %v41182_v41 }
 0x6f6   :  { %36340 = vmatprep.mubr.msk.f32.mxu0 %vm38339_vm2, %v44170_v57  ;;  %36350 = vmatprep.subr.mxu0 %v44170_v57  ;;  %v13559_v12 = vmul.f32 %v38129_v4, %v40929_v26 }
 0x6f7   :  { %36375 = vmatprep.mubr.msk.f32.mxu1 %vm38339_vm2, %v44170_v57  ;;  %36385 = vmatprep.subr.mxu1 %v44170_v57  ;;  %v15049_v22 = vsub.f32 %v41182_v41, %v15048_v38 }
 0x6f8   :  { %36341 = vmatmul.mubr.f32.vlgmr.msra.gmra.mxu0 %v14582_v7  ;;  %36376 = vmatmul.mubr.f32.vlgmr.msra.gmra.mxu1 %v41119_v42  ;;  %v15445_v26 = vsel %vm5869_vm4, %v13559_v12, 0 }
 0x6f9   :  { %36351 = vmatpush3.msra.mxu0 %v41065_v35  ;;  %36386 = vmatpush3.msra.mxu1 %v15089_v50  ;;  %v15050_v35 = vand.u32 4294901760, %v15049_v22 }
 0x6fa   :  { %20178 = vrot.lane.b32.xlu0 %v39591_v49, %s38342_s28  ;;  %36352 = vmatprep.subr.mxu0 %v44170_v57 }
 0x6fb   :  { %36353 = vmatpush3.msra.mxu0 %v41074_v60  ;;  %36354 = vmatprep.mubr.msk.f32.mxu0 %vm38339_vm2, %v44170_v57  ;;  %v15439_v60 = vpop.permute.xlu1 %15438 }
 0x6fc   :  { %36364 = vmatprep.subr.mxu0 %v44170_v57  ;;  %36355 = vmatmul.mubr.f32.vlgmr.msra.gmra.mxu0 %v14579_v6  ;;  %v15096_v6 = vand.u32 4294901760, %v15095_v48 }
 0x6fd   :  { %36365 = vmatpush3.msra.mxu0 %v14619_v17  ;;  %36368 = vmatprep.mubr.msk.f32.mxu0 %vm38339_vm2, %v44170_v57  ;;  %v41223_v17 = vand.u32 4294901760, %v15441_v46 }
 0x6fe   :  { %20651 = vrot.lane.b32.xlu0 %v39648_v19, %s38342_s28  ;;  %36366 = vmatprep.subr.mxu0 %v44170_v57 }
 0x6ff   :  { %36367 = vmatpush3.msra.mxu0 %v14626_v45  ;;  %36387 = vmatprep.subr.mxu1 %v44170_v57  ;;  %v41225_v45 = vand.u32 4294901760, %v15445_v26  ;;  %v41239_v63 = vsub.f32 %v15441_v46, %v41223_v17 }
 0x700   :  { %36378 = vmatprep.subr.mxu0 %v44170_v57  ;;  %36369 = vmatmul.mubr.f32.vlgmr.msra.gmra.mxu0 %v41119_v42  ;;  %v41231_v42 = vand.u32 4294901760, %v15439_v60 }
 0x701   :  { %36379 = vmatpush3.msra.mxu0 %v41122_v32  ;;  %36382 = vmatprep.mubr.msk.f32.mxu0 %vm38339_vm2, %v44170_v57  ;;  %v15515_v24 = vsub.f32 %v15445_v26, %v41225_v45  ;;  %v15555_v10 = vand.u32 4294901760, %v41239_v63 }
 0x702   :  { %20647 = vrot.lane.b32.xlu0 %v44190_v14, %s38342_s28  ;;  %36380 = vmatprep.subr.mxu0 %v44170_v57  ;;  %v41248_v29 = vsub.f32 %v15439_v60, %v41231_v42 }
 0x703   :  { %36381 = vmatpush3.msra.mxu0 %v41155_v55  ;;  %36388 = vmatpush3.msra.mxu1 %v15096_v6  ;;  %v15516_v7 = vand.u32 4294901760, %v15515_v24 }
 0x704   :  { %36392 = vmatprep.subr.mxu0 %v44170_v57  ;;  %36383 = vmatmul.mubr.f32.vlgmr.msra.gmra.mxu0 %v15050_v35 }
 0x705   :  { %36393 = vmatpush3.msra.mxu0 %v41136_v61  ;;  %36389 = vmatprep.mubr.msk.f32.mxu1 %vm38339_vm2, %v44170_v57  ;;  %v15562_v61 = vand.u32 4294901760, %v41248_v29  ;;  %v15517_v50 = vsub.f32 %v15515_v24, %v15516_v7 }
 0x706   :  { %21206 = vrot.lane.b32.xlu0 %v44191_v53, %s38343_s29  ;;  %36394 = vmatprep.subr.mxu0 %v44170_v57 }
 0x707   :  { %36395 = vmatpush3.msra.mxu0 %v41172_v30  ;;  %36390 = vmatmul.mubr.f32.vlgmr.msra.gmra.mxu1 %v41162_v13  ;;  %v15563_v30 = vsub.f32 %v41248_v29, %v15562_v61  ;;  %v15518_v4 = vand.u32 4294901760, %v15517_v50 }
 0x708   :  { %36396 = vmatprep.mubr.msk.f32.mxu0 %vm38339_vm2, %v44170_v57  ;;  %36399 = vmatprep.subr.mxu1 %v44170_v57  ;;  %v13543_v11 = vpop.xlane.xlu1 %13542 }
 0x709   :  { %36406 = vmatprep.subr.mxu0 %v44170_v57  ;;  %36397 = vmatmul.mubr.f32.vlgmr.msra.gmra.mxu0 %v41182_v41  ;;  %v15556_v41 = vsub.f32 %v41239_v63, %v15555_v10  ;;  %38130 = vrcp.f32 %v13543_v11 }
 0x70a   :  { %36400 = vmatpush3.msra.mxu1 %v41122_v32  ;;  %36407 = vmatpush3.msra.mxu0 %v15087_v47 }
 0x70b   :  { %21676 = vrot.lane.b32.xlu0 %v39177_v16, %s38343_s29  ;;  %36401 = vmatprep.subr.mxu1 %v44170_v57 }
 0x70c   :  { %36408 = vmatprep.subr.mxu0 %v44170_v57  ;;  %36402 = vmatpush3.msra.mxu1 %v41155_v55  ;;  %v15909_v47 = vpop.permute.xlu1 %15908 }
 0x70d   :  { %36403 = vmatprep.mubr.msk.f32.mxu1 %vm38339_vm2, %v44170_v57  ;;  %36409 = vmatpush3.msra.mxu0 %v15094_v1  ;;  %v41277_v1 = vand.u32 4294901760, %v15909_v47 }
 0x70e   :  { %36404 = vmatmul.mubr.f32.vlgmr.msra.gmra.mxu1 %v15048_v38  ;;  %36410 = vmatprep.mubr.msk.f32.mxu0 %vm38339_vm2, %v44170_v57  ;;  %v15564_v38 = vand.u32 4294901760, %v15563_v30 }
 0x70f   :  { %36413 = vmatprep.subr.mxu1 %v44170_v57  ;;  %36420 = vmatprep.subr.mxu0 %v44170_v57 }
 0x710   :  { %36411 = vmatmul.mubr.f32.vlgmr.msra.gmra.mxu0 %v41162_v13  ;;  %36414 = vmatpush3.msra.mxu1 %v41122_v32  ;;  %v15557_v32 = vand.u32 4294901760, %v15556_v41 }
 0x711   :  { %36421 = vmatpush3.msra.mxu0 %v41223_v17  ;;  %21674 = vrot.lane.b32.xlu0 %v39185_v0, %s38343_s29 }
 0x712   :  { %36415 = vmatprep.subr.mxu1 %v44170_v57  ;;  %36422 = vmatprep.subr.mxu0 %v44170_v57 }
 0x713   :  { %36416 = vmatpush3.msra.mxu1 %v41155_v55  ;;  %36417 = vmatprep.mubr.msk.f32.mxu1 %vm38339_vm2, %v44170_v57  ;;  %v41290_v55 = vsub.f32 %v15909_v47, %v41277_v1 }
 0x714   :  { %36423 = vmatpush3.msra.mxu0 %v41231_v42  ;;  %36418 = vmatmul.mubr.f32.vlgmr.msra.gmra.mxu1 %v41162_v13 }
 0x715   :  { %36427 = vmatprep.subr.mxu1 %v44170_v57  ;;  %36424 = vmatprep.mubr.msk.f32.mxu0 %vm38339_vm2, %v44170_v57  ;;  %v16023_v13 = vand.u32 4294901760, %v41290_v55 }
 0x716   :  { %36428 = vmatpush3.msra.mxu1 %v15557_v32  ;;  %36431 = vmatprep.mubr.msk.f32.mxu1 %vm38339_vm2, %v44170_v57  ;;  %v38131_v12 = vpop.eup %38130 }
 0x717   :  { %36429 = vmatprep.subr.mxu1 %v44170_v57  ;;  %36434 = vmatprep.subr.mxu0 %v44170_v57  ;;  %v16024_v48 = vsub.f32 %v41290_v55, %v16023_v13  ;;  %v13561_v6 = vmul.f32 %v38131_v12, %v40936_v54 }
 0x718   :  { %36430 = vmatpush3.msra.mxu1 %v15564_v38  ;;  %36425 = vmatmul.mubr.f32.vlgmr.msra.gmra.mxu0 %v15518_v4 }
 0x719   :  { %36432 = vmatmul.mubr.f32.vlgmr.msra.gmra.mxu1 %v41225_v45  ;;  %36435 = vmatpush3.msra.mxu0 %v41239_v63  ;;  %v16025_v22 = vand.u32 4294901760, %v16024_v48  ;;  %v15913_v26 = vsel %vm5869_vm4, %v13561_v6, 0 }
 0x71a   :  { %36441 = vmatprep.subr.mxu1 %v44170_v57  ;;  %36436 = vmatprep.subr.mxu0 %v44170_v57  ;;  %v41333_v54 = vand.u32 4294901760, %v15913_v26 }
 0x71b   :  { %36442 = vmatpush3.msra.mxu1 %v41223_v17  ;;  %36437 = vmatpush3.msra.mxu0 %v41248_v29  ;;  %v16377_v29 = vpop.permute.xlu1 %16376 }
 0x71c   :  { %36443 = vmatprep.subr.mxu1 %v44170_v57  ;;  %36438 = vmatprep.mubr.msk.f32.mxu0 %vm38339_vm2, %v44170_v57  ;;  %v13546_v46 = vpop.xlane.xlu0 %13545  ;;  %v15983_v35 = vsub.f32 %v15913_v26, %v41333_v54  ;;  %v41348_v32 = vand.u32 4294901760, %v16377_v29 }
 0x71d   :  { %36444 = vmatpush3.msra.mxu1 %v41231_v42  ;;  %36445 = vmatprep.mubr.msk.f32.mxu1 %vm38339_vm2, %v44170_v57  ;;  %38132 = vrcp.f32 %v13546_v46 }
 0x71e   :  { %36448 = vmatprep.subr.mxu0 %v44170_v57  ;;  %36439 = vmatmul.mubr.f32.vlgmr.msra.gmra.mxu0 %v15515_v24  ;;  %v16490_v12 = vsub.f32 %v16377_v29, %v41348_v32 }
 0x71f   :  { %36446 = vmatmul.mubr.f32.vlgmr.msra.gmra.mxu1 %v15516_v7  ;;  %36449 = vmatpush3.msra.mxu0 %v15555_v10  ;;  %v16375_v50 = vpop.permute.xlu1 %16374 }
 0x720   :  { %36455 = vmatprep.subr.mxu1 %v44170_v57  ;;  %36450 = vmatprep.subr.mxu0 %v44170_v57  ;;  %v41356_v46 = vand.u32 4294901760, %v16375_v50 }
 0x721   :  { %36456 = vmatpush3.msra.mxu1 %v41223_v17  ;;  %36451 = vmatpush3.msra.mxu0 %v15562_v61 }
 0x722   :  { %36457 = vmatprep.subr.mxu1 %v44170_v57  ;;  %36452 = vmatprep.mubr.msk.f32.mxu0 %vm38339_vm2, %v44170_v57 }
 0x723   :  { %36458 = vmatpush3.msra.mxu1 %v41231_v42  ;;  %36459 = vmatprep.mubr.msk.f32.mxu1 %vm38339_vm2, %v44170_v57  ;;  %v16845_v6 = vpop.permute.xlu1 %16844 }
 0x724   :  { %36453 = vmatmul.mubr.f32.vlgmr.msra.gmra.mxu0 %v41225_v45  ;;  %36460 = vmatmul.mubr.f32.vlgmr.msra.gmra.mxu1 %v41225_v45  ;;  %v15984_v45 = vand.u32 4294901760, %v15983_v35 }
 0x725   :  { %36462 = vmatprep.subr.mxu0 %v44170_v57  ;;  %36469 = vmatprep.subr.mxu1 %v44170_v57 }
 0x726   :  { %36463 = vmatpush3.msra.mxu0 %v41277_v1  ;;  %36470 = vmatpush3.msra.mxu1 %v16025_v22  ;;  %v15985_v24 = vsub.f32 %v15983_v35, %v15984_v45 }
 0x727   :  { %36464 = vmatprep.subr.mxu0 %v44170_v57  ;;  %36466 = vmatprep.mubr.msk.f32.mxu0 %vm38339_vm2, %v44170_v57 }
 0x728   :  { %36471 = vmatprep.subr.mxu1 %v44170_v57  ;;  %36473 = vmatprep.mubr.msk.f32.mxu1 %vm38339_vm2, %v44170_v57  ;;  %v15986_v61 = vand.u32 4294901760, %v15985_v24 }
 0x72a   :  { %v38133_v60 = vpop.eup %38132 }
 0x72b   :  { %v13563_v17 = vmul.f32 %v38133_v60, %v40945_v3 }
 0x72d   :  { %v16381_v63 = vsel %vm5869_vm4, %v13563_v17, 0 }
 0x72e   :  { %v41338_v10 = vand.u32 4294901760, %v16381_v63 }
 0x730   :  { %v41345_v3 = vsub.f32 %v16381_v63, %v41338_v10  ;;  %v16843_v63 = vpop.permute.xlu1 %16842 }
 0x732   :  { %v16452_v38 = vand.u32 4294901760, %v41345_v3 }
 0x734   :  { %v13549_v42 = vpop.xlane.xlu0 %13548 }
 0x735   :  { %38134 = vrcp.f32 %v13549_v42 }
 0x738   :  { %v15907_v11 = vpop.permute.xlu0 %15906 }
 0x739   :  { %v15947_v7 = vand.u32 4294901760, %v15907_v11 }
 0x73b   :  { %v16029_v47 = vsub.f32 %v15907_v11, %v15947_v7  ;;  %36465 = vmatpush3.msra.mxu0 %v15947_v7  ;;  %v41396_v11 = vand.u32 4294901760, %v16845_v6 }
 0x73c   :  { %36467 = vmatmul.mubr.f32.vlgmr.msra.gmra.mxu0 %v15986_v61  ;;  %36476 = vmatprep.subr.mxu0 %v44170_v57  ;;  %v41401_v61 = vand.u32 4294901760, %v16843_v63 }
 0x73d   :  { %v16030_v41 = vand.u32 4294901760, %v16029_v47  ;;  %36477 = vmatpush3.msra.mxu0 %v41290_v55  ;;  %36480 = vmatprep.mubr.msk.f32.mxu0 %vm38339_vm2, %v44170_v57  ;;  %v16453_v55 = vsub.f32 %v41345_v3, %v16452_v38 }
 0x73e   :  { %36478 = vmatprep.subr.mxu0 %v44170_v57 }
 0x73f   :  { %36479 = vmatpush3.msra.mxu0 %v16029_v47  ;;  %v16031_v30 = vsub.f32 %v16029_v47, %v16030_v41  ;;  %v17355_v47 = vpop.permute.xlu1 %17354 }
 0x740   :  { %36481 = vmatmul.mubr.f32.vlgmr.msra.gmra.mxu0 %v15983_v35  ;;  %36490 = vmatprep.subr.mxu0 %v44170_v57  ;;  %v16454_v35 = vand.u32 4294901760, %v16453_v55  ;;  %v17360_v55 = vsel %vm2124_vm3, %v17355_v47, 0 }
 0x741   :  { %36491 = vmatpush3.msra.mxu0 %v16023_v13  ;;  %v16032_v4 = vand.u32 4294901760, %v16031_v30  ;;  %36494 = vmatprep.mubr.msk.f32.mxu0 %vm38339_vm2, %v44170_v57  ;;  %v16497_v13 = vsub.f32 %v16375_v50, %v41356_v46  ;;  %v16965_v50 = vsub.f32 %v16843_v63, %v41401_v61 }
 0x742   :  { %v38135_v48 = vpop.eup %38134  ;;  %36492 = vmatprep.subr.mxu0 %v44170_v57 }
 0x743   :  { %36472 = vmatpush3.msra.mxu1 %v16032_v4  ;;  %36493 = vmatpush3.msra.mxu0 %v16030_v41  ;;  %v13565_v22 = vmul.f32 %v38135_v48, %v40963_v5  ;;  %v16491_v5 = vand.u32 4294901760, %v16490_v12  ;;  %v16498_v60 = vand.u32 4294901760, %v16497_v13  ;;  %v17351_v4 = vpop.permute.xlu1 %17350 }
 0x744   :  { %36474 = vmatmul.mubr.f32.vlgmr.msra.gmra.mxu1 %v41333_v54  ;;  %36483 = vmatprep.subr.mxu1 %v44170_v57 }
 0x745   :  { %36495 = vmatmul.mubr.f32.vlgmr.msra.gmra.mxu0 %v41333_v54  ;;  %36504 = vmatprep.subr.mxu0 %v44170_v57  ;;  %v16849_v26 = vsel %vm5869_vm4, %v13565_v22, 0  ;;  %v16492_v42 = vsub.f32 %v16490_v12, %v16491_v5  ;;  %v16499_v24 = vsub.f32 %v16497_v13, %v16498_v60  ;;  %v17356_v22 = vsel %vm2124_vm3, %v17351_v4, 0 }
 0x746   :  { %36484 = vmatpush3.msra.mxu1 %v41277_v1  ;;  %36505 = vmatpush3.msra.mxu0 %v41348_v32  ;;  %v41379_v17 = vand.u32 4294901760, %v16849_v26 }
 0x747   :  { %36485 = vmatprep.subr.mxu1 %v44170_v57  ;;  %36506 = vmatprep.subr.mxu0 %v44170_v57  ;;  %v16500_v29 = vand.u32 4294901760, %v16499_v24 }
 0x748   :  { %36486 = vmatpush3.msra.mxu1 %v15947_v7  ;;  %36487 = vmatprep.mubr.msk.f32.mxu1 %vm38339_vm2, %v44170_v57 }
 0x749   :  { %36507 = vmatpush3.msra.mxu0 %v41356_v46  ;;  %36508 = vmatprep.mubr.msk.f32.mxu0 %vm38339_vm2, %v44170_v57 }
 0x74a   :  { %36488 = vmatmul.mubr.f32.vlgmr.msra.gmra.mxu1 %v15984_v45  ;;  %36497 = vmatprep.subr.mxu1 %v44170_v57  ;;  %v41389_v45 = vsub.f32 %v16849_v26, %v41379_v17 }
 0x74b   :  { %36509 = vmatmul.mubr.f32.vlgmr.msra.gmra.mxu0 %v16454_v35  ;;  %36518 = vmatprep.subr.mxu0 %v44170_v57 }
 0x74c   :  { %36498 = vmatpush3.msra.mxu1 %v41277_v1  ;;  %36519 = vmatpush3.msra.mxu0 %v16490_v12  ;;  %v16493_v1 = vand.u32 4294901760, %v16492_v42  ;;  %v16966_v12 = vand.u32 4294901760, %v16965_v50 }
 0x74d   :  { %36499 = vmatprep.subr.mxu1 %v44170_v57  ;;  %36520 = vmatprep.subr.mxu0 %v44170_v57 }
 0x74e   :  { %36500 = vmatpush3.msra.mxu1 %v15947_v7  ;;  %36501 = vmatprep.mubr.msk.f32.mxu1 %vm38339_vm2, %v44170_v57  ;;  %v16920_v7 = vand.u32 4294901760, %v41389_v45 }
 0x74f   :  { %36521 = vmatpush3.msra.mxu0 %v16497_v13  ;;  %36522 = vmatprep.mubr.msk.f32.mxu0 %vm38339_vm2, %v44170_v57 }
 0x750   :  { %36502 = vmatmul.mubr.f32.vlgmr.msra.gmra.mxu1 %v41333_v54  ;;  %36511 = vmatprep.subr.mxu1 %v44170_v57  ;;  %v16958_v54 = vsub.f32 %v16845_v6, %v41396_v11  ;;  %v16921_v41 = vsub.f32 %v41389_v45, %v16920_v7  ;;  %v41435_v6 = vand.u32 4294901760, %v17356_v22 }
 0x751   :  { %36523 = vmatmul.mubr.f32.vlgmr.msra.gmra.mxu0 %v41345_v3  ;;  %36532 = vmatprep.subr.mxu0 %v44170_v57  ;;  %v16967_v3 = vsub.f32 %v16965_v50, %v16966_v12 }
 0x752   :  { %36512 = vmatpush3.msra.mxu1 %v16493_v1  ;;  %36533 = vmatpush3.msra.mxu0 %v16491_v5  ;;  %v16959_v30 = vand.u32 4294901760, %v16958_v54  ;;  %v16922_v48 = vand.u32 4294901760, %v16921_v41  ;;  %v17353_v5 = vpop.permute.xlu0 %17352 }
 0x753   :  { %36513 = vmatprep.subr.mxu1 %v44170_v57  ;;  %36534 = vmatprep.subr.mxu0 %v44170_v57  ;;  %v16968_v35 = vand.u32 4294901760, %v16967_v3 }
 0x754   :  { %36514 = vmatpush3.msra.mxu1 %v16500_v29  ;;  %36515 = vmatprep.mubr.msk.f32.mxu1 %vm38339_vm2, %v44170_v57  ;;  %v16960_v13 = vsub.f32 %v16958_v54, %v16959_v30 }
 0x755   :  { %36535 = vmatpush3.msra.mxu0 %v16498_v60  ;;  %36536 = vmatprep.mubr.msk.f32.mxu0 %vm38339_vm2, %v44170_v57 }
 0x756   :  { %36516 = vmatmul.mubr.f32.vlgmr.msra.gmra.mxu1 %v41338_v10  ;;  %36525 = vmatprep.subr.mxu1 %v44170_v57  ;;  %v16961_v26 = vand.u32 4294901760, %v16960_v13 }
 0x757   :  { %36537 = vmatmul.mubr.f32.vlgmr.msra.gmra.mxu0 %v41338_v10  ;;  %36546 = vmatprep.subr.mxu0 %v44170_v57 }
 0x758   :  { %36526 = vmatpush3.msra.mxu1 %v41348_v32  ;;  %36547 = vmatpush3.msra.mxu0 %v41396_v11 }
 0x759   :  { %36527 = vmatprep.subr.mxu1 %v44170_v57  ;;  %36548 = vmatprep.subr.mxu0 %v44170_v57 }
 0x75a   :  { %36528 = vmatpush3.msra.mxu1 %v41356_v46  ;;  %36529 = vmatprep.mubr.msk.f32.mxu1 %vm38339_vm2, %v44170_v57 }
 0x75b   :  { %36549 = vmatpush3.msra.mxu0 %v41401_v61  ;;  %36550 = vmatprep.mubr.msk.f32.mxu0 %vm38339_vm2, %v44170_v57 }
 0x75c   :  { %36530 = vmatmul.mubr.f32.vlgmr.msra.gmra.mxu1 %v16452_v38  ;;  %36539 = vmatprep.subr.mxu1 %v44170_v57  ;;  %v41439_v38 = vand.u32 4294901760, %v17360_v55 }
 0x75d   :  { %36551 = vmatmul.mubr.f32.vlgmr.msra.gmra.mxu0 %v16922_v48  ;;  %36560 = vmatprep.subr.mxu0 %v44170_v57 }
 0x75e   :  { %36540 = vmatpush3.msra.mxu1 %v41348_v32  ;;  %36561 = vmatpush3.msra.mxu0 %v16958_v54  ;;  %v17358_v32 = vsel %vm2124_vm3, %v17353_v5, 0  ;;  %v17469_v60 = vsub.f32 %v17360_v55, %v41439_v38  ;;  %v17826_v54 = vpop.permute.xlu0 %17825 }
 0x75f   :  { %36541 = vmatprep.subr.mxu1 %v44170_v57  ;;  %36562 = vmatprep.subr.mxu0 %v44170_v57  ;;  %v41454_v42 = vand.u32 4294901760, %v17358_v32 }
 0x760   :  { %36542 = vmatpush3.msra.mxu1 %v41356_v46  ;;  %36543 = vmatprep.mubr.msk.f32.mxu1 %vm38339_vm2, %v44170_v57  ;;  %v41450_v46 = vsub.f32 %v17356_v22, %v41435_v6  ;;  %v17470_v63 = vand.u32 4294901760, %v17469_v60 }
 0x761   :  { %36563 = vmatpush3.msra.mxu0 %v16965_v50  ;;  %36564 = vmatprep.mubr.msk.f32.mxu0 %vm38339_vm2, %v44170_v57  ;;  %v17476_v24 = vsub.f32 %v17358_v32, %v41454_v42 }
 0x762   :  { %36544 = vmatmul.mubr.f32.vlgmr.msra.gmra.mxu1 %v41338_v10  ;;  %36553 = vmatprep.subr.mxu1 %v44170_v57  ;;  %v17431_v10 = vand.u32 4294901760, %v41450_v46  ;;  %v17471_v29 = vsub.f32 %v17469_v60, %v17470_v63 }
 0x763   :  { %36565 = vmatmul.mubr.f32.vlgmr.msra.gmra.mxu0 %v41389_v45  ;;  %36574 = vmatprep.subr.mxu0 %v44170_v57  ;;  %v17477_v47 = vand.u32 4294901760, %v17476_v24 }
 0x764   :  { %36554 = vmatpush3.msra.mxu1 %v16961_v26  ;;  %36575 = vmatpush3.msra.mxu0 %v16959_v30  ;;  %v17432_v1 = vsub.f32 %v41450_v46, %v17431_v10  ;;  %v17472_v45 = vand.u32 4294901760, %v17471_v29  ;;  %v17824_v30 = vpop.permute.xlu1 %17823 }
 0x765   :  { %36555 = vmatprep.subr.mxu1 %v44170_v57  ;;  %36576 = vmatprep.subr.mxu0 %v44170_v57  ;;  %v17478_v50 = vsub.f32 %v17476_v24, %v17477_v47 }
 0x766   :  { %36556 = vmatpush3.msra.mxu1 %v16968_v35  ;;  %36557 = vmatprep.mubr.msk.f32.mxu1 %vm38339_vm2, %v44170_v57  ;;  %v17433_v41 = vand.u32 4294901760, %v17432_v1 }
 0x767   :  { %36577 = vmatpush3.msra.mxu0 %v16966_v12  ;;  %36578 = vmatprep.mubr.msk.f32.mxu0 %vm38339_vm2, %v44170_v57  ;;  %v17829_v12 = vsel %vm2124_vm3, %v17824_v30, 0 }
 0x768   :  { %36558 = vmatmul.mubr.f32.vlgmr.msra.gmra.mxu1 %v41379_v17  ;;  %36567 = vmatprep.subr.mxu1 %v44170_v57  ;;  %v41511_v22 = vand.u32 4294901760, %v17829_v12  ;;  %v18297_v35 = vpop.permute.xlu1 %18296 }
 0x769   :  { %36579 = vmatmul.mubr.f32.vlgmr.msra.gmra.mxu0 %v41379_v17  ;;  %36588 = vmatprep.subr.mxu0 %v44170_v57 }
 0x76a   :  { %36568 = vmatpush3.msra.mxu1 %v41396_v11  ;;  %36589 = vmatpush3.xpose.msra.mxu0 %v41439_v38  ;;  %v41527_v5 = vsub.f32 %v17829_v12, %v41511_v22 }
 0x76b   :  { %36569 = vmatprep.subr.mxu1 %v44170_v57  ;;  %36571 = vmatprep.mubr.msk.f32.mxu1 %vm38339_vm2, %v44170_v57 }
 0x76c   :  { %36570 = vmatpush3.msra.mxu1 %v41401_v61  ;;  %36590 = vmatprep.subr.mxu0 %v44170_v57  ;;  %v17948_v26 = vand.u32 4294901760, %v41527_v5  ;;  %v18293_v29 = vpop.permute.xlu1 %18292 }
 0x76d   :  { %36572 = vmatmul.mubr.f32.vlgmr.msra.gmra.mxu1 %v16920_v7  ;;  %36581 = vmatprep.subr.mxu1 %v44170_v57  ;;  %v17479_v7 = vand.u32 4294901760, %v17478_v50 }
 0x76e   :  { %36582 = vmatpush3.msra.mxu1 %v41396_v11  ;;  %36591 = vmatpush3.xpose.msra.mxu0 %v41454_v42  ;;  %v17822_v11 = vpop.permute.xlu0 %17821 }
 0x76f   :  { %36583 = vmatprep.subr.mxu1 %v44170_v57  ;;  %36585 = vmatprep.mubr.msk.f32.mxu1 %vm38339_vm2, %v44170_v57 }
 0x770   :  { %36584 = vmatpush3.msra.mxu1 %v41401_v61  ;;  %36592 = vmatprep.mubr.msk.f32.mxu0 %vm38339_vm2, %v44170_v57  ;;  %v17831_v61 = vsel %vm2124_vm3, %v17826_v54, 0  ;;  %v18302_v54 = vsel %vm2124_vm3, %v18297_v35, 0 }
 0x771   :  { %36586 = vmatmul.mubr.f32.vlgmr.msra.gmra.mxu1 %v41379_v17  ;;  %36593 = vmatmul.mubr.f32.vlgmr.msra.gmra.mxu0 %v17433_v41  ;;  %v17827_v17 = vsel %vm2124_vm3, %v17822_v11, 0  ;;  %v41501_v4 = vand.u32 4294901760, %v17831_v61  ;;  %v18298_v41 = vsel %vm2124_vm3, %v18293_v29, 0  ;;  %v41565_v11 = vand.u32 4294901760, %v18302_v54 }
 0x772   :  { %36595 = vmatprep.subr.mxu1 %v44170_v57  ;;  %36602 = vmatprep.subr.mxu0 %v44170_v57  ;;  %v41503_v48 = vand.u32 4294901760, %v17827_v17  ;;  %v18295_v50 = vpop.permute.xlu0 %18294 }
 0x773   :  { %36596 = vmatpush3.xpose.msra.mxu1 %v17472_v45  ;;  %36603 = vmatpush3.xpose.msra.mxu0 %v17469_v60  ;;  %v41514_v55 = vsub.f32 %v17831_v61, %v41501_v4  ;;  %v18300_v30 = vsel %vm2124_vm3, %v18295_v50, 0 }
 0x774   :  { %36597 = vmatprep.subr.mxu1 %v44170_v57  ;;  %36604 = vmatprep.subr.mxu0 %v44170_v57  ;;  %v41517_v13 = vsub.f32 %v17827_v17, %v41503_v48 }
 0x775   :  { %36599 = vmatprep.mubr.msk.f32.mxu1 %vm38339_vm2, %v44170_v57  ;;  %36606 = vmatprep.mubr.msk.f32.mxu0 %vm38339_vm2, %v44170_v57  ;;  %v17941_v3 = vand.u32 4294901760, %v41514_v55 }
 0x776   :  { %v17902_v32 = vand.u32 4294901760, %v41517_v13 }
 0x777   :  { %36598 = vmatpush3.xpose.msra.mxu1 %v17479_v7  ;;  %36605 = vmatpush3.xpose.msra.mxu0 %v17476_v24  ;;  %v17942_v60 = vsub.f32 %v41514_v55, %v17941_v3  ;;  %v41567_v7 = vand.u32 4294901760, %v18298_v41 }
 0x778   :  { %36609 = vmatprep.subr.mxu1 %v44170_v57  ;;  %36616 = vmatprep.subr.mxu0 %v44170_v57 }
 0x779   :  { %v17943_v24 = vand.u32 4294901760, %v17942_v60  ;;  %v41579_v35 = vsub.f32 %v18298_v41, %v41567_v7  ;;  %v41581_v60 = vand.u32 4294901760, %v18300_v30 }
 0x77a   :  { %36600 = vmatmul.mubr.f32.vlgmr.msra.gmra.mxu1 %v41435_v6  ;;  %36607 = vmatmul.mubr.f32.vlgmr.msra.gmra.mxu0 %v41450_v46  ;;  %v17949_v46 = vsub.f32 %v41527_v5, %v17948_v26 }
 0x77b   :  { %36610 = vmatpush3.xpose.msra.mxu1 %v41439_v38  ;;  %36617 = vmatpush3.xpose.msra.mxu0 %v17470_v63  ;;  %v17903_v63 = vsub.f32 %v41517_v13, %v17902_v32 }
 0x77c   :  { %36611 = vmatprep.subr.mxu1 %v44170_v57  ;;  %36618 = vmatprep.subr.mxu0 %v44170_v57 }
 0x77d   :  { %36613 = vmatprep.mubr.msk.f32.mxu1 %vm38339_vm2, %v44170_v57  ;;  %36620 = vmatprep.mubr.msk.f32.mxu0 %vm38339_vm2, %v44170_v57 }
 0x77f   :  { %36612 = vmatpush3.xpose.msra.mxu1 %v41454_v42  ;;  %36619 = vmatpush3.xpose.msra.mxu0 %v17477_v47  ;;  %v17950_v47 = vand.u32 4294901760, %v17949_v46 }
 0x780   :  { %36623 = vmatprep.subr.mxu1 %v44170_v57  ;;  %36630 = vmatprep.subr.mxu0 %v44170_v57 }
 0x782   :  { %36614 = vmatmul.mubr.f32.vlgmr.msra.gmra.mxu1 %v17431_v10  ;;  %36621 = vmatmul.mubr.f32.vlgmr.msra.gmra.mxu0 %v41435_v6  ;;  %v17904_v10 = vand.u32 4294901760, %v17903_v63 }
 0x783   :  { %36624 = vmatpush3.xpose.msra.mxu1 %v41439_v38  ;;  %36631 = vmatpush3.xpose.msra.mxu0 %v41501_v4 }
 0x784   :  { %36625 = vmatprep.subr.mxu1 %v44170_v57  ;;  %36632 = vmatprep.subr.mxu0 %v44170_v57 }
 0x785   :  { %36627 = vmatprep.mubr.msk.f32.mxu1 %vm38339_vm2, %v44170_v57  ;;  %36634 = vmatprep.mubr.msk.f32.mxu0 %vm38339_vm2, %v44170_v57 }
 0x787   :  { %36626 = vmatpush3.xpose.msra.mxu1 %v41454_v42  ;;  %36633 = vmatpush3.xpose.msra.mxu0 %v41511_v22 }
 0x788   :  { %36637 = vmatprep.subr.mxu1 %v44170_v57  ;;  %v13729_v38 = vpop.f32.mrf.mxu1  ;;  %36644 = vmatprep.subr.mxu0 %v44170_v57 }
 0x78a   :  { %36628 = vmatmul.mubr.f32.vlgmr.msra.gmra.mxu1 %v41435_v6  ;;  %v36265_v1 = vpop.f32.mrf.mxu1  ;;  %36635 = vmatmul.mubr.f32.vlgmr.msra.gmra.mxu0 %v17904_v10  ;;  %v18373_v10 = vand.u32 4294901760, %v41579_v35 }
 0x78b   :  { %36638 = vmatpush3.xpose.msra.mxu1 %v17943_v24  ;;  %36645 = vmatpush3.xpose.msra.mxu0 %v41514_v55  ;;  %v41593_v24 = vsub.f32 %v18300_v30, %v41581_v60 }
 0x78c   :  { %36639 = vmatprep.subr.mxu1 %v44170_v57  ;;  %v13880_v42 = vpop.f32.mrf.mxu1  ;;  %36646 = vmatprep.subr.mxu0 %v44170_v57 }
 0x78d   :  { %36641 = vmatprep.mubr.msk.f32.mxu1 %vm38339_vm2, %v44170_v57  ;;  %36648 = vmatprep.mubr.msk.f32.mxu0 %vm38339_vm2, %v44170_v57  ;;  %v18419_v41 = vand.u32 4294901760, %v41593_v24 }
 0x78e   :  { %v36279_v6 = vpop.f32.mrf.mxu1 }
 0x78f   :  { %36640 = vmatpush3.xpose.msra.mxu1 %v17950_v47  ;;  %36647 = vmatpush3.xpose.msra.mxu0 %v41527_v5  ;;  %v41576_v5 = vsub.f32 %v18302_v54, %v41565_v11  ;;  %v18374_v54 = vsub.f32 %v41579_v35, %v18373_v10 }
 0x790   :  { %36651 = vmatprep.subr.mxu1 %v44170_v57  ;;  %v13648_v45 = vpop.f32.mrf.mxu0  ;;  %36658 = vmatprep.subr.mxu0 %v44170_v57 }
 0x791   :  { %v13730_v61 = vadd.f32 %v13729_v38, %v13648_v45  ;;  %v14030_v17 = vpop.f32.mrf.mxu1  ;;  %v18412_v46 = vand.u32 4294901760, %v41576_v5  ;;  %v18375_v45 = vand.u32 4294901760, %v18374_v54 }
 0x792   :  { %36642 = vmatmul.mubr.f32.vlgmr.msra.gmra.mxu1 %v41503_v48  ;;  %v36258_v12 = vpop.f32.mrf.mxu0  ;;  %36649 = vmatmul.mubr.f32.vlgmr.msra.gmra.mxu0 %v41517_v13  ;;  %v18768_v13 = vpop.permute.xlu0 %18767 }
 0x793   :  { %36652 = vmatpush3.xpose.msra.mxu1 %v41501_v4  ;;  %v36293_v55 = vpop.f32.mrf.mxu1  ;;  %36659 = vmatpush3.xpose.msra.mxu0 %v17941_v3 }
 0x794   :  { %36653 = vmatprep.subr.mxu1 %v44170_v57  ;;  %36660 = vmatprep.subr.mxu0 %v44170_v57 }
 0x795   :  { %36655 = vmatprep.mubr.msk.f32.mxu1 %vm38339_vm2, %v44170_v57  ;;  %36662 = vmatprep.mubr.msk.f32.mxu0 %vm38339_vm2, %v44170_v57 }
 0x796   :  { %v18764_v55 = vpop.permute.xlu0 %18763 }
 0x797   :  { %36654 = vmatpush3.xpose.msra.mxu1 %v41511_v22  ;;  %v13805_v3 = vpop.f32.mrf.mxu0  ;;  %36661 = vmatpush3.xpose.msra.mxu0 %v17948_v26  ;;  %v18413_v26 = vsub.f32 %v41576_v5, %v18412_v46 }
 0x798   :  { %36665 = vmatprep.subr.mxu1 %v44170_v57  ;;  %v13806_v63 = vadd.f32 %v13805_v3, %v13730_v61  ;;  %v14197_v38 = vpop.f32.mrf.mxu1  ;;  %36672 = vmatprep.subr.mxu0 %v44170_v57  ;;  %v18420_v61 = vsub.f32 %v41593_v24, %v18419_v41 }
 0x799   :  { %v36272_v1 = vpop.f32.mrf.mxu0  ;;  %v18414_v30 = vand.u32 4294901760, %v18413_v26 }
 0x79a   :  { %36656 = vmatmul.mubr.f32.vlgmr.msra.gmra.mxu1 %v17902_v32  ;;  %v36307_v29 = vpop.f32.mrf.mxu1  ;;  %v13881_v47 = vadd.f32 %v13880_v42, %v13806_v63  ;;  %36663 = vmatmul.mubr.f32.vlgmr.msra.gmra.mxu0 %v41503_v48  ;;  %v18421_v3 = vand.u32 4294901760, %v18420_v61 }
 0x79b   :  { %36666 = vmatpush3.xpose.msra.mxu1 %v41501_v4  ;;  %36673 = vmatpush3.xpose.msra.mxu0 %v41565_v11 }
 0x79c   :  { %36667 = vmatprep.subr.mxu1 %v44170_v57  ;;  %36674 = vmatprep.subr.mxu0 %v44170_v57 }
 0x79d   :  { %36669 = vmatprep.mubr.msk.f32.mxu1 %vm38339_vm2, %v44170_v57  ;;  %36676 = vmatprep.mubr.msk.f32.mxu0 %vm38339_vm2, %v44170_v57 }
 0x79e   :  { %v13957_v4 = vpop.f32.mrf.mxu0  ;;  %v14348_v32 = vpop.f32.mrf.mxu1 }
 0x79f   :  { %36668 = vmatpush3.xpose.msra.mxu1 %v41511_v22  ;;  %v13958_v42 = vadd.f32 %v13957_v4, %v13881_v47  ;;  %36675 = vmatpush3.xpose.msra.mxu0 %v41581_v60 }
 0x7a0   :  { %36679 = vmatprep.subr.mxu1 %v44170_v57  ;;  %v36286_v6 = vpop.f32.mrf.mxu0  ;;  %v36321_v50 = vpop.f32.mrf.mxu1  ;;  %36686 = vmatprep.subr.mxu0 %v44170_v57 }
 0x7a1   :  { %v41617_v12 = vadd.f32 %v14030_v17, %v13958_v42  ;;  %v18773_v17 = vsel %vm2124_vm3, %v18768_v13, 0 }
 0x7a2   :  { %36670 = vmatmul.mubr.f32.vlgmr.msra.gmra.mxu1 %v41503_v48  ;;  %36677 = vmatmul.mubr.f32.vlgmr.msra.gmra.mxu0 %v18375_v45  ;;  %v18769_v48 = vsel %vm2124_vm3, %v18764_v55, 0  ;;  %v41631_v26 = vand.u32 4294901760, %v18773_v17 }
 0x7a3   :  { %36680 = vmatpush3.xpose.msra.mxu1 %v18414_v30  ;;  %36687 = vmatpush3.xpose.msra.mxu0 %v41576_v5  ;;  %v18766_v5 = vpop.permute.xlu1 %18765  ;;  %v41633_v54 = vand.u32 4294901760, %v18769_v48 }
 0x7a4   :  { %36681 = vmatprep.subr.mxu1 %v44170_v57  ;;  %v14116_v22 = vpop.f32.mrf.mxu0  ;;  %36688 = vmatprep.subr.mxu0 %v44170_v57  ;;  %v41644_v6 = vsub.f32 %v18773_v17, %v41631_v26 }
 0x7a5   :  { %36683 = vmatprep.mubr.msk.f32.mxu1 %vm38339_vm2, %v44170_v57  ;;  %v14198_v63 = vadd.f32 %v14197_v38, %v14116_v22  ;;  %v14498_v1 = vpop.f32.mrf.mxu1  ;;  %36690 = vmatprep.mubr.msk.f32.mxu0 %vm38339_vm2, %v44170_v57  ;;  %v18771_v38 = vsel %vm2124_vm3, %v18766_v5, 0  ;;  %v41647_v50 = vsub.f32 %v18769_v48, %v41633_v54 }
 0x7a6   :  { %v36300_v29 = vpop.f32.mrf.mxu0  ;;  %v41641_v42 = vand.u32 4294901760, %v18771_v38  ;;  %v18883_v55 = vand.u32 4294901760, %v41644_v6 }
 0x7a7   :  { %36682 = vmatpush3.xpose.msra.mxu1 %v18421_v3  ;;  %v36335_v47 = vpop.f32.mrf.mxu1  ;;  %36689 = vmatpush3.xpose.msra.mxu0 %v41593_v24  ;;  %v18844_v22 = vand.u32 4294901760, %v41647_v50  ;;  %v19239_v5 = vpop.permute.xlu1 %19238 }
 0x7a8   :  { %36693 = vmatprep.subr.mxu1 %v44170_v57  ;;  %36700 = vmatprep.subr.mxu0 %v44170_v57  ;;  %v41657_v30 = vsub.f32 %v18771_v38, %v41641_v42 }
 0x7aa   :  { %36684 = vmatmul.mubr.f32.vlgmr.msra.gmra.mxu1 %v41567_v7  ;;  %36691 = vmatmul.mubr.f32.vlgmr.msra.gmra.mxu0 %v41579_v35  ;;  %v18890_v29 = vand.u32 4294901760, %v41657_v30  ;;  %v18884_v35 = vsub.f32 %v41644_v6, %v18883_v55 }
 0x7ab   :  { %36694 = vmatpush3.xpose.msra.mxu1 %v41565_v11  ;;  %v14273_v13 = vpop.f32.mrf.mxu0  ;;  %v14665_v4 = vpop.f32.mrf.mxu1  ;;  %36701 = vmatpush3.xpose.msra.mxu0 %v18412_v46 }
 0x7ac   :  { %v14274_v24 = vadd.f32 %v14273_v13, %v14198_v63  ;;  %36695 = vmatprep.subr.mxu1 %v44170_v57  ;;  %36702 = vmatprep.subr.mxu0 %v44170_v57  ;;  %v18891_v47 = vsub.f32 %v41657_v30, %v18890_v29 }
 0x7ad   :  { %v36314_v45 = vpop.f32.mrf.mxu0  ;;  %v36349_v61 = vpop.f32.mrf.mxu1  ;;  %36697 = vmatprep.mubr.msk.f32.mxu1 %vm38339_vm2, %v44170_v57  ;;  %36704 = vmatprep.mubr.msk.f32.mxu0 %vm38339_vm2, %v44170_v57 }
 0x7ae   :  { %v14349_v46 = vadd.f32 %v14348_v32, %v14274_v24  ;;  %v18885_v24 = vand.u32 4294901760, %v18884_v35 }
 0x7af   :  { %36696 = vmatpush3.xpose.msra.mxu1 %v41581_v60  ;;  %36703 = vmatpush3.xpose.msra.mxu0 %v18419_v41 }
 0x7b0   :  { %36707 = vmatprep.subr.mxu1 %v44170_v57  ;;  %36714 = vmatprep.subr.mxu0 %v44170_v57 }
 0x7b1   :  { %v14425_v3 = vpop.f32.mrf.mxu0 }
 0x7b2   :  { %v14426_v63 = vadd.f32 %v14425_v3, %v14349_v46  ;;  %v14816_v17 = vpop.f32.mrf.mxu1  ;;  %36698 = vmatmul.mubr.f32.vlgmr.msra.gmra.mxu1 %v18373_v10  ;;  %36705 = vmatmul.mubr.f32.vlgmr.msra.gmra.mxu0 %v41567_v7  ;;  %v18845_v10 = vsub.f32 %v41647_v50, %v18844_v22 }
 0x7b3   :  { %36708 = vmatpush3.xpose.msra.mxu1 %v41565_v11  ;;  %v36328_v41 = vpop.f32.mrf.mxu0  ;;  %36715 = vmatpush3.xpose.msra.mxu0 %v41631_v26 }
 0x7b4   :  { %v41666_v32 = vadd.f32 %v14498_v1, %v14426_v63  ;;  %v36363_v48 = vpop.f32.mrf.mxu1  ;;  %36709 = vmatprep.subr.mxu1 %v44170_v57  ;;  %36716 = vmatprep.subr.mxu0 %v44170_v57  ;;  %v18846_v38 = vand.u32 4294901760, %v18845_v10  ;;  %v18892_v63 = vand.u32 4294901760, %v18891_v47 }
 0x7b5   :  { %36711 = vmatprep.mubr.msk.f32.mxu1 %vm38339_vm2, %v44170_v57  ;;  %36718 = vmatprep.mubr.msk.f32.mxu0 %vm38339_vm2, %v44170_v57  ;;  %v19237_v48 = vpop.permute.xlu0 %19236 }
 0x7b7   :  { %36710 = vmatpush3.xpose.msra.mxu1 %v41581_v60  ;;  %36717 = vmatpush3.xpose.msra.mxu0 %v41641_v42  ;;  %v19235_v60 = vpop.permute.xlu1 %19234 }
 0x7b8   :  { %v14584_v11 = vpop.f32.mrf.mxu0  ;;  %v14966_v1 = vpop.f32.mrf.mxu1  ;;  %36721 = vmatprep.subr.mxu1 %v44170_v57  ;;  %36728 = vmatprep.subr.mxu0 %v44170_v57  ;;  %v19240_v41 = vsel %vm2124_vm3, %v19235_v60, 0 }
 0x7b9   :  { %v14666_v13 = vadd.f32 %v14665_v4, %v14584_v11  ;;  %v19244_v4 = vsel %vm2124_vm3, %v19239_v5, 0  ;;  %v41703_v47 = vand.u32 4294901760, %v19240_v41  ;;  %v19242_v5 = vsel %vm2124_vm3, %v19237_v48, 0 }
 0x7ba   :  { %v36342_v45 = vpop.f32.mrf.mxu0  ;;  %v36377_v61 = vpop.f32.mrf.mxu1  ;;  %36712 = vmatmul.mubr.f32.vlgmr.msra.gmra.mxu1 %v41567_v7  ;;  %36719 = vmatmul.mubr.f32.vlgmr.msra.gmra.mxu0 %v18846_v38  ;;  %v41701_v11 = vand.u32 4294901760, %v19244_v4  ;;  %v41721_v60 = vand.u32 4294901760, %v19242_v5 }
 0x7bb   :  { %36722 = vmatpush3.xpose.msra.mxu1 %v18885_v24  ;;  %36729 = vmatpush3.xpose.msra.mxu0 %v41644_v6  ;;  %v41719_v61 = vsub.f32 %v19240_v41, %v41703_v47 }
 0x7bc   :  { %v14741_v46 = vpop.f32.mrf.mxu0  ;;  %36723 = vmatprep.subr.mxu1 %v44170_v57  ;;  %36730 = vmatprep.subr.mxu0 %v44170_v57  ;;  %v41716_v45 = vsub.f32 %v19244_v4, %v41701_v11 }
 0x7bd   :  { %v14742_v3 = vadd.f32 %v14741_v46, %v14666_v13  ;;  %36725 = vmatprep.mubr.msk.f32.mxu1 %vm38339_vm2, %v44170_v57  ;;  %36732 = vmatprep.mubr.msk.f32.mxu0 %vm38339_vm2, %v44170_v57 }
 0x7be   :  { %v36356_v7 = vpop.f32.mrf.mxu0  ;;  %v19354_v46 = vand.u32 4294901760, %v41716_v45 }
 0x7bf   :  { %v14817_v35 = vadd.f32 %v14816_v17, %v14742_v3  ;;  %36724 = vmatpush3.xpose.msra.mxu1 %v18892_v63  ;;  %36731 = vmatpush3.xpose.msra.mxu0 %v41657_v30  ;;  %v19315_v3 = vand.u32 4294901760, %v41719_v61  ;;  %v41735_v63 = vsub.f32 %v19242_v5, %v41721_v60 }
 0x7c0   :  { %v14893_v10 = vpop.f32.mrf.mxu0  ;;  %36735 = vmatprep.subr.mxu1 %v44170_v57  ;;  %36742 = vmatprep.subr.mxu0 %v44170_v57  ;;  %v19355_v30 = vsub.f32 %v41716_v45, %v19354_v46 }
 0x7c1   :  { %v14894_v38 = vadd.f32 %v14893_v10, %v14817_v35 }
 0x7c2   :  { %v36370_v13 = vpop.f32.mrf.mxu0  ;;  %36726 = vmatmul.mubr.f32.vlgmr.msra.gmra.mxu1 %v41633_v54  ;;  %36733 = vmatmul.mubr.f32.vlgmr.msra.gmra.mxu0 %v41647_v50  ;;  %v19361_v50 = vand.u32 4294901760, %v41735_v63 }
 0x7c3   :  { %v41708_v24 = vadd.f32 %v14966_v1, %v14894_v38  ;;  %36736 = vmatpush3.xpose.msra.mxu1 %v41631_v26  ;;  %36743 = vmatpush3.xpose.msra.mxu0 %v18883_v55 }
 0x7c4   :  { %v15052_v17 = vpop.f32.mrf.mxu0  ;;  %36737 = vmatprep.subr.mxu1 %v44170_v57  ;;  %36744 = vmatprep.subr.mxu0 %v44170_v57  ;;  %v19362_v13 = vsub.f32 %v41735_v63, %v19361_v50 }
 0x7c5   :  { %36739 = vmatprep.mubr.msk.f32.mxu1 %vm38339_vm2, %v44170_v57  ;;  %36746 = vmatprep.mubr.msk.f32.mxu0 %vm38339_vm2, %v44170_v57 }
 0x7c6   :  { %v36384_v1 = vpop.f32.mrf.mxu0 }
 0x7c7   :  { %v15133_v6 = vpop.f32.mrf.mxu1  ;;  %36738 = vmatpush3.xpose.msra.mxu1 %v41641_v42  ;;  %36745 = vmatpush3.xpose.msra.mxu0 %v18890_v29  ;;  %v19316_v29 = vsub.f32 %v41719_v61, %v19315_v3  ;;  %v19356_v1 = vand.u32 4294901760, %v19355_v30  ;;  %v19708_v30 = vpop.permute.xlu1 %19707 }
 0x7c8   :  { %v15134_v55 = vadd.f32 %v15133_v6, %v15052_v17  ;;  %36749 = vmatprep.subr.mxu1 %v44170_v57  ;;  %36756 = vmatprep.subr.mxu0 %v44170_v57 }
 0x7c9   :  { %v15209_v4 = vpop.f32.mrf.mxu0  ;;  %v36391_v41 = vpop.f32.mrf.mxu1  ;;  %v19317_v5 = vand.u32 4294901760, %v19316_v29 }
 0x7ca   :  { %v15210_v7 = vadd.f32 %v15209_v4, %v15134_v55  ;;  %36740 = vmatmul.mubr.f32.vlgmr.msra.gmra.mxu1 %v18844_v22  ;;  %36747 = vmatmul.mubr.f32.vlgmr.msra.gmra.mxu0 %v41633_v54  ;;  %v19710_v22 = vpop.permute.xlu0 %19709  ;;  %v19363_v41 = vand.u32 4294901760, %v19362_v13 }
 0x7cb   :  { %v36398_v48 = vpop.f32.mrf.mxu0  ;;  %36750 = vmatpush3.xpose.msra.mxu1 %v41631_v26  ;;  %36757 = vmatpush3.xpose.msra.mxu0 %v41701_v11 }
 0x7cc   :  { %36751 = vmatprep.subr.mxu1 %v44170_v57  ;;  %36758 = vmatprep.subr.mxu0 %v44170_v57 }
 0x7cd   :  { %36753 = vmatprep.mubr.msk.f32.mxu1 %vm38339_vm2, %v44170_v57  ;;  %36760 = vmatprep.mubr.msk.f32.mxu0 %vm38339_vm2, %v44170_v57 }
 0x7ce   :  { %v15284_v26 = vpop.f32.mrf.mxu1  ;;  %v19706_v55 = vpop.permute.xlu0 %19705 }
 0x7cf   :  { %v15285_v35 = vadd.f32 %v15284_v26, %v15210_v7  ;;  %36752 = vmatpush3.xpose.msra.mxu1 %v41641_v42  ;;  %36759 = vmatpush3.xpose.msra.mxu0 %v41721_v60  ;;  %v19715_v7 = vsel %vm2124_vm3, %v19710_v22, 0  ;;  %v19713_v22 = vsel %vm2124_vm3, %v19708_v30, 0 }
 0x7d0   :  { %v15361_v10 = vpop.f32.mrf.mxu0  ;;  %v36405_v38 = vpop.f32.mrf.mxu1  ;;  %36763 = vmatprep.subr.mxu1 %v44170_v57  ;;  %36770 = vmatprep.subr.mxu0 %v44170_v57  ;;  %v41775_v26 = vand.u32 4294901760, %v19715_v7 }
 0x7d1   :  { %v15362_v17 = vadd.f32 %v15361_v10, %v15285_v35 }
 0x7d2   :  { %v36412_v6 = vpop.f32.mrf.mxu0  ;;  %36754 = vmatmul.mubr.f32.vlgmr.msra.gmra.mxu1 %v41633_v54  ;;  %36761 = vmatmul.mubr.f32.vlgmr.msra.gmra.mxu0 %v19317_v5  ;;  %v19711_v54 = vsel %vm2124_vm3, %v19706_v55, 0 }
 0x7d3   :  { %36764 = vmatpush3.xpose.msra.mxu1 %v19356_v1  ;;  %36771 = vmatpush3.xpose.msra.mxu0 %v41716_v45  ;;  %v41777_v35 = vand.u32 4294901760, %v19711_v54 }
 0x7d4   :  { %v15434_v42 = vpop.f32.mrf.mxu1  ;;  %36765 = vmatprep.subr.mxu1 %v44170_v57  ;;  %36772 = vmatprep.subr.mxu0 %v44170_v57 }
 0x7d5   :  { %v41764_v4 = vadd.f32 %v15434_v42, %v15362_v17  ;;  %36767 = vmatprep.mubr.msk.f32.mxu1 %vm38339_vm2, %v44170_v57  ;;  %36774 = vmatprep.mubr.msk.f32.mxu0 %vm38339_vm2, %v44170_v57  ;;  %v41790_v17 = vsub.f32 %v19715_v7, %v41775_v26  ;;  %v41793_v1 = vsub.f32 %v19711_v54, %v41777_v35 }
 0x7d6   :  { %v36419_v48 = vpop.f32.mrf.mxu1 }
 0x7d7   :  { %36766 = vmatpush3.xpose.msra.mxu1 %v19363_v41  ;;  %36773 = vmatpush3.xpose.msra.mxu0 %v41735_v63  ;;  %v41787_v63 = vand.u32 4294901760, %v19713_v22  ;;  %v19825_v41 = vand.u32 4294901760, %v41790_v17  ;;  %v19786_v7 = vand.u32 4294901760, %v41793_v1 }
 0x7d8   :  { %v15520_v29 = vpop.f32.mrf.mxu0  ;;  %36777 = vmatprep.subr.mxu1 %v44170_v57  ;;  %36784 = vmatprep.subr.mxu0 %v44170_v57 }
 0x7d9   :  { %v15601_v10 = vpop.f32.mrf.mxu1  ;;  %v41803_v42 = vsub.f32 %v19713_v22, %v41787_v63  ;;  %v19826_v22 = vsub.f32 %v41790_v17, %v19825_v41 }
 0x7da   :  { %v15602_v38 = vadd.f32 %v15601_v10, %v15520_v29  ;;  %v36426_v5 = vpop.f32.mrf.mxu0  ;;  %36768 = vmatmul.mubr.f32.vlgmr.msra.gmra.mxu1 %v41703_v47  ;;  %36775 = vmatmul.mubr.f32.vlgmr.msra.gmra.mxu0 %v41719_v61  ;;  %v20181_v10 = vpop.permute.xlu1 %20180  ;;  %v19787_v61 = vsub.f32 %v41793_v1, %v19786_v7 }
 0x7db   :  { %v36433_v13 = vpop.f32.mrf.mxu1  ;;  %36778 = vmatpush3.xpose.msra.mxu1 %v41701_v11  ;;  %36785 = vmatpush3.xpose.msra.mxu0 %v19354_v46  ;;  %v19832_v29 = vand.u32 4294901760, %v41803_v42 }
 0x7dc   :  { %36779 = vmatprep.subr.mxu1 %v44170_v57  ;;  %36786 = vmatprep.subr.mxu0 %v44170_v57 }
 0x7dd   :  { %36781 = vmatprep.mubr.msk.f32.mxu1 %vm38339_vm2, %v44170_v57  ;;  %36788 = vmatprep.mubr.msk.f32.mxu0 %vm38339_vm2, %v44170_v57  ;;  %v19833_v13 = vsub.f32 %v41803_v42, %v19832_v29 }
 0x7de   :  { %v15677_v6 = vpop.f32.mrf.mxu0 }
 0x7df   :  { %v15678_v45 = vadd.f32 %v15677_v6, %v15602_v38  ;;  %v15752_v46 = vpop.f32.mrf.mxu1  ;;  %36780 = vmatpush3.xpose.msra.mxu1 %v41721_v60  ;;  %36787 = vmatpush3.xpose.msra.mxu0 %v19361_v50  ;;  %v19788_v6 = vand.u32 4294901760, %v19787_v61 }
 0x7e0   :  { %v36440_v55 = vpop.f32.mrf.mxu0  ;;  %36791 = vmatprep.subr.mxu1 %v44170_v57  ;;  %36798 = vmatprep.subr.mxu0 %v44170_v57 }
 0x7e1   :  { %v15753_v54 = vadd.f32 %v15752_v46, %v15678_v45  ;;  %v36447_v48 = vpop.f32.mrf.mxu1  ;;  %v19827_v45 = vand.u32 4294901760, %v19826_v22  ;;  %v20177_v46 = vpop.permute.xlu1 %20176  ;;  %v20186_v55 = vsel %vm2124_vm3, %v20181_v10, 0 }
 0x7e2   :  { %36782 = vmatmul.mubr.f32.vlgmr.msra.gmra.mxu1 %v19315_v3  ;;  %36789 = vmatmul.mubr.f32.vlgmr.msra.gmra.mxu0 %v41703_v47 }
 0x7e3   :  { %36792 = vmatpush3.xpose.msra.mxu1 %v41701_v11  ;;  %36799 = vmatpush3.xpose.msra.mxu0 %v41775_v26 }
 0x7e4   :  { %v15829_v50 = vpop.f32.mrf.mxu0  ;;  %v15902_v30 = vpop.f32.mrf.mxu1  ;;  %36793 = vmatprep.subr.mxu1 %v44170_v57  ;;  %36800 = vmatprep.subr.mxu0 %v44170_v57 }
 0x7e5   :  { %v15830_v3 = vadd.f32 %v15829_v50, %v15753_v54  ;;  %36795 = vmatprep.mubr.msk.f32.mxu1 %vm38339_vm2, %v44170_v57  ;;  %36802 = vmatprep.mubr.msk.f32.mxu0 %vm38339_vm2, %v44170_v57  ;;  %v20182_v54 = vsel %vm2124_vm3, %v20177_v46, 0 }
 0x7e6   :  { %v36454_v11 = vpop.f32.mrf.mxu0  ;;  %v36461_v38 = vpop.f32.mrf.mxu1  ;;  %v41845_v48 = vand.u32 4294901760, %v20182_v54 }
 0x7e7   :  { %v41824_v5 = vadd.f32 %v15902_v30, %v15830_v3  ;;  %36794 = vmatpush3.xpose.msra.mxu1 %v41721_v60  ;;  %36801 = vmatpush3.xpose.msra.mxu0 %v41787_v63  ;;  %v19834_v60 = vand.u32 4294901760, %v19833_v13 }
 0x7e8   :  { %36805 = vmatprep.subr.mxu1 %v44170_v57  ;;  %36812 = vmatprep.subr.mxu0 %v44170_v57  ;;  %v41857_v30 = vsub.f32 %v20182_v54, %v41845_v48 }
 0x7ea   :  { %36796 = vmatmul.mubr.f32.vlgmr.msra.gmra.mxu1 %v41703_v47  ;;  %36803 = vmatmul.mubr.f32.vlgmr.msra.gmra.mxu0 %v19788_v6  ;;  %v20179_v47 = vpop.permute.xlu0 %20178  ;;  %v20257_v22 = vand.u32 4294901760, %v41857_v30 }
 0x7eb   :  { %36806 = vmatpush3.xpose.msra.mxu1 %v19827_v45  ;;  %36813 = vmatpush3.xpose.msra.mxu0 %v41790_v17  ;;  %v41843_v17 = vand.u32 4294901760, %v20186_v55  ;;  %v20184_v50 = vsel %vm2124_vm3, %v20179_v47, 0 }
 0x7ec   :  { %36807 = vmatprep.subr.mxu1 %v44170_v57  ;;  %36814 = vmatprep.subr.mxu0 %v44170_v57  ;;  %v41859_v10 = vand.u32 4294901760, %v20184_v50  ;;  %v20258_v11 = vsub.f32 %v41857_v30, %v20257_v22 }
 0x7ed   :  { %36809 = vmatprep.mubr.msk.f32.mxu1 %vm38339_vm2, %v44170_v57  ;;  %36816 = vmatprep.mubr.msk.f32.mxu0 %vm38339_vm2, %v44170_v57 }
 0x7ee   :  { %v41871_v61 = vsub.f32 %v20184_v50, %v41859_v10  ;;  %v20652_v13 = vpop.permute.xlu0 %20651 }
 0x7ef   :  { %36808 = vmatpush3.xpose.msra.mxu1 %v19834_v60  ;;  %36815 = vmatpush3.xpose.msra.mxu0 %v41803_v42  ;;  %v41854_v42 = vsub.f32 %v20186_v55, %v41843_v17  ;;  %v20657_v50 = vsel %vm2124_vm3, %v20652_v13, 0 }
 0x7f0   :  { %36819 = vmatprep.subr.mxu1 %v44170_v57  ;;  %36826 = vmatprep.subr.mxu0 %v44170_v57  ;;  %v20303_v38 = vand.u32 4294901760, %v41871_v61 }
 0x7f2   :  { %36810 = vmatmul.mubr.f32.vlgmr.msra.gmra.mxu1 %v41777_v35  ;;  %36817 = vmatmul.mubr.f32.vlgmr.msra.gmra.mxu0 %v41793_v1  ;;  %v20304_v6 = vsub.f32 %v41871_v61, %v20303_v38  ;;  %v20648_v60 = vpop.permute.xlu0 %20647 }
 0x7f3   :  { %36820 = vmatpush3.xpose.msra.mxu1 %v41775_v26  ;;  %36827 = vmatpush3.xpose.msra.mxu0 %v19825_v41  ;;  %v20296_v41 = vand.u32 4294901760, %v41854_v42 }
 0x7f4   :  { %36821 = vmatprep.subr.mxu1 %v44170_v57  ;;  %36828 = vmatprep.subr.mxu0 %v44170_v57  ;;  %v20305_v55 = vand.u32 4294901760, %v20304_v6 }
 0x7f5   :  { %36823 = vmatprep.mubr.msk.f32.mxu1 %vm38339_vm2, %v44170_v57  ;;  %36830 = vmatprep.mubr.msk.f32.mxu0 %vm38339_vm2, %v44170_v57  ;;  %v20297_v3 = vsub.f32 %v41854_v42, %v20296_v41 }
 0x7f7   :  { %36822 = vmatpush3.xpose.msra.mxu1 %v41787_v63  ;;  %36829 = vmatpush3.xpose.msra.mxu0 %v19832_v29  ;;  %v20298_v45 = vand.u32 4294901760, %v20297_v3 }
 0x7f8   :  { %36833 = vmatprep.subr.mxu1 %v44170_v57  ;;  %36840 = vmatprep.subr.mxu0 %v44170_v57 }
 0x7fa   :  { %36824 = vmatmul.mubr.f32.vlgmr.msra.gmra.mxu1 %v19786_v7  ;;  %36831 = vmatmul.mubr.f32.vlgmr.msra.gmra.mxu0 %v41777_v35  ;;  %v20259_v7 = vand.u32 4294901760, %v20258_v11 }
 0x7fb   :  { %36834 = vmatpush3.xpose.msra.mxu1 %v41775_v26  ;;  %36841 = vmatpush3.xpose.msra.mxu0 %v41843_v17 }
 0x7fc   :  { %36835 = vmatprep.subr.mxu1 %v44170_v57  ;;  %v15988_v29 = vpop.f32.mrf.mxu0  ;;  %36842 = vmatprep.subr.mxu0 %v44170_v57 }
 0x7fd   :  { %36837 = vmatprep.mubr.msk.f32.mxu1 %vm38339_vm2, %v44170_v57  ;;  %36844 = vmatprep.mubr.msk.f32.mxu0 %vm38339_vm2, %v44170_v57 }
 0x7fe   :  { %v36468_v26 = vpop.f32.mrf.mxu0 }
 0x7ff   :  { %36836 = vmatpush3.xpose.msra.mxu1 %v41787_v63  ;;  %36843 = vmatpush3.xpose.msra.mxu0 %v41859_v10 }
 0x800   :  { %36847 = vmatprep.subr.mxu1 %v44170_v57  ;;  %v16145_v1 = vpop.f32.mrf.mxu0  ;;  %36854 = vmatprep.subr.mxu0 %v44170_v57 }
 0x802   :  { %36838 = vmatmul.mubr.f32.vlgmr.msra.gmra.mxu1 %v41777_v35  ;;  %v36482_v46 = vpop.f32.mrf.mxu0  ;;  %36845 = vmatmul.mubr.f32.vlgmr.msra.gmra.mxu0 %v20259_v7  ;;  %v20653_v35 = vsel %vm2124_vm3, %v20648_v60, 0  ;;  %v41907_v7 = vand.u32 4294901760, %v20657_v50 }
 0x803   :  { %36848 = vmatpush3.xpose.msra.mxu1 %v20298_v45  ;;  %36855 = vmatpush3.xpose.msra.mxu0 %v41854_v42  ;;  %v20650_v42 = vpop.permute.xlu1 %20649 }
 0x804   :  { %36849 = vmatprep.subr.mxu1 %v44170_v57  ;;  %v16069_v63 = vpop.f32.mrf.mxu1  ;;  %36856 = vmatprep.subr.mxu0 %v44170_v57  ;;  %v20655_v13 = vsel %vm2124_vm3, %v20650_v42, 0  ;;  %v41920_v60 = vsub.f32 %v20657_v50, %v41907_v7 }
 0x805   :  { %36851 = vmatprep.mubr.msk.f32.mxu1 %vm38339_vm2, %v44170_v57  ;;  %v16070_v54 = vadd.f32 %v16069_v63, %v15988_v29  ;;  %v16297_v47 = vpop.f32.mrf.mxu0  ;;  %36858 = vmatprep.mubr.msk.f32.mxu0 %vm38339_vm2, %v44170_v57  ;;  %v41909_v29 = vand.u32 4294901760, %v20653_v35  ;;  %v41917_v46 = vand.u32 4294901760, %v20655_v13 }
 0x806   :  { %v36475_v3 = vpop.f32.mrf.mxu1 }
 0x807   :  { %36850 = vmatpush3.xpose.msra.mxu1 %v20305_v55  ;;  %v36496_v11 = vpop.f32.mrf.mxu0  ;;  %v16146_v26 = vadd.f32 %v16145_v1, %v16070_v54  ;;  %36857 = vmatpush3.xpose.msra.mxu0 %v41871_v61  ;;  %v41923_v63 = vsub.f32 %v20653_v35, %v41909_v29  ;;  %v41933_v50 = vsub.f32 %v20655_v13, %v41917_v46  ;;  %v20767_v35 = vand.u32 4294901760, %v41920_v60 }
 0x808   :  { %36861 = vmatprep.subr.mxu1 %v44170_v57  ;;  %36868 = vmatprep.subr.mxu0 %v44170_v57 }
 0x809   :  { %v20728_v3 = vand.u32 4294901760, %v41923_v63  ;;  %v20768_v13 = vsub.f32 %v41920_v60, %v20767_v35 }
 0x80a   :  { %36852 = vmatmul.mubr.f32.vlgmr.msra.gmra.mxu1 %v41845_v48  ;;  %v16220_v6 = vpop.f32.mrf.mxu1  ;;  %36859 = vmatmul.mubr.f32.vlgmr.msra.gmra.mxu0 %v41857_v30 }
 0x80b   :  { %36862 = vmatpush3.xpose.msra.mxu1 %v41843_v17  ;;  %v16221_v1 = vadd.f32 %v16220_v6, %v16146_v26  ;;  %v16456_v45 = vpop.f32.mrf.mxu0  ;;  %36869 = vmatpush3.xpose.msra.mxu0 %v20296_v41  ;;  %v20774_v26 = vand.u32 4294901760, %v41933_v50  ;;  %v20729_v6 = vsub.f32 %v41923_v63, %v20728_v3 }
 0x80c   :  { %36863 = vmatprep.subr.mxu1 %v44170_v57  ;;  %v36489_v61 = vpop.f32.mrf.mxu1  ;;  %36870 = vmatprep.subr.mxu0 %v44170_v57 }
 0x80d   :  { %36865 = vmatprep.mubr.msk.f32.mxu1 %vm38339_vm2, %v44170_v57  ;;  %v36510_v55 = vpop.f32.mrf.mxu0  ;;  %v16298_v54 = vadd.f32 %v16297_v47, %v16221_v1  ;;  %36872 = vmatprep.mubr.msk.f32.mxu0 %vm38339_vm2, %v44170_v57  ;;  %v20775_v61 = vsub.f32 %v41933_v50, %v20774_v26 }
 0x80e   :  { %v20730_v55 = vand.u32 4294901760, %v20729_v6 }
 0x80f   :  { %36864 = vmatpush3.xpose.msra.mxu1 %v41859_v10  ;;  %36871 = vmatpush3.xpose.msra.mxu0 %v20303_v38 }
 0x810   :  { %36875 = vmatprep.subr.mxu1 %v44170_v57  ;;  %v16370_v41 = vpop.f32.mrf.mxu1  ;;  %36882 = vmatprep.subr.mxu0 %v44170_v57 }
 0x811   :  { %v41938_v42 = vadd.f32 %v16370_v41, %v16298_v54  ;;  %v16613_v47 = vpop.f32.mrf.mxu0  ;;  %v20769_v54 = vand.u32 4294901760, %v20768_v13 }
 0x812   :  { %36866 = vmatmul.mubr.f32.vlgmr.msra.gmra.mxu1 %v20257_v22  ;;  %v36503_v11 = vpop.f32.mrf.mxu1  ;;  %36873 = vmatmul.mubr.f32.vlgmr.msra.gmra.mxu0 %v41845_v48 }
 0x813   :  { %36876 = vmatpush3.xpose.msra.mxu1 %v41843_v17  ;;  %v36524_v38 = vpop.f32.mrf.mxu0  ;;  %36883 = vmatpush3.xpose.msra.mxu0 %v41907_v7 }
 0x814   :  { %36877 = vmatprep.subr.mxu1 %v44170_v57  ;;  %36884 = vmatprep.subr.mxu0 %v44170_v57 }
 0x815   :  { %36879 = vmatprep.mubr.msk.f32.mxu1 %vm38339_vm2, %v44170_v57  ;;  %36886 = vmatprep.mubr.msk.f32.mxu0 %vm38339_vm2, %v44170_v57 }
 0x816   :  { %v16537_v17 = vpop.f32.mrf.mxu1 }
 0x817   :  { %36878 = vmatpush3.xpose.msra.mxu1 %v41859_v10  ;;  %v16538_v30 = vadd.f32 %v16537_v17, %v16456_v45  ;;  %v16765_v22 = vpop.f32.mrf.mxu0  ;;  %36885 = vmatpush3.xpose.msra.mxu0 %v41917_v46  ;;  %v20776_v45 = vand.u32 4294901760, %v20775_v61 }
 0x818   :  { %36889 = vmatprep.subr.mxu1 %v44170_v57  ;;  %v36517_v1 = vpop.f32.mrf.mxu1  ;;  %36896 = vmatprep.subr.mxu0 %v44170_v57 }
 0x819   :  { %v36538_v41 = vpop.f32.mrf.mxu0  ;;  %v16614_v11 = vadd.f32 %v16613_v47, %v16538_v30 }
 0x81a   :  { %36880 = vmatmul.mubr.f32.vlgmr.msra.gmra.mxu1 %v41845_v48  ;;  %36887 = vmatmul.mubr.f32.vlgmr.msra.gmra.mxu0 %v20730_v55 }
 0x81b   :  { %36890 = vmatpush3.xpose.msra.mxu1 %v20769_v54  ;;  %36897 = vmatpush3.xpose.msra.mxu0 %v41920_v60 }
 0x81c   :  { %36891 = vmatprep.subr.mxu1 %v44170_v57  ;;  %v16688_v10 = vpop.f32.mrf.mxu1  ;;  %36898 = vmatprep.subr.mxu0 %v44170_v57 }
 0x81d   :  { %36893 = vmatprep.mubr.msk.f32.mxu1 %vm38339_vm2, %v44170_v57  ;;  %v16689_v38 = vadd.f32 %v16688_v10, %v16614_v11  ;;  %v16924_v6 = vpop.f32.mrf.mxu0  ;;  %36900 = vmatprep.mubr.msk.f32.mxu0 %vm38339_vm2, %v44170_v57 }
 0x81e   :  { %v36531_v47 = vpop.f32.mrf.mxu1 }
 0x81f   :  { %36892 = vmatpush3.xpose.msra.mxu1 %v20776_v45  ;;  %v36552_v48 = vpop.f32.mrf.mxu0  ;;  %v16766_v13 = vadd.f32 %v16765_v22, %v16689_v38  ;;  %36899 = vmatpush3.xpose.msra.mxu0 %v41933_v50 }
 0x820   :  { %36903 = vmatprep.subr.mxu1 %v44170_v57  ;;  %36910 = vmatprep.subr.mxu0 %v44170_v57 }
 0x822   :  { %36894 = vmatmul.mubr.f32.vlgmr.msra.gmra.mxu1 %v41909_v29  ;;  %v16838_v60 = vpop.f32.mrf.mxu1  ;;  %36901 = vmatmul.mubr.f32.vlgmr.msra.gmra.mxu0 %v41923_v63 }
 0x823   :  { %36904 = vmatpush3.xpose.msra.mxu1 %v41907_v7  ;;  %v41975_v17 = vadd.f32 %v16838_v60, %v16766_v13  ;;  %v17081_v30 = vpop.f32.mrf.mxu0  ;;  %36911 = vmatpush3.xpose.msra.mxu0 %v20767_v35 }
 0x824   :  { %36905 = vmatprep.subr.mxu1 %v44170_v57  ;;  %v36545_v22 = vpop.f32.mrf.mxu1  ;;  %36912 = vmatprep.subr.mxu0 %v44170_v57 }
 0x825   :  { %v36566_v50 = vpop.f32.mrf.mxu0  ;;  %36907 = vmatprep.mubr.msk.f32.mxu1 %vm38339_vm2, %v44170_v57  ;;  %36914 = vmatprep.mubr.msk.f32.mxu0 %vm38339_vm2, %v44170_v57 }
 0x827   :  { %36906 = vmatpush3.xpose.msra.mxu1 %v41917_v46  ;;  %36913 = vmatpush3.xpose.msra.mxu0 %v20774_v26 }
 0x828   :  { %v17005_v1 = vpop.f32.mrf.mxu1  ;;  %36917 = vmatprep.subr.mxu1 %v44170_v57  ;;  %36924 = vmatprep.subr.mxu0 %v44170_v57 }
 0x829   :  { %v17006_v61 = vadd.f32 %v17005_v1, %v16924_v6  ;;  %v17233_v35 = vpop.f32.mrf.mxu0 }
 0x82a   :  { %36908 = vmatmul.mubr.f32.vlgmr.msra.gmra.mxu1 %v20728_v3  ;;  %v36559_v55 = vpop.f32.mrf.mxu1  ;;  %36915 = vmatmul.mubr.f32.vlgmr.msra.gmra.mxu0 %v41909_v29 }
 0x82b   :  { %36918 = vmatpush3.xpose.msra.mxu1 %v41907_v7  ;;  %v36580_v54 = vpop.f32.mrf.mxu0  ;;  %v17082_v41 = vadd.f32 %v17081_v30, %v17006_v61  ;;  %36921 = vmatprep.mubr.msk.f32.mxu1 %vm38339_vm2, %v44170_v57 }
 0x82c   :  { %36919 = vmatprep.subr.mxu1 %v44170_v57  ;;  %36928 = vmatprep.mubr.msk.f32.mxu0 %vm38339_vm2, %v44170_v57 }
 0x82d   :  { %v17156_v26 = vpop.f32.mrf.mxu1 }
 0x82e   :  { %v17157_v11 = vadd.f32 %v17156_v26, %v17082_v41 }
 0x82f   :  { %36920 = vmatpush3.xpose.msra.mxu1 %v41917_v46  ;;  %v36573_v63 = vpop.f32.mrf.mxu1 }
 0x830   :  { %v17234_v3 = vadd.f32 %v17233_v35, %v17157_v11  ;;  %36931 = vmatprep.subr.mxu1 %v44170_v57 }
 0x831   :  { %v17306_v10 = vpop.f32.mrf.mxu1  ;;  %v17435_v45 = vpop.f32.mrf.mxu0 }
 0x832   :  { %v41997_v7 = vadd.f32 %v17306_v10, %v17234_v3  ;;  %36922 = vmatmul.mubr.f32.vlgmr.msra.gmra.mxu1 %v41909_v29 }
 0x833   :  { %v36587_v38 = vpop.f32.mrf.mxu1  ;;  %36935 = vmatprep.mubr.msk.f32.mxu1 %vm38339_vm2, %v44170_v57  ;;  %v36594_v6 = vpop.f32.mrf.mxu0 }
 0x83a   :  { %v17516_v47 = vpop.f32.mrf.mxu1  ;;  %v17592_v48 = vpop.f32.mrf.mxu0 }
 0x83b   :  { %v17517_v46 = vadd.f32 %v17516_v47, %v17435_v45 }
 0x83c   :  { %v36601_v13 = vpop.f32.mrf.mxu1  ;;  %v36608_v60 = vpop.f32.mrf.mxu0 }
 0x83d   :  { %v17593_v22 = vadd.f32 %v17592_v48, %v17517_v46 }
 0x842   :  { %v17667_v30 = vpop.f32.mrf.mxu1  ;;  %v17744_v50 = vpop.f32.mrf.mxu0 }
 0x843   :  { %v17668_v61 = vadd.f32 %v17667_v30, %v17593_v22 }
 0x844   :  { %v36615_v1 = vpop.f32.mrf.mxu1  ;;  %v36622_v35 = vpop.f32.mrf.mxu0 }
 0x845   :  { %v17745_v55 = vadd.f32 %v17744_v50, %v17668_v61 }
 0x84a   :  { %v17817_v54 = vpop.f32.mrf.mxu1  ;;  %v17906_v29 = vpop.f32.mrf.mxu0 }
 0x84b   :  { %v42002_v41 = vadd.f32 %v17817_v54, %v17745_v55 }
 0x84c   :  { %v36629_v26 = vpop.f32.mrf.mxu1  ;;  %v36636_v11 = vpop.f32.mrf.mxu0 }
 0x84d   :  { %v21118_v63 = vsel %vm5869_vm4, %v42002_v41, -inf }
 0x84e   :  { %21119 = vmax.xlane.f32.xlu1 %v21118_v63 }
 0x852   :  { %v17987_v3 = vpop.f32.mrf.mxu1  ;;  %v18063_v10 = vpop.f32.mrf.mxu0 }
 0x853   :  { %v17988_v6 = vadd.f32 %v17987_v3, %v17906_v29 }
 0x854   :  { %v36643_v45 = vpop.f32.mrf.mxu1  ;;  %v36650_v38 = vpop.f32.mrf.mxu0 }
 0x855   :  { %v18064_v48 = vadd.f32 %v18063_v10, %v17988_v6 }
 0x85a   :  { %v18138_v47 = vpop.f32.mrf.mxu1  ;;  %v18215_v13 = vpop.f32.mrf.mxu0 }
 0x85b   :  { %v18139_v46 = vadd.f32 %v18138_v47, %v18064_v48 }
 0x85c   :  { %v36657_v60 = vpop.f32.mrf.mxu1  ;;  %v36664_v30 = vpop.f32.mrf.mxu0 }
 0x85d   :  { %v18216_v22 = vadd.f32 %v18215_v13, %v18139_v46 }
 0x85f   :  { %21208 = vrot.lane.b32.xlu1 %v44192_v52, %s38343_s29 }
 0x862   :  { %v18288_v50 = vpop.f32.mrf.mxu1  ;;  %v18377_v61 = vpop.f32.mrf.mxu0 }
 0x863   :  { %v42008_v1 = vadd.f32 %v18288_v50, %v18216_v22 }
 0x864   :  { %v36671_v35 = vpop.f32.mrf.mxu1  ;;  %v36678_v55 = vpop.f32.mrf.mxu0 }
 0x865   :  { %v21121_v54 = vsel %vm5869_vm4, %v42008_v1, -inf }
 0x866   :  { %21122 = vmax.xlane.f32.xlu0 %v21121_v54 }
 0x86a   :  { %v18458_v29 = vpop.f32.mrf.mxu1  ;;  %v18534_v26 = vpop.f32.mrf.mxu0 }
 0x86b   :  { %v18459_v3 = vadd.f32 %v18458_v29, %v18377_v61 }
 0x86c   :  { %v36685_v11 = vpop.f32.mrf.mxu1  ;;  %v36692_v63 = vpop.f32.mrf.mxu0 }
 0x86d   :  { %v18535_v45 = vadd.f32 %v18534_v26, %v18459_v3 }
 0x872   :  { %v18609_v10 = vpop.f32.mrf.mxu1  ;;  %v18686_v38 = vpop.f32.mrf.mxu0 }
 0x873   :  { %v18610_v47 = vadd.f32 %v18609_v10, %v18535_v45 }
 0x874   :  { %v36699_v6 = vpop.f32.mrf.mxu1  ;;  %v36706_v48 = vpop.f32.mrf.mxu0 }
 0x875   :  { %v18687_v13 = vadd.f32 %v18686_v38, %v18610_v47 }
 0x87a   :  { %v18759_v60 = vpop.f32.mrf.mxu1  ;;  %v18848_v30 = vpop.f32.mrf.mxu0 }
 0x87b   :  { %v42012_v46 = vadd.f32 %v18759_v60, %v18687_v13 }
 0x87c   :  { %v36713_v22 = vpop.f32.mrf.mxu1  ;;  %v36720_v50 = vpop.f32.mrf.mxu0 }
 0x87d   :  { %v21124_v35 = vsel %vm5869_vm4, %v42012_v46, -inf }
 0x87e   :  { %21125 = vmax.xlane.f32.xlu0 %v21124_v35 }
 0x882   :  { %v18929_v55 = vpop.f32.mrf.mxu1  ;;  %v19005_v54 = vpop.f32.mrf.mxu0 }
 0x883   :  { %v18930_v26 = vadd.f32 %v18929_v55, %v18848_v30 }
 0x884   :  { %v36727_v61 = vpop.f32.mrf.mxu1  ;;  %v36734_v29 = vpop.f32.mrf.mxu0 }
 0x885   :  { %v19006_v63 = vadd.f32 %v19005_v54, %v18930_v26 }
 0x88a   :  { %v19080_v11 = vpop.f32.mrf.mxu1  ;;  %v19157_v3 = vpop.f32.mrf.mxu0 }
 0x88b   :  { %v19081_v45 = vadd.f32 %v19080_v11, %v19006_v63 }
 0x88c   :  { %v36741_v10 = vpop.f32.mrf.mxu1  ;;  %v36748_v38 = vpop.f32.mrf.mxu0 }
 0x88d   :  { %v19158_v6 = vadd.f32 %v19157_v3, %v19081_v45 }
 0x892   :  { %v19230_v47 = vpop.f32.mrf.mxu1  ;;  %v19319_v13 = vpop.f32.mrf.mxu0 }
 0x893   :  { %v42016_v48 = vadd.f32 %v19230_v47, %v19158_v6 }
 0x894   :  { %v36755_v60 = vpop.f32.mrf.mxu1  ;;  %v36762_v22 = vpop.f32.mrf.mxu0 }
 0x895   :  { %v21127_v50 = vsel %vm5869_vm4, %v42016_v48, -inf }
 0x896   :  { %21128 = vmax.xlane.f32.xlu1 %v21127_v50 }
 0x89a   :  { %v19400_v35 = vpop.f32.mrf.mxu1  ;;  %v19476_v61 = vpop.f32.mrf.mxu0 }
 0x89b   :  { %v19401_v54 = vadd.f32 %v19400_v35, %v19319_v13 }
 0x89c   :  { %v36769_v30 = vpop.f32.mrf.mxu1  ;;  %v36776_v55 = vpop.f32.mrf.mxu0 }
 0x89d   :  { %v19477_v26 = vadd.f32 %v19476_v61, %v19401_v54 }
 0x8a2   :  { %v19551_v29 = vpop.f32.mrf.mxu1  ;;  %v19628_v11 = vpop.f32.mrf.mxu0 }
 0x8a3   :  { %v19552_v3 = vadd.f32 %v19551_v29, %v19477_v26 }
 0x8a4   :  { %v36783_v63 = vpop.f32.mrf.mxu1  ;;  %v36790_v10 = vpop.f32.mrf.mxu0 }
 0x8a5   :  { %v19629_v45 = vadd.f32 %v19628_v11, %v19552_v3 }
 0x8aa   :  { %v19701_v38 = vpop.f32.mrf.mxu1  ;;  %v19790_v47 = vpop.f32.mrf.mxu0 }
 0x8ab   :  { %v42020_v6 = vadd.f32 %v19701_v38, %v19629_v45 }
 0x8ac   :  { %v36797_v60 = vpop.f32.mrf.mxu1  ;;  %v36804_v22 = vpop.f32.mrf.mxu0 }
 0x8ad   :  { %v21130_v50 = vsel %vm5869_vm4, %v42020_v6, -inf }
 0x8ae   :  { %21131 = vmax.xlane.f32.xlu0 %v21130_v50 }
 0x8b2   :  { %v19871_v30 = vpop.f32.mrf.mxu1  ;;  %v19947_v55 = vpop.f32.mrf.mxu0 }
 0x8b3   :  { %v19872_v61 = vadd.f32 %v19871_v30, %v19790_v47 }
 0x8b4   :  { %v36811_v13 = vpop.f32.mrf.mxu1  ;;  %v36818_v35 = vpop.f32.mrf.mxu0 }
 0x8b5   :  { %v19948_v63 = vadd.f32 %v19947_v55, %v19872_v61 }
 0x8ba   :  { %v20022_v54 = vpop.f32.mrf.mxu1  ;;  %v20099_v29 = vpop.f32.mrf.mxu0 }
 0x8bb   :  { %v20023_v11 = vadd.f32 %v20022_v54, %v19948_v63  ;;  %v21207_v63 = vpop.permute.xlu0 %21206 }
 0x8bc   :  { %v36825_v26 = vpop.f32.mrf.mxu1  ;;  %v36832_v3 = vpop.f32.mrf.mxu0 }
 0x8bd   :  { %v20100_v10 = vadd.f32 %v20099_v29, %v20023_v11  ;;  %v42030_v3 = vand.u32 4294901760, %v21207_v63 }
 0x8c2   :  { %v20172_v45 = vpop.f32.mrf.mxu1  ;;  %v20261_v60 = vpop.f32.mrf.mxu0 }
 0x8c3   :  { %v42024_v38 = vadd.f32 %v20172_v45, %v20100_v10 }
 0x8c4   :  { %v36839_v22 = vpop.f32.mrf.mxu1  ;;  %22142 = vrot.lane.b32.xlu0 %v39275_v21, %s38343_s29  ;;  %v36846_v50 = vpop.f32.mrf.mxu0 }
 0x8c5   :  { %v21133_v13 = vsel %vm5869_vm4, %v42024_v38, -inf  ;;  %v42035_v50 = vsub.f32 %v21207_v63, %v42030_v3 }
 0x8c6   :  { %21134 = vmax.xlane.f32.xlu1 %v21133_v13 }
 0x8ca   :  { %v20342_v47 = vpop.f32.mrf.mxu1  ;;  %v20418_v30 = vpop.f32.mrf.mxu0 }
 0x8cb   :  { %v20343_v61 = vadd.f32 %v20342_v47, %v20261_v60 }
 0x8cc   :  { %v36853_v55 = vpop.f32.mrf.mxu1  ;;  %v36860_v35 = vpop.f32.mrf.mxu0 }
 0x8cd   :  { %v20419_v10 = vadd.f32 %v20418_v30, %v20343_v61 }
 0x8d2   :  { %v20493_v54 = vpop.f32.mrf.mxu1  ;;  %v20570_v29 = vpop.f32.mrf.mxu0 }
 0x8d3   :  { %v20494_v22 = vadd.f32 %v20493_v54, %v20419_v10 }
 0x8d4   :  { %v36867_v26 = vpop.f32.mrf.mxu1  ;;  %v36874_v11 = vpop.f32.mrf.mxu0 }
 0x8d5   :  { %v20571_v60 = vadd.f32 %v20570_v29, %v20494_v22  ;;  %v44136_v11 = vand.u32 4294901760, %v42035_v50 }
 0x8d7   :  { %v21120_v45 = vpop.xlane.xlu1 %21119  ;;  %22144 = vrot.lane.b32.xlu1 %v39263_v31, %s38343_s29  ;;  %v21331_v29 = vsub.f32 %v42035_v50, %v44136_v11 }
 0x8da   :  { %v20643_v13 = vpop.f32.mrf.mxu1  ;;  %v20732_v55 = vpop.f32.mrf.mxu0 }
 0x8db   :  { %v21209_v35 = vpop.permute.xlu1 %21208  ;;  %v42040_v37 = vadd.f32 %v20643_v13, %v20571_v60 }
 0x8dc   :  { %v42037_v47 = vand.u32 4294901760, %v21209_v35  ;;  %v36881_v28 = vpop.f32.mrf.mxu1  ;;  %v36888_v26 = vpop.f32.mrf.mxu0 }
 0x8dd   :  { %v21136_v28 = vsel %vm5869_vm4, %v42040_v37, -inf  ;;  %v21332_v26 = vand.u32 4294901760, %v21331_v29 }
 0x8de   :  { %v42043_v30 = vsub.f32 %v21209_v35, %v42037_v47  ;;  %36925 = vmatpush3.msra.mxu0 %v42037_v47  ;;  %v42058_v35 = vpop.permute.xlu0 %21676 }
 0x8df   :  { %36926 = vmatprep.subr.mxu0 %v44170_v57 }
 0x8e0   :  { %v44135_v61 = vand.u32 4294901760, %v42043_v30  ;;  %36927 = vmatpush3.msra.mxu0 %v42030_v3 }
 0x8e1   :  { %36938 = vmatprep.subr.mxu0 %v44170_v57 }
 0x8e2   :  { %v20813_v54 = vpop.f32.mrf.mxu1  ;;  %v21324_v63 = vsub.f32 %v42043_v30, %v44135_v61  ;;  %v20889_v10 = vpop.f32.mrf.mxu0 }
 0x8e3   :  { %21137 = vmax.xlane.f32.xlu0 %v21136_v28  ;;  %v20814_v62 = vadd.f32 %v20813_v54, %v20732_v55  ;;  %v42062_v2 = vpop.permute.xlu0 %21674 }
 0x8e4   :  { %v36895_v22 = vpop.f32.mrf.mxu1  ;;  %v21325_v13 = vand.u32 4294901760, %v21324_v63  ;;  %v36902_v60 = vpop.f32.mrf.mxu0 }
 0x8e5   :  { %v20890_v28 = vadd.f32 %v20889_v10, %v20814_v62 }
 0x8e6   :  { %36932 = vmatpush3.msra.mxu1 %v21325_v13 }
 0x8e7   :  { %36933 = vmatprep.subr.mxu1 %v44170_v57 }
 0x8e8   :  { %36934 = vmatpush3.msra.mxu1 %v21332_v26 }
 0x8e9   :  { %36945 = vmatprep.subr.mxu1 %v44170_v57 }
 0x8ea   :  { %v20964_v61 = vpop.f32.mrf.mxu1  ;;  %v21041_v43 = vpop.f32.mrf.mxu0 }
 0x8eb   :  { %v20965_v63 = vadd.f32 %v20964_v61, %v20890_v28 }
 0x8ec   :  { %v36909_v11 = vpop.f32.mrf.mxu1  ;;  %v36916_v59 = vpop.f32.mrf.mxu0 }
 0x8ed   :  { %v21042_v29 = vadd.f32 %v21041_v43, %v20965_v63  ;;  %v21142_v11 = vsub.f32 %v42002_v41, %v21120_v45 }
 0x8ef   :  { %v21123_v22 = vpop.xlane.xlu0 %21122 }
 0x8f0   :  { %v21143_v58 = vsub.f32 %v42008_v1, %v21123_v22  ;;  %v21150_v1 = vmul.f32 1.442695, %v21142_v11 }
 0x8f2   :  { %v21152_v60 = vmul.f32 1.442695, %v21143_v58  ;;  %v21114_v13 = vpop.f32.mrf.mxu1 }
 0x8f3   :  { %v21115_v26 = vadd.f32 %v21114_v13, %v21042_v29 }
 0x8f4   :  { %38136 = vpow2.f32 %v21152_v60  ;;  %v36923_v20 = vpop.f32.mrf.mxu1 }
 0x8f5   :  { %v21139_v55 = vsel %vm5869_vm4, %v21115_v26, -inf  ;;  %38138 = vpow2.f32 %v21150_v1 }
 0x8f9   :  { %22612 = vrot.lane.b32.xlu0 %v39336_v9, %s38343_s29 }
 0x8fb   :  { %21140 = vmax.xlane.f32.xlu1 %v21139_v55 }
 0x901   :  { %v42069_v59 = vpop.eup %38136 }
 0x902   :  { %v21169_v62 = vsel %vm5869_vm4, %v42069_v59, 0.0  ;;  %v42074_v61 = vpop.eup %38138 }
 0x903   :  { %21170 = vadd.xlane.f32.xlu1 %v21169_v62  ;;  %v21166_v54 = vsel %vm5869_vm4, %v42074_v61, 0.0 }
 0x907   :  { %v21126_v58 = vpop.xlane.xlu0 %21125 }
 0x908   :  { %v21144_v20 = vsub.f32 %v42012_v46, %v21126_v58 }
 0x90a   :  { %v21154_v43 = vmul.f32 1.442695, %v21144_v20 }
 0x90c   :  { %38140 = vpow2.f32 %v21154_v43 }
 0x918   :  { %21167 = vadd.xlane.f32.xlu0 %v21166_v54 }
 0x919   :  { %v42078_v41 = vpop.eup %38140 }
 0x91a   :  { %v21172_v45 = vsel %vm5869_vm4, %v42078_v41, 0.0 }
 0x91c   :  { %21173 = vadd.xlane.f32.xlu0 %v21172_v45 }
 0x91f   :  { %v21129_v10 = vpop.xlane.xlu1 %21128 }
 0x920   :  { %v21145_v28 = vsub.f32 %v42016_v48, %v21129_v10 }
 0x922   :  { %v21156_v22 = vmul.f32 1.442695, %v21145_v28 }
 0x924   :  { %38142 = vpow2.f32 %v21156_v22 }
 0x931   :  { %v42083_v46 = vpop.eup %38142 }
 0x932   :  { %v21175_v63 = vsel %vm5869_vm4, %v42083_v46, 0.0 }
 0x933   :  { %21176 = vadd.xlane.f32.xlu1 %v21175_v63 }
 0x937   :  { %v21132_v60 = vpop.xlane.xlu0 %21131 }
 0x938   :  { %v21146_v13 = vsub.f32 %v42020_v6, %v21132_v60 }
 0x93a   :  { %v21158_v29 = vmul.f32 1.442695, %v21146_v13 }
 0x93b   :  { %v42101_v58 = vpop.permute.xlu0 %22142 }
 0x93c   :  { %38144 = vpow2.f32 %v21158_v29 }
 0x944   :  { %23080 = vrot.lane.b32.xlu1 %v39421_v51, %s38343_s29 }
 0x948   :  { %23078 = vrot.lane.b32.xlu1 %v39433_v27, %s38343_s29 }
 0x949   :  { %v42092_v48 = vpop.eup %38144 }
 0x94a   :  { %v21178_v55 = vsel %vm5869_vm4, %v42092_v48, 0.0 }
 0x94b   :  { %21179 = vadd.xlane.f32.xlu0 %v21178_v55 }
 0x94f   :  { %v21135_v11 = vpop.xlane.xlu1 %21134 }
 0x950   :  { %v21147_v62 = vsub.f32 %v42024_v38, %v21135_v11  ;;  %v42143_v11 = vand.u32 4294901760, %v42058_v35 }
 0x952   :  { %v21160_v1 = vmul.f32 1.442695, %v21147_v62 }
 0x953   :  { %v42112_v28 = vpop.permute.xlu1 %22144 }
 0x954   :  { %38146 = vpow2.f32 %v21160_v1  ;;  %v42150_v1 = vand.u32 4294901760, %v42062_v2 }
 0x961   :  { %22610 = vrot.lane.b32.xlu0 %v39347_v36, %s38343_s29  ;;  %v42099_v6 = vpop.eup %38146 }
 0x962   :  { %v21181_v20 = vsel %vm5869_vm4, %v42099_v6, 0.0 }
 0x96c   :  { %v21138_v43 = vpop.xlane.xlu0 %21137  ;;  %21182 = vadd.xlane.f32.xlu1 %v21181_v20 }
 0x96d   :  { %v21148_v54 = vsub.f32 %v42040_v37, %v21138_v43  ;;  %v42155_v43 = vsub.f32 %v42058_v35, %v42143_v11 }
 0x96f   :  { %v21162_v45 = vmul.f32 1.442695, %v21148_v54 }
 0x970   :  { %v42132_v13 = vpop.permute.xlu0 %22612 }
 0x971   :  { %38148 = vpow2.f32 %v21162_v45 }
 0x97d   :  { %23548 = vrot.lane.b32.xlu1 %v39494_v44, %s38343_s29 }
 0x97e   :  { %v42108_v38 = vpop.eup %38148 }
 0x97f   :  { %v21184_v10 = vsel %vm5869_vm4, %v42108_v38, 0.0 }
 0x980   :  { %21185 = vadd.xlane.f32.xlu0 %v21184_v10  ;;  %v42166_v10 = vsub.f32 %v42062_v2, %v42150_v1 }
 0x981   :  { %24016 = vrot.lane.b32.xlu1 %v39579_v33, %s38343_s29 }
 0x984   :  { %v21141_v22 = vpop.xlane.xlu1 %21140 }
 0x985   :  { %v21149_v63 = vsub.f32 %v21115_v26, %v21141_v22  ;;  %24014 = vrot.lane.b32.xlu1 %v39591_v49, %s38343_s29 }
 0x987   :  { %v21164_v37 = vmul.f32 1.442695, %v21149_v63  ;;  %v21798_v63 = vand.u32 4294901760, %v42166_v10 }
 0x989   :  { %38150 = vpow2.f32 %v21164_v37  ;;  %24484 = vrot.lane.b32.xlu1 %v39648_v19, %s38343_s29 }
 0x98c   :  { %v21171_v55 = vpop.xlane.xlu1 %21170 }
 0x98d   :  { %24482 = vrot.lane.b32.xlu1 %v39659_v39, %s38343_s29 }
 0x991   :  { %24994 = vrot.lane.b32.xlu1 %v44192_v52, %s38344_s30 }
 0x995   :  { %24990 = vrot.lane.b32.xlu1 %v44193_v34, %s38344_s30 }
 0x996   :  { %v42126_v60 = vpop.eup %38150 }
 0x997   :  { %v21187_v26 = vsel %vm5869_vm4, %v42126_v60, 0.0 }
 0x998   :  { %21188 = vadd.xlane.f32.xlu0 %v21187_v26 }
 0x999   :  { %25463 = vrot.lane.b32.xlu1 %v39185_v0, %s38344_s30 }
 0x99d   :  { %25936 = vrot.lane.b32.xlu1 %v39263_v31, %s38344_s30 }
 0x9a1   :  { %v21168_v29 = vpop.xlane.xlu0 %21167  ;;  %25932 = vrot.lane.b32.xlu1 %v39259_v8, %s38344_s30 }
 0x9a2   :  { %38152 = vrcp.f32 %v21168_v29 }
 0x9a3   :  { %38154 = vrcp.f32 %v21171_v55 }
 0x9a5   :  { %26405 = vrot.lane.b32.xlu1 %v39347_v36, %s38344_s30  ;;  %v21174_v26 = vpop.xlane.xlu0 %21173 }
 0x9a6   :  { %38156 = vrcp.f32 %v21174_v26 }
 0x9a9   :  { %26878 = vrot.lane.b32.xlu1 %v39421_v51, %s38344_s30 }
 0x9ad   :  { %26874 = vrot.lane.b32.xlu1 %v39417_v56, %s38344_s30 }
 0x9ae   :  { %23546 = vrot.lane.b32.xlu0 %v39505_v25, %s38343_s29 }
 0x9af   :  { %v38153_v62 = vpop.eup %38152 }
 0x9b0   :  { %v21191_v20 = vmul.f32 %v38153_v62, %v42074_v61  ;;  %v38155_v22 = vpop.eup %38154  ;;  %v21791_v61 = vand.u32 4294901760, %v42155_v43  ;;  %v21799_v62 = vsub.f32 %v42166_v10, %v21798_v63 }
 0x9b1   :  { %27347 = vrot.lane.b32.xlu1 %v39505_v25, %s38344_s30  ;;  %v21193_v37 = vmul.f32 %v38155_v22, %v42069_v59  ;;  %v42209_v22 = vand.u32 4294901760, %v42112_v28 }
 0x9b2   :  { %24992 = vrot.lane.b32.xlu0 %v44191_v53, %s38344_s30  ;;  %v21213_v54 = vsel %vm5869_vm4, %v21191_v20, 0  ;;  %v21792_v55 = vsub.f32 %v42155_v43, %v21791_v61 }
 0x9b3   :  { %v42162_v45 = vand.u32 4294901760, %v21213_v54  ;;  %v42228_v26 = vsub.f32 %v42112_v28, %v42209_v22 }
 0x9b4   :  { %v21793_v20 = vand.u32 4294901760, %v21792_v55  ;;  %v44204_v55 = vand.u32 4294901760, %v42043_v30 }
 0x9b5   :  { %v21283_v35 = vsub.f32 %v21213_v54, %v42162_v45  ;;  %36936 = vmatmul.mubr.f32.vlgmr.msra.gmra.mxu1 %v42162_v45  ;;  %27820 = vrot.lane.b32.xlu1 %v39579_v33, %s38344_s30  ;;  %v21800_v54 = vand.u32 4294901760, %v21799_v62  ;;  %v22259_v62 = vand.u32 4294901760, %v42228_v26 }
 0x9b6   :  { %36946 = vmatpush3.msra.mxu1 %v42037_v47  ;;  %25465 = vrot.lane.b32.xlu0 %v39177_v16, %s38344_s30 }
 0x9b7   :  { %36947 = vmatprep.subr.mxu1 %v44170_v57  ;;  %36949 = vmatprep.mubr.msk.f32.mxu1 %vm38339_vm2, %v44170_v57  ;;  %v21284_v2 = vand.u32 4294901760, %v21283_v35 }
 0x9b8   :  { %36948 = vmatpush3.msra.mxu1 %v42030_v3 }
 0x9b9   :  { %36959 = vmatprep.subr.mxu1 %v44170_v57  ;;  %36950 = vmatmul.mubr.f32.vlgmr.msra.gmra.mxu1 %v21284_v2  ;;  %v21285_v29 = vsub.f32 %v21283_v35, %v21284_v2  ;;  %v42217_v2 = vand.u32 4294901760, %v42101_v58 }
 0x9ba   :  { %36960 = vmatpush3.msra.mxu1 %v42037_v47  ;;  %27816 = vrot.lane.b32.xlu1 %v39575_v40, %s38344_s30  ;;  %v21681_v47 = vsel %vm5869_vm4, %v21193_v37, 0 }
 0x9bb   :  { %36961 = vmatprep.subr.mxu1 %v44170_v57  ;;  %25461 = vrot.lane.b32.xlu0 %v39010_v18, %s38344_s30  ;;  %v21286_v59 = vand.u32 4294901760, %v21285_v29 }
 0x9bc   :  { %36962 = vmatpush3.msra.mxu1 %v42030_v3  ;;  %36963 = vmatprep.mubr.msk.f32.mxu1 %vm38339_vm2, %v44170_v57  ;;  %v42204_v3 = vand.u32 4294901760, %v21681_v47  ;;  %v21177_v29 = vpop.xlane.xlu1 %21176 }
 0x9bd   :  { %36973 = vmatprep.subr.mxu1 %v44170_v57  ;;  %36929 = vmatmul.mubr.f32.vlgmr.msra.gmra.mxu0 %v21286_v59  ;;  %v42237_v59 = vsub.f32 %v42101_v58, %v42217_v2  ;;  %38158 = vrcp.f32 %v21177_v29 }
 0x9be   :  { %36939 = vmatpush3.msra.mxu0 %v42043_v30  ;;  %36964 = vmatmul.mubr.f32.vlgmr.msra.gmra.mxu1 %v42162_v45  ;;  %v42223_v37 = vsub.f32 %v21681_v47, %v42204_v3  ;;  %v44205_v30 = vand.u32 4294901760, %v42035_v50 }
 0x9bf   :  { %36974 = vmatpush3.msra.mxu1 %v21793_v20  ;;  %28289 = vrot.lane.b32.xlu1 %v39659_v39, %s38344_s30  ;;  %v22266_v58 = vand.u32 4294901760, %v42237_v59  ;;  %v22260_v20 = vsub.f32 %v42228_v26, %v22259_v62 }
 0x9c0   :  { %36940 = vmatprep.subr.mxu0 %v44170_v57  ;;  %36975 = vmatprep.subr.mxu1 %v44170_v57  ;;  %v21752_v28 = vand.u32 4294901760, %v42223_v37 }
 0x9c1   :  { %25934 = vrot.lane.b32.xlu0 %v39275_v21, %s38344_s30  ;;  %36941 = vmatpush3.msra.mxu0 %v42035_v50 }
 0x9c2   :  { %36976 = vmatpush3.msra.mxu1 %v21800_v54  ;;  %36942 = vmatprep.mubr.msk.f32.mxu0 %vm38339_vm2, %v44170_v57  ;;  %v21753_v50 = vsub.f32 %v42223_v37, %v21752_v28  ;;  %v22261_v54 = vand.u32 4294901760, %v22260_v20 }
 0x9c3   :  { %36952 = vmatprep.subr.mxu0 %v44170_v57  ;;  %36977 = vmatprep.mubr.msk.f32.mxu1 %vm38339_vm2, %v44170_v57 }
 0x9c4   :  { %36987 = vmatprep.subr.mxu1 %v44170_v57  ;;  %36943 = vmatmul.mubr.f32.vlgmr.msra.gmra.mxu0 %v21283_v35  ;;  %v38157_v35 = vpop.eup %38156 }
 0x9c5   :  { %36953 = vmatpush3.msra.mxu0 %v44204_v55  ;;  %36978 = vmatmul.mubr.f32.vlgmr.msra.gmra.mxu1 %v42204_v3  ;;  %v21195_v47 = vmul.f32 %v38157_v35, %v42078_v41  ;;  %v21754_v41 = vand.u32 4294901760, %v21753_v50  ;;  %v42285_v55 = vand.u32 4294901760, %v42132_v13 }
 0x9c6   :  { %36988 = vmatpush3.msra.mxu1 %v42143_v11  ;;  %36954 = vmatprep.subr.mxu0 %v44170_v57 }
 0x9c7   :  { %26407 = vrot.lane.b32.xlu0 %v39336_v9, %s38344_s30  ;;  %36989 = vmatprep.subr.mxu1 %v44170_v57  ;;  %v42299_v50 = vsub.f32 %v42132_v13, %v42285_v55 }
 0x9c8   :  { %36955 = vmatpush3.msra.mxu0 %v44205_v30  ;;  %36990 = vmatpush3.msra.mxu1 %v42150_v1 }
 0x9c9   :  { %36956 = vmatprep.mubr.msk.f32.mxu0 %vm38339_vm2, %v44170_v57  ;;  %36966 = vmatprep.subr.mxu0 %v44170_v57  ;;  %v22727_v13 = vand.u32 4294901760, %v42299_v50 }
 0x9ca   :  { %36991 = vmatprep.mubr.msk.f32.mxu1 %vm38339_vm2, %v44170_v57  ;;  %37001 = vmatprep.subr.mxu1 %v44170_v57  ;;  %v38159_v30 = vpop.eup %38158 }
 0x9cb   :  { %36957 = vmatmul.mubr.f32.vlgmr.msra.gmra.mxu0 %v42162_v45  ;;  %36992 = vmatmul.mubr.f32.vlgmr.msra.gmra.mxu1 %v21752_v28  ;;  %v22149_v45 = vsel %vm5869_vm4, %v21195_v47, 0  ;;  %v21197_v47 = vmul.f32 %v38159_v30, %v42083_v46 }
 0x9cc   :  { %36967 = vmatpush3.msra.mxu0 %v42143_v11  ;;  %37002 = vmatpush3.msra.mxu1 %v42143_v11  ;;  %v22267_v11 = vsub.f32 %v42237_v59, %v22266_v58  ;;  %v42282_v29 = vand.u32 4294901760, %v22149_v45 }
 0x9cd   :  { %36968 = vmatprep.subr.mxu0 %v44170_v57  ;;  %26403 = vrot.lane.b32.xlu0 %v39016_v23, %s38344_s30 }
 0x9ce   :  { %37003 = vmatprep.subr.mxu1 %v44170_v57  ;;  %36969 = vmatpush3.msra.mxu0 %v42150_v1  ;;  %v22219_v35 = vsub.f32 %v22149_v45, %v42282_v29 }
 0x9cf   :  { %37004 = vmatpush3.msra.mxu1 %v42150_v1  ;;  %36970 = vmatprep.mubr.msk.f32.mxu0 %vm38339_vm2, %v44170_v57  ;;  %v22268_v1 = vand.u32 4294901760, %v22267_v11 }
 0x9d0   :  { %36980 = vmatprep.subr.mxu0 %v44170_v57  ;;  %37005 = vmatprep.mubr.msk.f32.mxu1 %vm38339_vm2, %v44170_v57  ;;  %v22220_v46 = vand.u32 4294901760, %v22219_v35 }
 0x9d1   :  { %37015 = vmatprep.subr.mxu1 %v44170_v57  ;;  %36971 = vmatmul.mubr.f32.vlgmr.msra.gmra.mxu0 %v21754_v41 }
 0x9d2   :  { %36981 = vmatpush3.msra.mxu0 %v42155_v43  ;;  %37006 = vmatmul.mubr.f32.vlgmr.msra.gmra.mxu1 %v42204_v3  ;;  %v22617_v43 = vsel %vm5869_vm4, %v21197_v47, 0 }
 0x9d3   :  { %37016 = vmatpush3.msra.mxu1 %v22261_v54  ;;  %26876 = vrot.lane.b32.xlu0 %v39433_v27, %s38344_s30 }
 0x9d4   :  { %36982 = vmatprep.subr.mxu0 %v44170_v57  ;;  %37017 = vmatprep.subr.mxu1 %v44170_v57  ;;  %v21180_v28 = vpop.xlane.xlu0 %21179 }
 0x9d5   :  { %36983 = vmatpush3.msra.mxu0 %v42166_v10  ;;  %37018 = vmatpush3.msra.mxu1 %v22268_v1  ;;  %38160 = vrcp.f32 %v21180_v28  ;;  %v42325_v10 = vand.u32 4294901760, %v22617_v43  ;;  %v23081_v28 = vpop.permute.xlu1 %23080 }
 0x9d6   :  { %36984 = vmatprep.mubr.msk.f32.mxu0 %vm38339_vm2, %v44170_v57  ;;  %36994 = vmatprep.subr.mxu0 %v44170_v57 }
 0x9d7   :  { %37019 = vmatprep.mubr.msk.f32.mxu1 %vm38339_vm2, %v44170_v57  ;;  %37029 = vmatprep.subr.mxu1 %v44170_v57 }
 0x9d8   :  { %36985 = vmatmul.mubr.f32.vlgmr.msra.gmra.mxu0 %v42223_v37  ;;  %37020 = vmatmul.mubr.f32.vlgmr.msra.gmra.mxu1 %v42282_v29  ;;  %v22611_v20 = vpop.permute.xlu0 %22610  ;;  %v22728_v37 = vsub.f32 %v42299_v50, %v22727_v13 }
 0x9d9   :  { %36995 = vmatpush3.msra.mxu0 %v21791_v61  ;;  %37030 = vmatpush3.msra.mxu1 %v42209_v22  ;;  %v42318_v61 = vand.u32 4294901760, %v22611_v20 }
 0x9da   :  { %27349 = vrot.lane.b32.xlu0 %v39494_v44, %s38344_s30  ;;  %36996 = vmatprep.subr.mxu0 %v44170_v57  ;;  %v22729_v11 = vand.u32 4294901760, %v22728_v37 }
 0x9db   :  { %37031 = vmatprep.subr.mxu1 %v44170_v57  ;;  %36997 = vmatpush3.msra.mxu0 %v21798_v63  ;;  %v22221_v63 = vsub.f32 %v22219_v35, %v22220_v46  ;;  %v42335_v41 = vsub.f32 %v22611_v20, %v42318_v61 }
 0x9dc   :  { %37032 = vmatpush3.msra.mxu1 %v42217_v2  ;;  %36998 = vmatprep.mubr.msk.f32.mxu0 %vm38339_vm2, %v44170_v57 }
 0x9dd   :  { %37008 = vmatprep.subr.mxu0 %v44170_v57  ;;  %37033 = vmatprep.mubr.msk.f32.mxu1 %vm38339_vm2, %v44170_v57  ;;  %v22734_v45 = vand.u32 4294901760, %v42335_v41 }
 0x9de   :  { %37043 = vmatprep.subr.mxu1 %v44170_v57  ;;  %36999 = vmatmul.mubr.f32.vlgmr.msra.gmra.mxu0 %v42204_v3  ;;  %v22222_v3 = vand.u32 4294901760, %v22221_v63 }
 0x9df   :  { %37009 = vmatpush3.msra.mxu0 %v42209_v22  ;;  %37034 = vmatmul.mubr.f32.vlgmr.msra.gmra.mxu1 %v22220_v46  ;;  %v22735_v1 = vsub.f32 %v42335_v41, %v22734_v45 }
 0x9e0   :  { %37044 = vmatpush3.msra.mxu1 %v42209_v22  ;;  %27345 = vrot.lane.b32.xlu0 %v44177_v15, %s38344_s30  ;;  %v42345_v22 = vsub.f32 %v22617_v43, %v42325_v10 }
 0x9e1   :  { %37010 = vmatprep.subr.mxu0 %v44170_v57  ;;  %37045 = vmatprep.subr.mxu1 %v44170_v57  ;;  %v22736_v20 = vand.u32 4294901760, %v22735_v1 }
 0x9e2   :  { %37011 = vmatpush3.msra.mxu0 %v42217_v2  ;;  %37046 = vmatpush3.msra.mxu1 %v42217_v2  ;;  %v38161_v2 = vpop.eup %38160  ;;  %v22688_v54 = vand.u32 4294901760, %v42345_v22 }
 0x9e3   :  { %37012 = vmatprep.mubr.msk.f32.mxu0 %vm38339_vm2, %v44170_v57  ;;  %37022 = vmatprep.subr.mxu0 %v44170_v57  ;;  %v21199_v30 = vmul.f32 %v38161_v2, %v42092_v48 }
 0x9e4   :  { %37047 = vmatprep.mubr.msk.f32.mxu1 %vm38339_vm2, %v44170_v57  ;;  %37057 = vmatprep.subr.mxu1 %v44170_v57  ;;  %v22689_v47 = vsub.f32 %v42345_v22, %v22688_v54 }
 0x9e5   :  { %37013 = vmatmul.mubr.f32.vlgmr.msra.gmra.mxu0 %v22222_v3  ;;  %37048 = vmatmul.mubr.f32.vlgmr.msra.gmra.mxu1 %v42282_v29  ;;  %v23085_v48 = vsel %vm5869_vm4, %v21199_v30, 0 }
 0x9e6   :  { %37023 = vmatpush3.msra.mxu0 %v42228_v26  ;;  %37058 = vmatpush3.msra.mxu1 %v22729_v11  ;;  %v22690_v26 = vand.u32 4294901760, %v22689_v47 }
 0x9e7   :  { %27818 = vrot.lane.b32.xlu0 %v39591_v49, %s38344_s30  ;;  %37024 = vmatprep.subr.mxu0 %v44170_v57 }
 0x9e8   :  { %37025 = vmatpush3.msra.mxu0 %v42237_v59  ;;  %37026 = vmatprep.mubr.msk.f32.mxu0 %vm38339_vm2, %v44170_v57  ;;  %v23079_v59 = vpop.permute.xlu1 %23078 }
 0x9e9   :  { %37036 = vmatprep.subr.mxu0 %v44170_v57  ;;  %37027 = vmatmul.mubr.f32.vlgmr.msra.gmra.mxu0 %v22219_v35 }
 0x9ea   :  { %37037 = vmatpush3.msra.mxu0 %v22259_v62  ;;  %37040 = vmatprep.mubr.msk.f32.mxu0 %vm38339_vm2, %v44170_v57  ;;  %v42386_v62 = vand.u32 4294901760, %v23081_v28 }
 0x9eb   :  { %28291 = vrot.lane.b32.xlu0 %v39648_v19, %s38344_s30  ;;  %37038 = vmatprep.subr.mxu0 %v44170_v57 }
 0x9ec   :  { %37039 = vmatpush3.msra.mxu0 %v22266_v58  ;;  %37059 = vmatprep.subr.mxu1 %v44170_v57  ;;  %v42388_v58 = vand.u32 4294901760, %v23085_v48  ;;  %v42402_v35 = vsub.f32 %v23081_v28, %v42386_v62 }
 0x9ed   :  { %37050 = vmatprep.subr.mxu0 %v44170_v57  ;;  %37041 = vmatmul.mubr.f32.vlgmr.msra.gmra.mxu0 %v42282_v29  ;;  %v42394_v29 = vand.u32 4294901760, %v23079_v59 }
 0x9ee   :  { %37051 = vmatpush3.msra.mxu0 %v42285_v55  ;;  %37054 = vmatprep.mubr.msk.f32.mxu0 %vm38339_vm2, %v44170_v57  ;;  %v23155_v46 = vsub.f32 %v23085_v48, %v42388_v58  ;;  %v23195_v63 = vand.u32 4294901760, %v42402_v35 }
 0x9ef   :  { %28287 = vrot.lane.b32.xlu0 %v44190_v14, %s38344_s30  ;;  %37052 = vmatprep.subr.mxu0 %v44170_v57  ;;  %v42411_v43 = vsub.f32 %v23079_v59, %v42394_v29 }
 0x9f0   :  { %37053 = vmatpush3.msra.mxu0 %v42318_v61  ;;  %37060 = vmatpush3.msra.mxu1 %v22736_v20  ;;  %v23156_v37 = vand.u32 4294901760, %v23155_v46 }
 0x9f1   :  { %37064 = vmatprep.subr.mxu0 %v44170_v57  ;;  %37055 = vmatmul.mubr.f32.vlgmr.msra.gmra.mxu0 %v22690_v26 }
 0x9f2   :  { %37065 = vmatpush3.msra.mxu0 %v42299_v50  ;;  %37061 = vmatprep.mubr.msk.f32.mxu1 %vm38339_vm2, %v44170_v57  ;;  %v23202_v50 = vand.u32 4294901760, %v42411_v43  ;;  %v23157_v3 = vsub.f32 %v23155_v46, %v23156_v37 }
 0x9f3   :  { %28846 = vrot.lane.b32.xlu0 %v44191_v53, %s38345_s7  ;;  %37066 = vmatprep.subr.mxu0 %v44170_v57 }
 0x9f4   :  { %37067 = vmatpush3.msra.mxu0 %v42335_v41  ;;  %37062 = vmatmul.mubr.f32.vlgmr.msra.gmra.mxu1 %v42325_v10  ;;  %v23203_v41 = vsub.f32 %v42411_v43, %v23202_v50 }
 0x9f5   :  { %37068 = vmatprep.mubr.msk.f32.mxu0 %vm38339_vm2, %v44170_v57  ;;  %37071 = vmatprep.subr.mxu1 %v44170_v57  ;;  %v21183_v53 = vpop.xlane.xlu1 %21182 }
 0x9f6   :  { %37078 = vmatprep.subr.mxu0 %v44170_v57  ;;  %37069 = vmatmul.mubr.f32.vlgmr.msra.gmra.mxu0 %v42345_v22  ;;  %38162 = vrcp.f32 %v21183_v53  ;;  %v23204_v11 = vand.u32 4294901760, %v23203_v41 }
 0x9f7   :  { %37072 = vmatpush3.msra.mxu1 %v42285_v55  ;;  %37079 = vmatpush3.msra.mxu0 %v22727_v13  ;;  %v23196_v13 = vsub.f32 %v42402_v35, %v23195_v63 }
 0x9f8   :  { %29316 = vrot.lane.b32.xlu0 %v39177_v16, %s38345_s7  ;;  %37073 = vmatprep.subr.mxu1 %v44170_v57 }
 0x9f9   :  { %37080 = vmatprep.subr.mxu0 %v44170_v57  ;;  %37074 = vmatpush3.msra.mxu1 %v42318_v61  ;;  %v23549_v16 = vpop.permute.xlu1 %23548 }
 0x9fa   :  { %37075 = vmatprep.mubr.msk.f32.mxu1 %vm38339_vm2, %v44170_v57  ;;  %37081 = vmatpush3.msra.mxu0 %v22734_v45  ;;  %v42440_v22 = vand.u32 4294901760, %v23549_v16 }
 0x9fb   :  { %37076 = vmatmul.mubr.f32.vlgmr.msra.gmra.mxu1 %v22688_v54  ;;  %37082 = vmatprep.mubr.msk.f32.mxu0 %vm38339_vm2, %v44170_v57 }
 0x9fc   :  { %37085 = vmatprep.subr.mxu1 %v44170_v57  ;;  %37092 = vmatprep.subr.mxu0 %v44170_v57 }
 0x9fd   :  { %37083 = vmatmul.mubr.f32.vlgmr.msra.gmra.mxu0 %v42325_v10  ;;  %37086 = vmatpush3.msra.mxu1 %v42285_v55  ;;  %v23197_v55 = vand.u32 4294901760, %v23196_v13 }
 0x9fe   :  { %37093 = vmatpush3.msra.mxu0 %v42386_v62  ;;  %29314 = vrot.lane.b32.xlu0 %v39185_v0, %s38345_s7  ;;  %v23158_v0 = vand.u32 4294901760, %v23157_v3 }
 0x9ff   :  { %37087 = vmatprep.subr.mxu1 %v44170_v57  ;;  %37094 = vmatprep.subr.mxu0 %v44170_v57 }
 0xa00   :  { %37088 = vmatpush3.msra.mxu1 %v42318_v61  ;;  %37089 = vmatprep.mubr.msk.f32.mxu1 %vm38339_vm2, %v44170_v57  ;;  %v42453_v61 = vsub.f32 %v23549_v16, %v42440_v22 }
 0xa01   :  { %37095 = vmatpush3.msra.mxu0 %v42394_v29  ;;  %37090 = vmatmul.mubr.f32.vlgmr.msra.gmra.mxu1 %v42325_v10 }
 0xa02   :  { %37099 = vmatprep.subr.mxu1 %v44170_v57  ;;  %37096 = vmatprep.mubr.msk.f32.mxu0 %vm38339_vm2, %v44170_v57  ;;  %v23663_v10 = vand.u32 4294901760, %v42453_v61 }
 0xa03   :  { %37100 = vmatpush3.msra.mxu1 %v23197_v55  ;;  %37103 = vmatprep.mubr.msk.f32.mxu1 %vm38339_vm2, %v44170_v57  ;;  %v38163_v54 = vpop.eup %38162 }
 0xa04   :  { %37101 = vmatprep.subr.mxu1 %v44170_v57  ;;  %37106 = vmatprep.subr.mxu0 %v44170_v57  ;;  %v23664_v45 = vsub.f32 %v42453_v61, %v23663_v10  ;;  %v21201_v28 = vmul.f32 %v38163_v54, %v42099_v6 }
 0xa05   :  { %37102 = vmatpush3.msra.mxu1 %v23204_v11  ;;  %37097 = vmatmul.mubr.f32.vlgmr.msra.gmra.mxu0 %v23158_v0 }
 0xa06   :  { %37104 = vmatmul.mubr.f32.vlgmr.msra.gmra.mxu1 %v42388_v58  ;;  %37107 = vmatpush3.msra.mxu0 %v42402_v35  ;;  %v23665_v1 = vand.u32 4294901760, %v23664_v45  ;;  %v23553_v30 = vsel %vm5869_vm4, %v21201_v28, 0  ;;  %v24017_v35 = vpop.permute.xlu1 %24016 }
 0xa07   :  { %37113 = vmatprep.subr.mxu1 %v44170_v57  ;;  %37108 = vmatprep.subr.mxu0 %v44170_v57  ;;  %v42496_v6 = vand.u32 4294901760, %v23553_v30  ;;  %v42511_v13 = vand.u32 4294901760, %v24017_v35 }
 0xa08   :  { %37114 = vmatpush3.msra.mxu1 %v42386_v62  ;;  %37109 = vmatpush3.msra.mxu0 %v42411_v43 }
 0xa09   :  { %37115 = vmatprep.subr.mxu1 %v44170_v57  ;;  %37110 = vmatprep.mubr.msk.f32.mxu0 %vm38339_vm2, %v44170_v57  ;;  %v21186_v2 = vpop.xlane.xlu0 %21185  ;;  %v23623_v47 = vsub.f32 %v23553_v30, %v42496_v6  ;;  %v24130_v11 = vsub.f32 %v24017_v35, %v42511_v13 }
 0xa0a   :  { %37116 = vmatpush3.msra.mxu1 %v42394_v29  ;;  %37117 = vmatprep.mubr.msk.f32.mxu1 %vm38339_vm2, %v44170_v57  ;;  %38164 = vrcp.f32 %v21186_v2 }
 0xa0b   :  { %37120 = vmatprep.subr.mxu0 %v44170_v57  ;;  %37111 = vmatmul.mubr.f32.vlgmr.msra.gmra.mxu0 %v23155_v46  ;;  %v23624_v26 = vand.u32 4294901760, %v23623_v47 }
 0xa0c   :  { %37118 = vmatmul.mubr.f32.vlgmr.msra.gmra.mxu1 %v23156_v37  ;;  %37121 = vmatpush3.msra.mxu0 %v23195_v63 }
 0xa0d   :  { %37127 = vmatprep.subr.mxu1 %v44170_v57  ;;  %37122 = vmatprep.subr.mxu0 %v44170_v57 }
 0xa0e   :  { %37128 = vmatpush3.msra.mxu1 %v42386_v62  ;;  %37123 = vmatpush3.msra.mxu0 %v23202_v50  ;;  %v24015_v50 = vpop.permute.xlu1 %24014 }
 0xa0f   :  { %37129 = vmatprep.subr.mxu1 %v44170_v57  ;;  %37124 = vmatprep.mubr.msk.f32.mxu0 %vm38339_vm2, %v44170_v57  ;;  %v42519_v0 = vand.u32 4294901760, %v24015_v50 }
 0xa10   :  { %37130 = vmatpush3.msra.mxu1 %v42394_v29  ;;  %37131 = vmatprep.mubr.msk.f32.mxu1 %vm38339_vm2, %v44170_v57 }
 0xa11   :  { %37125 = vmatmul.mubr.f32.vlgmr.msra.gmra.mxu0 %v42388_v58  ;;  %37132 = vmatmul.mubr.f32.vlgmr.msra.gmra.mxu1 %v42388_v58  ;;  %v23625_v58 = vsub.f32 %v23623_v47, %v23624_v26 }
 0xa12   :  { %37134 = vmatprep.subr.mxu0 %v44170_v57  ;;  %37141 = vmatprep.subr.mxu1 %v44170_v57  ;;  %v24485_v2 = vpop.permute.xlu1 %24484 }
 0xa13   :  { %37135 = vmatpush3.msra.mxu0 %v42440_v22  ;;  %37142 = vmatpush3.msra.mxu1 %v23665_v1  ;;  %v23626_v43 = vand.u32 4294901760, %v23625_v58 }
 0xa14   :  { %37136 = vmatprep.subr.mxu0 %v44170_v57  ;;  %37138 = vmatprep.mubr.msk.f32.mxu0 %vm38339_vm2, %v44170_v57 }
 0xa15   :  { %37143 = vmatprep.subr.mxu1 %v44170_v57  ;;  %37145 = vmatprep.mubr.msk.f32.mxu1 %vm38339_vm2, %v44170_v57 }
 0xa17   :  { %v38165_v20 = vpop.eup %38164 }
 0xa18   :  { %v21203_v48 = vmul.f32 %v38165_v20, %v42108_v38  ;;  %v24483_v20 = vpop.permute.xlu1 %24482 }
 0xa19   :  { %v42565_v35 = vand.u32 4294901760, %v24483_v20 }
 0xa1a   :  { %v24021_v62 = vsel %vm5869_vm4, %v21203_v48, 0 }
 0xa1b   :  { %v42501_v46 = vand.u32 4294901760, %v24021_v62 }
 0xa1c   :  { %v24995_v58 = vpop.permute.xlu1 %24994 }
 0xa1d   :  { %v42508_v38 = vsub.f32 %v24021_v62, %v42501_v46  ;;  %v42560_v62 = vand.u32 4294901760, %v24485_v2 }
 0xa1f   :  { %v24092_v41 = vand.u32 4294901760, %v42508_v38 }
 0xa21   :  { %v21189_v59 = vpop.xlane.xlu0 %21188 }
 0xa22   :  { %38166 = vrcp.f32 %v21189_v59 }
 0xa25   :  { %v23547_v29 = vpop.permute.xlu0 %23546 }
 0xa26   :  { %v23587_v53 = vand.u32 4294901760, %v23547_v29 }
 0xa28   :  { %v23669_v63 = vsub.f32 %v23547_v29, %v23587_v53  ;;  %37137 = vmatpush3.msra.mxu0 %v23587_v53 }
 0xa29   :  { %37139 = vmatmul.mubr.f32.vlgmr.msra.gmra.mxu0 %v23626_v43  ;;  %37148 = vmatprep.subr.mxu0 %v44170_v57  ;;  %v24605_v43 = vsub.f32 %v24483_v20, %v42565_v35 }
 0xa2a   :  { %v23670_v37 = vand.u32 4294901760, %v23669_v63  ;;  %37149 = vmatpush3.msra.mxu0 %v42453_v61  ;;  %37152 = vmatprep.mubr.msk.f32.mxu0 %vm38339_vm2, %v44170_v57  ;;  %v24093_v61 = vsub.f32 %v42508_v38, %v24092_v41 }
 0xa2b   :  { %37150 = vmatprep.subr.mxu0 %v44170_v57 }
 0xa2c   :  { %v23671_v16 = vsub.f32 %v23669_v63, %v23670_v37  ;;  %37151 = vmatpush3.msra.mxu0 %v23669_v63  ;;  %v24094_v1 = vand.u32 4294901760, %v24093_v61  ;;  %v24991_v63 = vpop.permute.xlu1 %24990  ;;  %v24993_v61 = vpop.permute.xlu0 %24992 }
 0xa2d   :  { %37153 = vmatmul.mubr.f32.vlgmr.msra.gmra.mxu0 %v23623_v47  ;;  %37162 = vmatprep.subr.mxu0 %v44170_v57 }
 0xa2e   :  { %v23672_v3 = vand.u32 4294901760, %v23671_v16  ;;  %37163 = vmatpush3.msra.mxu0 %v23663_v10  ;;  %37166 = vmatprep.mubr.msk.f32.mxu0 %vm38339_vm2, %v44170_v57  ;;  %v24137_v10 = vsub.f32 %v24015_v50, %v42519_v0  ;;  %v24606_v16 = vand.u32 4294901760, %v24605_v43 }
 0xa2f   :  { %v38167_v55 = vpop.eup %38166  ;;  %37164 = vmatprep.subr.mxu0 %v44170_v57 }
 0xa30   :  { %37144 = vmatpush3.msra.mxu1 %v23672_v3  ;;  %37165 = vmatpush3.msra.mxu0 %v23670_v37  ;;  %v21205_v45 = vmul.f32 %v38167_v55, %v42126_v60  ;;  %v24131_v60 = vand.u32 4294901760, %v24130_v11  ;;  %v24138_v28 = vand.u32 4294901760, %v24137_v10  ;;  %v24996_v3 = vsel %vm2124_vm3, %v24991_v63, 0  ;;  %v25466_v20 = vpop.permute.xlu0 %25465 }
 0xa31   :  { %37146 = vmatmul.mubr.f32.vlgmr.msra.gmra.mxu1 %v42496_v6  ;;  %37155 = vmatprep.subr.mxu1 %v44170_v57 }
 0xa32   :  { %37167 = vmatmul.mubr.f32.vlgmr.msra.gmra.mxu0 %v42496_v6  ;;  %37176 = vmatprep.subr.mxu0 %v44170_v57  ;;  %v24489_v54 = vsel %vm5869_vm4, %v21205_v45, 0  ;;  %v24132_v47 = vsub.f32 %v24130_v11, %v24131_v60  ;;  %v24139_v48 = vsub.f32 %v24137_v10, %v24138_v28  ;;  %v42597_v45 = vand.u32 4294901760, %v24996_v3 }
 0xa33   :  { %37156 = vmatpush3.msra.mxu1 %v42440_v22  ;;  %37177 = vmatpush3.msra.mxu0 %v42511_v13  ;;  %v42543_v30 = vand.u32 4294901760, %v24489_v54 }
 0xa34   :  { %37157 = vmatprep.subr.mxu1 %v44170_v57  ;;  %37178 = vmatprep.subr.mxu0 %v44170_v57  ;;  %v24133_v59 = vand.u32 4294901760, %v24132_v47 }
 0xa35   :  { %37158 = vmatpush3.msra.mxu1 %v23587_v53  ;;  %37159 = vmatprep.mubr.msk.f32.mxu1 %vm38339_vm2, %v44170_v57 }
 0xa36   :  { %37179 = vmatpush3.msra.mxu0 %v42519_v0  ;;  %37180 = vmatprep.mubr.msk.f32.mxu0 %vm38339_vm2, %v44170_v57 }
 0xa37   :  { %37160 = vmatmul.mubr.f32.vlgmr.msra.gmra.mxu1 %v23624_v26  ;;  %37169 = vmatprep.subr.mxu1 %v44170_v57  ;;  %v42554_v26 = vsub.f32 %v24489_v54, %v42543_v30 }
 0xa38   :  { %37181 = vmatmul.mubr.f32.vlgmr.msra.gmra.mxu0 %v24094_v1  ;;  %37190 = vmatprep.subr.mxu0 %v44170_v57 }
 0xa39   :  { %37170 = vmatpush3.msra.mxu1 %v42440_v22  ;;  %37191 = vmatpush3.msra.mxu0 %v24130_v11  ;;  %v24140_v22 = vand.u32 4294901760, %v24139_v48  ;;  %v24560_v29 = vand.u32 4294901760, %v42554_v26  ;;  %v25000_v11 = vsel %vm2124_vm3, %v24995_v58, 0 }
 0xa3a   :  { %37171 = vmatprep.subr.mxu1 %v44170_v57  ;;  %37192 = vmatprep.subr.mxu0 %v44170_v57 }
 0xa3b   :  { %37172 = vmatpush3.msra.mxu1 %v23587_v53  ;;  %37173 = vmatprep.mubr.msk.f32.mxu1 %vm38339_vm2, %v44170_v57  ;;  %v24561_v53 = vsub.f32 %v42554_v26, %v24560_v29 }
 0xa3c   :  { %37193 = vmatpush3.msra.mxu0 %v24137_v10  ;;  %37194 = vmatprep.mubr.msk.f32.mxu0 %vm38339_vm2, %v44170_v57  ;;  %v24998_v10 = vsel %vm2124_vm3, %v24993_v61, 0 }
 0xa3d   :  { %37174 = vmatmul.mubr.f32.vlgmr.msra.gmra.mxu1 %v42496_v6  ;;  %37183 = vmatprep.subr.mxu1 %v44170_v57  ;;  %v24598_v6 = vsub.f32 %v24485_v2, %v42560_v62  ;;  %v24562_v50 = vand.u32 4294901760, %v24561_v53  ;;  %v42612_v2 = vsub.f32 %v24996_v3, %v42597_v45  ;;  %v42617_v54 = vand.u32 4294901760, %v24998_v10 }
 0xa3e   :  { %37195 = vmatmul.mubr.f32.vlgmr.msra.gmra.mxu0 %v42508_v38  ;;  %37204 = vmatprep.subr.mxu0 %v44170_v57  ;;  %v24607_v38 = vsub.f32 %v24605_v43, %v24606_v16 }
 0xa3f   :  { %37184 = vmatpush3.msra.mxu1 %v24133_v59  ;;  %37205 = vmatpush3.msra.mxu0 %v24131_v60  ;;  %v24599_v37 = vand.u32 4294901760, %v24598_v6 }
 0xa40   :  { %37185 = vmatprep.subr.mxu1 %v44170_v57  ;;  %37206 = vmatprep.subr.mxu0 %v44170_v57 }
 0xa41   :  { %37186 = vmatpush3.msra.mxu1 %v24140_v22  ;;  %37187 = vmatprep.mubr.msk.f32.mxu1 %vm38339_vm2, %v44170_v57  ;;  %v24600_v55 = vsub.f32 %v24598_v6, %v24599_v37 }
 0xa42   :  { %37207 = vmatpush3.msra.mxu0 %v24138_v28  ;;  %37208 = vmatprep.mubr.msk.f32.mxu0 %vm38339_vm2, %v44170_v57  ;;  %v25116_v28 = vsub.f32 %v24998_v10, %v42617_v54 }
 0xa43   :  { %37188 = vmatmul.mubr.f32.vlgmr.msra.gmra.mxu1 %v42501_v46  ;;  %37197 = vmatprep.subr.mxu1 %v44170_v57 }
 0xa44   :  { %37209 = vmatmul.mubr.f32.vlgmr.msra.gmra.mxu0 %v42501_v46  ;;  %37218 = vmatprep.subr.mxu0 %v44170_v57  ;;  %v25117_v59 = vand.u32 4294901760, %v25116_v28 }
 0xa45   :  { %37198 = vmatpush3.msra.mxu1 %v42511_v13  ;;  %37219 = vmatpush3.msra.mxu0 %v42560_v62 }
 0xa46   :  { %37199 = vmatprep.subr.mxu1 %v44170_v57  ;;  %37220 = vmatprep.subr.mxu0 %v44170_v57 }
 0xa47   :  { %37200 = vmatpush3.msra.mxu1 %v42519_v0  ;;  %37201 = vmatprep.mubr.msk.f32.mxu1 %vm38339_vm2, %v44170_v57 }
 0xa48   :  { %37221 = vmatpush3.msra.mxu0 %v42565_v35  ;;  %37222 = vmatprep.mubr.msk.f32.mxu0 %vm38339_vm2, %v44170_v57 }
 0xa49   :  { %37202 = vmatmul.mubr.f32.vlgmr.msra.gmra.mxu1 %v24092_v41  ;;  %37211 = vmatprep.subr.mxu1 %v44170_v57  ;;  %v42604_v41 = vand.u32 4294901760, %v25000_v11 }
 0xa4a   :  { %37223 = vmatmul.mubr.f32.vlgmr.msra.gmra.mxu0 %v24562_v50  ;;  %37232 = vmatprep.subr.mxu0 %v44170_v57 }
 0xa4b   :  { %37212 = vmatpush3.msra.mxu1 %v42511_v13  ;;  %37233 = vmatpush3.msra.mxu0 %v24598_v6  ;;  %v24601_v13 = vand.u32 4294901760, %v24600_v55  ;;  %v25109_v60 = vsub.f32 %v25000_v11, %v42604_v41  ;;  %v25464_v6 = vpop.permute.xlu1 %25463 }
 0xa4c   :  { %37213 = vmatprep.subr.mxu1 %v44170_v57  ;;  %37234 = vmatprep.subr.mxu0 %v44170_v57  ;;  %v25469_v63 = vsel %vm2124_vm3, %v25464_v6, 0 }
 0xa4d   :  { %37214 = vmatpush3.msra.mxu1 %v42519_v0  ;;  %37215 = vmatprep.mubr.msk.f32.mxu1 %vm38339_vm2, %v44170_v57  ;;  %v24608_v0 = vand.u32 4294901760, %v24607_v38  ;;  %v25110_v1 = vand.u32 4294901760, %v25109_v60  ;;  %v42678_v50 = vand.u32 4294901760, %v25469_v63 }
 0xa4e   :  { %37235 = vmatpush3.msra.mxu0 %v24605_v43  ;;  %37236 = vmatprep.mubr.msk.f32.mxu0 %vm38339_vm2, %v44170_v57 }
 0xa4f   :  { %37216 = vmatmul.mubr.f32.vlgmr.msra.gmra.mxu1 %v42501_v46  ;;  %37225 = vmatprep.subr.mxu1 %v44170_v57  ;;  %v25071_v46 = vand.u32 4294901760, %v42612_v2  ;;  %v25111_v48 = vsub.f32 %v25109_v60, %v25110_v1  ;;  %v25587_v55 = vsub.f32 %v25469_v63, %v42678_v50  ;;  %v25937_v61 = vpop.permute.xlu1 %25936 }
 0xa50   :  { %37237 = vmatmul.mubr.f32.vlgmr.msra.gmra.mxu0 %v42554_v26  ;;  %37246 = vmatprep.subr.mxu0 %v44170_v57  ;;  %v25118_v26 = vsub.f32 %v25116_v28, %v25117_v59 }
 0xa51   :  { %37226 = vmatpush3.msra.mxu1 %v24601_v13  ;;  %37247 = vmatpush3.msra.mxu0 %v24599_v37  ;;  %v25072_v47 = vsub.f32 %v42612_v2, %v25071_v46  ;;  %v25112_v58 = vand.u32 4294901760, %v25111_v48  ;;  %v25588_v13 = vand.u32 4294901760, %v25587_v55 }
 0xa52   :  { %37227 = vmatprep.subr.mxu1 %v44170_v57  ;;  %37248 = vmatprep.subr.mxu0 %v44170_v57 }
 0xa53   :  { %37228 = vmatpush3.msra.mxu1 %v24608_v0  ;;  %37229 = vmatprep.mubr.msk.f32.mxu1 %vm38339_vm2, %v44170_v57  ;;  %v25073_v22 = vand.u32 4294901760, %v25072_v47  ;;  %v25589_v0 = vsub.f32 %v25587_v55, %v25588_v13 }
 0xa54   :  { %37249 = vmatpush3.msra.mxu0 %v24606_v16  ;;  %37250 = vmatprep.mubr.msk.f32.mxu0 %vm38339_vm2, %v44170_v57 }
 0xa55   :  { %37230 = vmatmul.mubr.f32.vlgmr.msra.gmra.mxu1 %v42543_v30  ;;  %37239 = vmatprep.subr.mxu1 %v44170_v57 }
 0xa56   :  { %37251 = vmatmul.mubr.f32.vlgmr.msra.gmra.mxu0 %v42543_v30  ;;  %37260 = vmatprep.subr.mxu0 %v44170_v57 }
 0xa57   :  { %37240 = vmatpush3.msra.mxu1 %v42560_v62  ;;  %37261 = vmatpush3.xpose.msra.mxu0 %v42604_v41 }
 0xa58   :  { %37241 = vmatprep.subr.mxu1 %v44170_v57  ;;  %37243 = vmatprep.mubr.msk.f32.mxu1 %vm38339_vm2, %v44170_v57 }
 0xa59   :  { %37242 = vmatpush3.msra.mxu1 %v42565_v35  ;;  %37262 = vmatprep.subr.mxu0 %v44170_v57 }
 0xa5a   :  { %37244 = vmatmul.mubr.f32.vlgmr.msra.gmra.mxu1 %v24560_v29  ;;  %37253 = vmatprep.subr.mxu1 %v44170_v57  ;;  %v25462_v29 = vpop.permute.xlu0 %25461 }
 0xa5b   :  { %37254 = vmatpush3.msra.mxu1 %v42560_v62  ;;  %37263 = vmatpush3.xpose.msra.mxu0 %v42617_v54  ;;  %v25119_v62 = vand.u32 4294901760, %v25118_v26 }
 0xa5c   :  { %37255 = vmatprep.subr.mxu1 %v44170_v57  ;;  %37257 = vmatprep.mubr.msk.f32.mxu1 %vm38339_vm2, %v44170_v57 }
 0xa5d   :  { %37256 = vmatpush3.msra.mxu1 %v42565_v35  ;;  %37264 = vmatprep.mubr.msk.f32.mxu0 %vm38339_vm2, %v44170_v57  ;;  %v25467_v35 = vsel %vm2124_vm3, %v25462_v29, 0 }
 0xa5e   :  { %37258 = vmatmul.mubr.f32.vlgmr.msra.gmra.mxu1 %v42543_v30  ;;  %37265 = vmatmul.mubr.f32.vlgmr.msra.gmra.mxu0 %v25073_v22  ;;  %v25471_v30 = vsel %vm2124_vm3, %v25466_v20, 0  ;;  %v42663_v53 = vand.u32 4294901760, %v25467_v35  ;;  %v25935_v48 = vpop.permute.xlu0 %25934 }
 0xa5f   :  { %37267 = vmatprep.subr.mxu1 %v44170_v57  ;;  %37274 = vmatprep.subr.mxu0 %v44170_v57  ;;  %v42667_v43 = vand.u32 4294901760, %v25471_v30 }
 0xa60   :  { %37268 = vmatpush3.xpose.msra.mxu1 %v25112_v58  ;;  %37275 = vmatpush3.xpose.msra.mxu0 %v25109_v60  ;;  %v42674_v37 = vsub.f32 %v25467_v35, %v42663_v53 }
 0xa61   :  { %37269 = vmatprep.subr.mxu1 %v44170_v57  ;;  %37276 = vmatprep.subr.mxu0 %v44170_v57  ;;  %v25580_v16 = vsub.f32 %v25471_v30, %v42667_v43 }
 0xa62   :  { %37271 = vmatprep.mubr.msk.f32.mxu1 %vm38339_vm2, %v44170_v57  ;;  %37278 = vmatprep.mubr.msk.f32.mxu0 %vm38339_vm2, %v44170_v57  ;;  %v25542_v3 = vand.u32 4294901760, %v42674_v37 }
 0xa63   :  { %v25581_v11 = vand.u32 4294901760, %v25580_v16 }
 0xa64   :  { %37270 = vmatpush3.xpose.msra.mxu1 %v25119_v62  ;;  %37277 = vmatpush3.xpose.msra.mxu0 %v25116_v28  ;;  %v25543_v38 = vsub.f32 %v42674_v37, %v25542_v3  ;;  %v25590_v28 = vand.u32 4294901760, %v25589_v0  ;;  %v25940_v62 = vsel %vm2124_vm3, %v25935_v48, 0 }
 0xa65   :  { %37281 = vmatprep.subr.mxu1 %v44170_v57  ;;  %37288 = vmatprep.subr.mxu0 %v44170_v57  ;;  %v25582_v10 = vsub.f32 %v25580_v16, %v25581_v11 }
 0xa67   :  { %37272 = vmatmul.mubr.f32.vlgmr.msra.gmra.mxu1 %v42597_v45  ;;  %37279 = vmatmul.mubr.f32.vlgmr.msra.gmra.mxu0 %v42612_v2  ;;  %v25583_v60 = vand.u32 4294901760, %v25582_v10 }
 0xa68   :  { %37282 = vmatpush3.xpose.msra.mxu1 %v42604_v41  ;;  %37289 = vmatpush3.xpose.msra.mxu0 %v25110_v1 }
 0xa69   :  { %37283 = vmatprep.subr.mxu1 %v44170_v57  ;;  %37290 = vmatprep.subr.mxu0 %v44170_v57 }
 0xa6a   :  { %37285 = vmatprep.mubr.msk.f32.mxu1 %vm38339_vm2, %v44170_v57  ;;  %37292 = vmatprep.mubr.msk.f32.mxu0 %vm38339_vm2, %v44170_v57 }
 0xa6c   :  { %37284 = vmatpush3.xpose.msra.mxu1 %v42617_v54  ;;  %37291 = vmatpush3.xpose.msra.mxu0 %v25117_v59 }
 0xa6d   :  { %37295 = vmatprep.subr.mxu1 %v44170_v57  ;;  %37302 = vmatprep.subr.mxu0 %v44170_v57 }
 0xa6f   :  { %37286 = vmatmul.mubr.f32.vlgmr.msra.gmra.mxu1 %v25071_v46  ;;  %37293 = vmatmul.mubr.f32.vlgmr.msra.gmra.mxu0 %v42597_v45  ;;  %v25933_v46 = vpop.permute.xlu1 %25932 }
 0xa70   :  { %37296 = vmatpush3.xpose.msra.mxu1 %v42604_v41  ;;  %37303 = vmatpush3.xpose.msra.mxu0 %v42667_v43  ;;  %v25544_v41 = vand.u32 4294901760, %v25543_v38  ;;  %v25938_v47 = vsel %vm2124_vm3, %v25933_v46, 0  ;;  %v26408_v46 = vpop.permute.xlu0 %26407 }
 0xa71   :  { %37297 = vmatprep.subr.mxu1 %v44170_v57  ;;  %37304 = vmatprep.subr.mxu0 %v44170_v57  ;;  %v42717_v59 = vand.u32 4294901760, %v25938_v47 }
 0xa72   :  { %37299 = vmatprep.mubr.msk.f32.mxu1 %vm38339_vm2, %v44170_v57  ;;  %37306 = vmatprep.mubr.msk.f32.mxu0 %vm38339_vm2, %v44170_v57 }
 0xa73   :  { %v42728_v6 = vsub.f32 %v25938_v47, %v42717_v59 }
 0xa74   :  { %37298 = vmatpush3.xpose.msra.mxu1 %v42617_v54  ;;  %37305 = vmatpush3.xpose.msra.mxu0 %v42678_v50 }
 0xa75   :  { %37309 = vmatprep.subr.mxu1 %v44170_v57  ;;  %37316 = vmatprep.subr.mxu0 %v44170_v57  ;;  %v21369_v2 = vpop.f32.mrf.mxu1 }
 0xa77   :  { %37300 = vmatmul.mubr.f32.vlgmr.msra.gmra.mxu1 %v42597_v45  ;;  %37307 = vmatmul.mubr.f32.vlgmr.msra.gmra.mxu0 %v25544_v41  ;;  %v36937_v1 = vpop.f32.mrf.mxu1  ;;  %v25942_v45 = vsel %vm2124_vm3, %v25937_v61, 0 }
 0xa78   :  { %37310 = vmatpush3.xpose.msra.mxu1 %v25583_v60  ;;  %37317 = vmatpush3.xpose.msra.mxu0 %v25580_v16  ;;  %v42721_v58 = vand.u32 4294901760, %v25942_v45  ;;  %v42735_v16 = vand.u32 4294901760, %v25940_v62 }
 0xa79   :  { %37311 = vmatprep.subr.mxu1 %v44170_v57  ;;  %37318 = vmatprep.subr.mxu0 %v44170_v57  ;;  %v21520_v54 = vpop.f32.mrf.mxu1 }
 0xa7a   :  { %37313 = vmatprep.mubr.msk.f32.mxu1 %vm38339_vm2, %v44170_v57  ;;  %37320 = vmatprep.mubr.msk.f32.mxu0 %vm38339_vm2, %v44170_v57  ;;  %v42733_v63 = vsub.f32 %v25942_v45, %v42721_v58  ;;  %v42747_v41 = vsub.f32 %v25940_v62, %v42735_v16 }
 0xa7b   :  { %v36951_v20 = vpop.f32.mrf.mxu1 }
 0xa7c   :  { %37312 = vmatpush3.xpose.msra.mxu1 %v25590_v28  ;;  %37319 = vmatpush3.xpose.msra.mxu0 %v25587_v55  ;;  %v26052_v10 = vand.u32 4294901760, %v42733_v63 }
 0xa7d   :  { %37323 = vmatprep.subr.mxu1 %v44170_v57  ;;  %37330 = vmatprep.subr.mxu0 %v44170_v57  ;;  %v21288_v22 = vpop.f32.mrf.mxu0 }
 0xa7e   :  { %v21370_v26 = vadd.f32 %v21369_v2, %v21288_v22  ;;  %v21670_v29 = vpop.f32.mrf.mxu1 }
 0xa7f   :  { %37314 = vmatmul.mubr.f32.vlgmr.msra.gmra.mxu1 %v42663_v53  ;;  %37321 = vmatmul.mubr.f32.vlgmr.msra.gmra.mxu0 %v42674_v37  ;;  %v36930_v35 = vpop.f32.mrf.mxu0  ;;  %v26053_v37 = vsub.f32 %v42733_v63, %v26052_v10 }
 0xa80   :  { %37324 = vmatpush3.xpose.msra.mxu1 %v42667_v43  ;;  %37331 = vmatpush3.xpose.msra.mxu0 %v25581_v11  ;;  %v36965_v30 = vpop.f32.mrf.mxu1  ;;  %v26013_v11 = vand.u32 4294901760, %v42728_v6 }
 0xa81   :  { %37325 = vmatprep.subr.mxu1 %v44170_v57  ;;  %37332 = vmatprep.subr.mxu0 %v44170_v57  ;;  %v26054_v20 = vand.u32 4294901760, %v26053_v37  ;;  %v26413_v30 = vsel %vm2124_vm3, %v26408_v46, 0 }
 0xa82   :  { %37327 = vmatprep.mubr.msk.f32.mxu1 %vm38339_vm2, %v44170_v57  ;;  %37334 = vmatprep.mubr.msk.f32.mxu0 %vm38339_vm2, %v44170_v57  ;;  %v26014_v60 = vsub.f32 %v42728_v6, %v26013_v11 }
 0xa84   :  { %37326 = vmatpush3.xpose.msra.mxu1 %v42678_v50  ;;  %37333 = vmatpush3.xpose.msra.mxu0 %v25588_v13  ;;  %v21445_v55 = vpop.f32.mrf.mxu0  ;;  %v26015_v28 = vand.u32 4294901760, %v26014_v60 }
 0xa85   :  { %37337 = vmatprep.subr.mxu1 %v44170_v57  ;;  %37344 = vmatprep.subr.mxu0 %v44170_v57  ;;  %v21446_v61 = vadd.f32 %v21445_v55, %v21370_v26  ;;  %v21837_v38 = vpop.f32.mrf.mxu1  ;;  %v26404_v26 = vpop.permute.xlu0 %26403 }
 0xa86   :  { %v36944_v2 = vpop.f32.mrf.mxu0  ;;  %v26409_v35 = vsel %vm2124_vm3, %v26404_v26, 0 }
 0xa87   :  { %37328 = vmatmul.mubr.f32.vlgmr.msra.gmra.mxu1 %v25542_v3  ;;  %37335 = vmatmul.mubr.f32.vlgmr.msra.gmra.mxu0 %v42663_v53  ;;  %v36979_v13 = vpop.f32.mrf.mxu1  ;;  %v21521_v0 = vadd.f32 %v21520_v54, %v21446_v61  ;;  %v26059_v3 = vand.u32 4294901760, %v42747_v41  ;;  %v42783_v2 = vand.u32 4294901760, %v26409_v35 }
 0xa88   :  { %37338 = vmatpush3.xpose.msra.mxu1 %v42667_v43  ;;  %37345 = vmatpush3.xpose.msra.mxu0 %v42721_v58  ;;  %v42787_v13 = vand.u32 4294901760, %v26413_v30 }
 0xa89   :  { %37339 = vmatprep.subr.mxu1 %v44170_v57  ;;  %37346 = vmatprep.subr.mxu0 %v44170_v57  ;;  %v26060_v48 = vsub.f32 %v42747_v41, %v26059_v3  ;;  %v42794_v60 = vsub.f32 %v26409_v35, %v42783_v2 }
 0xa8a   :  { %37341 = vmatprep.mubr.msk.f32.mxu1 %vm38339_vm2, %v44170_v57  ;;  %37348 = vmatprep.mubr.msk.f32.mxu0 %vm38339_vm2, %v44170_v57 }
 0xa8b   :  { %v21597_v43 = vpop.f32.mrf.mxu0  ;;  %v21988_v1 = vpop.f32.mrf.mxu1  ;;  %v26061_v62 = vand.u32 4294901760, %v26060_v48 }
 0xa8c   :  { %37340 = vmatpush3.xpose.msra.mxu1 %v42678_v50  ;;  %37347 = vmatpush3.xpose.msra.mxu0 %v42735_v16  ;;  %v21598_v54 = vadd.f32 %v21597_v43, %v21521_v0  ;;  %v42801_v43 = vsub.f32 %v26413_v30, %v42787_v13 }
 0xa8d   :  { %37351 = vmatprep.subr.mxu1 %v44170_v57  ;;  %37358 = vmatprep.subr.mxu0 %v44170_v57  ;;  %v36958_v47 = vpop.f32.mrf.mxu0  ;;  %v36993_v45 = vpop.f32.mrf.mxu1 }
 0xa8e   :  { %v42770_v22 = vadd.f32 %v21670_v29, %v21598_v54  ;;  %v26484_v47 = vand.u32 4294901760, %v42794_v60 }
 0xa8f   :  { %37342 = vmatmul.mubr.f32.vlgmr.msra.gmra.mxu1 %v42663_v53  ;;  %37349 = vmatmul.mubr.f32.vlgmr.msra.gmra.mxu0 %v26015_v28 }
 0xa90   :  { %37352 = vmatpush3.xpose.msra.mxu1 %v26054_v20  ;;  %37359 = vmatpush3.xpose.msra.mxu0 %v42733_v63  ;;  %v26406_v63 = vpop.permute.xlu1 %26405  ;;  %v26523_v20 = vand.u32 4294901760, %v42801_v43 }
 0xa91   :  { %37353 = vmatprep.subr.mxu1 %v44170_v57  ;;  %37360 = vmatprep.subr.mxu0 %v44170_v57  ;;  %v21756_v50 = vpop.f32.mrf.mxu0  ;;  %v26411_v0 = vsel %vm2124_vm3, %v26406_v63, 0 }
 0xa92   :  { %37355 = vmatprep.mubr.msk.f32.mxu1 %vm38339_vm2, %v44170_v57  ;;  %37362 = vmatprep.mubr.msk.f32.mxu0 %vm38339_vm2, %v44170_v57  ;;  %v21838_v29 = vadd.f32 %v21837_v38, %v21756_v50  ;;  %v22138_v53 = vpop.f32.mrf.mxu1  ;;  %v42798_v37 = vand.u32 4294901760, %v26411_v0 }
 0xa93   :  { %v36972_v55 = vpop.f32.mrf.mxu0 }
 0xa94   :  { %37354 = vmatpush3.xpose.msra.mxu1 %v26061_v62  ;;  %37361 = vmatpush3.xpose.msra.mxu0 %v42747_v41  ;;  %v37007_v61 = vpop.f32.mrf.mxu1  ;;  %v42812_v45 = vsub.f32 %v26411_v0, %v42798_v37  ;;  %v26485_v62 = vsub.f32 %v42794_v60, %v26484_v47 }
 0xa95   :  { %37365 = vmatprep.subr.mxu1 %v44170_v57  ;;  %37372 = vmatprep.subr.mxu0 %v44170_v57 }
 0xa97   :  { %37356 = vmatmul.mubr.f32.vlgmr.msra.gmra.mxu1 %v42717_v59  ;;  %37363 = vmatmul.mubr.f32.vlgmr.msra.gmra.mxu0 %v42728_v6  ;;  %v26530_v6 = vand.u32 4294901760, %v42812_v45 }
 0xa98   :  { %37366 = vmatpush3.xpose.msra.mxu1 %v42721_v58  ;;  %37373 = vmatpush3.xpose.msra.mxu0 %v26052_v10  ;;  %v21913_v38 = vpop.f32.mrf.mxu0  ;;  %v22305_v41 = vpop.f32.mrf.mxu1 }
 0xa99   :  { %v21914_v46 = vadd.f32 %v21913_v38, %v21838_v29  ;;  %37367 = vmatprep.subr.mxu1 %v44170_v57  ;;  %37374 = vmatprep.subr.mxu0 %v44170_v57  ;;  %v26531_v55 = vsub.f32 %v42812_v45, %v26530_v6 }
 0xa9a   :  { %v36986_v54 = vpop.f32.mrf.mxu0  ;;  %v37021_v28 = vpop.f32.mrf.mxu1  ;;  %37369 = vmatprep.mubr.msk.f32.mxu1 %vm38339_vm2, %v44170_v57  ;;  %37376 = vmatprep.mubr.msk.f32.mxu0 %vm38339_vm2, %v44170_v57 }
 0xa9b   :  { %v21989_v10 = vadd.f32 %v21988_v1, %v21914_v46  ;;  %v26532_v54 = vand.u32 4294901760, %v26531_v55 }
 0xa9c   :  { %37368 = vmatpush3.xpose.msra.mxu1 %v42735_v16  ;;  %37375 = vmatpush3.xpose.msra.mxu0 %v26059_v3  ;;  %v26879_v3 = vpop.permute.xlu1 %26878 }
 0xa9d   :  { %37379 = vmatprep.subr.mxu1 %v44170_v57  ;;  %37386 = vmatprep.subr.mxu0 %v44170_v57 }
 0xa9e   :  { %v22065_v48 = vpop.f32.mrf.mxu0 }
 0xa9f   :  { %v22066_v26 = vadd.f32 %v22065_v48, %v21989_v10  ;;  %v22456_v50 = vpop.f32.mrf.mxu1  ;;  %37370 = vmatmul.mubr.f32.vlgmr.msra.gmra.mxu1 %v26013_v11  ;;  %37377 = vmatmul.mubr.f32.vlgmr.msra.gmra.mxu0 %v42717_v59  ;;  %v26524_v11 = vsub.f32 %v42801_v43, %v26523_v20  ;;  %v26877_v48 = vpop.permute.xlu0 %26876 }
 0xaa0   :  { %37380 = vmatpush3.xpose.msra.mxu1 %v42721_v58  ;;  %37387 = vmatpush3.xpose.msra.mxu0 %v42787_v13  ;;  %v37000_v1 = vpop.f32.mrf.mxu0  ;;  %v26486_v58 = vand.u32 4294901760, %v26485_v62  ;;  %v26875_v63 = vpop.permute.xlu1 %26874 }
 0xaa1   :  { %v42823_v35 = vadd.f32 %v22138_v53, %v22066_v26  ;;  %v37035_v29 = vpop.f32.mrf.mxu1  ;;  %37381 = vmatprep.subr.mxu1 %v44170_v57  ;;  %37388 = vmatprep.subr.mxu0 %v44170_v57  ;;  %v26525_v61 = vand.u32 4294901760, %v26524_v11  ;;  %v26880_v28 = vsel %vm2124_vm3, %v26875_v63, 0  ;;  %v26882_v11 = vsel %vm2124_vm3, %v26877_v48, 0 }
 0xaa2   :  { %37383 = vmatprep.mubr.msk.f32.mxu1 %vm38339_vm2, %v44170_v57  ;;  %37390 = vmatprep.mubr.msk.f32.mxu0 %vm38339_vm2, %v44170_v57  ;;  %v42849_v26 = vand.u32 4294901760, %v26880_v28  ;;  %v42869_v55 = vand.u32 4294901760, %v26882_v11 }
 0xaa4   :  { %37382 = vmatpush3.xpose.msra.mxu1 %v42735_v16  ;;  %37389 = vmatpush3.xpose.msra.mxu0 %v42798_v37 }
 0xaa5   :  { %v22224_v53 = vpop.f32.mrf.mxu0  ;;  %v22606_v30 = vpop.f32.mrf.mxu1  ;;  %37393 = vmatprep.subr.mxu1 %v44170_v57  ;;  %37400 = vmatprep.subr.mxu0 %v44170_v57 }
 0xaa6   :  { %v22306_v0 = vadd.f32 %v22305_v41, %v22224_v53 }
 0xaa7   :  { %v37014_v38 = vpop.f32.mrf.mxu0  ;;  %v37049_v46 = vpop.f32.mrf.mxu1  ;;  %37384 = vmatmul.mubr.f32.vlgmr.msra.gmra.mxu1 %v42717_v59  ;;  %37391 = vmatmul.mubr.f32.vlgmr.msra.gmra.mxu0 %v26486_v58  ;;  %v26884_v59 = vsel %vm2124_vm3, %v26879_v3, 0 }
 0xaa8   :  { %37394 = vmatpush3.xpose.msra.mxu1 %v26525_v61  ;;  %37401 = vmatpush3.xpose.msra.mxu0 %v42801_v43  ;;  %v42853_v62 = vand.u32 4294901760, %v26884_v59  ;;  %v42881_v38 = vsub.f32 %v26882_v11, %v42869_v55 }
 0xaa9   :  { %v22381_v16 = vpop.f32.mrf.mxu0  ;;  %37395 = vmatprep.subr.mxu1 %v44170_v57  ;;  %37402 = vmatprep.subr.mxu0 %v44170_v57 }
 0xaaa   :  { %v22382_v10 = vadd.f32 %v22381_v16, %v22306_v0  ;;  %37397 = vmatprep.mubr.msk.f32.mxu1 %vm38339_vm2, %v44170_v57  ;;  %37404 = vmatprep.mubr.msk.f32.mxu0 %vm38339_vm2, %v44170_v57  ;;  %v42867_v53 = vsub.f32 %v26884_v59, %v42853_v62 }
 0xaab   :  { %v37028_v41 = vpop.f32.mrf.mxu0 }
 0xaac   :  { %v22457_v43 = vadd.f32 %v22456_v50, %v22382_v10  ;;  %37396 = vmatpush3.xpose.msra.mxu1 %v26532_v54  ;;  %37403 = vmatpush3.xpose.msra.mxu0 %v42812_v45  ;;  %v42862_v45 = vsub.f32 %v26880_v28, %v42849_v26  ;;  %v26994_v0 = vand.u32 4294901760, %v42867_v53  ;;  %v27350_v10 = vpop.permute.xlu0 %27349 }
 0xaad   :  { %v22533_v1 = vpop.f32.mrf.mxu0  ;;  %37407 = vmatprep.subr.mxu1 %v44170_v57  ;;  %37414 = vmatprep.subr.mxu0 %v44170_v57 }
 0xaae   :  { %v22534_v29 = vadd.f32 %v22533_v1, %v22457_v43  ;;  %v26955_v63 = vand.u32 4294901760, %v42862_v45  ;;  %v26995_v59 = vsub.f32 %v42867_v53, %v26994_v0 }
 0xaaf   :  { %v37042_v58 = vpop.f32.mrf.mxu0  ;;  %37398 = vmatmul.mubr.f32.vlgmr.msra.gmra.mxu1 %v42783_v2  ;;  %37405 = vmatmul.mubr.f32.vlgmr.msra.gmra.mxu0 %v42794_v60  ;;  %v27001_v60 = vand.u32 4294901760, %v42881_v38 }
 0xab0   :  { %v42858_v50 = vadd.f32 %v22606_v30, %v22534_v29  ;;  %37408 = vmatpush3.xpose.msra.mxu1 %v42787_v13  ;;  %37415 = vmatpush3.xpose.msra.mxu0 %v26523_v20  ;;  %v26956_v28 = vsub.f32 %v42862_v45, %v26955_v63  ;;  %v26996_v1 = vand.u32 4294901760, %v26995_v59  ;;  %v27346_v58 = vpop.permute.xlu0 %27345 }
 0xab1   :  { %v22692_v3 = vpop.f32.mrf.mxu0  ;;  %37409 = vmatprep.subr.mxu1 %v44170_v57  ;;  %37416 = vmatprep.subr.mxu0 %v44170_v57  ;;  %v27002_v29 = vsub.f32 %v42881_v38, %v27001_v60 }
 0xab2   :  { %37411 = vmatprep.mubr.msk.f32.mxu1 %vm38339_vm2, %v44170_v57  ;;  %37418 = vmatprep.mubr.msk.f32.mxu0 %vm38339_vm2, %v44170_v57  ;;  %v26957_v41 = vand.u32 4294901760, %v26956_v28 }
 0xab3   :  { %v37056_v20 = vpop.f32.mrf.mxu0 }
 0xab4   :  { %v22773_v30 = vpop.f32.mrf.mxu1  ;;  %37410 = vmatpush3.xpose.msra.mxu1 %v42798_v37  ;;  %37417 = vmatpush3.xpose.msra.mxu0 %v26530_v6  ;;  %v27003_v20 = vand.u32 4294901760, %v27002_v29 }
 0xab5   :  { %v22774_v61 = vadd.f32 %v22773_v30, %v22692_v3  ;;  %37421 = vmatprep.subr.mxu1 %v44170_v57  ;;  %37428 = vmatprep.subr.mxu0 %v44170_v57  ;;  %v27351_v30 = vsel %vm2124_vm3, %v27346_v58, 0 }
 0xab6   :  { %v22849_v46 = vpop.f32.mrf.mxu0  ;;  %v37063_v16 = vpop.f32.mrf.mxu1 }
 0xab7   :  { %v22850_v54 = vadd.f32 %v22849_v46, %v22774_v61  ;;  %37412 = vmatmul.mubr.f32.vlgmr.msra.gmra.mxu1 %v26484_v47  ;;  %37419 = vmatmul.mubr.f32.vlgmr.msra.gmra.mxu0 %v42783_v2  ;;  %v42917_v16 = vand.u32 4294901760, %v27351_v30 }
 0xab8   :  { %v37070_v6 = vpop.f32.mrf.mxu0  ;;  %37422 = vmatpush3.xpose.msra.mxu1 %v42787_v13  ;;  %37429 = vmatpush3.xpose.msra.mxu0 %v42853_v62 }
 0xab9   :  { %37423 = vmatprep.subr.mxu1 %v44170_v57  ;;  %37430 = vmatprep.subr.mxu0 %v44170_v57 }
 0xaba   :  { %37425 = vmatprep.mubr.msk.f32.mxu1 %vm38339_vm2, %v44170_v57  ;;  %37432 = vmatprep.mubr.msk.f32.mxu0 %vm38339_vm2, %v44170_v57 }
 0xabb   :  { %v22924_v13 = vpop.f32.mrf.mxu1 }
 0xabc   :  { %v22925_v47 = vadd.f32 %v22924_v13, %v22850_v54  ;;  %37424 = vmatpush3.xpose.msra.mxu1 %v42798_v37  ;;  %37431 = vmatpush3.xpose.msra.mxu0 %v42869_v55 }
 0xabd   :  { %v23001_v48 = vpop.f32.mrf.mxu0  ;;  %v37077_v43 = vpop.f32.mrf.mxu1  ;;  %37435 = vmatprep.subr.mxu1 %v44170_v57  ;;  %37442 = vmatprep.subr.mxu0 %v44170_v57 }
 0xabe   :  { %v23002_v11 = vadd.f32 %v23001_v48, %v22925_v47 }
 0xabf   :  { %v37084_v3 = vpop.f32.mrf.mxu0  ;;  %37426 = vmatmul.mubr.f32.vlgmr.msra.gmra.mxu1 %v42783_v2  ;;  %37433 = vmatmul.mubr.f32.vlgmr.msra.gmra.mxu0 %v26957_v41  ;;  %v27355_v2 = vsel %vm2124_vm3, %v27350_v10, 0 }
 0xac0   :  { %37436 = vmatpush3.xpose.msra.mxu1 %v26996_v1  ;;  %37443 = vmatpush3.xpose.msra.mxu0 %v42867_v53  ;;  %v27348_v53 = vpop.permute.xlu1 %27347  ;;  %v42921_v6 = vand.u32 4294901760, %v27355_v2 }
 0xac1   :  { %v23074_v37 = vpop.f32.mrf.mxu1  ;;  %37437 = vmatprep.subr.mxu1 %v44170_v57  ;;  %37444 = vmatprep.subr.mxu0 %v44170_v57  ;;  %v27353_v59 = vsel %vm2124_vm3, %v27348_v53, 0 }
 0xac2   :  { %v42909_v61 = vadd.f32 %v23074_v37, %v23002_v11  ;;  %37439 = vmatprep.mubr.msk.f32.mxu1 %vm38339_vm2, %v44170_v57  ;;  %37446 = vmatprep.mubr.msk.f32.mxu0 %vm38339_vm2, %v44170_v57  ;;  %v42932_v41 = vand.u32 4294901760, %v27353_v59  ;;  %v42935_v48 = vsub.f32 %v27355_v2, %v42921_v6 }
 0xac3   :  { %v37091_v46 = vpop.f32.mrf.mxu1 }
 0xac4   :  { %37438 = vmatpush3.xpose.msra.mxu1 %v27003_v20  ;;  %37445 = vmatpush3.xpose.msra.mxu0 %v42881_v38  ;;  %v42928_v38 = vsub.f32 %v27351_v30, %v42917_v16  ;;  %v27471_v58 = vsub.f32 %v27353_v59, %v42932_v41  ;;  %v27465_v3 = vand.u32 4294901760, %v42935_v48  ;;  %v27821_v30 = vpop.permute.xlu1 %27820 }
 0xac5   :  { %v23160_v54 = vpop.f32.mrf.mxu0  ;;  %37449 = vmatprep.subr.mxu1 %v44170_v57  ;;  %37456 = vmatprep.subr.mxu0 %v44170_v57 }
 0xac6   :  { %v23241_v28 = vpop.f32.mrf.mxu1  ;;  %v27426_v29 = vand.u32 4294901760, %v42928_v38  ;;  %v27472_v53 = vand.u32 4294901760, %v27471_v58 }
 0xac7   :  { %v23242_v13 = vadd.f32 %v23241_v28, %v23160_v54  ;;  %v37098_v47 = vpop.f32.mrf.mxu0  ;;  %37440 = vmatmul.mubr.f32.vlgmr.msra.gmra.mxu1 %v42849_v26  ;;  %37447 = vmatmul.mubr.f32.vlgmr.msra.gmra.mxu0 %v42862_v45  ;;  %v27466_v45 = vsub.f32 %v42935_v48, %v27465_v3 }
 0xac8   :  { %v37105_v10 = vpop.f32.mrf.mxu1  ;;  %37450 = vmatpush3.xpose.msra.mxu1 %v42853_v62  ;;  %37457 = vmatpush3.xpose.msra.mxu0 %v26994_v0 }
 0xac9   :  { %37451 = vmatprep.subr.mxu1 %v44170_v57  ;;  %37458 = vmatprep.subr.mxu0 %v44170_v57  ;;  %v27467_v47 = vand.u32 4294901760, %v27466_v45  ;;  %v27817_v10 = vpop.permute.xlu1 %27816 }
 0xaca   :  { %37453 = vmatprep.mubr.msk.f32.mxu1 %vm38339_vm2, %v44170_v57  ;;  %37460 = vmatprep.mubr.msk.f32.mxu0 %vm38339_vm2, %v44170_v57 }
 0xacb   :  { %v23317_v43 = vpop.f32.mrf.mxu0 }
 0xacc   :  { %v23318_v0 = vadd.f32 %v23317_v43, %v23242_v13  ;;  %v23392_v1 = vpop.f32.mrf.mxu1  ;;  %37452 = vmatpush3.xpose.msra.mxu1 %v42869_v55  ;;  %37459 = vmatpush3.xpose.msra.mxu0 %v27001_v60  ;;  %v27427_v60 = vsub.f32 %v42928_v38, %v27426_v29  ;;  %v27473_v13 = vsub.f32 %v27471_v58, %v27472_v53  ;;  %v27822_v43 = vsel %vm2124_vm3, %v27817_v10, 0 }
 0xacd   :  { %v37112_v11 = vpop.f32.mrf.mxu0  ;;  %37463 = vmatprep.subr.mxu1 %v44170_v57  ;;  %37470 = vmatprep.subr.mxu0 %v44170_v57 }
 0xace   :  { %v23393_v37 = vadd.f32 %v23392_v1, %v23318_v0  ;;  %v37119_v20 = vpop.f32.mrf.mxu1  ;;  %v27428_v59 = vand.u32 4294901760, %v27427_v60  ;;  %v27826_v0 = vsel %vm2124_vm3, %v27821_v30, 0  ;;  %v42978_v1 = vand.u32 4294901760, %v27822_v43 }
 0xacf   :  { %37454 = vmatmul.mubr.f32.vlgmr.msra.gmra.mxu1 %v26955_v63  ;;  %37461 = vmatmul.mubr.f32.vlgmr.msra.gmra.mxu0 %v42849_v26 }
 0xad0   :  { %37464 = vmatpush3.xpose.msra.mxu1 %v42853_v62  ;;  %37471 = vmatpush3.xpose.msra.mxu0 %v42921_v6 }
 0xad1   :  { %v23469_v2 = vpop.f32.mrf.mxu0  ;;  %v23542_v46 = vpop.f32.mrf.mxu1  ;;  %37465 = vmatprep.subr.mxu1 %v44170_v57  ;;  %37472 = vmatprep.subr.mxu0 %v44170_v57 }
 0xad2   :  { %v23470_v63 = vadd.f32 %v23469_v2, %v23393_v37  ;;  %37467 = vmatprep.mubr.msk.f32.mxu1 %vm38339_vm2, %v44170_v57  ;;  %37474 = vmatprep.mubr.msk.f32.mxu0 %vm38339_vm2, %v44170_v57  ;;  %v42989_v37 = vsub.f32 %v27822_v43, %v42978_v1 }
 0xad3   :  { %v37126_v62 = vpop.f32.mrf.mxu0  ;;  %v37133_v54 = vpop.f32.mrf.mxu1 }
 0xad4   :  { %v42962_v28 = vadd.f32 %v23542_v46, %v23470_v63  ;;  %37466 = vmatpush3.xpose.msra.mxu1 %v42869_v55  ;;  %37473 = vmatpush3.xpose.msra.mxu0 %v42932_v41  ;;  %v27474_v55 = vand.u32 4294901760, %v27473_v13 }
 0xad5   :  { %37477 = vmatprep.subr.mxu1 %v44170_v57  ;;  %37484 = vmatprep.subr.mxu0 %v44170_v57 }
 0xad7   :  { %37468 = vmatmul.mubr.f32.vlgmr.msra.gmra.mxu1 %v42849_v26  ;;  %37475 = vmatmul.mubr.f32.vlgmr.msra.gmra.mxu0 %v27428_v59  ;;  %v27819_v26 = vpop.permute.xlu0 %27818 }
 0xad8   :  { %37478 = vmatpush3.xpose.msra.mxu1 %v27467_v47  ;;  %37485 = vmatpush3.xpose.msra.mxu0 %v42935_v48  ;;  %v42982_v48 = vand.u32 4294901760, %v27826_v0  ;;  %v27824_v11 = vsel %vm2124_vm3, %v27819_v26, 0  ;;  %v28290_v26 = vpop.permute.xlu1 %28289 }
 0xad9   :  { %37479 = vmatprep.subr.mxu1 %v44170_v57  ;;  %37486 = vmatprep.subr.mxu0 %v44170_v57  ;;  %v42996_v20 = vand.u32 4294901760, %v27824_v11 }
 0xada   :  { %37481 = vmatprep.mubr.msk.f32.mxu1 %vm38339_vm2, %v44170_v57  ;;  %37488 = vmatprep.mubr.msk.f32.mxu0 %vm38339_vm2, %v44170_v57 }
 0xadb   :  { %v43008_v60 = vsub.f32 %v27824_v11, %v42996_v20  ;;  %v28292_v46 = vpop.permute.xlu0 %28291 }
 0xadc   :  { %37480 = vmatpush3.xpose.msra.mxu1 %v27474_v55  ;;  %37487 = vmatpush3.xpose.msra.mxu0 %v27471_v58  ;;  %v42994_v58 = vsub.f32 %v27826_v0, %v42982_v48  ;;  %v28297_v43 = vsel %vm2124_vm3, %v28292_v46, 0 }
 0xadd   :  { %37491 = vmatprep.subr.mxu1 %v44170_v57  ;;  %37498 = vmatprep.subr.mxu0 %v44170_v57 }
 0xade   :  { %v27936_v30 = vand.u32 4294901760, %v42994_v58 }
 0xadf   :  { %37482 = vmatmul.mubr.f32.vlgmr.msra.gmra.mxu1 %v42917_v16  ;;  %37489 = vmatmul.mubr.f32.vlgmr.msra.gmra.mxu0 %v42928_v38  ;;  %v27943_v38 = vand.u32 4294901760, %v43008_v60  ;;  %v28288_v59 = vpop.permute.xlu0 %28287 }
 0xae0   :  { %37492 = vmatpush3.xpose.msra.mxu1 %v42921_v6  ;;  %37499 = vmatpush3.xpose.msra.mxu0 %v27465_v3  ;;  %v27897_v3 = vand.u32 4294901760, %v42989_v37  ;;  %v27937_v45 = vsub.f32 %v42994_v58, %v27936_v30  ;;  %v28293_v10 = vsel %vm2124_vm3, %v28288_v59, 0 }
 0xae1   :  { %37493 = vmatprep.subr.mxu1 %v44170_v57  ;;  %37500 = vmatprep.subr.mxu0 %v44170_v57  ;;  %v27944_v54 = vsub.f32 %v43008_v60, %v27943_v38 }
 0xae2   :  { %37495 = vmatprep.mubr.msk.f32.mxu1 %vm38339_vm2, %v44170_v57  ;;  %37502 = vmatprep.mubr.msk.f32.mxu0 %vm38339_vm2, %v44170_v57  ;;  %v27898_v2 = vsub.f32 %v42989_v37, %v27897_v3  ;;  %v27938_v62 = vand.u32 4294901760, %v27937_v45  ;;  %v43046_v45 = vand.u32 4294901760, %v28297_v43 }
 0xae3   :  { %v27945_v47 = vand.u32 4294901760, %v27944_v54 }
 0xae4   :  { %37494 = vmatpush3.xpose.msra.mxu1 %v42932_v41  ;;  %37501 = vmatpush3.xpose.msra.mxu0 %v27472_v53  ;;  %v43060_v54 = vsub.f32 %v28297_v43, %v43046_v45 }
 0xae5   :  { %37505 = vmatprep.subr.mxu1 %v44170_v57  ;;  %37512 = vmatprep.subr.mxu0 %v44170_v57 }
 0xae7   :  { %37496 = vmatmul.mubr.f32.vlgmr.msra.gmra.mxu1 %v27426_v29  ;;  %37503 = vmatmul.mubr.f32.vlgmr.msra.gmra.mxu0 %v42917_v16  ;;  %v27899_v29 = vand.u32 4294901760, %v27898_v2  ;;  %v43042_v2 = vand.u32 4294901760, %v28293_v10 }
 0xae8   :  { %37506 = vmatpush3.xpose.msra.mxu1 %v42921_v6  ;;  %37513 = vmatpush3.xpose.msra.mxu0 %v42982_v48 }
 0xae9   :  { %37507 = vmatprep.subr.mxu1 %v44170_v57  ;;  %37514 = vmatprep.subr.mxu0 %v44170_v57  ;;  %v23628_v53 = vpop.f32.mrf.mxu0 }
 0xaea   :  { %37509 = vmatprep.mubr.msk.f32.mxu1 %vm38339_vm2, %v44170_v57  ;;  %37516 = vmatprep.mubr.msk.f32.mxu0 %vm38339_vm2, %v44170_v57 }
 0xaeb   :  { %v37140_v6 = vpop.f32.mrf.mxu0 }
 0xaec   :  { %37508 = vmatpush3.xpose.msra.mxu1 %v42932_v41  ;;  %37515 = vmatpush3.xpose.msra.mxu0 %v42996_v20 }
 0xaed   :  { %37519 = vmatprep.subr.mxu1 %v44170_v57  ;;  %37526 = vmatprep.subr.mxu0 %v44170_v57  ;;  %v23785_v63 = vpop.f32.mrf.mxu0 }
 0xaef   :  { %37510 = vmatmul.mubr.f32.vlgmr.msra.gmra.mxu1 %v42917_v16  ;;  %37517 = vmatmul.mubr.f32.vlgmr.msra.gmra.mxu0 %v27899_v29  ;;  %v37154_v13 = vpop.f32.mrf.mxu0  ;;  %v43053_v29 = vsub.f32 %v28293_v10, %v43042_v2  ;;  %v28407_v10 = vand.u32 4294901760, %v43060_v54 }
 0xaf0   :  { %37520 = vmatpush3.xpose.msra.mxu1 %v27938_v62  ;;  %37527 = vmatpush3.xpose.msra.mxu0 %v42994_v58 }
 0xaf1   :  { %37521 = vmatprep.subr.mxu1 %v44170_v57  ;;  %37528 = vmatprep.subr.mxu0 %v44170_v57  ;;  %v23709_v41 = vpop.f32.mrf.mxu1  ;;  %v28368_v13 = vand.u32 4294901760, %v43053_v29 }
 0xaf2   :  { %37523 = vmatprep.mubr.msk.f32.mxu1 %vm38339_vm2, %v44170_v57  ;;  %37530 = vmatprep.mubr.msk.f32.mxu0 %vm38339_vm2, %v44170_v57  ;;  %v23710_v16 = vadd.f32 %v23709_v41, %v23628_v53  ;;  %v23937_v55 = vpop.f32.mrf.mxu0  ;;  %v28295_v53 = vsel %vm2124_vm3, %v28290_v26, 0 }
 0xaf3   :  { %v37147_v0 = vpop.f32.mrf.mxu1  ;;  %v43057_v62 = vand.u32 4294901760, %v28295_v53 }
 0xaf4   :  { %37522 = vmatpush3.xpose.msra.mxu1 %v27945_v47  ;;  %37529 = vmatpush3.xpose.msra.mxu0 %v43008_v60  ;;  %v37168_v11 = vpop.f32.mrf.mxu0  ;;  %v23786_v58 = vadd.f32 %v23785_v63, %v23710_v16  ;;  %v28369_v0 = vsub.f32 %v43053_v29, %v28368_v13 }
 0xaf5   :  { %37533 = vmatprep.subr.mxu1 %v44170_v57  ;;  %37540 = vmatprep.subr.mxu0 %v44170_v57  ;;  %v43071_v47 = vsub.f32 %v28295_v53, %v43057_v62 }
 0xaf7   :  { %37524 = vmatmul.mubr.f32.vlgmr.msra.gmra.mxu1 %v42978_v1  ;;  %37531 = vmatmul.mubr.f32.vlgmr.msra.gmra.mxu0 %v42989_v37  ;;  %v23860_v46 = vpop.f32.mrf.mxu1  ;;  %v28414_v26 = vand.u32 4294901760, %v43071_v47  ;;  %v28408_v37 = vsub.f32 %v43060_v54, %v28407_v10 }
 0xaf8   :  { %37534 = vmatpush3.xpose.msra.mxu1 %v42982_v48  ;;  %37541 = vmatpush3.xpose.msra.mxu0 %v27936_v30  ;;  %v23861_v60 = vadd.f32 %v23860_v46, %v23786_v58  ;;  %v24096_v6 = vpop.f32.mrf.mxu0  ;;  %v28370_v58 = vand.u32 4294901760, %v28369_v0 }
 0xaf9   :  { %37535 = vmatprep.subr.mxu1 %v44170_v57  ;;  %37542 = vmatprep.subr.mxu0 %v44170_v57  ;;  %v37161_v63 = vpop.f32.mrf.mxu1  ;;  %v28415_v46 = vsub.f32 %v43071_v47, %v28414_v26 }
 0xafa   :  { %37537 = vmatprep.mubr.msk.f32.mxu1 %vm38339_vm2, %v44170_v57  ;;  %37544 = vmatprep.mubr.msk.f32.mxu0 %vm38339_vm2, %v44170_v57  ;;  %v37182_v30 = vpop.f32.mrf.mxu0  ;;  %v23938_v59 = vadd.f32 %v23937_v55, %v23861_v60  ;;  %v28409_v60 = vand.u32 4294901760, %v28408_v37 }
 0xafc   :  { %37536 = vmatpush3.xpose.msra.mxu1 %v42996_v20  ;;  %37543 = vmatpush3.xpose.msra.mxu0 %v27943_v38 }
 0xafd   :  { %37547 = vmatprep.subr.mxu1 %v44170_v57  ;;  %37554 = vmatprep.subr.mxu0 %v44170_v57  ;;  %v24010_v41 = vpop.f32.mrf.mxu1 }
 0xafe   :  { %v43074_v16 = vadd.f32 %v24010_v41, %v23938_v59  ;;  %v24253_v43 = vpop.f32.mrf.mxu0 }
 0xaff   :  { %37538 = vmatmul.mubr.f32.vlgmr.msra.gmra.mxu1 %v27897_v3  ;;  %37545 = vmatmul.mubr.f32.vlgmr.msra.gmra.mxu0 %v42978_v1  ;;  %v37175_v38 = vpop.f32.mrf.mxu1 }
 0xb00   :  { %37548 = vmatpush3.xpose.msra.mxu1 %v42982_v48  ;;  %37555 = vmatpush3.xpose.msra.mxu0 %v43046_v45  ;;  %v37196_v55 = vpop.f32.mrf.mxu0 }
 0xb01   :  { %37549 = vmatprep.subr.mxu1 %v44170_v57  ;;  %37556 = vmatprep.subr.mxu0 %v44170_v57 }
 0xb02   :  { %37551 = vmatprep.mubr.msk.f32.mxu1 %vm38339_vm2, %v44170_v57  ;;  %37558 = vmatprep.mubr.msk.f32.mxu0 %vm38339_vm2, %v44170_v57 }
 0xb03   :  { %v24177_v48 = vpop.f32.mrf.mxu1 }
 0xb04   :  { %37550 = vmatpush3.xpose.msra.mxu1 %v42996_v20  ;;  %37557 = vmatpush3.xpose.msra.mxu0 %v43057_v62  ;;  %v24178_v3 = vadd.f32 %v24177_v48, %v24096_v6  ;;  %v24405_v11 = vpop.f32.mrf.mxu0  ;;  %v28416_v6 = vand.u32 4294901760, %v28415_v46 }
 0xb05   :  { %37561 = vmatprep.subr.mxu1 %v44170_v57  ;;  %37568 = vmatprep.subr.mxu0 %v44170_v57  ;;  %v37189_v53 = vpop.f32.mrf.mxu1 }
 0xb06   :  { %v37210_v63 = vpop.f32.mrf.mxu0  ;;  %v24254_v30 = vadd.f32 %v24253_v43, %v24178_v3 }
 0xb07   :  { %37552 = vmatmul.mubr.f32.vlgmr.msra.gmra.mxu1 %v42978_v1  ;;  %37559 = vmatmul.mubr.f32.vlgmr.msra.gmra.mxu0 %v28370_v58 }
 0xb08   :  { %37562 = vmatpush3.xpose.msra.mxu1 %v28409_v60  ;;  %37569 = vmatpush3.xpose.msra.mxu0 %v43060_v54 }
 0xb09   :  { %37563 = vmatprep.subr.mxu1 %v44170_v57  ;;  %37570 = vmatprep.subr.mxu0 %v44170_v57  ;;  %v24328_v20 = vpop.f32.mrf.mxu1 }
 0xb0a   :  { %37565 = vmatprep.mubr.msk.f32.mxu1 %vm38339_vm2, %v44170_v57  ;;  %37572 = vmatprep.mubr.msk.f32.mxu0 %vm38339_vm2, %v44170_v57  ;;  %v24329_v59 = vadd.f32 %v24328_v20, %v24254_v30  ;;  %v24564_v41 = vpop.f32.mrf.mxu0 }
 0xb0b   :  { %v37203_v43 = vpop.f32.mrf.mxu1 }
 0xb0c   :  { %37564 = vmatpush3.xpose.msra.mxu1 %v28416_v6  ;;  %37571 = vmatpush3.xpose.msra.mxu0 %v43071_v47  ;;  %v37224_v1 = vpop.f32.mrf.mxu0  ;;  %v24406_v54 = vadd.f32 %v24405_v11, %v24329_v59 }
 0xb0d   :  { %37575 = vmatprep.subr.mxu1 %v44170_v57  ;;  %37582 = vmatprep.subr.mxu0 %v44170_v57 }
 0xb0f   :  { %37566 = vmatmul.mubr.f32.vlgmr.msra.gmra.mxu1 %v43042_v2  ;;  %37573 = vmatmul.mubr.f32.vlgmr.msra.gmra.mxu0 %v43053_v29  ;;  %v24478_v38 = vpop.f32.mrf.mxu1 }
 0xb10   :  { %37576 = vmatpush3.xpose.msra.mxu1 %v43046_v45  ;;  %37583 = vmatpush3.xpose.msra.mxu0 %v28407_v10  ;;  %v43111_v55 = vadd.f32 %v24478_v38, %v24406_v54  ;;  %v24721_v0 = vpop.f32.mrf.mxu0 }
 0xb11   :  { %37577 = vmatprep.subr.mxu1 %v44170_v57  ;;  %37584 = vmatprep.subr.mxu0 %v44170_v57  ;;  %v37217_v47 = vpop.f32.mrf.mxu1 }
 0xb12   :  { %v37238_v37 = vpop.f32.mrf.mxu0  ;;  %37579 = vmatprep.mubr.msk.f32.mxu1 %vm38339_vm2, %v44170_v57  ;;  %37586 = vmatprep.mubr.msk.f32.mxu0 %vm38339_vm2, %v44170_v57 }
 0xb14   :  { %37578 = vmatpush3.xpose.msra.mxu1 %v43057_v62  ;;  %37585 = vmatpush3.xpose.msra.mxu0 %v28414_v26 }
 0xb15   :  { %v24645_v48 = vpop.f32.mrf.mxu1  ;;  %37589 = vmatprep.subr.mxu1 %v44170_v57  ;;  %37596 = vmatprep.subr.mxu0 %v44170_v57 }
 0xb16   :  { %v24646_v10 = vadd.f32 %v24645_v48, %v24564_v41  ;;  %v24873_v3 = vpop.f32.mrf.mxu0 }
 0xb17   :  { %37580 = vmatmul.mubr.f32.vlgmr.msra.gmra.mxu1 %v28368_v13  ;;  %37587 = vmatmul.mubr.f32.vlgmr.msra.gmra.mxu0 %v43042_v2  ;;  %v37231_v11 = vpop.f32.mrf.mxu1 }
 0xb18   :  { %37590 = vmatpush3.xpose.msra.mxu1 %v43046_v45  ;;  %v37252_v58 = vpop.f32.mrf.mxu0  ;;  %v24722_v53 = vadd.f32 %v24721_v0, %v24646_v10  ;;  %37593 = vmatprep.mubr.msk.f32.mxu1 %vm38339_vm2, %v44170_v57 }
 0xb19   :  { %37591 = vmatprep.subr.mxu1 %v44170_v57  ;;  %37600 = vmatprep.mubr.msk.f32.mxu0 %vm38339_vm2, %v44170_v57 }
 0xb1a   :  { %v24796_v26 = vpop.f32.mrf.mxu1 }
 0xb1b   :  { %v24797_v46 = vadd.f32 %v24796_v26, %v24722_v53 }
 0xb1c   :  { %37592 = vmatpush3.xpose.msra.mxu1 %v43057_v62  ;;  %v37245_v29 = vpop.f32.mrf.mxu1 }
 0xb1d   :  { %v24874_v13 = vadd.f32 %v24873_v3, %v24797_v46  ;;  %37603 = vmatprep.subr.mxu1 %v44170_v57 }
 0xb1e   :  { %v24946_v60 = vpop.f32.mrf.mxu1  ;;  %v25075_v45 = vpop.f32.mrf.mxu0 }
 0xb1f   :  { %v43133_v63 = vadd.f32 %v24946_v60, %v24874_v13  ;;  %37594 = vmatmul.mubr.f32.vlgmr.msra.gmra.mxu1 %v43042_v2 }
 0xb20   :  { %v37259_v30 = vpop.f32.mrf.mxu1  ;;  %v37266_v20 = vpop.f32.mrf.mxu0  ;;  %37607 = vmatprep.mubr.msk.f32.mxu1 %vm38339_vm2, %v44170_v57 }
 0xb27   :  { %v25156_v6 = vpop.f32.mrf.mxu1  ;;  %v25232_v59 = vpop.f32.mrf.mxu0 }
 0xb28   :  { %v25157_v62 = vadd.f32 %v25156_v6, %v25075_v45 }
 0xb29   :  { %v37273_v41 = vpop.f32.mrf.mxu1  ;;  %v37280_v43 = vpop.f32.mrf.mxu0 }
 0xb2a   :  { %v25233_v38 = vadd.f32 %v25232_v59, %v25157_v62 }
 0xb2f   :  { %v25307_v1 = vpop.f32.mrf.mxu1  ;;  %v25384_v54 = vpop.f32.mrf.mxu0 }
 0xb30   :  { %v25308_v37 = vadd.f32 %v25307_v1, %v25233_v38 }
 0xb31   :  { %v37287_v0 = vpop.f32.mrf.mxu1  ;;  %v37294_v47 = vpop.f32.mrf.mxu0 }
 0xb32   :  { %v25385_v48 = vadd.f32 %v25384_v54, %v25308_v37 }
 0xb37   :  { %v25457_v10 = vpop.f32.mrf.mxu1  ;;  %v25546_v3 = vpop.f32.mrf.mxu0 }
 0xb38   :  { %v43138_v2 = vadd.f32 %v25457_v10, %v25385_v48 }
 0xb39   :  { %v37301_v11 = vpop.f32.mrf.mxu1  ;;  %v37308_v58 = vpop.f32.mrf.mxu0 }
 0xb3a   :  { %v28758_v53 = vsel %vm5869_vm4, %v43138_v2, -inf }
 0xb3b   :  { %28759 = vmax.xlane.f32.xlu1 %v28758_v53 }
 0xb3f   :  { %v25627_v26 = vpop.f32.mrf.mxu1  ;;  %v25703_v46 = vpop.f32.mrf.mxu0 }
 0xb40   :  { %v25628_v60 = vadd.f32 %v25627_v26, %v25546_v3 }
 0xb41   :  { %v37315_v29 = vpop.f32.mrf.mxu1  ;;  %v37322_v13 = vpop.f32.mrf.mxu0 }
 0xb42   :  { %v25704_v20 = vadd.f32 %v25703_v46, %v25628_v60 }
 0xb47   :  { %v25778_v45 = vpop.f32.mrf.mxu1  ;;  %v25855_v30 = vpop.f32.mrf.mxu0 }
 0xb48   :  { %v25779_v41 = vadd.f32 %v25778_v45, %v25704_v20 }
 0xb49   :  { %v37329_v6 = vpop.f32.mrf.mxu1  ;;  %v37336_v59 = vpop.f32.mrf.mxu0 }
 0xb4a   :  { %v25856_v43 = vadd.f32 %v25855_v30, %v25779_v41 }
 0xb4c   :  { %28848 = vrot.lane.b32.xlu1 %v44192_v52, %s38345_s7 }
 0xb4f   :  { %v25928_v62 = vpop.f32.mrf.mxu1  ;;  %v26017_v1 = vpop.f32.mrf.mxu0 }
 0xb50   :  { %v43144_v54 = vadd.f32 %v25928_v62, %v25856_v43 }
 0xb51   :  { %v37343_v38 = vpop.f32.mrf.mxu1  ;;  %v37350_v0 = vpop.f32.mrf.mxu0 }
 0xb52   :  { %v28761_v47 = vsel %vm5869_vm4, %v43144_v54, -inf }
 0xb53   :  { %28762 = vmax.xlane.f32.xlu0 %v28761_v47 }
 0xb57   :  { %v26098_v37 = vpop.f32.mrf.mxu1  ;;  %v26174_v48 = vpop.f32.mrf.mxu0 }
 0xb58   :  { %v26099_v11 = vadd.f32 %v26098_v37, %v26017_v1 }
 0xb59   :  { %v37357_v10 = vpop.f32.mrf.mxu1  ;;  %v37364_v3 = vpop.f32.mrf.mxu0 }
 0xb5a   :  { %v26175_v26 = vadd.f32 %v26174_v48, %v26099_v11 }
 0xb5f   :  { %v26249_v58 = vpop.f32.mrf.mxu1  ;;  %v26326_v53 = vpop.f32.mrf.mxu0 }
 0xb60   :  { %v26250_v29 = vadd.f32 %v26249_v58, %v26175_v26 }
 0xb61   :  { %v37371_v52 = vpop.f32.mrf.mxu1  ;;  %v37378_v46 = vpop.f32.mrf.mxu0 }
 0xb62   :  { %v26327_v13 = vadd.f32 %v26326_v53, %v26250_v29 }
 0xb67   :  { %v26399_v60 = vpop.f32.mrf.mxu1  ;;  %v26488_v45 = vpop.f32.mrf.mxu0 }
 0xb68   :  { %v43148_v30 = vadd.f32 %v26399_v60, %v26327_v13 }
 0xb69   :  { %v37385_v20 = vpop.f32.mrf.mxu1  ;;  %v37392_v6 = vpop.f32.mrf.mxu0 }
 0xb6a   :  { %v28764_v59 = vsel %vm5869_vm4, %v43148_v30, -inf }
 0xb6b   :  { %28765 = vmax.xlane.f32.xlu0 %v28764_v59 }
 0xb6f   :  { %v26569_v41 = vpop.f32.mrf.mxu1  ;;  %v26645_v43 = vpop.f32.mrf.mxu0 }
 0xb70   :  { %v26570_v38 = vadd.f32 %v26569_v41, %v26488_v45 }
 0xb71   :  { %v37399_v62 = vpop.f32.mrf.mxu1  ;;  %v37406_v1 = vpop.f32.mrf.mxu0 }
 0xb72   :  { %v26646_v37 = vadd.f32 %v26645_v43, %v26570_v38 }
 0xb77   :  { %v26720_v0 = vpop.f32.mrf.mxu1  ;;  %v26797_v47 = vpop.f32.mrf.mxu0 }
 0xb78   :  { %v26721_v3 = vadd.f32 %v26720_v0, %v26646_v37 }
 0xb79   :  { %v37413_v48 = vpop.f32.mrf.mxu1  ;;  %v37420_v10 = vpop.f32.mrf.mxu0 }
 0xb7a   :  { %v26798_v11 = vadd.f32 %v26797_v47, %v26721_v3 }
 0xb7f   :  { %v26870_v58 = vpop.f32.mrf.mxu1  ;;  %v26959_v53 = vpop.f32.mrf.mxu0 }
 0xb80   :  { %v43152_v26 = vadd.f32 %v26870_v58, %v26798_v11 }
 0xb81   :  { %v37427_v52 = vpop.f32.mrf.mxu1  ;;  %v37434_v46 = vpop.f32.mrf.mxu0 }
 0xb82   :  { %v28767_v29 = vsel %vm5869_vm4, %v43152_v26, -inf }
 0xb83   :  { %28768 = vmax.xlane.f32.xlu1 %v28767_v29 }
 0xb87   :  { %v27040_v13 = vpop.f32.mrf.mxu1  ;;  %v27116_v60 = vpop.f32.mrf.mxu0 }
 0xb88   :  { %v27041_v6 = vadd.f32 %v27040_v13, %v26959_v53 }
 0xb89   :  { %v37441_v45 = vpop.f32.mrf.mxu1  ;;  %v37448_v20 = vpop.f32.mrf.mxu0 }
 0xb8a   :  { %v27117_v43 = vadd.f32 %v27116_v60, %v27041_v6 }
 0xb8f   :  { %v27191_v59 = vpop.f32.mrf.mxu1  ;;  %v27268_v41 = vpop.f32.mrf.mxu0 }
 0xb90   :  { %v27192_v38 = vadd.f32 %v27191_v59, %v27117_v43 }
 0xb91   :  { %v37455_v62 = vpop.f32.mrf.mxu1  ;;  %v37462_v1 = vpop.f32.mrf.mxu0 }
 0xb92   :  { %v27269_v0 = vadd.f32 %v27268_v41, %v27192_v38 }
 0xb97   :  { %v27341_v47 = vpop.f32.mrf.mxu1  ;;  %v27430_v37 = vpop.f32.mrf.mxu0 }
 0xb98   :  { %v43156_v48 = vadd.f32 %v27341_v47, %v27269_v0 }
 0xb99   :  { %v37469_v10 = vpop.f32.mrf.mxu1  ;;  %v37476_v3 = vpop.f32.mrf.mxu0 }
 0xb9a   :  { %v28770_v11 = vsel %vm5869_vm4, %v43156_v48, -inf }
 0xb9b   :  { %28771 = vmax.xlane.f32.xlu0 %v28770_v11 }
 0xb9f   :  { %v27511_v58 = vpop.f32.mrf.mxu1  ;;  %v27587_v52 = vpop.f32.mrf.mxu0 }
 0xba0   :  { %v27512_v29 = vadd.f32 %v27511_v58, %v27430_v37 }
 0xba1   :  { %v37483_v53 = vpop.f32.mrf.mxu1  ;;  %v37490_v46 = vpop.f32.mrf.mxu0 }
 0xba2   :  { %v27588_v45 = vadd.f32 %v27587_v52, %v27512_v29  ;;  %v28847_v46 = vpop.permute.xlu0 %28846 }
 0xba7   :  { %v27662_v13 = vpop.f32.mrf.mxu1  ;;  %v27739_v60 = vpop.f32.mrf.mxu0 }
 0xba8   :  { %v27663_v59 = vadd.f32 %v27662_v13, %v27588_v45 }
 0xba9   :  { %v37497_v20 = vpop.f32.mrf.mxu1  ;;  %v37504_v6 = vpop.f32.mrf.mxu0 }
 0xbaa   :  { %v27740_v41 = vadd.f32 %v27739_v60, %v27663_v59  ;;  %v43166_v60 = vand.u32 4294901760, %v28847_v46 }
 0xbac   :  { %v43171_v6 = vsub.f32 %v28847_v46, %v43166_v60 }
 0xbaf   :  { %v27812_v43 = vpop.f32.mrf.mxu1  ;;  %v27901_v62 = vpop.f32.mrf.mxu0 }
 0xbb0   :  { %v43160_v1 = vadd.f32 %v27812_v43, %v27740_v41 }
 0xbb1   :  { %v37511_v38 = vpop.f32.mrf.mxu1  ;;  %29782 = vrot.lane.b32.xlu0 %v39275_v21, %s38345_s7  ;;  %v37518_v0 = vpop.f32.mrf.mxu0 }
 0xbb2   :  { %v28773_v47 = vsel %vm5869_vm4, %v43160_v1, -inf }
 0xbb3   :  { %28774 = vmax.xlane.f32.xlu1 %v28773_v47 }
 0xbb7   :  { %v27982_v37 = vpop.f32.mrf.mxu1  ;;  %v28058_v10 = vpop.f32.mrf.mxu0 }
 0xbb8   :  { %v27983_v58 = vadd.f32 %v27982_v37, %v27901_v62  ;;  %v44137_v37 = vand.u32 4294901760, %v43171_v6 }
 0xbb9   :  { %v37525_v3 = vpop.f32.mrf.mxu1  ;;  %v37532_v11 = vpop.f32.mrf.mxu0 }
 0xbba   :  { %v28059_v45 = vadd.f32 %v28058_v10, %v27983_v58  ;;  %v28971_v11 = vsub.f32 %v43171_v6, %v44137_v37 }
 0xbbf   :  { %v28133_v52 = vpop.f32.mrf.mxu1  ;;  %v28210_v53 = vpop.f32.mrf.mxu0 }
 0xbc0   :  { %v28134_v21 = vadd.f32 %v28133_v52, %v28059_v45 }
 0xbc1   :  { %v37539_v29 = vpop.f32.mrf.mxu1  ;;  %v37546_v13 = vpop.f32.mrf.mxu0 }
 0xbc2   :  { %v28211_v62 = vadd.f32 %v28210_v53, %v28134_v21  ;;  %v43194_v21 = vpop.permute.xlu0 %29316 }
 0xbc4   :  { %v28760_v20 = vpop.xlane.xlu1 %28759  ;;  %29784 = vrot.lane.b32.xlu1 %v39263_v31, %s38345_s7 }
 0xbc7   :  { %v28283_v59 = vpop.f32.mrf.mxu1  ;;  %v28372_v41 = vpop.f32.mrf.mxu0 }
 0xbc8   :  { %v28849_v43 = vpop.permute.xlu1 %28848  ;;  %v43176_v3 = vadd.f32 %v28283_v59, %v28211_v62  ;;  %v28972_v59 = vand.u32 4294901760, %v28971_v11 }
 0xbc9   :  { %v43173_v38 = vand.u32 4294901760, %v28849_v43  ;;  %v37553_v0 = vpop.f32.mrf.mxu1  ;;  %v37560_v47 = vpop.f32.mrf.mxu0 }
 0xbca   :  { %v28776_v46 = vsel %vm5869_vm4, %v43176_v3, -inf  ;;  %v43198_v47 = vpop.permute.xlu0 %29314 }
 0xbcb   :  { %v43179_v10 = vsub.f32 %v28849_v43, %v43173_v38  ;;  %37597 = vmatpush3.msra.mxu0 %v43173_v38 }
 0xbcc   :  { %37598 = vmatprep.subr.mxu0 %v44170_v57 }
 0xbcd   :  { %v44138_v31 = vand.u32 4294901760, %v43179_v10  ;;  %37599 = vmatpush3.msra.mxu0 %v43166_v60 }
 0xbce   :  { %37610 = vmatprep.subr.mxu0 %v44170_v57 }
 0xbcf   :  { %v28964_v58 = vsub.f32 %v43179_v10, %v44138_v31  ;;  %v28453_v52 = vpop.f32.mrf.mxu1  ;;  %v28529_v53 = vpop.f32.mrf.mxu0 }
 0xbd0   :  { %28777 = vmax.xlane.f32.xlu0 %v28776_v46  ;;  %v28454_v43 = vadd.f32 %v28453_v52, %v28372_v41 }
 0xbd1   :  { %v28965_v29 = vand.u32 4294901760, %v28964_v58  ;;  %v37567_v13 = vpop.f32.mrf.mxu1  ;;  %v37574_v45 = vpop.f32.mrf.mxu0 }
 0xbd2   :  { %v28530_v46 = vadd.f32 %v28529_v53, %v28454_v43 }
 0xbd3   :  { %37604 = vmatpush3.msra.mxu1 %v28965_v29 }
 0xbd4   :  { %37605 = vmatprep.subr.mxu1 %v44170_v57 }
 0xbd5   :  { %37606 = vmatpush3.msra.mxu1 %v28972_v59 }
 0xbd6   :  { %37617 = vmatprep.subr.mxu1 %v44170_v57 }
 0xbd7   :  { %v28604_v62 = vpop.f32.mrf.mxu1  ;;  %v28681_v0 = vpop.f32.mrf.mxu0 }
 0xbd8   :  { %v28605_v13 = vadd.f32 %v28604_v62, %v28530_v46 }
 0xbd9   :  { %v37581_v37 = vpop.f32.mrf.mxu1  ;;  %v37588_v31 = vpop.f32.mrf.mxu0 }
 0xbda   :  { %v28682_v29 = vadd.f32 %v28681_v0, %v28605_v13  ;;  %v28782_v37 = vsub.f32 %v43138_v2, %v28760_v20 }
 0xbdc   :  { %v28763_v58 = vpop.xlane.xlu0 %28762 }
 0xbdd   :  { %v28783_v45 = vsub.f32 %v43144_v54, %v28763_v58  ;;  %v28790_v54 = vmul.f32 1.442695, %v28782_v37 }
 0xbdf   :  { %v28792_v23 = vmul.f32 1.442695, %v28783_v45  ;;  %v28754_v11 = vpop.f32.mrf.mxu1 }
 0xbe0   :  { %v28755_v59 = vadd.f32 %v28754_v11, %v28682_v29 }
 0xbe1   :  { %38168 = vpow2.f32 %v28792_v23  ;;  %v37595_v8 = vpop.f32.mrf.mxu1 }
 0xbe2   :  { %v28779_v41 = vsel %vm5869_vm4, %v28755_v59, -inf  ;;  %38170 = vpow2.f32 %v28790_v54 }
 0xbe6   :  { %30252 = vrot.lane.b32.xlu0 %v39336_v9, %s38345_s7 }
 0xbe8   :  { %28780 = vmax.xlane.f32.xlu1 %v28779_v41 }
 0xbee   :  { %v43205_v31 = vpop.eup %38168 }
 0xbef   :  { %v28809_v52 = vsel %vm5869_vm4, %v43205_v31, 0.0  ;;  %v43210_v43 = vpop.eup %38170 }
 0xbf0   :  { %28810 = vadd.xlane.f32.xlu1 %v28809_v52  ;;  %v28806_v9 = vsel %vm5869_vm4, %v43210_v43, 0.0 }
 0xbf4   :  { %v28766_v53 = vpop.xlane.xlu0 %28765 }
 0xbf5   :  { %v28784_v23 = vsub.f32 %v43148_v30, %v28766_v53 }
 0xbf7   :  { %v28794_v8 = vmul.f32 1.442695, %v28784_v23 }
 0xbf9   :  { %38172 = vpow2.f32 %v28794_v8 }
 0xc05   :  { %28807 = vadd.xlane.f32.xlu0 %v28806_v9 }
 0xc06   :  { %v43214_v2 = vpop.eup %38172 }
 0xc07   :  { %v28812_v20 = vsel %vm5869_vm4, %v43214_v2, 0.0 }
 0xc09   :  { %28813 = vadd.xlane.f32.xlu0 %v28812_v20 }
 0xc0c   :  { %v28769_v62 = vpop.xlane.xlu1 %28768 }
 0xc0d   :  { %v28785_v0 = vsub.f32 %v43152_v26, %v28769_v62 }
 0xc0f   :  { %v28796_v46 = vmul.f32 1.442695, %v28785_v0 }
 0xc11   :  { %38174 = vpow2.f32 %v28796_v46 }
 0xc1e   :  { %v43219_v30 = vpop.eup %38174 }
 0xc1f   :  { %v28815_v58 = vsel %vm5869_vm4, %v43219_v30, 0.0 }
 0xc20   :  { %28816 = vadd.xlane.f32.xlu1 %v28815_v58 }
 0xc24   :  { %v28772_v13 = vpop.xlane.xlu0 %28771 }
 0xc25   :  { %v28786_v45 = vsub.f32 %v43156_v48, %v28772_v13 }
 0xc27   :  { %v28798_v11 = vmul.f32 1.442695, %v28786_v45 }
 0xc29   :  { %38176 = vpow2.f32 %v28798_v11 }
 0xc31   :  { %30720 = vrot.lane.b32.xlu1 %v39421_v51, %s38345_s7  ;;  %v43237_v51 = vpop.permute.xlu0 %29782 }
 0xc35   :  { %30718 = vrot.lane.b32.xlu1 %v39433_v27, %s38345_s7 }
 0xc36   :  { %v43228_v26 = vpop.eup %38176 }
 0xc37   :  { %v28818_v29 = vsel %vm5869_vm4, %v43228_v26, 0.0 }
 0xc38   :  { %28819 = vadd.xlane.f32.xlu0 %v28818_v29 }
 0xc3c   :  { %v28775_v41 = vpop.xlane.xlu1 %28774 }
 0xc3d   :  { %v28787_v37 = vsub.f32 %v43160_v1, %v28775_v41  ;;  %v44206_v41 = vand.u32 4294901760, %v43179_v10 }
 0xc3f   :  { %v28800_v52 = vmul.f32 1.442695, %v28787_v37 }
 0xc40   :  { %v43248_v8 = vpop.permute.xlu1 %29784 }
 0xc41   :  { %38178 = vpow2.f32 %v28800_v52  ;;  %v43336_v45 = vand.u32 4294901760, %v43248_v8  ;;  %v44207_v52 = vand.u32 4294901760, %v43171_v6 }
 0xc4e   :  { %30250 = vrot.lane.b32.xlu0 %v39347_v36, %s38345_s7  ;;  %v43235_v48 = vpop.eup %38178 }
 0xc4f   :  { %v28821_v27 = vsel %vm5869_vm4, %v43235_v48, 0.0 }
 0xc59   :  { %v28778_v54 = vpop.xlane.xlu0 %28777  ;;  %28822 = vadd.xlane.f32.xlu1 %v28821_v27 }
 0xc5a   :  { %v28788_v53 = vsub.f32 %v43176_v3, %v28778_v54 }
 0xc5c   :  { %v28802_v23 = vmul.f32 1.442695, %v28788_v53 }
 0xc5e   :  { %38180 = vpow2.f32 %v28802_v23 }
 0xc6a   :  { %31188 = vrot.lane.b32.xlu1 %v39494_v44, %s38345_s7 }
 0xc6b   :  { %v43244_v1 = vpop.eup %38180 }
 0xc6c   :  { %v28824_v36 = vsel %vm5869_vm4, %v43244_v1, 0.0 }
 0xc6d   :  { %28825 = vadd.xlane.f32.xlu0 %v28824_v36 }
 0xc6e   :  { %31656 = vrot.lane.b32.xlu1 %v39579_v33, %s38345_s7 }
 0xc71   :  { %v28781_v9 = vpop.xlane.xlu1 %28780 }
 0xc72   :  { %v28789_v20 = vsub.f32 %v28755_v59, %v28781_v9  ;;  %31654 = vrot.lane.b32.xlu1 %v39591_v49, %s38345_s7  ;;  %v43268_v49 = vpop.permute.xlu0 %30252 }
 0xc74   :  { %v28804_v3 = vmul.f32 1.442695, %v28789_v20  ;;  %v43411_v20 = vand.u32 4294901760, %v43268_v49 }
 0xc76   :  { %38182 = vpow2.f32 %v28804_v3  ;;  %32124 = vrot.lane.b32.xlu1 %v39648_v19, %s38345_s7 }
 0xc7a   :  { %32122 = vrot.lane.b32.xlu1 %v39659_v39, %s38345_s7  ;;  %v28811_v39 = vpop.xlane.xlu1 %28810 }
 0xc7e   :  { %17318 = vrot.lane.b32.xlu1 %v41617_v12, %s38333_s27  ;;  %v43279_v12 = vand.u32 4294901760, %v43194_v21 }
 0xc82   :  { %24958 = vrot.lane.b32.xlu1 %v42770_v22, %s38346_s8 }
 0xc83   :  { %v43262_v44 = vpop.eup %38182 }
 0xc84   :  { %v28827_v33 = vsel %vm5869_vm4, %v43262_v44, 0.0 }
 0xc85   :  { %28828 = vadd.xlane.f32.xlu0 %v28827_v33 }
 0xc86   :  { %17322 = vrot.lane.b32.xlu1 %v41708_v24, %s38333_s27 }
 0xc8a   :  { %24962 = vrot.lane.b32.xlu1 %v42858_v50, %s38346_s8  ;;  %v43291_v50 = vsub.f32 %v43194_v21, %v43279_v12 }
 0xc8c   :  { %v29431_v59 = vand.u32 4294901760, %v43291_v50 }
 0xc8e   :  { %v28808_v19 = vpop.xlane.xlu0 %28807  ;;  %17326 = vrot.lane.b32.xlu1 %v41824_v5, %s38333_s27  ;;  %v43286_v5 = vand.u32 4294901760, %v43198_v47  ;;  %v29432_v0 = vsub.f32 %v43291_v50, %v29431_v59 }
 0xc8f   :  { %38184 = vrcp.f32 %v28808_v19 }
 0xc90   :  { %38186 = vrcp.f32 %v28811_v39  ;;  %v29433_v13 = vand.u32 4294901760, %v29432_v0 }
 0xc92   :  { %24966 = vrot.lane.b32.xlu1 %v42962_v28, %s38346_s8  ;;  %v43298_v28 = vsub.f32 %v43198_v47, %v43286_v5  ;;  %v28814_v62 = vpop.xlane.xlu0 %28813 }
 0xc93   :  { %38188 = vrcp.f32 %v28814_v62 }
 0xc96   :  { %17330 = vrot.lane.b32.xlu1 %v41975_v17, %s38333_s27 }
 0xc9a   :  { %24970 = vrot.lane.b32.xlu1 %v43111_v55, %s38346_s8 }
 0xc9b   :  { %31186 = vrot.lane.b32.xlu0 %v39505_v25, %s38345_s7 }
 0xc9c   :  { %v38185_v24 = vpop.eup %38184 }
 0xc9d   :  { %v28831_v22 = vmul.f32 %v38185_v24, %v43210_v43  ;;  %v38187_v55 = vpop.eup %38186 }
 0xc9e   :  { %v28833_v47 = vmul.f32 %v38187_v55, %v43205_v31 }
 0xc9f   :  { %17320 = vrot.lane.b32.xlu0 %v41666_v32, %s38333_s27  ;;  %v28853_v17 = vsel %vm5869_vm4, %v28831_v22, 0  ;;  %v29438_v32 = vand.u32 4294901760, %v43298_v28 }
 0xca0   :  { %v43300_v25 = vand.u32 4294901760, %v28853_v17  ;;  %v29321_v58 = vsel %vm5869_vm4, %v28833_v47, 0  ;;  %v38189_v27 = vpop.eup %38188 }
 0xca1   :  { %v29439_v31 = vsub.f32 %v43298_v28, %v29438_v32 }
 0xca2   :  { %v28923_v43 = vsub.f32 %v28853_v17, %v43300_v25  ;;  %37608 = vmatmul.mubr.f32.vlgmr.msra.gmra.mxu1 %v43300_v25 }
 0xca3   :  { %37618 = vmatpush3.msra.mxu1 %v43173_v38  ;;  %24960 = vrot.lane.b32.xlu0 %v42823_v35, %s38346_s8 }
 0xca4   :  { %37619 = vmatprep.subr.mxu1 %v44170_v57  ;;  %37621 = vmatprep.mubr.msk.f32.mxu1 %vm38339_vm2, %v44170_v57  ;;  %v28924_v21 = vand.u32 4294901760, %v28923_v43 }
 0xca5   :  { %37620 = vmatpush3.msra.mxu1 %v43166_v60 }
 0xca6   :  { %37631 = vmatprep.subr.mxu1 %v44170_v57  ;;  %37622 = vmatmul.mubr.f32.vlgmr.msra.gmra.mxu1 %v28924_v21  ;;  %v28925_v35 = vsub.f32 %v28923_v43, %v28924_v21 }
 0xca7   :  { %37632 = vmatpush3.msra.mxu1 %v43173_v38  ;;  %17324 = vrot.lane.b32.xlu0 %v41764_v4, %s38333_s27  ;;  %v29440_v4 = vand.u32 4294901760, %v29439_v31  ;;  %v43333_v38 = vand.u32 4294901760, %v29321_v58 }
 0xca8   :  { %37633 = vmatprep.subr.mxu1 %v44170_v57  ;;  %37635 = vmatprep.mubr.msk.f32.mxu1 %vm38339_vm2, %v44170_v57  ;;  %v28926_v46 = vand.u32 4294901760, %v28925_v35 }
 0xca9   :  { %37634 = vmatpush3.msra.mxu1 %v43166_v60  ;;  %v43346_v60 = vand.u32 4294901760, %v43237_v51  ;;  %v43352_v11 = vsub.f32 %v29321_v58, %v43333_v38  ;;  %v28817_v29 = vpop.xlane.xlu1 %28816 }
 0xcaa   :  { %37645 = vmatprep.subr.mxu1 %v44170_v57  ;;  %37601 = vmatmul.mubr.f32.vlgmr.msra.gmra.mxu0 %v28926_v46  ;;  %38190 = vrcp.f32 %v28817_v29 }
 0xcab   :  { %37611 = vmatpush3.msra.mxu0 %v43179_v10  ;;  %37636 = vmatmul.mubr.f32.vlgmr.msra.gmra.mxu1 %v43300_v25  ;;  %v43367_v37 = vsub.f32 %v43237_v51, %v43346_v60  ;;  %v29392_v10 = vand.u32 4294901760, %v43352_v11 }
 0xcac   :  { %37646 = vmatpush3.msra.mxu1 %v29433_v13  ;;  %37612 = vmatprep.subr.mxu0 %v44170_v57 }
 0xcad   :  { %37647 = vmatprep.subr.mxu1 %v44170_v57  ;;  %24964 = vrot.lane.b32.xlu0 %v42909_v61, %s38346_s8  ;;  %v43356_v61 = vsub.f32 %v43248_v8, %v43336_v45  ;;  %v29393_v51 = vsub.f32 %v43352_v11, %v29392_v10  ;;  %v30721_v21 = vpop.permute.xlu1 %30720 }
 0xcae   :  { %37613 = vmatpush3.msra.mxu0 %v43171_v6  ;;  %37648 = vmatpush3.msra.mxu1 %v29440_v4  ;;  %v28835_v6 = vmul.f32 %v38189_v27, %v43214_v2  ;;  %v43499_v46 = vand.u32 4294901760, %v30721_v21 }
 0xcaf   :  { %37614 = vmatprep.mubr.msk.f32.mxu0 %vm38339_vm2, %v44170_v57  ;;  %37624 = vmatprep.subr.mxu0 %v44170_v57  ;;  %v29899_v54 = vand.u32 4294901760, %v43356_v61  ;;  %v29394_v23 = vand.u32 4294901760, %v29393_v51 }
 0xcb0   :  { %37649 = vmatprep.mubr.msk.f32.mxu1 %vm38339_vm2, %v44170_v57  ;;  %37659 = vmatprep.subr.mxu1 %v44170_v57  ;;  %v29789_v36 = vsel %vm5869_vm4, %v28835_v6, 0 }
 0xcb1   :  { %37615 = vmatmul.mubr.f32.vlgmr.msra.gmra.mxu0 %v28923_v43  ;;  %37650 = vmatmul.mubr.f32.vlgmr.msra.gmra.mxu1 %v43333_v38  ;;  %v29900_v53 = vsub.f32 %v43356_v61, %v29899_v54  ;;  %v30719_v31 = vpop.permute.xlu1 %30718 }
 0xcb2   :  { %37625 = vmatpush3.msra.mxu0 %v44206_v41  ;;  %37660 = vmatpush3.msra.mxu1 %v43279_v12  ;;  %v43508_v4 = vand.u32 4294901760, %v30719_v31 }
 0xcb3   :  { %37626 = vmatprep.subr.mxu0 %v44170_v57  ;;  %17328 = vrot.lane.b32.xlu0 %v41938_v42, %s38333_s27  ;;  %v29906_v42 = vand.u32 4294901760, %v43367_v37  ;;  %v29901_v8 = vand.u32 4294901760, %v29900_v53 }
 0xcb4   :  { %37661 = vmatprep.subr.mxu1 %v44170_v57  ;;  %37627 = vmatpush3.msra.mxu0 %v44207_v52 }
 0xcb5   :  { %37662 = vmatpush3.msra.mxu1 %v43286_v5  ;;  %37628 = vmatprep.mubr.msk.f32.mxu0 %vm38339_vm2, %v44170_v57  ;;  %v29907_v2 = vsub.f32 %v43367_v37, %v29906_v42 }
 0xcb6   :  { %37638 = vmatprep.subr.mxu0 %v44170_v57  ;;  %37663 = vmatprep.mubr.msk.f32.mxu1 %vm38339_vm2, %v44170_v57 }
 0xcb7   :  { %37673 = vmatprep.subr.mxu1 %v44170_v57  ;;  %37629 = vmatmul.mubr.f32.vlgmr.msra.gmra.mxu0 %v43300_v25  ;;  %v29908_v9 = vand.u32 4294901760, %v29907_v2  ;;  %v38191_v3 = vpop.eup %38190 }
 0xcb8   :  { %37639 = vmatpush3.msra.mxu0 %v43279_v12  ;;  %37664 = vmatmul.mubr.f32.vlgmr.msra.gmra.mxu1 %v29392_v10  ;;  %v28837_v39 = vmul.f32 %v38191_v3, %v43219_v30 }
 0xcb9   :  { %37674 = vmatpush3.msra.mxu1 %v43279_v12  ;;  %37640 = vmatprep.subr.mxu0 %v44170_v57 }
 0xcba   :  { %24968 = vrot.lane.b32.xlu0 %v43074_v16, %s38346_s8  ;;  %37675 = vmatprep.subr.mxu1 %v44170_v57  ;;  %v43408_v16 = vand.u32 4294901760, %v29789_v36 }
 0xcbb   :  { %37641 = vmatpush3.msra.mxu0 %v43286_v5  ;;  %37676 = vmatpush3.msra.mxu1 %v43286_v5  ;;  %v30257_v5 = vsel %vm5869_vm4, %v28837_v39, 0 }
 0xcbc   :  { %37642 = vmatprep.mubr.msk.f32.mxu0 %vm38339_vm2, %v44170_v57  ;;  %37652 = vmatprep.subr.mxu0 %v44170_v57  ;;  %v29859_v19 = vsub.f32 %v29789_v36, %v43408_v16 }
 0xcbd   :  { %37677 = vmatprep.mubr.msk.f32.mxu1 %vm38339_vm2, %v44170_v57  ;;  %37687 = vmatprep.subr.mxu1 %v44170_v57 }
 0xcbe   :  { %37643 = vmatmul.mubr.f32.vlgmr.msra.gmra.mxu0 %v29394_v23  ;;  %37678 = vmatmul.mubr.f32.vlgmr.msra.gmra.mxu1 %v43333_v38  ;;  %v29860_v30 = vand.u32 4294901760, %v29859_v19 }
 0xcbf   :  { %37653 = vmatpush3.msra.mxu0 %v43291_v50  ;;  %37688 = vmatpush3.msra.mxu1 %v29901_v8 }
 0xcc0   :  { %17332 = vrot.lane.b32.xlu0 %v41997_v7, %s38333_s27  ;;  %37654 = vmatprep.subr.mxu0 %v44170_v57  ;;  %v43426_v7 = vsub.f32 %v43268_v49, %v43411_v20  ;;  %v29861_v50 = vsub.f32 %v29859_v19, %v29860_v30 }
 0xcc1   :  { %37689 = vmatprep.subr.mxu1 %v44170_v57  ;;  %37655 = vmatpush3.msra.mxu0 %v43298_v28  ;;  %v28820_v33 = vpop.xlane.xlu0 %28819 }
 0xcc2   :  { %37690 = vmatpush3.msra.mxu1 %v29908_v9  ;;  %37656 = vmatprep.mubr.msk.f32.mxu0 %vm38339_vm2, %v44170_v57  ;;  %38192 = vrcp.f32 %v28820_v33  ;;  %v30367_v49 = vand.u32 4294901760, %v43426_v7  ;;  %v29862_v25 = vand.u32 4294901760, %v29861_v50 }
 0xcc3   :  { %37666 = vmatprep.subr.mxu0 %v44170_v57  ;;  %37691 = vmatprep.mubr.msk.f32.mxu1 %vm38339_vm2, %v44170_v57 }
 0xcc4   :  { %37701 = vmatprep.subr.mxu1 %v44170_v57  ;;  %37657 = vmatmul.mubr.f32.vlgmr.msra.gmra.mxu0 %v43352_v11  ;;  %v30368_v28 = vsub.f32 %v43426_v7, %v30367_v49 }
 0xcc5   :  { %37667 = vmatpush3.msra.mxu0 %v29431_v59  ;;  %37692 = vmatmul.mubr.f32.vlgmr.msra.gmra.mxu1 %v43408_v16  ;;  %v30251_v12 = vpop.permute.xlu0 %30250 }
 0xcc6   :  { %37702 = vmatpush3.msra.mxu1 %v43336_v45  ;;  %24972 = vrot.lane.b32.xlu0 %v43133_v63, %s38346_s8  ;;  %v43437_v24 = vand.u32 4294901760, %v30251_v12  ;;  %v43455_v63 = vand.u32 4294901760, %v30257_v5 }
 0xcc7   :  { %37668 = vmatprep.subr.mxu0 %v44170_v57  ;;  %37703 = vmatprep.subr.mxu1 %v44170_v57 }
 0xcc8   :  { %37669 = vmatpush3.msra.mxu0 %v29438_v32  ;;  %37704 = vmatpush3.msra.mxu1 %v43346_v60  ;;  %v43447_v22 = vsub.f32 %v30251_v12, %v43437_v24  ;;  %v30327_v59 = vsub.f32 %v30257_v5, %v43455_v63  ;;  %v30369_v32 = vand.u32 4294901760, %v30368_v28 }
 0xcc9   :  { %37670 = vmatprep.mubr.msk.f32.mxu0 %vm38339_vm2, %v44170_v57  ;;  %37680 = vmatprep.subr.mxu0 %v44170_v57 }
 0xcca   :  { %37705 = vmatprep.mubr.msk.f32.mxu1 %vm38339_vm2, %v44170_v57  ;;  %37715 = vmatprep.subr.mxu1 %v44170_v57  ;;  %v30374_v17 = vand.u32 4294901760, %v43447_v22  ;;  %v30328_v0 = vand.u32 4294901760, %v30327_v59 }
 0xccb   :  { %37671 = vmatmul.mubr.f32.vlgmr.msra.gmra.mxu0 %v43333_v38  ;;  %37706 = vmatmul.mubr.f32.vlgmr.msra.gmra.mxu1 %v29860_v30  ;;  %v43514_v38 = vsub.f32 %v30721_v21, %v43499_v46 }
 0xccc   :  { %37681 = vmatpush3.msra.mxu0 %v43336_v45  ;;  %37716 = vmatpush3.msra.mxu1 %v43336_v45  ;;  %v30375_v55 = vsub.f32 %v43447_v22, %v30374_v17  ;;  %v30329_v35 = vsub.f32 %v30327_v59, %v30328_v0 }
 0xccd   :  { %37682 = vmatprep.subr.mxu0 %v44170_v57  ;;  %37717 = vmatprep.subr.mxu1 %v44170_v57  ;;  %v30835_v11 = vand.u32 4294901760, %v43514_v38 }
 0xcce   :  { %37683 = vmatpush3.msra.mxu0 %v43346_v60  ;;  %37718 = vmatpush3.msra.mxu1 %v43346_v60  ;;  %v30376_v62 = vand.u32 4294901760, %v30375_v55  ;;  %v30330_v13 = vand.u32 4294901760, %v30329_v35  ;;  %v43525_v60 = vsub.f32 %v30719_v31, %v43508_v4 }
 0xccf   :  { %37684 = vmatprep.mubr.msk.f32.mxu0 %vm38339_vm2, %v44170_v57  ;;  %37694 = vmatprep.subr.mxu0 %v44170_v57  ;;  %v38193_v43 = vpop.eup %38192 }
 0xcd0   :  { %37719 = vmatprep.mubr.msk.f32.mxu1 %vm38339_vm2, %v44170_v57  ;;  %37729 = vmatprep.subr.mxu1 %v44170_v57  ;;  %v28839_v47 = vmul.f32 %v38193_v43, %v43228_v26  ;;  %v30842_v41 = vand.u32 4294901760, %v43525_v60 }
 0xcd1   :  { %37685 = vmatmul.mubr.f32.vlgmr.msra.gmra.mxu0 %v29862_v25  ;;  %37720 = vmatmul.mubr.f32.vlgmr.msra.gmra.mxu1 %v43408_v16 }
 0xcd2   :  { %37695 = vmatpush3.msra.mxu0 %v43356_v61  ;;  %37730 = vmatpush3.msra.mxu1 %v30369_v32  ;;  %v30725_v26 = vsel %vm5869_vm4, %v28839_v47, 0  ;;  %v30843_v27 = vsub.f32 %v43525_v60, %v30842_v41 }
 0xcd3   :  { %37696 = vmatprep.subr.mxu0 %v44170_v57  ;;  %37698 = vmatprep.mubr.msk.f32.mxu0 %vm38339_vm2, %v44170_v57  ;;  %v43501_v58 = vand.u32 4294901760, %v30725_v26 }
 0xcd4   :  { %37697 = vmatpush3.msra.mxu0 %v43367_v37  ;;  %37731 = vmatprep.subr.mxu1 %v44170_v57  ;;  %v30836_v37 = vsub.f32 %v43514_v38, %v30835_v11  ;;  %v30844_v53 = vand.u32 4294901760, %v30843_v27 }
 0xcd5   :  { %37708 = vmatprep.subr.mxu0 %v44170_v57  ;;  %37699 = vmatmul.mubr.f32.vlgmr.msra.gmra.mxu0 %v29859_v19  ;;  %v43520_v45 = vsub.f32 %v30725_v26, %v43501_v58  ;;  %v44209_v26 = vld [vmem:[#allocation17_spill] sm:$0xff] }
 0xcd6   :  { %37709 = vmatpush3.msra.mxu0 %v29899_v54  ;;  %37712 = vmatprep.mubr.msk.f32.mxu0 %vm38339_vm2, %v44170_v57  ;;  %v9708_v35 = vadd.f32 %v44209_v26, %v39575_v40 }
 0xcd7   :  { %37710 = vmatprep.subr.mxu0 %v44170_v57  ;;  %37732 = vmatpush3.msra.mxu1 %v30376_v62  ;;  %v30796_v61 = vand.u32 4294901760, %v43520_v45 }
 0xcd8   :  { %37711 = vmatpush3.msra.mxu0 %v29906_v42  ;;  %37733 = vmatprep.mubr.msk.f32.mxu1 %vm38339_vm2, %v44170_v57  ;;  %v30837_v42 = vand.u32 4294901760, %v30836_v37 }
 0xcd9   :  { %37722 = vmatprep.subr.mxu0 %v44170_v57  ;;  %37713 = vmatmul.mubr.f32.vlgmr.msra.gmra.mxu0 %v43408_v16  ;;  %v30797_v52 = vsub.f32 %v43520_v45, %v30796_v61 }
 0xcda   :  { %37723 = vmatpush3.msra.mxu0 %v43411_v20  ;;  %37726 = vmatprep.mubr.msk.f32.mxu0 %vm38339_vm2, %v44170_v57 }
 0xcdb   :  { %37724 = vmatprep.subr.mxu0 %v44170_v57  ;;  %37734 = vmatmul.mubr.f32.vlgmr.msra.gmra.mxu1 %v43455_v63  ;;  %v30798_v6 = vand.u32 4294901760, %v30797_v52 }
 0xcdc   :  { %37725 = vmatpush3.msra.mxu0 %v43437_v24  ;;  %37743 = vmatprep.subr.mxu1 %v44170_v57 }
 0xcdd   :  { %37736 = vmatprep.subr.mxu0 %v44170_v57  ;;  %37727 = vmatmul.mubr.f32.vlgmr.msra.gmra.mxu0 %v30330_v13 }
 0xcde   :  { %37737 = vmatpush3.msra.mxu0 %v43426_v7  ;;  %37740 = vmatprep.mubr.msk.f32.mxu0 %vm38339_vm2, %v44170_v57 }
 0xcdf   :  { %37738 = vmatprep.subr.mxu0 %v44170_v57  ;;  %37744 = vmatpush3.msra.mxu1 %v43411_v20 }
 0xce0   :  { %37739 = vmatpush3.msra.mxu0 %v43447_v22  ;;  %37745 = vmatprep.subr.mxu1 %v44170_v57 }
 0xce1   :  { %37750 = vmatprep.subr.mxu0 %v44170_v57  ;;  %37741 = vmatmul.mubr.f32.vlgmr.msra.gmra.mxu0 %v30327_v59 }
 0xce2   :  { %37751 = vmatpush3.msra.mxu0 %v30367_v49  ;;  %37746 = vmatpush3.msra.mxu1 %v43437_v24  ;;  %v28823_v29 = vpop.xlane.xlu1 %28822 }
 0xce3   :  { %37752 = vmatprep.subr.mxu0 %v44170_v57  ;;  %37747 = vmatprep.mubr.msk.f32.mxu1 %vm38339_vm2, %v44170_v57  ;;  %38194 = vrcp.f32 %v28823_v29 }
 0xce4   :  { %37753 = vmatpush3.msra.mxu0 %v30374_v17  ;;  %37748 = vmatmul.mubr.f32.vlgmr.msra.gmra.mxu1 %v30328_v0 }
 0xce5   :  { %37754 = vmatprep.mubr.msk.f32.mxu0 %vm38339_vm2, %v44170_v57  ;;  %37757 = vmatprep.subr.mxu1 %v44170_v57 }
 0xce6   :  { %37764 = vmatprep.subr.mxu0 %v44170_v57  ;;  %37755 = vmatmul.mubr.f32.vlgmr.msra.gmra.mxu0 %v43455_v63  ;;  %v31189_v10 = vpop.permute.xlu1 %31188 }
 0xce7   :  { %37758 = vmatpush3.msra.mxu1 %v43411_v20  ;;  %37765 = vmatpush3.msra.mxu0 %v43499_v46  ;;  %v43553_v54 = vand.u32 4294901760, %v31189_v10 }
 0xce8   :  { %37759 = vmatprep.subr.mxu1 %v44170_v57  ;;  %37766 = vmatprep.subr.mxu0 %v44170_v57 }
 0xce9   :  { %37760 = vmatpush3.msra.mxu1 %v43437_v24  ;;  %37761 = vmatprep.mubr.msk.f32.mxu1 %vm38339_vm2, %v44170_v57  ;;  %v43568_v2 = vsub.f32 %v31189_v10, %v43553_v54 }
 0xcea   :  { %37767 = vmatpush3.msra.mxu0 %v43508_v4  ;;  %37762 = vmatmul.mubr.f32.vlgmr.msra.gmra.mxu1 %v43455_v63  ;;  %v43560_v51 = vpop.permute.xlu1 %31656  ;;  %v44208_v63 = vld [vmem:[#allocation21_spill] sm:$0xff] }
 0xceb   :  { %37771 = vmatprep.subr.mxu1 %v44170_v57  ;;  %37768 = vmatprep.mubr.msk.f32.mxu0 %vm38339_vm2, %v44170_v57  ;;  %v31303_v36 = vand.u32 4294901760, %v43568_v2  ;;  %v9706_v50 = vadd.f32 %v44208_v63, %v39417_v56  ;;  %v43668_v29 = vand.u32 4294901760, %v43560_v51 }
 0xcec   :  { %37772 = vmatpush3.msra.mxu1 %v30837_v42  ;;  %37775 = vmatprep.mubr.msk.f32.mxu1 %vm38339_vm2, %v44170_v57 }
 0xced   :  { %37773 = vmatprep.subr.mxu1 %v44170_v57  ;;  %37778 = vmatprep.subr.mxu0 %v44170_v57  ;;  %v31304_v16 = vsub.f32 %v43568_v2, %v31303_v36  ;;  %v31770_v42 = vsub.f32 %v43560_v51, %v43668_v29 }
 0xcee   :  { %37774 = vmatpush3.msra.mxu1 %v30844_v53  ;;  %37769 = vmatmul.mubr.f32.vlgmr.msra.gmra.mxu0 %v30798_v6  ;;  %v43572_v23 = vpop.permute.xlu1 %31654 }
 0xcef   :  { %37776 = vmatmul.mubr.f32.vlgmr.msra.gmra.mxu1 %v43501_v58  ;;  %37779 = vmatpush3.msra.mxu0 %v43514_v38  ;;  %v31305_v20 = vand.u32 4294901760, %v31304_v16  ;;  %v43680_v27 = vand.u32 4294901760, %v43572_v23 }
 0xcf0   :  { %37785 = vmatprep.subr.mxu1 %v44170_v57  ;;  %37780 = vmatprep.subr.mxu0 %v44170_v57  ;;  %v38195_v33 = vpop.eup %38194 }
 0xcf1   :  { %37786 = vmatpush3.msra.mxu1 %v43499_v46  ;;  %37781 = vmatpush3.msra.mxu0 %v43525_v60  ;;  %v28841_v7 = vmul.f32 %v38195_v33, %v43235_v48 }
 0xcf2   :  { %37787 = vmatprep.subr.mxu1 %v44170_v57  ;;  %37782 = vmatprep.mubr.msk.f32.mxu0 %vm38339_vm2, %v44170_v57  ;;  %v43584_v8 = vpop.permute.xlu1 %32124 }
 0xcf3   :  { %37788 = vmatpush3.msra.mxu1 %v43508_v4  ;;  %37789 = vmatprep.mubr.msk.f32.mxu1 %vm38339_vm2, %v44170_v57  ;;  %v31193_v12 = vsel %vm5869_vm4, %v28841_v7, 0 }
 0xcf4   :  { %37792 = vmatprep.subr.mxu0 %v44170_v57  ;;  %37783 = vmatmul.mubr.f32.vlgmr.msra.gmra.mxu0 %v43520_v45  ;;  %v43624_v30 = vand.u32 4294901760, %v31193_v12 }
 0xcf5   :  { %37790 = vmatmul.mubr.f32.vlgmr.msra.gmra.mxu1 %v30796_v61  ;;  %37793 = vmatpush3.msra.mxu0 %v30835_v11 }
 0xcf6   :  { %37799 = vmatprep.subr.mxu1 %v44170_v57  ;;  %37794 = vmatprep.subr.mxu0 %v44170_v57  ;;  %v43596_v9 = vpop.permute.xlu1 %32122  ;;  %v28826_v3 = vpop.xlane.xlu0 %28825  ;;  %v43629_v48 = vsub.f32 %v31193_v12, %v43624_v30  ;;  %v44210_v12 = vld [vmem:[#allocation16_spill] sm:$0xff] }
 0xcf7   :  { %37800 = vmatpush3.msra.mxu1 %v43499_v46  ;;  %37795 = vmatpush3.msra.mxu0 %v30842_v41  ;;  %38196 = vrcp.f32 %v28826_v3 }
 0xcf8   :  { %37801 = vmatprep.subr.mxu1 %v44170_v57  ;;  %37796 = vmatprep.mubr.msk.f32.mxu0 %vm38339_vm2, %v44170_v57  ;;  %v31264_v25 = vand.u32 4294901760, %v43629_v48 }
 0xcf9   :  { %37802 = vmatpush3.msra.mxu1 %v43508_v4  ;;  %37803 = vmatprep.mubr.msk.f32.mxu1 %vm38339_vm2, %v44170_v57 }
 0xcfa   :  { %37797 = vmatmul.mubr.f32.vlgmr.msra.gmra.mxu0 %v43501_v58  ;;  %37804 = vmatmul.mubr.f32.vlgmr.msra.gmra.mxu1 %v43501_v58  ;;  %v43607_v19 = vpop.permute.xlu1 %17318  ;;  %v31265_v47 = vsub.f32 %v43629_v48, %v31264_v25 }
 0xcfb   :  { %37806 = vmatprep.subr.mxu0 %v44170_v57  ;;  %37813 = vmatprep.subr.mxu1 %v44170_v57 }
 0xcfc   :  { %37807 = vmatpush3.msra.mxu0 %v43553_v54  ;;  %37814 = vmatpush3.msra.mxu1 %v31305_v20  ;;  %v31266_v13 = vand.u32 4294901760, %v31265_v47 }
 0xcfd   :  { %37808 = vmatprep.subr.mxu0 %v44170_v57  ;;  %37810 = vmatprep.mubr.msk.f32.mxu0 %vm38339_vm2, %v44170_v57 }
 0xcfe   :  { %v43616_v39 = vpop.permute.xlu1 %24958  ;;  %37815 = vmatprep.subr.mxu1 %v44170_v57  ;;  %37817 = vmatprep.mubr.msk.f32.mxu1 %vm38339_vm2, %v44170_v57 }
 0xd02   :  { %v43622_v24 = vpop.permute.xlu1 %17322 }
 0xd04   :  { %v38197_v5 = vpop.eup %38196 }
 0xd05   :  { %v28843_v28 = vmul.f32 %v38197_v5, %v43244_v1  ;;  %v9707_v5 = vadd.f32 %v44210_v12, %v44177_v15 }
 0xd06   :  { %v43626_v49 = vpop.permute.xlu1 %24962 }
 0xd07   :  { %v31661_v21 = vsel %vm5869_vm4, %v28843_v28, 0  ;;  %v43736_v28 = vand.u32 4294901760, %v43584_v8 }
 0xd08   :  { %v43647_v31 = vand.u32 4294901760, %v31661_v21 }
 0xd0a   :  { %v17327_v22 = vpop.permute.xlu1 %17326  ;;  %v43664_v11 = vsub.f32 %v31661_v21, %v43647_v31 }
 0xd0b   :  { %v17346_v17 = vadd.f32 %v17327_v22, %v39417_v56 }
 0xd0c   :  { %v31732_v52 = vand.u32 4294901760, %v43664_v11 }
 0xd0d   :  { %v32634_v55 = vsel %vm2124_vm3, %v9706_v50, %v17346_v17 }
 0xd0e   :  { %v28829_v59 = vpop.xlane.xlu0 %28828  ;;  %v24967_v43 = vpop.permute.xlu1 %24966 }
 0xd0f   :  { %38198 = vrcp.f32 %v28829_v59  ;;  %v24986_v32 = vadd.f32 %v24967_v43, %v39417_v56  ;;  %v43743_v59 = vand.u32 4294901760, %v43596_v9 }
 0xd11   :  { %v43643_v62 = vsel %vm5869_vm4, %v32634_v55, %v24986_v32  ;;  %v32238_v32 = vsub.f32 %v43584_v8, %v43736_v28  ;;  %v32245_v47 = vsub.f32 %v43596_v9, %v43743_v59 }
 0xd12   :  { %v31187_v0 = vpop.permute.xlu0 %31186  ;;  %v17331_v1 = vpop.permute.xlu1 %17330 }
 0xd13   :  { %v43649_v46 = vand.u32 4294901760, %v31187_v0  ;;  %v17348_v58 = vadd.f32 %v17331_v1, %v39575_v40 }
 0xd15   :  { %v31309_v4 = vsub.f32 %v31187_v0, %v43649_v46  ;;  %v43654_v38 = vsel %vm2124_vm3, %v9708_v35, %v17348_v58  ;;  %37809 = vmatpush3.msra.mxu0 %v43649_v46  ;;  %v44211_v0 = vld [vmem:[#allocation18_spill] sm:$0xff]  ;;  %v32239_v35 = vand.u32 4294901760, %v32238_v32  ;;  %v32246_v58 = vand.u32 4294901760, %v32245_v47 }
 0xd16   :  { %v43657_v45 = vpop.permute.xlu0 %17320  ;;  %37811 = vmatmul.mubr.f32.vlgmr.msra.gmra.mxu0 %v31266_v13  ;;  %37820 = vmatprep.subr.mxu0 %v44170_v57  ;;  %v9709_v1 = vadd.f32 %v44211_v0, %v44190_v14  ;;  %v32654_v0 = vld [vmem:[#allocation10] sm:$0xff] }
 0xd17   :  { %v31310_v60 = vand.u32 4294901760, %v31309_v4  ;;  %37821 = vmatpush3.msra.mxu0 %v43568_v2  ;;  %37824 = vmatprep.mubr.msk.f32.mxu0 %vm38339_vm2, %v44170_v57  ;;  %v31733_v2 = vsub.f32 %v43664_v11, %v31732_v52  ;;  %v32240_v13 = vsub.f32 %v32238_v32, %v32239_v35 }
 0xd18   :  { %37822 = vmatprep.subr.mxu0 %v44170_v57 }
 0xd19   :  { %v31311_v61 = vsub.f32 %v31309_v4, %v31310_v60  ;;  %37823 = vmatpush3.msra.mxu0 %v31309_v4  ;;  %v32247_v4 = vsub.f32 %v32245_v47, %v32246_v58 }
 0xd1a   :  { %v43670_v41 = vpop.permute.xlu0 %24960  ;;  %37825 = vmatmul.mubr.f32.vlgmr.msra.gmra.mxu0 %v43629_v48  ;;  %37834 = vmatprep.subr.mxu0 %v44170_v57 }
 0xd1b   :  { %v31312_v37 = vand.u32 4294901760, %v31311_v61  ;;  %37835 = vmatpush3.msra.mxu0 %v31303_v36  ;;  %37838 = vmatprep.mubr.msk.f32.mxu0 %vm38339_vm2, %v44170_v57  ;;  %v31777_v36 = vsub.f32 %v43572_v23, %v43680_v27  ;;  %v31734_v23 = vand.u32 4294901760, %v31733_v2 }
 0xd1c   :  { %v38199_v10 = vpop.eup %38198  ;;  %37836 = vmatprep.subr.mxu0 %v44170_v57 }
 0xd1d   :  { %37816 = vmatpush3.msra.mxu1 %v31312_v37  ;;  %37837 = vmatpush3.msra.mxu0 %v31310_v60  ;;  %v28845_v6 = vmul.f32 %v38199_v10, %v43262_v44  ;;  %v31771_v44 = vand.u32 4294901760, %v31770_v42  ;;  %v31778_v20 = vand.u32 4294901760, %v31777_v36  ;;  %v32241_v60 = vand.u32 4294901760, %v32240_v13 }
 0xd1e   :  { %v43686_v53 = vpop.permute.xlu0 %17324  ;;  %37818 = vmatmul.mubr.f32.vlgmr.msra.gmra.mxu1 %v43624_v30  ;;  %37827 = vmatprep.subr.mxu1 %v44170_v57 }
 0xd1f   :  { %37839 = vmatmul.mubr.f32.vlgmr.msra.gmra.mxu0 %v43624_v30  ;;  %37848 = vmatprep.subr.mxu0 %v44170_v57  ;;  %v32129_v51 = vsel %vm5869_vm4, %v28845_v6, 0  ;;  %v31772_v33 = vsub.f32 %v31770_v42, %v31771_v44  ;;  %v31779_v22 = vsub.f32 %v31777_v36, %v31778_v20 }
 0xd20   :  { %37828 = vmatpush3.msra.mxu1 %v43553_v54  ;;  %37849 = vmatpush3.msra.mxu0 %v43668_v29  ;;  %v43713_v3 = vand.u32 4294901760, %v32129_v51 }
 0xd21   :  { %37829 = vmatprep.subr.mxu1 %v44170_v57  ;;  %37850 = vmatprep.subr.mxu0 %v44170_v57  ;;  %v31773_v50 = vand.u32 4294901760, %v31772_v33  ;;  %v31780_v17 = vand.u32 4294901760, %v31779_v22 }
 0xd22   :  { %37830 = vmatpush3.msra.mxu1 %v43649_v46  ;;  %37831 = vmatprep.mubr.msk.f32.mxu1 %vm38339_vm2, %v44170_v57  ;;  %v43705_v16 = vpop.permute.xlu0 %24964  ;;  %v43729_v63 = vsub.f32 %v32129_v51, %v43713_v3 }
 0xd23   :  { %37851 = vmatpush3.msra.mxu0 %v43680_v27  ;;  %37852 = vmatprep.mubr.msk.f32.mxu0 %vm38339_vm2, %v44170_v57 }
 0xd24   :  { %37832 = vmatmul.mubr.f32.vlgmr.msra.gmra.mxu1 %v31264_v25  ;;  %37841 = vmatprep.subr.mxu1 %v44170_v57 }
 0xd25   :  { %37853 = vmatmul.mubr.f32.vlgmr.msra.gmra.mxu0 %v31734_v23  ;;  %37862 = vmatprep.subr.mxu0 %v44170_v57 }
 0xd26   :  { %37842 = vmatpush3.msra.mxu1 %v43553_v54  ;;  %37863 = vmatpush3.msra.mxu0 %v31770_v42  ;;  %v17329_v7 = vpop.permute.xlu0 %17328 }
 0xd27   :  { %37843 = vmatprep.subr.mxu1 %v44170_v57  ;;  %37864 = vmatprep.subr.mxu0 %v44170_v57  ;;  %v17347_v48 = vadd.f32 %v17329_v7, %v44177_v15 }
 0xd28   :  { %37844 = vmatpush3.msra.mxu1 %v43649_v46  ;;  %37845 = vmatprep.mubr.msk.f32.mxu1 %vm38339_vm2, %v44170_v57 }
 0xd29   :  { %37865 = vmatpush3.msra.mxu0 %v31777_v36  ;;  %37866 = vmatprep.mubr.msk.f32.mxu0 %vm38339_vm2, %v44170_v57  ;;  %v32635_v54 = vsel %vm2124_vm3, %v9707_v5, %v17347_v48 }
 0xd2a   :  { %37846 = vmatmul.mubr.f32.vlgmr.msra.gmra.mxu1 %v43624_v30  ;;  %37855 = vmatprep.subr.mxu1 %v44170_v57  ;;  %v32200_v30 = vand.u32 4294901760, %v43729_v63 }
 0xd2b   :  { %37867 = vmatmul.mubr.f32.vlgmr.msra.gmra.mxu0 %v43664_v11  ;;  %37876 = vmatprep.subr.mxu0 %v44170_v57  ;;  %v32248_v11 = vand.u32 4294901760, %v32247_v4  ;;  %v43847_v4 = vand.u32 4294901760, %v32654_v0 }
 0xd2c   :  { %37856 = vmatpush3.msra.mxu1 %v31773_v50  ;;  %37877 = vmatpush3.msra.mxu0 %v31771_v44  ;;  %v24969_v25 = vpop.permute.xlu0 %24968  ;;  %v32201_v21 = vsub.f32 %v43729_v63, %v32200_v30 }
 0xd2d   :  { %37857 = vmatprep.subr.mxu1 %v44170_v57  ;;  %37878 = vmatprep.subr.mxu0 %v44170_v57  ;;  %v24987_v55 = vadd.f32 %v24969_v25, %v44177_v15 }
 0xd2e   :  { %37858 = vmatpush3.msra.mxu1 %v31780_v17  ;;  %37859 = vmatprep.mubr.msk.f32.mxu1 %vm38339_vm2, %v44170_v57  ;;  %v32202_v46 = vand.u32 4294901760, %v32201_v21 }
 0xd2f   :  { %37879 = vmatpush3.msra.mxu0 %v31778_v20  ;;  %37880 = vmatprep.mubr.msk.f32.mxu0 %vm38339_vm2, %v44170_v57  ;;  %v43750_v43 = vsel %vm5869_vm4, %v32635_v54, %v24987_v55  ;;  %v32657_v54 = vld [vmem:[#allocation10 + $0x18] sm:$0xff] }
 0xd30   :  { %37860 = vmatmul.mubr.f32.vlgmr.msra.gmra.mxu1 %v43647_v31  ;;  %37869 = vmatprep.subr.mxu1 %v44170_v57 }
 0xd31   :  { %37881 = vmatmul.mubr.f32.vlgmr.msra.gmra.mxu0 %v43647_v31  ;;  %37890 = vmatprep.subr.mxu0 %v44170_v57 }
 0xd32   :  { %37870 = vmatpush3.msra.mxu1 %v43668_v29  ;;  %37891 = vmatpush3.msra.mxu0 %v43736_v28  ;;  %v17333_v8 = vpop.permute.xlu0 %17332 }
 0xd33   :  { %37871 = vmatprep.subr.mxu1 %v44170_v57  ;;  %37892 = vmatprep.subr.mxu0 %v44170_v57  ;;  %v17349_v26 = vadd.f32 %v17333_v8, %v44190_v14 }
 0xd34   :  { %37872 = vmatpush3.msra.mxu1 %v43680_v27  ;;  %37873 = vmatprep.mubr.msk.f32.mxu1 %vm38339_vm2, %v44170_v57 }
 0xd35   :  { %37893 = vmatpush3.msra.mxu0 %v43743_v59  ;;  %37894 = vmatprep.mubr.msk.f32.mxu0 %vm38339_vm2, %v44170_v57  ;;  %v43777_v9 = vsel %vm2124_vm3, %v9709_v1, %v17349_v26 }
 0xd36   :  { %37874 = vmatmul.mubr.f32.vlgmr.msra.gmra.mxu1 %v31732_v52  ;;  %37883 = vmatprep.subr.mxu1 %v44170_v57 }
 0xd37   :  { %37895 = vmatmul.mubr.f32.vlgmr.msra.gmra.mxu0 %v32202_v46  ;;  %37904 = vmatprep.subr.mxu0 %v44170_v57 }
 0xd38   :  { %37884 = vmatpush3.msra.mxu1 %v43668_v29  ;;  %37905 = vmatpush3.msra.mxu0 %v32238_v32 }
 0xd39   :  { %37885 = vmatprep.subr.mxu1 %v44170_v57  ;;  %37906 = vmatprep.subr.mxu0 %v44170_v57 }
 0xd3a   :  { %37886 = vmatpush3.msra.mxu1 %v43680_v27  ;;  %37887 = vmatprep.mubr.msk.f32.mxu1 %vm38339_vm2, %v44170_v57 }
 0xd3b   :  { %37907 = vmatpush3.msra.mxu0 %v32245_v47  ;;  %37908 = vmatprep.mubr.msk.f32.mxu0 %vm38339_vm2, %v44170_v57 }
 0xd3c   :  { %37888 = vmatmul.mubr.f32.vlgmr.msra.gmra.mxu1 %v43647_v31  ;;  %37897 = vmatprep.subr.mxu1 %v44170_v57 }
 0xd3d   :  { %37909 = vmatmul.mubr.f32.vlgmr.msra.gmra.mxu0 %v43729_v63  ;;  %37918 = vmatprep.subr.mxu0 %v44170_v57  ;;  %v43819_v63 = vand.u32 4294901760, %v32657_v54 }
 0xd3e   :  { %37898 = vmatpush3.msra.mxu1 %v32241_v60  ;;  %37919 = vmatpush3.msra.mxu0 %v32239_v35 }
 0xd3f   :  { %37899 = vmatprep.subr.mxu1 %v44170_v57  ;;  %37920 = vmatprep.subr.mxu0 %v44170_v57  ;;  %v43822_v25 = vsub.f32 %v32657_v54, %v43819_v63 }
 0xd40   :  { %37900 = vmatpush3.msra.mxu1 %v32248_v11  ;;  %37901 = vmatprep.mubr.msk.f32.mxu1 %vm38339_vm2, %v44170_v57 }
 0xd41   :  { %37921 = vmatpush3.msra.mxu0 %v32246_v58  ;;  %37922 = vmatprep.mubr.msk.f32.mxu0 %vm38339_vm2, %v44170_v57  ;;  %v43829_v32 = vand.u32 4294901760, %v43822_v25 }
 0xd42   :  { %37902 = vmatmul.mubr.f32.vlgmr.msra.gmra.mxu1 %v43713_v3  ;;  %37911 = vmatprep.subr.mxu1 %v44170_v57 }
 0xd43   :  { %37923 = vmatmul.mubr.f32.vlgmr.msra.gmra.mxu0 %v43713_v3  ;;  %37912 = vmatpush3.msra.mxu1 %v43736_v28  ;;  %v32863_v35 = vsub.f32 %v43822_v25, %v43829_v32 }
 0xd44   :  { %37913 = vmatprep.subr.mxu1 %v44170_v57  ;;  %37915 = vmatprep.mubr.msk.f32.mxu1 %vm38339_vm2, %v44170_v57 }
 0xd45   :  { %37914 = vmatpush3.msra.mxu1 %v43743_v59  ;;  %37932 = vmatprep.subr.mxu0 %v43819_v63  ;;  %v32864_v11 = vand.u32 4294901760, %v32863_v35 }
 0xd46   :  { %37916 = vmatmul.mubr.f32.vlgmr.msra.gmra.mxu1 %v32200_v30  ;;  %37925 = vmatprep.subr.mxu1 %v44170_v57  ;;  %v32655_v30 = vld [vmem:[#allocation10 + $0x8] sm:$0xff] }
 0xd47   :  { %37926 = vmatpush3.msra.mxu1 %v43736_v28  ;;  %37929 = vmatprep.mubr.msk.f32.mxu1 %vm38339_vm2, %v44170_v57  ;;  %v32656_v28 = vld [vmem:[#allocation10 + $0x10] sm:$0xff]  ;;  %v43834_v47 = vand.u32 4294901760, %v32655_v30 }
 0xd48   :  { %37927 = vmatprep.subr.mxu1 %v44170_v57  ;;  %v43824_v55 = vand.u32 4294901760, %v32656_v28  ;;  %37933 = vmatpush3.msra.mxu0 %v43819_v63 }
 0xd49   :  { %37928 = vmatpush3.msra.mxu1 %v43743_v59  ;;  %v43844_v58 = vsub.f32 %v32655_v30, %v43834_v47 }
 0xd4a   :  { %37930 = vmatmul.mubr.f32.vlgmr.msra.gmra.mxu1 %v43713_v3  ;;  %v43832_v21 = vsub.f32 %v32656_v28, %v43824_v55  ;;  %37934 = vmatprep.subr.mxu0 %v43824_v55 }
 0xd4b   :  { %37935 = vmatpush3.msra.mxu0 %v43824_v55  ;;  %37952 = vmatprep.subr.mxu1 %v32864_v11 }
 0xd4c   :  { %v43841_v46 = vand.u32 4294901760, %v43832_v21  ;;  %37936 = vmatprep.subr.mxu0 %v43834_v47  ;;  %37953 = vmatpush3.msra.mxu1 %v32864_v11 }
 0xd4d   :  { %37937 = vmatpush3.msra.mxu0 %v43834_v47 }
 0xd4e   :  { %37938 = vmatprep.subr.mxu0 %v43847_v4 }
 0xd4f   :  { %37939 = vmatpush3.msra.mxu0 %v43847_v4 }
 0xd50   :  { %37972 = vmatprep.subr.mxu0 %v43822_v25 }
 0xd62   :  { %v29009_v31 = vpop.f32.mrf.mxu1 }
 0xd64   :  { %v37609_v61 = vpop.f32.mrf.mxu1 }
 0xd65   :  { %v43853_v61 = vand.u32 4294901760, %v43844_v58 }
 0xd66   :  { %v29160_v29 = vpop.f32.mrf.mxu1 }
 0xd68   :  { %v37623_v37 = vpop.f32.mrf.mxu1 }
 0xd69   :  { %v43856_v37 = vsub.f32 %v32654_v0, %v43847_v4 }
 0xd6a   :  { %v28928_v52 = vpop.f32.mrf.mxu0 }
 0xd6b   :  { %v29310_v10 = vpop.f32.mrf.mxu1  ;;  %v29010_v6 = vadd.f32 %v29009_v31, %v28928_v52  ;;  %v32870_v31 = vsub.f32 %v43832_v21, %v43841_v46 }
 0xd6c   :  { %v37602_v27 = vpop.f32.mrf.mxu0 }
 0xd6d   :  { %v37637_v42 = vpop.f32.mrf.mxu1  ;;  %v32871_v52 = vand.u32 4294901760, %v32870_v31  ;;  %v43863_v27 = vand.u32 4294901760, %v43856_v37 }
 0xd6f   :  { %37954 = vmatprep.subr.mxu1 %v32871_v52 }
 0xd70   :  { %37955 = vmatpush3.msra.mxu1 %v32871_v52 }
 0xd71   :  { %v29085_v2 = vpop.f32.mrf.mxu0  ;;  %v29477_v36 = vpop.f32.mrf.mxu1 }
 0xd72   :  { %v29086_v44 = vadd.f32 %v29085_v2, %v29010_v6 }
 0xd73   :  { %v37616_v51 = vpop.f32.mrf.mxu0  ;;  %v37651_v23 = vpop.f32.mrf.mxu1 }
 0xd74   :  { %v29161_v20 = vadd.f32 %v29160_v29, %v29086_v44  ;;  %v32884_v44 = vsub.f32 %v43856_v37, %v43863_v27 }
 0xd77   :  { %v29237_v57 = vpop.f32.mrf.mxu0 }
 0xd78   :  { %v29238_v33 = vadd.f32 %v29237_v57, %v29161_v20  ;;  %v29628_v7 = vpop.f32.mrf.mxu1  ;;  %v32885_v57 = vand.u32 4294901760, %v32884_v44 }
 0xd79   :  { %v37630_v12 = vpop.f32.mrf.mxu0 }
 0xd7a   :  { %v29311_v3 = vadd.f32 %v29310_v10, %v29238_v33  ;;  %v37665_v5 = vpop.f32.mrf.mxu1  ;;  %v32877_v10 = vsub.f32 %v43844_v58, %v43853_v61 }
 0xd7c   :  { %32598 = vrot.lane.b32.xlu1 %v29311_v3, %s38347_s9  ;;  %v32878_v2 = vand.u32 4294901760, %v32877_v10 }
 0xd7e   :  { %v29396_v48 = vpop.f32.mrf.mxu0  ;;  %v29778_v22 = vpop.f32.mrf.mxu1  ;;  %37956 = vmatprep.subr.mxu1 %v32878_v2 }
 0xd7f   :  { %v29478_v59 = vadd.f32 %v29477_v36, %v29396_v48  ;;  %37957 = vmatpush3.msra.mxu1 %v32878_v2 }
 0xd80   :  { %v37644_v50 = vpop.f32.mrf.mxu0  ;;  %v37679_v17 = vpop.f32.mrf.mxu1  ;;  %37958 = vmatprep.subr.mxu1 %v32885_v57 }
 0xd81   :  { %37959 = vmatpush3.msra.mxu1 %v32885_v57 }
 0xd82   :  { %37992 = vmatprep.subr.mxu1 %v43819_v63 }
 0xd84   :  { %v29553_v8 = vpop.f32.mrf.mxu0 }
 0xd85   :  { %v29554_v1 = vadd.f32 %v29553_v8, %v29478_v59  ;;  %v29945_v26 = vpop.f32.mrf.mxu1 }
 0xd86   :  { %v37658_v13 = vpop.f32.mrf.mxu0 }
 0xd87   :  { %v37693_v60 = vpop.f32.mrf.mxu1  ;;  %v29629_v29 = vadd.f32 %v29628_v7, %v29554_v1 }
 0xd8b   :  { %v29705_v42 = vpop.f32.mrf.mxu0  ;;  %v30096_v6 = vpop.f32.mrf.mxu1 }
 0xd8c   :  { %v29706_v36 = vadd.f32 %v29705_v42, %v29629_v29 }
 0xd8d   :  { %v37672_v51 = vpop.f32.mrf.mxu0  ;;  %v37707_v23 = vpop.f32.mrf.mxu1 }
 0xd8e   :  { %v29779_v20 = vadd.f32 %v29778_v22, %v29706_v36 }
 0xd90   :  { %32600 = vrot.lane.b32.xlu0 %v29779_v20, %s38347_s9 }
 0xd91   :  { %v29864_v33 = vpop.f32.mrf.mxu0  ;;  %v30246_v7 = vpop.f32.mrf.mxu1 }
 0xd92   :  { %v29946_v5 = vadd.f32 %v29945_v26, %v29864_v33 }
 0xd93   :  { %v37686_v12 = vpop.f32.mrf.mxu0  ;;  %v37721_v3 = vpop.f32.mrf.mxu1 }
 0xd95   :  { %v30021_v48 = vpop.f32.mrf.mxu0 }
 0xd96   :  { %v30022_v54 = vadd.f32 %v30021_v48, %v29946_v5 }
 0xd97   :  { %v37700_v50 = vpop.f32.mrf.mxu0 }
 0xd98   :  { %v30097_v17 = vadd.f32 %v30096_v6, %v30022_v54 }
 0xd99   :  { %v30173_v28 = vpop.f32.mrf.mxu0 }
 0xd9a   :  { %v30174_v30 = vadd.f32 %v30173_v28, %v30097_v17 }
 0xd9b   :  { %v37714_v22 = vpop.f32.mrf.mxu0  ;;  %v30413_v59 = vpop.f32.mrf.mxu1 }
 0xd9c   :  { %v30247_v8 = vadd.f32 %v30246_v7, %v30174_v30 }
 0xd9d   :  { %v30332_v0 = vpop.f32.mrf.mxu0  ;;  %v37735_v1 = vpop.f32.mrf.mxu1 }
 0xd9e   :  { %32602 = vrot.lane.b32.xlu1 %v30247_v8, %s38347_s9  ;;  %v30414_v35 = vadd.f32 %v30413_v59, %v30332_v0 }
 0xd9f   :  { %v37728_v13 = vpop.f32.mrf.mxu0 }
 0xda1   :  { %v30489_v60 = vpop.f32.mrf.mxu0 }
 0xda2   :  { %v30490_v11 = vadd.f32 %v30489_v60, %v30414_v35 }
 0xda3   :  { %v37742_v31 = vpop.f32.mrf.mxu0 }
 0xda4   :  { %v30564_v29 = vpop.f32.mrf.mxu1 }
 0xda5   :  { %v30565_v26 = vadd.f32 %v30564_v29, %v30490_v11 }
 0xda6   :  { %v30641_v52 = vpop.f32.mrf.mxu0  ;;  %v37749_v10 = vpop.f32.mrf.mxu1 }
 0xda7   :  { %v30642_v42 = vadd.f32 %v30641_v52, %v30565_v26 }
 0xda8   :  { %v37756_v6 = vpop.f32.mrf.mxu0 }
 0xdaa   :  { %v30714_v2 = vpop.f32.mrf.mxu1 }
 0xdab   :  { %v30715_v36 = vadd.f32 %v30714_v2, %v30642_v42 }
 0xdac   :  { %v37763_v44 = vpop.f32.mrf.mxu1 }
 0xdad   :  { %32604 = vrot.lane.b32.xlu0 %v30715_v36, %s38347_s9  ;;  %v43873_v44 = vpop.permute.xlu1 %24970 }
 0xdae   :  { %v30800_v51 = vpop.f32.mrf.mxu0 }
 0xdaf   :  { %v30881_v23 = vpop.f32.mrf.mxu1 }
 0xdb0   :  { %v37770_v20 = vpop.f32.mrf.mxu0  ;;  %v30882_v33 = vadd.f32 %v30881_v23, %v30800_v51  ;;  %v17342_v23 = vadd.f32 %v43607_v19, %v44193_v34 }
 0xdb1   :  { %v37777_v57 = vpop.f32.mrf.mxu1 }
 0xdb4   :  { %v30957_v7 = vpop.f32.mrf.mxu0 }
 0xdb5   :  { %v30958_v12 = vadd.f32 %v30957_v7, %v30882_v33  ;;  %v31032_v3 = vpop.f32.mrf.mxu1  ;;  %v24982_v33 = vadd.f32 %v43616_v39, %v44193_v34 }
 0xdb6   :  { %v37784_v5 = vpop.f32.mrf.mxu0 }
 0xdb7   :  { %v31033_v48 = vadd.f32 %v31032_v3, %v30958_v12  ;;  %v37791_v54 = vpop.f32.mrf.mxu1  ;;  %v44212_v12 = vld [vmem:[#allocation25_spill] sm:$0xff] }
 0xdb8   :  { %v9702_v3 = vadd.f32 %v44212_v12, %v44193_v34 }
 0xdba   :  { %v31109_v50 = vpop.f32.mrf.mxu0  ;;  %v31182_v17 = vpop.f32.mrf.mxu1  ;;  %v32630_v54 = vsel %vm2124_vm3, %v9702_v3, %v17342_v23  ;;  %v17343_v23 = vadd.f32 %v43657_v45, %v39010_v18  ;;  %v38201_v45 = vld [vmem:[%s44115_s5] ss:$0 sm:$0xff]  ;;  %s38349_s5 = smov [#allocation11]  }
 0xdbb   :  { %v31110_v28 = vadd.f32 %v31109_v50, %v31033_v48  ;;  %v32638_v19 = vsel %vm5869_vm4, %v32630_v54, %v24982_v33  ;;  %v44213_v33 = vld [vmem:[#allocation26_spill] sm:$0xff]  ;;  %s33501_s1 = sshll.u32 %s38349_s5, 4  ;;  %s33502_s1 = int_to_ptr.vmem [resolvable:$true] %s33501_s1 }
 0xdbc   :  { %v37798_v30 = vpop.f32.mrf.mxu0  ;;  %v37805_v22 = vpop.f32.mrf.mxu1  ;;  %s38302_s13 = scalar_lea.vmem %s33502_s1, 1024  ;;  %p38307_p12 = scmp.lt.s32.totalorder %s33502_s1, %s33502_s1 }
 0xdbd   :  { %v31183_v59 = vadd.f32 %v31182_v17, %v31110_v28  ;;  %p38303_p11 = scmp.ne.s32.totalorder %s33502_s1, %s38302_s13  ;;  %p38308_p13 = scmp.lt.s32.totalorder %s38302_s13, %s38302_s13 }
 0xdbf   :  { %32606 = vrot.lane.b32.xlu1 %v31183_v59, %s38347_s9  ;;  %p38309_p0 = por %p38308_p13, %p38307_p12 }
 0xdc1   :  { %p38310_p1 = pnand %p38309_p0, %p38303_p11 }
 0xdd6   :  { %v31268_v8 = vpop.f32.mrf.mxu0 }
 0xdd8   :  { %v37812_v0 = vpop.f32.mrf.mxu0 }
 0xdda   :  { %v31425_v1 = vpop.f32.mrf.mxu0 }
 0xddc   :  { %v37826_v35 = vpop.f32.mrf.mxu0 }
 0xdde   :  { %v31349_v13 = vpop.f32.mrf.mxu1 }
 0xddf   :  { %v31350_v60 = vadd.f32 %v31349_v13, %v31268_v8  ;;  %v31577_v11 = vpop.f32.mrf.mxu0 }
 0xde0   :  { %v37819_v31 = vpop.f32.mrf.mxu1 }
 0xde1   :  { %v37840_v29 = vpop.f32.mrf.mxu0  ;;  %v31426_v26 = vadd.f32 %v31425_v1, %v31350_v60 }
 0xde4   :  { %v31500_v52 = vpop.f32.mrf.mxu1 }
 0xde5   :  { %v31501_v10 = vadd.f32 %v31500_v52, %v31426_v26  ;;  %v31736_v42 = vpop.f32.mrf.mxu0 }
 0xde6   :  { %v37833_v6 = vpop.f32.mrf.mxu1 }
 0xde7   :  { %v37854_v2 = vpop.f32.mrf.mxu0  ;;  %v31578_v36 = vadd.f32 %v31577_v11, %v31501_v10 }
 0xdea   :  { %v31650_v51 = vpop.f32.mrf.mxu1 }
 0xdeb   :  { %v31651_v20 = vadd.f32 %v31650_v51, %v31578_v36  ;;  %v31893_v57 = vpop.f32.mrf.mxu0  ;;  %v43900_v36 = vpop.permute.xlu0 %24972 }
 0xdec   :  { %v37847_v7 = vpop.f32.mrf.mxu1 }
 0xded   :  { %v37868_v5 = vpop.f32.mrf.mxu0  ;;  %32608 = vrot.lane.b32.xlu0 %v31651_v20, %s38347_s9  ;;  %v9703_v7 = vadd.f32 %v44213_v33, %v39010_v18 }
 0xdee   :  { %v32599_v48 = vpop.permute.xlu1 %32598 }
 0xdef   :  { %v32622_v50 = vadd.f32 %v32599_v48, %v44193_v34  ;;  %v32631_v5 = vsel %vm2124_vm3, %v9703_v7, %v17343_v23 }
 0xdf0   :  { %v31817_v17 = vpop.f32.mrf.mxu1 }
 0xdf1   :  { %v43886_v28 = vsel %vm126_vm0, %v32638_v19, %v32622_v50  ;;  %v31818_v39 = vadd.f32 %v31817_v17, %v31736_v42  ;;  %v32045_v30 = vpop.f32.mrf.mxu0 }
 0xdf2   :  { %v32663_v22 = vsel %vm32661_vm5, %v43886_v28, 0  ;;  %v37861_v59 = vpop.f32.mrf.mxu1 }
 0xdf3   :  { %v43890_v8 = vand.u32 4294901760, %v32663_v22  ;;  %v37882_v0 = vpop.f32.mrf.mxu0  ;;  %v31894_v1 = vadd.f32 %v31893_v57, %v31818_v39  ;;  %v24983_v57 = vadd.f32 %v43670_v41, %v39010_v18 }
 0xdf5   :  { %v43893_v35 = vsub.f32 %v32663_v22, %v43890_v8  ;;  %37960 = vmatprep.mubr.f32.mxu1 %v43890_v8  ;;  %v32639_v19 = vsel %vm5869_vm4, %v32631_v5, %v24983_v57  ;;  %v44216_v5 = vld [vmem:[#allocation20_spill] sm:$0xff] }
 0xdf6   :  { %v31968_v34 = vpop.f32.mrf.mxu1 }
 0xdf7   :  { %v31969_v13 = vadd.f32 %v31968_v34, %v31894_v1  ;;  %v32204_v60 = vpop.f32.mrf.mxu0  ;;  %v32757_v11 = vand.u32 4294901760, %v43893_v35 }
 0xdf8   :  { %v37875_v31 = vpop.f32.mrf.mxu1 }
 0xdf9   :  { %v37896_v29 = vpop.f32.mrf.mxu0  ;;  %v32046_v26 = vadd.f32 %v32045_v30, %v31969_v13  ;;  %v32758_v52 = vsub.f32 %v43893_v35, %v32757_v11 }
 0xdfb   :  { %v32759_v10 = vand.u32 4294901760, %v32758_v52  ;;  %v44214_v52 = vld [vmem:[#allocation38_spill] sm:$0xff] }
 0xdfc   :  { %v32118_v42 = vpop.f32.mrf.mxu1 }
 0xdfd   :  { %v32119_v6 = vadd.f32 %v32118_v42, %v32046_v26  ;;  %v32361_v2 = vpop.f32.mrf.mxu0  ;;  %37940 = vmatprep.mubr.f32.mxu0 %v32759_v10  ;;  %v17344_v10 = vadd.f32 %v43622_v24, %v44214_v52 }
 0xdfe   :  { %v37889_v51 = vpop.f32.mrf.mxu1 }
 0xdff   :  { %v37910_v20 = vpop.f32.mrf.mxu0  ;;  %32610 = vrot.lane.b32.xlu1 %v32119_v6, %s38347_s9  ;;  %v24984_v6 = vadd.f32 %v43626_v49, %v44214_v52 }
 0xe02   :  { %v32601_v12 = vpop.permute.xlu0 %32600  ;;  %v32285_v3 = vpop.f32.mrf.mxu1 }
 0xe03   :  { %v32623_v48 = vadd.f32 %v32601_v12, %v39010_v18  ;;  %v32286_v54 = vadd.f32 %v32285_v3, %v32204_v60  ;;  %v32513_v50 = vpop.f32.mrf.mxu0  ;;  %32658 = vrot.lane.b32.xlu1 %v38201_v45, %s38348_s12 }
 0xe04   :  { %v37903_v41 = vpop.f32.mrf.mxu1 }
 0xe05   :  { %v43916_v17 = vsel %vm126_vm0, %v32639_v19, %v32623_v48  ;;  %v37924_v39 = vpop.f32.mrf.mxu0  ;;  %v32362_v30 = vadd.f32 %v32361_v2, %v32286_v54  ;;  %v44215_v2 = vld [vmem:[#allocation32_spill] sm:$0xff]  ;;  %v24985_v48 = vadd.f32 %v43705_v16, %v44216_v5 }
 0xe06   :  { %v32666_v22 = vsel %vm32661_vm5, %v43916_v17, 0  ;;  %v32436_v18 = vpop.f32.mrf.mxu1  ;;  %v9704_v51 = vadd.f32 %v44215_v2, %v44214_v52 }
 0xe07   :  { %v43920_v59 = vand.u32 4294901760, %v32666_v22  ;;  %v32437_v0 = vadd.f32 %v32436_v18, %v32362_v30 }
 0xe08   :  { %v37917_v1 = vpop.f32.mrf.mxu1  ;;  %v32632_v20 = vsel %vm2124_vm3, %v9704_v51, %v17344_v10 }
 0xe09   :  { %v43923_v34 = vsub.f32 %v32666_v22, %v43920_v59  ;;  %37961 = vmatmul.mubr.f32.vlgmr.msra.gmra.mxu1 %v43920_v59  ;;  %v32514_v13 = vadd.f32 %v32513_v50, %v32437_v0  ;;  %v32640_v49 = vsel %vm5869_vm4, %v32632_v20, %v24984_v6  ;;  %v44217_v50 = vld [vmem:[#allocation33_spill] sm:$0xff] }
 0xe0a   :  { %v32586_v60 = vpop.f32.mrf.mxu1  ;;  %37993 = vmatpush3.msra.mxu1 %v43819_v63  ;;  %v9705_v45 = vadd.f32 %v44217_v50, %v44216_v5 }
 0xe0b   :  { %v32767_v31 = vand.u32 4294901760, %v43923_v34  ;;  %v32587_v29 = vadd.f32 %v32586_v60, %v32514_v13  ;;  %37994 = vmatprep.subr.mxu1 %v43824_v55 }
 0xe0c   :  { %v37931_v26 = vpop.f32.mrf.mxu1  ;;  %37995 = vmatpush3.msra.mxu1 %v43824_v55 }
 0xe0d   :  { %v32768_v42 = vsub.f32 %v43923_v34, %v32767_v31  ;;  %32612 = vrot.lane.b32.xlu0 %v32587_v29, %s38347_s9  ;;  %37996 = vmatprep.subr.mxu1 %v43834_v47 }
 0xe0e   :  { %37997 = vmatpush3.msra.mxu1 %v43834_v47 }
 0xe0f   :  { %v32769_v23 = vand.u32 4294901760, %v32768_v42  ;;  %37998 = vmatprep.subr.mxu1 %v43847_v4 }
 0xe10   :  { %v32603_v24 = vpop.permute.xlu1 %32602  ;;  %37999 = vmatpush3.msra.mxu1 %v43847_v4 }
 0xe11   :  { %v32624_v57 = vadd.f32 %v32603_v24, %v44214_v52  ;;  %37941 = vmatmul.mubr.f32.vlgmr.msra.gmra.mxu0 %v32769_v23  ;;  %38032 = vmatprep.subr.mxu1 %v43819_v63 }
 0xe12   :  { %37973 = vmatpush3.msra.mxu0 %v43822_v25 }
 0xe13   :  { %v43950_v33 = vsel %vm126_vm0, %v32640_v49, %v32624_v57  ;;  %37974 = vmatprep.subr.mxu0 %v43832_v21 }
 0xe14   :  { %v32669_v7 = vsel %vm32661_vm5, %v43950_v33, 0  ;;  %37975 = vmatpush3.msra.mxu0 %v43832_v21 }
 0xe15   :  { %v43956_v12 = vand.u32 4294901760, %v32669_v7  ;;  %37976 = vmatprep.subr.mxu0 %v43844_v58 }
 0xe16   :  { %37977 = vmatpush3.msra.mxu0 %v43844_v58  ;;  %v17345_v58 = vadd.f32 %v43686_v53, %v44216_v5 }
 0xe17   :  { %v43961_v3 = vsub.f32 %v32669_v7, %v43956_v12  ;;  %37963 = vmatprep.mubr.f32.mxu1 %v43956_v12  ;;  %37978 = vmatprep.subr.mxu0 %v43856_v37 }
 0xe18   :  { %37979 = vmatpush3.msra.mxu0 %v43856_v37  ;;  %v32633_v37 = vsel %vm2124_vm3, %v9705_v45, %v17345_v58 }
 0xe19   :  { %v32777_v25 = vand.u32 4294901760, %v43961_v3  ;;  %38012 = vmatprep.subr.mxu0 %v43829_v32  ;;  %v32641_v39 = vsel %vm5869_vm4, %v32633_v37, %v24985_v48 }
 0xe1b   :  { %v32778_v21 = vsub.f32 %v43961_v3, %v32777_v25 }
 0xe1d   :  { %v32779_v54 = vand.u32 4294901760, %v32778_v21 }
 0xe1f   :  { %v32605_v19 = vpop.permute.xlu0 %32604  ;;  %37943 = vmatprep.mubr.f32.mxu0 %v32779_v54 }
 0xe20   :  { %v32625_v41 = vadd.f32 %v32605_v19, %v44216_v5 }
 0xe22   :  { %v43981_v30 = vsel %vm126_vm0, %v32641_v39, %v32625_v41 }
 0xe23   :  { %v32672_v53 = vsel %vm32661_vm5, %v43981_v30, 0 }
 0xe24   :  { %v43985_v22 = vand.u32 4294901760, %v32672_v53 }
 0xe26   :  { %v43988_v16 = vsub.f32 %v32672_v53, %v43985_v22  ;;  %37964 = vmatmul.mubr.f32.gmra.mxu1 %v43985_v22 }
 0xe28   :  { %v32787_v18 = vand.u32 4294901760, %v43988_v16 }
 0xe2a   :  { %v32788_v0 = vsub.f32 %v43988_v16, %v32787_v18 }
 0xe2c   :  { %v32789_v1 = vand.u32 4294901760, %v32788_v0 }
 0xe2e   :  { %37944 = vmatmul.mubr.f32.gmra.mxu0 %v32789_v1 }
 0xe31   :  { %v32607_v13 = vpop.permute.xlu1 %32606 }
 0xe32   :  { %v32626_v60 = vadd.f32 %v32607_v13, %v39417_v56 }
 0xe34   :  { %v43996_v29 = vsel %vm126_vm0, %v43643_v62, %v32626_v60 }
 0xe35   :  { %v32675_v26 = vsel %vm32661_vm5, %v43996_v29, 0 }
 0xe36   :  { %v44000_v52 = vand.u32 4294901760, %v32675_v26 }
 0xe38   :  { %v44003_v10 = vsub.f32 %v32675_v26, %v44000_v52  ;;  %37966 = vmatprep.mubr.f32.mxu1 %v44000_v52 }
 0xe3a   :  { %v32797_v42 = vand.u32 4294901760, %v44003_v10 }
 0xe3c   :  { %v32798_v6 = vsub.f32 %v44003_v10, %v32797_v42 }
 0xe3e   :  { %v32799_v2 = vand.u32 4294901760, %v32798_v6 }
 0xe40   :  { %37946 = vmatprep.mubr.f32.mxu0 %v32799_v2 }
 0xe5f   :  { %v32609_v56 = vpop.permute.xlu0 %32608 }
 0xe60   :  { %v32627_v62 = vadd.f32 %v32609_v56, %v44177_v15  ;;  %v24988_v15 = vadd.f32 %v43873_v44, %v39575_v40 }
 0xe62   :  { %v44011_v51 = vsel %vm126_vm0, %v43750_v43, %v32627_v62  ;;  %v32644_v5 = vsel %vm5869_vm4, %v43654_v38, %v24988_v15 }
 0xe63   :  { %v32678_v23 = vsel %vm32661_vm5, %v44011_v51, 0 }
 0xe64   :  { %v44015_v24 = vand.u32 4294901760, %v32678_v23 }
 0xe66   :  { %v32806_v20 = vsub.f32 %v32678_v23, %v44015_v24  ;;  %37967 = vmatmul.mubr.f32.gmra.mxu1 %v44015_v24 }
 0xe68   :  { %v32807_v57 = vand.u32 4294901760, %v32806_v20 }
 0xe6a   :  { %v32808_v49 = vsub.f32 %v32806_v20, %v32807_v57 }
 0xe6c   :  { %v32809_v7 = vand.u32 4294901760, %v32808_v49 }
 0xe6e   :  { %37947 = vmatmul.mubr.f32.gmra.mxu0 %v32809_v7 }
 0xe71   :  { %v32611_v21 = vpop.permute.xlu1 %32610 }
 0xe72   :  { %v32628_v43 = vadd.f32 %v32611_v21, %v39575_v40  ;;  %v24989_v40 = vadd.f32 %v43900_v36, %v44190_v14 }
 0xe74   :  { %v44025_v58 = vsel %vm126_vm0, %v32644_v5, %v32628_v43  ;;  %v32645_v41 = vsel %vm5869_vm4, %v43777_v9, %v24989_v40 }
 0xe75   :  { %v32681_v48 = vsel %vm32661_vm5, %v44025_v58, 0  ;;  %v32659_v26 = vpop.permute.xlu1 %32658 }
 0xe76   :  { %v44029_v54 = vand.u32 4294901760, %v32681_v48 }
 0xe78   :  { %v32816_v50 = vsub.f32 %v32681_v48, %v44029_v54  ;;  %37969 = vmatprep.mubr.f32.mxu1 %v44029_v54 }
 0xe7a   :  { %v32817_v45 = vand.u32 4294901760, %v32816_v50 }
 0xe7c   :  { %v32818_v44 = vsub.f32 %v32816_v50, %v32817_v45 }
 0xe7e   :  { %v32819_v19 = vand.u32 4294901760, %v32818_v44 }
 0xe7f   :  { %v32613_v37 = vpop.permute.xlu0 %32612 }
 0xe80   :  { %v32629_v38 = vadd.f32 %v32613_v37, %v44190_v14  ;;  %37949 = vmatprep.mubr.f32.mxu0 %v32819_v19 }
 0xe82   :  { %v44039_v39 = vsel %vm126_vm0, %v32645_v41, %v32629_v38 }
 0xe83   :  { %v32684_v53 = vsel %vm32661_vm5, %v44039_v39, 0 }
 0xe84   :  { %v32825_v0 = vand.u32 4294901760, %v32684_v53 }
 0xe86   :  { %v32826_v1 = vsub.f32 %v32684_v53, %v32825_v0  ;;  %37970 = vmatmul.mubr.f32.gmra.mxu1 %v32825_v0 }
 0xe87   :  { %38000 = vmatprep.mubr.f32.mxu1 %v32757_v11 }
 0xe88   :  { %v32827_v36 = vand.u32 4294901760, %v32826_v1 }
 0xe8a   :  { %38001 = vmatmul.mubr.f32.vlgmr.msra.gmra.mxu1 %v32767_v31  ;;  %v32828_v14 = vsub.f32 %v32826_v1, %v32827_v36 }
 0xe8b   :  { %38003 = vmatprep.mubr.f32.mxu1 %v32777_v25  ;;  %38033 = vmatpush3.msra.mxu1 %v43819_v63 }
 0xe8c   :  { %v32829_v9 = vand.u32 4294901760, %v32828_v14  ;;  %38034 = vmatprep.subr.mxu1 %v43824_v55 }
 0xe8d   :  { %38035 = vmatpush3.msra.mxu1 %v43824_v55 }
 0xe8e   :  { %37950 = vmatmul.mubr.f32.gmra.mxu0 %v32829_v9  ;;  %38004 = vmatmul.mubr.f32.gmra.mxu1 %v32787_v18 }
 0xe8f   :  { %37980 = vmatprep.mubr.f32.mxu0 %v43893_v35  ;;  %38006 = vmatprep.mubr.f32.mxu1 %v32797_v42 }
 0xe90   :  { %38036 = vmatprep.subr.mxu1 %v43834_v47 }
 0xe91   :  { %38037 = vmatpush3.msra.mxu1 %v43834_v47 }
 0xe92   :  { %37981 = vmatmul.mubr.f32.vlgmr.msra.gmra.mxu0 %v43923_v34  ;;  %38007 = vmatmul.mubr.f32.gmra.mxu1 %v32807_v57 }
 0xe93   :  { %37983 = vmatprep.mubr.f32.mxu0 %v43961_v3  ;;  %38009 = vmatprep.mubr.f32.mxu1 %v32817_v45 }
 0xe94   :  { %38038 = vmatprep.subr.mxu1 %v43847_v4  ;;  %38013 = vmatpush3.msra.mxu0 %v43829_v32 }
 0xe95   :  { %38039 = vmatpush3.msra.mxu1 %v43847_v4  ;;  %38014 = vmatprep.subr.mxu0 %v43841_v46 }
 0xe96   :  { %37984 = vmatmul.mubr.f32.gmra.mxu0 %v43988_v16  ;;  %38010 = vmatmul.mubr.f32.gmra.mxu1 %v32827_v36 }
 0xe97   :  { %37986 = vmatprep.mubr.f32.mxu0 %v44003_v10  ;;  %38040 = vmatprep.mubr.f32.mxu1 %v43890_v8 }
 0xe98   :  { %38015 = vmatpush3.msra.mxu0 %v43841_v46 }
 0xe99   :  { %38016 = vmatprep.subr.mxu0 %v43853_v61 }
 0xe9a   :  { %37987 = vmatmul.mubr.f32.gmra.mxu0 %v32806_v20  ;;  %38041 = vmatmul.mubr.f32.vlgmr.msra.gmra.mxu1 %v43920_v59 }
 0xe9b   :  { %37989 = vmatprep.mubr.f32.mxu0 %v32816_v50  ;;  %38043 = vmatprep.mubr.f32.mxu1 %v43956_v12 }
 0xe9c   :  { %38017 = vmatpush3.msra.mxu0 %v43853_v61 }
 0xe9d   :  { %38018 = vmatprep.subr.mxu0 %v43863_v27 }
 0xe9e   :  { %37990 = vmatmul.mubr.f32.gmra.mxu0 %v32826_v1  ;;  %38044 = vmatmul.mubr.f32.gmra.mxu1 %v43985_v22 }
 0xe9f   :  { %38020 = vmatprep.mubr.f32.mxu0 %v43890_v8  ;;  %38046 = vmatprep.mubr.f32.mxu1 %v44000_v52 }
 0xea0   :  { %38019 = vmatpush3.msra.mxu0 %v43863_v27 }
 0xea2   :  { %38021 = vmatmul.mubr.f32.vlgmr.msra.gmra.mxu0 %v43920_v59  ;;  %38047 = vmatmul.mubr.f32.gmra.mxu1 %v44015_v24 }
 0xea3   :  { %38023 = vmatprep.mubr.f32.mxu0 %v43956_v12  ;;  %38049 = vmatprep.mubr.f32.mxu1 %v44029_v54 }
 0xea6   :  { %38024 = vmatmul.mubr.f32.gmra.mxu0 %v43985_v22  ;;  %38050 = vmatmul.mubr.f32.gmra.mxu1 %v32825_v0 }
 0xea7   :  { %38026 = vmatprep.mubr.f32.mxu0 %v44000_v52 }
 0xeaa   :  { %38027 = vmatmul.mubr.f32.gmra.mxu0 %v44015_v24 }
 0xeab   :  { %38029 = vmatprep.mubr.f32.mxu0 %v44029_v54 }
 0xeae   :  { %38030 = vmatmul.mubr.f32.gmra.mxu0 %v32825_v0 }
 0xec9   :  { %v37962_v63 = vpop.f32.mrf.mxu1 }
 0xecb   :  { %v32922_v55 = vpop.f32.mrf.mxu1 }
 0xed1   :  { %v37942_v47 = vpop.f32.mrf.mxu0 }
 0xed2   :  { %v32772_v2 = vadd.f32 %v37942_v47, %v32659_v26 }
 0xed3   :  { %v32761_v4 = vpop.f32.mrf.mxu0 }
 0xed4   :  { %v32762_v23 = vadd.f32 %v32761_v4, %v32659_v26  ;;  %v32929_v49 = vadd.f32 %v37962_v63, %v32772_v2 }
 0xed6   :  { %v32923_v5 = vadd.f32 %v32922_v55, %v32762_v23 }
 0xee6   :  { %v37965_v32 = vpop.f32.mrf.mxu1 }
 0xee8   :  { %v32934_v46 = vpop.f32.mrf.mxu1 }
 0xeee   :  { %v37945_v27 = vpop.f32.mrf.mxu0 }
 0xeef   :  { %v32792_v57 = vadd.f32 %v37945_v27, %v32659_v26 }
 0xef0   :  { %v32781_v35 = vpop.f32.mrf.mxu0 }
 0xef1   :  { %v32782_v21 = vadd.f32 %v32781_v35, %v32659_v26  ;;  %v32941_v44 = vadd.f32 %v37965_v32, %v32792_v57 }
 0xef3   :  { %v32935_v38 = vadd.f32 %v32934_v46, %v32782_v21 }
 0xf26   :  { %v37968_v61 = vpop.f32.mrf.mxu1 }
 0xf28   :  { %v32946_v8 = vpop.f32.mrf.mxu1 }
 0xf2e   :  { %v37948_v59 = vpop.f32.mrf.mxu0 }
 0xf2f   :  { %v32812_v48 = vadd.f32 %v37948_v59, %v32659_v26 }
 0xf30   :  { %v32801_v12 = vpop.f32.mrf.mxu0 }
 0xf31   :  { %v32802_v40 = vadd.f32 %v32801_v12, %v32659_v26  ;;  %v32953_v0 = vadd.f32 %v37968_v61, %v32812_v48 }
 0xf33   :  { %v32947_v55 = vadd.f32 %v32946_v8, %v32802_v40 }
 0xf46   :  { %v37971_v11 = vpop.f32.mrf.mxu1 }
 0xf48   :  { %v32958_v34 = vpop.f32.mrf.mxu1 }
 0xf4a   :  { %v38002_v31 = vpop.f32.mrf.mxu1 }
 0xf4c   :  { %v33170_v3 = vpop.f32.mrf.mxu1 }
 0xf4e   :  { %v37951_v25 = vpop.f32.mrf.mxu0  ;;  %v38005_v22 = vpop.f32.mrf.mxu1 }
 0xf4f   :  { %v32832_v53 = vadd.f32 %v37951_v25, %v32659_v26 }
 0xf50   :  { %v32821_v16 = vpop.f32.mrf.mxu0  ;;  %v33186_v18 = vpop.f32.mrf.mxu1 }
 0xf51   :  { %v32822_v47 = vadd.f32 %v32821_v16, %v32659_v26  ;;  %v32965_v12 = vadd.f32 %v37971_v11, %v32832_v53 }
 0xf52   :  { %v37982_v13 = vpop.f32.mrf.mxu0  ;;  %v38008_v60 = vpop.f32.mrf.mxu1 }
 0xf53   :  { %v33052_v43 = vadd.f32 %v37982_v13, %v32929_v49  ;;  %v32959_v23 = vadd.f32 %v32958_v34, %v32822_v47 }
 0xf54   :  { %v33044_v52 = vpop.f32.mrf.mxu0  ;;  %v33202_v10 = vpop.f32.mrf.mxu1 }
 0xf55   :  { %v33045_v45 = vadd.f32 %v33044_v52, %v32923_v5  ;;  %v33179_v41 = vadd.f32 %v38002_v31, %v33052_v43 }
 0xf56   :  { %v37985_v42 = vpop.f32.mrf.mxu0  ;;  %v44082_v6 = vpop.f32.mrf.mxu1 }
 0xf57   :  { %v33066_v37 = vadd.f32 %v37985_v42, %v32941_v44  ;;  %v33171_v63 = vadd.f32 %v33170_v3, %v33045_v45 }
 0xf58   :  { %v33058_v56 = vpop.f32.mrf.mxu0  ;;  %v44084_v62 = vpop.f32.mrf.mxu1 }
 0xf59   :  { %v33059_v14 = vadd.f32 %v33058_v56, %v32935_v38  ;;  %v33195_v13 = vadd.f32 %v38005_v22, %v33066_v37 }
 0xf5a   :  { %v37988_v24 = vpop.f32.mrf.mxu0  ;;  %v38042_v20 = vpop.f32.mrf.mxu1 }
 0xf5b   :  { %v33080_v4 = vadd.f32 %v37988_v24, %v32953_v0  ;;  %v33187_v61 = vadd.f32 %v33186_v18, %v33059_v14 }
 0xf5c   :  { %v33072_v7 = vpop.f32.mrf.mxu0  ;;  %v33426_v15 = vpop.f32.mrf.mxu1 }
 0xf5d   :  { %v33073_v32 = vadd.f32 %v33072_v7, %v32947_v55  ;;  %v33211_v57 = vadd.f32 %v38008_v60, %v33080_v4 }
 0xf5e   :  { %v37991_v54 = vpop.f32.mrf.mxu0  ;;  %v38045_v50 = vpop.f32.mrf.mxu1 }
 0xf5f   :  { %v33094_v2 = vadd.f32 %v37991_v54, %v32965_v12  ;;  %v33203_v49 = vadd.f32 %v33202_v10, %v33073_v32 }
 0xf60   :  { %v33086_v19 = vpop.f32.mrf.mxu0  ;;  %v33438_v1 = vpop.f32.mrf.mxu1 }
 0xf61   :  { %v33087_v24 = vadd.f32 %v33086_v19, %v32959_v23  ;;  %v33227_v34 = vadd.f32 %v44082_v6, %v33094_v2 }
 0xf62   :  { %v38022_v36 = vpop.f32.mrf.mxu0  ;;  %v38048_v52 = vpop.f32.mrf.mxu1 }
 0xf63   :  { %v33316_v9 = vadd.f32 %v38022_v36, %v33179_v41  ;;  %v33219_v10 = vadd.f32 %v44084_v62, %v33087_v24 }
 0xf64   :  { %v33309_v27 = vpop.f32.mrf.mxu0 }
 0xf65   :  { %v33433_v35 = vadd.f32 %v38042_v20, %v33316_v9  ;;  %v33310_v59 = vadd.f32 %v33309_v27, %v33171_v63  ;;  %v33450_v20 = vpop.f32.mrf.mxu1 }
 0xf66   :  { %v38025_v42 = vpop.f32.mrf.mxu0 }
 0xf67   :  { %v33473_v46 = vmax.f32 %v33433_v35, 0.0  ;;  %v33427_v31 = vadd.f32 %v33426_v15, %v33310_v59  ;;  %v33328_v25 = vadd.f32 %v38025_v42, %v33195_v13  ;;  %v38051_v48 = vpop.f32.mrf.mxu1 }
 0xf68   :  { %v33321_v56 = vpop.f32.mrf.mxu0 }
 0xf69   :  { %v33481_v3 = vadd.f32 %v33473_v46, %v43916_v17  ;;  %v33472_v16 = vmax.f32 %v33427_v31, 0.0  ;;  %v33445_v8 = vadd.f32 %v38045_v50, %v33328_v25  ;;  %v33322_v26 = vadd.f32 %v33321_v56, %v33187_v61  ;;  %v33462_v38 = vpop.f32.mrf.mxu1 }
 0xf6a   :  { %v38028_v22 = vpop.f32.mrf.mxu0 }
 0xf6b   :  { %33489 = vst.msk [vmem:[#allocation11 + $0x8] sm:$0xff] %vm32661_vm5, %v33481_v3  ;;  %v33480_v11 = vadd.f32 %v33472_v16, %v43886_v28  ;;  %v33475_v7 = vmax.f32 %v33445_v8, 0.0  ;;  %v33439_v15 = vadd.f32 %v33438_v1, %v33322_v26  ;;  %v33340_v18 = vadd.f32 %v38028_v22, %v33211_v57 }
 0xf6c   :  { %v33333_v21 = vpop.f32.mrf.mxu0 }
 0xf6d   :  { %33488 = vst.msk [vmem:[#allocation11] sm:$0xff] %vm32661_vm5, %v33480_v11  ;;  %v33483_v17 = vadd.f32 %v33475_v7, %v43981_v30  ;;  %v33474_v60 = vmax.f32 %v33439_v15, 0.0  ;;  %v33457_v43 = vadd.f32 %v38048_v52, %v33340_v18  ;;  %v33334_v5 = vadd.f32 %v33333_v21, %v33203_v49 }
 0xf6e   :  { %v38031_v54 = vpop.f32.mrf.mxu0 }
 0xf6f   :  { %33491 = vst.msk [vmem:[#allocation11 + $0x18] sm:$0xff] %vm32661_vm5, %v33483_v17  ;;  %v33482_v28 = vadd.f32 %v33474_v60, %v43950_v33  ;;  %v33477_v50 = vmax.f32 %v33457_v43, 0.0  ;;  %v33451_v45 = vadd.f32 %v33450_v20, %v33334_v5  ;;  %v33352_v44 = vadd.f32 %v38031_v54, %v33227_v34 }
 0xf70   :  { %v33345_v40 = vpop.f32.mrf.mxu0 }
 0xf71   :  { %33490 = vst.msk [vmem:[#allocation11 + $0x10] sm:$0xff] %vm32661_vm5, %v33482_v28  ;;  %v33485_v6 = vadd.f32 %v33477_v50, %v44011_v51  ;;  %v33476_v30 = vmax.f32 %v33451_v45, 0.0  ;;  %v33469_v19 = vadd.f32 %v38051_v48, %v33352_v44  ;;  %v33346_v37 = vadd.f32 %v33345_v40, %v33219_v10 }
 0xf73   :  { %33493 = vst.msk [vmem:[#allocation11 + $0x28] sm:$0xff] %vm32661_vm5, %v33485_v6  ;;  %v33484_v62 = vadd.f32 %v33476_v30, %v43996_v29  ;;  %v33479_v41 = vmax.f32 %v33469_v19, 0.0  ;;  %v33463_v53 = vadd.f32 %v33462_v38, %v33346_v37 }
 0xf75   :  { %33492 = vst.msk [vmem:[#allocation11 + $0x20] sm:$0xff] %vm32661_vm5, %v33484_v62  ;;  %v33487_v33 = vadd.f32 %v33479_v41, %v44039_v39  ;;  %v33478_v0 = vmax.f32 %v33463_v53, 0.0 }
 0xf77   :  { %33495 = vst.msk [vmem:[#allocation11 + $0x38] sm:$0xff] %vm32661_vm5, %v33487_v33  ;;  %v33486_v51 = vadd.f32 %v33478_v0, %v44025_v58 }
 0xf79   :  { %33494 = vst.msk [vmem:[#allocation11 + $0x30] sm:$0xff] %vm32661_vm5, %v33486_v51 }
 0xf7a   :  { %38313 = shalt.err (!%p38310_p1)
}
 0xf7b   :  { %33507 = dma.vmem_to_hbm [thread:$0]  %s33502_s1, 1024, %s44116_s6, [#allocation4], %s38332_s26, %s38332_s26, %s38333_s27  }
 0xf7c   :  { %38328 = dma.done.wait [#allocation4], 1024  }
 0xf7d   :  { %38329 = vsyncadd [#allocation4], 4294966272 }
 0xf7e   :  { %33511 = vsyncpa [#allocation3], 1 }
 0xf7f   :  { %33512 = vsyncpa [#allocation6], 1 }
 0xf80   :  { %33513 = vsyncpa [#allocation9], 1 }
 0xf81   :  { %33514 = vsyncpa [#allocation4], 1 }

</bundles_post_ra>
